<compile_context>
chip_gen: v7x
topology: tpu7x:2x2x1
jax: 0.10.0
libtpu: 0.0.40
codegen_flags: <defaults>
</compile_context>

<pallas_src>
import functools

import jax
import jax.numpy as jnp
from jax.experimental import pallas as pl
from jax.experimental.pallas import tpu as pltpu


# ----------------------------------------------------------------------------
# Pallas kernels
# ----------------------------------------------------------------------------
def _mm_kernel(a_ref, w_ref, scale_ref, shift_ref, o_ref, *, relu):
    acc = jnp.dot(a_ref[...], w_ref[...], preferred_element_type=jnp.float32)
    y = acc * scale_ref[...] + shift_ref[...]
    if relu:
        y = jnp.maximum(y, 0.0)
    o_ref[...] = y.astype(o_ref.dtype)


def _mm_res_kernel(a_ref, w_ref, scale_ref, shift_ref, res_ref, o_ref, *, relu):
    acc = jnp.dot(a_ref[...], w_ref[...], preferred_element_type=jnp.float32)
    y = acc * scale_ref[...] + shift_ref[...] + res_ref[...].astype(jnp.float32)
    if relu:
        y = jnp.maximum(y, 0.0)
    o_ref[...] = y.astype(o_ref.dtype)


def _block_kernel(xp1_ref, xds_ref,
                  w1_ref, s1_ref, b1_ref,
                  w2_ref, s2_ref, b2_ref,
                  wd_ref, sd_ref, bd_ref,
                  o_ref):
    """Fused 1^3-spatial BasicBlock: ds(1x1 conv+BN) || conv1+BN+ReLU -> conv2+BN
    -> +identity -> ReLU.  All operands are full-extent VMEM blocks (M = batch)."""
    ident = jnp.dot(xds_ref[...], wd_ref[...], preferred_element_type=jnp.float32)
    ident = ident * sd_ref[...] + bd_ref[...]
    h = jnp.dot(xp1_ref[...], w1_ref[...], preferred_element_type=jnp.float32)
    h = jnp.maximum(h * s1_ref[...] + b1_ref[...], 0.0)
    y = jnp.dot(h.astype(jnp.bfloat16), w2_ref[...],
                preferred_element_type=jnp.float32)
    y = y * s2_ref[...] + b2_ref[...] + ident
    o_ref[...] = jnp.maximum(y, 0.0).astype(o_ref.dtype)


def _head_kernel(x_ref, w0_ref, b0_ref, w1_ref, b1_ref, o_ref):
    # fc0 + ReLU + fc1, all f32 (pooled features + age precision preserved).
    h = jnp.dot(x_ref[...], w0_ref[...], preferred_element_type=jnp.float32)
    h = jnp.maximum(h + b0_ref[...], 0.0)                        # (B, 1024)
    # fc1 (N=1) as a lane reduction: (B,1024) * (1,1024) -> sum -> (B,1)
    o_ref[...] = jnp.sum(h * w1_ref[...], axis=-1, keepdims=True) + b1_ref[...]


# ----------------------------------------------------------------------------
# Tiling policy
# ----------------------------------------------------------------------------
def _pick_tn(N):
    if N >= 512 and N % 256 == 0:
        return 256          # 2 N-steps for N=512: lane-dense, 2-TC friendly (v7x)
    if N % 128 == 0:
        return 128
    return N                # full-extent (e.g. N=64) is legal


def _pick_tm(M, n_steps):
    # Fat M tiles; give a 2-wide M grid when the N grid is 1-wide (v7x 2 TCs).
    if M >= 512:
        half = M // 2
        if M % 2 == 0 and half % 8 == 0:
            return half
        return 128 if M % 128 == 0 else M
    if n_steps == 1 and M >= 64 and M % 2 == 0 and (M // 2) % 8 == 0:
        return M // 2
    return M                # small M: full-extent block (legal even if < 8)


# ----------------------------------------------------------------------------
# Fused matmul: relu?( a @ w * scale + shift (+ residual) )
# ----------------------------------------------------------------------------
def fused_matmul(a, w, scale, shift, residual=None, relu=True,
                 out_dtype=jnp.bfloat16):
    """a: (M, K) bf16, w: (K, N) bf16 (pre-prepared), scale/shift: (N,) f32.
    Single K step (no accumulator scratch); f32 accumulate + f32 epilogue."""
    M, K = a.shape
    Kw, N = w.shape
    assert K == Kw, (K, Kw)

    a = a.astype(jnp.bfloat16)
    scale = scale.reshape(1, N).astype(jnp.float32)
    shift = shift.reshape(1, N).astype(jnp.float32)

    TN = _pick_tn(N)
    TM = _pick_tm(M, N // TN)
    grid = (M // TM, N // TN)

    in_specs = [
        pl.BlockSpec((TM, K), lambda i, j: (i, 0)),
        pl.BlockSpec((K, TN), lambda i, j: (0, j)),
        pl.BlockSpec((1, TN), lambda i, j: (0, j)),
        pl.BlockSpec((1, TN), lambda i, j: (0, j)),
    ]
    args = [a, w, scale, shift]
    if residual is not None:
        in_specs.append(pl.BlockSpec((TM, TN), lambda i, j: (i, j)))
        args.append(residual.astype(jnp.bfloat16))
        kernel = functools.partial(_mm_res_kernel, relu=relu)
    else:
        kernel = functools.partial(_mm_kernel, relu=relu)

    return pl.pallas_call(
        kernel,
        out_shape=jax.ShapeDtypeStruct((M, N), out_dtype),
        grid_spec=pltpu.PrefetchScalarGridSpec(
            num_scalar_prefetch=0,
            grid=grid,
            in_specs=in_specs,
            out_specs=pl.BlockSpec((TM, TN), lambda i, j: (i, j)),
        ),
        compiler_params=pltpu.CompilerParams(
            dimension_semantics=("parallel", "parallel")),
    )(*args)


# ----------------------------------------------------------------------------
# im2col with static dropping of all-padding taps
# ----------------------------------------------------------------------------
def _out_dim(size, k, stride, pad):
    return (size + 2 * pad - k) // stride + 1


def _valid_offsets(size, k, stride, pad):
    """Kernel-tap offsets along one dim that touch real data for >=1 output pos."""
    out = _out_dim(size, k, stride, pad)
    offs = []
    for t in range(k):
        if any(0 <= o * stride - pad + t < size for o in range(out)):
            offs.append(t)
    return tuple(offs)


def _im2col_3d(x, k, stride, pad):
    """x: (N, D, H, W, C) -> patches (N*oD*oH*oW, n_taps*C), output spatial shape.
    Taps whose window lies entirely in padding (statically known) are skipped."""
    N, D, H, W, C = x.shape
    od, oh, ow = (_out_dim(s, k, stride, pad) for s in (D, H, W))
    offs_d = _valid_offsets(D, k, stride, pad)
    offs_h = _valid_offsets(H, k, stride, pad)
    offs_w = _valid_offsets(W, k, stride, pad)
    xp = jnp.pad(x, ((0, 0), (pad, pad), (pad, pad), (pad, pad), (0, 0))) if pad else x
    cols = []
    for kd in offs_d:
        for kh in offs_h:
            for kw in offs_w:
                cols.append(xp[:, kd:kd + od * stride:stride,
                               kh:kh + oh * stride:stride,
                               kw:kw + ow * stride:stride, :])
    patches = cols[0] if len(cols) == 1 else jnp.concatenate(cols, axis=-1)
    n_taps = len(offs_d) * len(offs_h) * len(offs_w)
    return patches.reshape(N * od * oh * ow, n_taps * C), (N, od, oh, ow)


# ----------------------------------------------------------------------------
# Conv3d (+BN +ReLU +residual) = im2col (XLA glue) + fused Pallas matmul
# ----------------------------------------------------------------------------
def conv_bn_act(x, cp, k, stride, pad, relu=True, residual=None):
    """x: (N,D,H,W,Cin) bf16; cp holds prepared w_mat (K_eff,Cout) bf16, scale, shift."""
    patches, (N, od, oh, ow) = _im2col_3d(x, k, stride, pad)
    w_mat = cp['w_mat']
    assert patches.shape[1] == w_mat.shape[0], (patches.shape, w_mat.shape)
    cout = w_mat.shape[1]
    res_flat = (residual.reshape(N * od * oh * ow, cout)
                if residual is not None else None)
    y = fused_matmul(patches, w_mat, cp['scale'], cp['shift'],
                     residual=res_flat, relu=relu, out_dtype=jnp.bfloat16)
    return y.reshape(N, od, oh, ow, cout)


def fused_small_block(x, bp, stride):
    """Whole BasicBlock (ds + conv1 + conv2 + residual + ReLU) in one pallas_call.
    Only used when the block's output spatial size is 1^3 (layer2 / layer3 here)."""
    B = x.shape[0]
    xp1, (n, od, oh, ow) = _im2col_3d(x, 3, stride, 1)
    xds, _ = _im2col_3d(x, 1, stride, 0)
    c1, c2, ds = bp['conv1'], bp['conv2'], bp['ds']
    assert xp1.shape[1] == c1['w_mat'].shape[0]
    assert xds.shape[1] == ds['w_mat'].shape[0]
    cout = c2['w_mat'].shape[1]
    M = xp1.shape[0]
    args = (
        xp1.astype(jnp.bfloat16), xds.astype(jnp.bfloat16),
        c1['w_mat'], c1['scale'].reshape(1, -1), c1['shift'].reshape(1, -1),
        c2['w_mat'], c2['scale'].reshape(1, -1), c2['shift'].reshape(1, -1),
        ds['w_mat'], ds['scale'].reshape(1, -1), ds['shift'].reshape(1, -1),
    )
    y = pl.pallas_call(
        _block_kernel,
        out_shape=jax.ShapeDtypeStruct((M, cout), jnp.bfloat16),
        grid_spec=pltpu.PrefetchScalarGridSpec(
            num_scalar_prefetch=0,
            grid=(1,),
            in_specs=[pl.BlockSpec(a.shape, lambda i: (0, 0)) for a in args],
            out_specs=pl.BlockSpec((M, cout), lambda i: (0, 0)),
        ),
        compiler_params=pltpu.CompilerParams(
            dimension_semantics=("arbitrary",)),
    )(*args)
    return y.reshape(B, od, oh, ow, cout)


def basic_block(x, bp, stride):
    """3D BasicBlock: conv3-BN-ReLU -> conv3-BN -> (+ identity/downsample) -> ReLU."""
    od = _out_dim(x.shape[1], 3, stride, 1)
    oh = _out_dim(x.shape[2], 3, stride, 1)
    ow = _out_dim(x.shape[3], 3, stride, 1)
    if 'ds' in bp and od == 1 and oh == 1 and ow == 1:
        return fused_small_block(x, bp, stride)
    if 'ds' in bp:
        identity = conv_bn_act(x, bp['ds'], k=1, stride=stride, pad=0, relu=False)
    else:
        identity = x
    h = conv_bn_act(x, bp['conv1'], k=3, stride=stride, pad=1, relu=True)
    return conv_bn_act(h, bp['conv2'], k=3, stride=1, pad=1, relu=True,
                       residual=identity)


def basic_layer(x, blocks, stride):
    x = basic_block(x, blocks[0], stride)
    for bp in blocks[1:]:
        x = basic_block(x, bp, 1)
    return x


# ----------------------------------------------------------------------------
# Fused FC head: fc0 + ReLU + fc1 in one tiny kernel (M = batch)
# ----------------------------------------------------------------------------
def fc_head(x, prep):
    B = x.shape[0]
    x = x.astype(jnp.float32)                             # (B, 513) keep f32
    w0 = prep['fc0_w']                                    # (513, 1024) f32
    b0 = prep['fc0_b'].reshape(1, -1)                     # (1, 1024)
    w1t = prep['fc1_w'].reshape(1, -1)                    # (1, 1024)
    b1 = prep['fc1_b'].reshape(1, 1)                      # (1, 1)
    args = (x, w0, b0, w1t, b1)
    return pl.pallas_call(
        _head_kernel,
        out_shape=jax.ShapeDtypeStruct((B, 1), jnp.float32),
        grid_spec=pltpu.PrefetchScalarGridSpec(
            num_scalar_prefetch=0,
            grid=(1,),
            in_specs=[pl.BlockSpec(a.shape, lambda i: (0, 0)) for a in args],
            out_specs=pl.BlockSpec((B, 1), lambda i: (0, 0)),
        ),
        compiler_params=pltpu.CompilerParams(
            dimension_semantics=("arbitrary",)),
    )(*args)


# ----------------------------------------------------------------------------
# Parameter init (deterministic, synthetic) + one-time preparation
# ----------------------------------------------------------------------------
def _conv_bn_init(key, k, cin, cout):
    ks = jax.random.split(key, 6)
    fan_in = k * k * k * cin
    return {
        'w': jax.random.normal(ks[0], (k, k, k, cin, cout), jnp.float32)
             / jnp.sqrt(jnp.float32(fan_in)),
        'b': 0.01 * jax.random.normal(ks[1], (cout,), jnp.float32),
        'gamma': 1.0 + 0.1 * jax.random.normal(ks[2], (cout,), jnp.float32),
        'beta': 0.1 * jax.random.normal(ks[3], (cout,), jnp.float32),
        'mean': 0.1 * jax.random.normal(ks[4], (cout,), jnp.float32),
        'var': 1.0 + 0.1 * jnp.abs(jax.random.normal(ks[5], (cout,), jnp.float32)),
    }


def init_params(key, layers=(1, 1, 1, 1)):
    keys = iter(jax.random.split(key, 128))
    params = {'conv0': _conv_bn_init(next(keys), 7, 1, 64)}
    inplanes = 64
    for li, (planes, nblocks) in enumerate(zip((64, 128, 256, 512), layers)):
        stride = 2
        blocks = []
        bp = {'conv1': _conv_bn_init(next(keys), 3, inplanes, planes),
              'conv2': _conv_bn_init(next(keys), 3, planes, planes)}
        if stride != 1 or inplanes != planes:
            bp['ds'] = _conv_bn_init(next(keys), 1, inplanes, planes)
        blocks.append(bp)
        inplanes = planes
        for _ in range(1, nblocks):
            blocks.append({'conv1': _conv_bn_init(next(keys), 3, planes, planes),
                           'conv2': _conv_bn_init(next(keys), 3, planes, planes)})
        params[f'layer{li}'] = blocks
    params['fc0_w'] = (jax.random.normal(next(keys), (513, 1024), jnp.float32)
                       / jnp.sqrt(513.0))
    params['fc0_b'] = 0.01 * jax.random.normal(next(keys), (1024,), jnp.float32)
    params['fc1_w'] = (jax.random.normal(next(keys), (1024, 1), jnp.float32)
                       / jnp.sqrt(1024.0))
    params['fc1_b'] = 0.01 * jax.random.normal(next(keys), (1,), jnp.float32)
    return params


def _prep_conv(p, in_spatial, k, stride, pad, eps=1e-5):
    """Slice away all-padding taps, reshape to (K_eff, Cout) bf16, and split BN into
    an epilogue scale/shift.  Runs ONCE outside jit — no per-forward weight work."""
    offs = [_valid_offsets(s, k, stride, pad) for s in in_spatial]
    w = p['w']
    if len(offs[0]) < k:
        w = jnp.take(w, jnp.asarray(offs[0]), axis=0)
    if len(offs[1]) < k:
        w = jnp.take(w, jnp.asarray(offs[1]), axis=1)
    if len(offs[2]) < k:
        w = jnp.take(w, jnp.asarray(offs[2]), axis=2)
    cout = w.shape[-1]
    scale = (p['gamma'] / jnp.sqrt(p['var'] + eps)).astype(jnp.float32)
    shift = ((p['b'] - p['mean']) * scale + p['beta']).astype(jnp.float32)
    return {'w_mat': w.reshape(-1, cout).astype(jnp.bfloat16),
            'scale': scale, 'shift': shift}


def prepare_params(params, in_spatial=(16, 16, 16), eps=1e-5):
    """Static shape trace of the net -> prepared (bf16, tap-sliced) weight operands."""
    def out_sp(sp, k, s, p):
        return tuple(_out_dim(d, k, s, p) for d in sp)

    prep = {'conv0': _prep_conv(params['conv0'], in_spatial, 7, 2, 3, eps)}
    sp = out_sp(in_spatial, 7, 2, 3)
    for li in range(4):
        blocks_prep = []
        for bi, bp in enumerate(params[f'layer{li}']):
            stride = 2 if bi == 0 else 1
            bprep = {}
            if 'ds' in bp:
                bprep['ds'] = _prep_conv(bp['ds'], sp, 1, stride, 0, eps)
            bprep['conv1'] = _prep_conv(bp['conv1'], sp, 3, stride, 1, eps)
            sp = out_sp(sp, 3, stride, 1)
            bprep['conv2'] = _prep_conv(bp['conv2'], sp, 3, 1, 1, eps)
            sp = out_sp(sp, 3, 1, 1)
            blocks_prep.append(bprep)
        prep[f'layer{li}'] = blocks_prep
    prep['fc0_w'] = params['fc0_w'].astype(jnp.float32)
    prep['fc0_b'] = params['fc0_b'].astype(jnp.float32)
    prep['fc1_w'] = params['fc1_w'].astype(jnp.float32)
    prep['fc1_b'] = params['fc1_b'].astype(jnp.float32)
    return prep


# ----------------------------------------------------------------------------
# RasterNet forward
# ----------------------------------------------------------------------------
def rasternet_forward(prep, raster_ncdhw, age):
    # PyTorch input is NCDHW; compute in NDHWC, bf16 activations end-to-end.
    x = jnp.transpose(raster_ncdhw, (0, 2, 3, 4, 1)).astype(jnp.bfloat16)
    x = conv_bn_act(x, prep['conv0'], k=7, stride=2, pad=3, relu=True)
    x = basic_layer(x, prep['layer0'], stride=2)
    # ops.drop_block3d(block_size=3, p=0.0) is an exact identity (p == 0).
    x = basic_layer(x, prep['layer1'], stride=2)
    # ops.drop_block3d(block_size=3, p=0.0) is an exact identity (p == 0).
    x = basic_layer(x, prep['layer2'], stride=2)
    x = basic_layer(x, prep['layer3'], stride=2)
    # AdaptiveAvgPool3d((1,1,1)) + view(B, -1): mean over spatial dims (glue).
    x = jnp.mean(x.astype(jnp.float32), axis=(1, 2, 3))          # (B, 512)
    x = jnp.concatenate([x, age.astype(jnp.float32)], axis=1)    # (B, 513)
    # Dropout(p=0.0) is an exact identity.  fc0+ReLU+fc1 fused in one kernel.
    return fc_head(x, prep)                                      # (B, 1)


if __name__ == "__main__":
    key = jax.random.PRNGKey(0)
    pkey, rkey, akey = jax.random.split(key, 3)
    params = init_params(pkey, layers=(1, 1, 1, 1))
    prep = prepare_params(params, in_spatial=(16, 16, 16))       # one-time, outside jit
    raster = jax.random.normal(rkey, (2, 1, 16, 16, 16), dtype=jnp.float32)
    age = jax.random.normal(akey, (2, 1), dtype=jnp.float32)

    out = jax.jit(rasternet_forward)(prep, raster, age)
    out = jax.block_until_ready(out)
    assert out.shape == (2, 1), out.shape
    assert bool(jnp.all(jnp.isfinite(out)))
    print("KERNEL_OK")
</pallas_src>

<mosaic_0001>
module attributes {stable_mosaic.version = 11 : i64} {
  func.func @_mm_kernel(%arg0: i32, %arg1: i32, %arg2: memref<512x343xbf16, #tpu.memory_space<vmem>>, %arg3: memref<343x64xbf16, #tpu.memory_space<vmem>>, %arg4: memref<1x64xf32, #tpu.memory_space<vmem>>, %arg5: memref<1x64xf32, #tpu.memory_space<vmem>>, %arg6: memref<512x64xbf16, #tpu.memory_space<vmem>>) attributes {dimension_semantics = [#tpu.dimension_semantics<parallel>, #tpu.dimension_semantics<parallel>], iteration_bounds = array<i64: 2, 1>, scalar_prefetch = 0 : i64, scratch_operands = 0 : i64, tpu.core_type = #tpu.core_type<tc>, window_params = [{transform_indices = @transform_0, window_bounds = array<i64: 512, 343>}, {transform_indices = @transform_1, window_bounds = array<i64: 343, 64>}, {transform_indices = @transform_2, window_bounds = array<i64: 1, 64>}, {transform_indices = @transform_3, window_bounds = array<i64: 1, 64>}, {transform_indices = @transform_4, window_bounds = array<i64: 512, 64>}]} {
    %c0 = arith.constant 0 : index
    %c0_0 = arith.constant 0 : index
    %0 = vector.load %arg2[%c0, %c0_0] : memref<512x343xbf16, #tpu.memory_space<vmem>>, vector<512x343xbf16>
    %c0_1 = arith.constant 0 : index
    %c0_2 = arith.constant 0 : index
    %1 = vector.load %arg3[%c0_1, %c0_2] : memref<343x64xbf16, #tpu.memory_space<vmem>>, vector<343x64xbf16>
    %cst = arith.constant dense<0.000000e+00> : vector<512x64xf32>
    %2 = tpu.matmul %0, %1, %cst {dimension_numbers = #tpu.dot_dimension_numbers<[1], [0], [0], [1], [0, 0, 1, 1], [], []>} : vector<512x343xbf16>, vector<343x64xbf16>, vector<512x64xf32> -> vector<512x64xf32>
    %c0_3 = arith.constant 0 : index
    %c0_4 = arith.constant 0 : index
    %3 = vector.load %arg4[%c0_3, %c0_4] : memref<1x64xf32, #tpu.memory_space<vmem>>, vector<1x64xf32>
    %4 = vector.broadcast %3 : vector<1x64xf32> to vector<512x64xf32>
    %5 = arith.mulf %2, %4 : vector<512x64xf32>
    %c0_5 = arith.constant 0 : index
    %c0_6 = arith.constant 0 : index
    %6 = vector.load %arg5[%c0_5, %c0_6] : memref<1x64xf32, #tpu.memory_space<vmem>>, vector<1x64xf32>
    %7 = vector.broadcast %6 : vector<1x64xf32> to vector<512x64xf32>
    %8 = arith.addf %5, %7 : vector<512x64xf32>
    %cst_7 = arith.constant 0.000000e+00 : f32
    %9 = vector.broadcast %cst_7 : f32 to vector<512x64xf32>
    %10 = arith.maximumf %8, %9 : vector<512x64xf32>
    %11 = arith.truncf %10 : vector<512x64xf32> to vector<512x64xbf16>
    %c0_8 = arith.constant 0 : index
    %c0_9 = arith.constant 0 : index
    %12 = vector.load %arg6[%c0_8, %c0_9] : memref<512x64xbf16, #tpu.memory_space<vmem>>, vector<512x64xbf16>
    tpu.vector_store %arg6[%c0_8, %c0_9], %11 {strides = array<i32>} : memref<512x64xbf16, #tpu.memory_space<vmem>>, vector<512x64xbf16>,
    return
  }
  func.func @transform_0(%arg0: i32, %arg1: i32) -> (i32, i32) {
    %c0_i32 = arith.constant 0 : i32
    %c0_i32_0 = arith.constant 0 : i32
    return %arg0, %c0_i32 : i32, i32
  }
  func.func @transform_1(%arg0: i32, %arg1: i32) -> (i32, i32) {
    %c0_i32 = arith.constant 0 : i32
    %c0_i32_0 = arith.constant 0 : i32
    return %c0_i32, %arg1 : i32, i32
  }
  func.func @transform_2(%arg0: i32, %arg1: i32) -> (i32, i32) {
    %c0_i32 = arith.constant 0 : i32
    %c0_i32_0 = arith.constant 0 : i32
    return %c0_i32, %arg1 : i32, i32
  }
  func.func @transform_3(%arg0: i32, %arg1: i32) -> (i32, i32) {
    %c0_i32 = arith.constant 0 : i32
    %c0_i32_0 = arith.constant 0 : i32
    return %c0_i32, %arg1 : i32, i32
  }
  func.func @transform_4(%arg0: i32, %arg1: i32) -> (i32, i32) {
    %c0_i32 = arith.constant 0 : i32
    return %arg0, %arg1 : i32, i32
  }
}

module attributes {stable_mosaic.version = 11 : i64} {
  func.func @_mm_kernel(%arg0: i32, %arg1: i32, %arg2: memref<64x1728xbf16, #tpu.memory_space<vmem>>, %arg3: memref<1728x64xbf16, #tpu.memory_space<vmem>>, %arg4: memref<1x64xf32, #tpu.memory_space<vmem>>, %arg5: memref<1x64xf32, #tpu.memory_space<vmem>>, %arg6: memref<64x64xbf16, #tpu.memory_space<vmem>>) attributes {dimension_semantics = [#tpu.dimension_semantics<parallel>, #tpu.dimension_semantics<parallel>], iteration_bounds = array<i64: 2, 1>, scalar_prefetch = 0 : i64, scratch_operands = 0 : i64, tpu.core_type = #tpu.core_type<tc>, window_params = [{transform_indices = @transform_0, window_bounds = array<i64: 64, 1728>}, {transform_indices = @transform_1, window_bounds = array<i64: 1728, 64>}, {transform_indices = @transform_2, window_bounds = array<i64: 1, 64>}, {transform_indices = @transform_3, window_bounds = array<i64: 1, 64>}, {transform_indices = @transform_4, window_bounds = array<i64: 64, 64>}]} {
    %c0 = arith.constant 0 : index
    %c0_0 = arith.constant 0 : index
    %0 = vector.load %arg2[%c0, %c0_0] : memref<64x1728xbf16, #tpu.memory_space<vmem>>, vector<64x1728xbf16>
    %c0_1 = arith.constant 0 : index
    %c0_2 = arith.constant 0 : index
    %1 = vector.load %arg3[%c0_1, %c0_2] : memref<1728x64xbf16, #tpu.memory_space<vmem>>, vector<1728x64xbf16>
    %cst = arith.constant dense<0.000000e+00> : vector<64x64xf32>
    %2 = tpu.matmul %0, %1, %cst {dimension_numbers = #tpu.dot_dimension_numbers<[1], [0], [0], [1], [0, 0, 1, 1], [], []>} : vector<64x1728xbf16>, vector<1728x64xbf16>, vector<64x64xf32> -> vector<64x64xf32>
    %c0_3 = arith.constant 0 : index
    %c0_4 = arith.constant 0 : index
    %3 = vector.load %arg4[%c0_3, %c0_4] : memref<1x64xf32, #tpu.memory_space<vmem>>, vector<1x64xf32>
    %4 = vector.broadcast %3 : vector<1x64xf32> to vector<64x64xf32>
    %5 = arith.mulf %2, %4 : vector<64x64xf32>
    %c0_5 = arith.constant 0 : index
    %c0_6 = arith.constant 0 : index
    %6 = vector.load %arg5[%c0_5, %c0_6] : memref<1x64xf32, #tpu.memory_space<vmem>>, vector<1x64xf32>
    %7 = vector.broadcast %6 : vector<1x64xf32> to vector<64x64xf32>
    %8 = arith.addf %5, %7 : vector<64x64xf32>
    %cst_7 = arith.constant 0.000000e+00 : f32
    %9 = vector.broadcast %cst_7 : f32 to vector<64x64xf32>
    %10 = arith.maximumf %8, %9 : vector<64x64xf32>
    %11 = arith.truncf %10 : vector<64x64xf32> to vector<64x64xbf16>
    %c0_8 = arith.constant 0 : index
    %c0_9 = arith.constant 0 : index
    %12 = vector.load %arg6[%c0_8, %c0_9] : memref<64x64xbf16, #tpu.memory_space<vmem>>, vector<64x64xbf16>
    tpu.vector_store %arg6[%c0_8, %c0_9], %11 {strides = array<i32>} : memref<64x64xbf16, #tpu.memory_space<vmem>>, vector<64x64xbf16>,
    return
  }
  func.func @transform_0(%arg0: i32, %arg1: i32) -> (i32, i32) {
    %c0_i32 = arith.constant 0 : i32
    %c0_i32_0 = arith.constant 0 : i32
    return %arg0, %c0_i32 : i32, i32
  }
  func.func @transform_1(%arg0: i32, %arg1: i32) -> (i32, i32) {
    %c0_i32 = arith.constant 0 : i32
    %c0_i32_0 = arith.constant 0 : i32
    return %c0_i32, %arg1 : i32, i32
  }
  func.func @transform_2(%arg0: i32, %arg1: i32) -> (i32, i32) {
    %c0_i32 = arith.constant 0 : i32
    %c0_i32_0 = arith.constant 0 : i32
    return %c0_i32, %arg1 : i32, i32
  }
  func.func @transform_3(%arg0: i32, %arg1: i32) -> (i32, i32) {
    %c0_i32 = arith.constant 0 : i32
    %c0_i32_0 = arith.constant 0 : i32
    return %c0_i32, %arg1 : i32, i32
  }
  func.func @transform_4(%arg0: i32, %arg1: i32) -> (i32, i32) {
    %c0_i32 = arith.constant 0 : i32
    return %arg0, %arg1 : i32, i32
  }
}

module attributes {stable_mosaic.version = 11 : i64} {
  func.func @_mm_kernel(%arg0: i32, %arg1: i32, %arg2: memref<64x64xbf16, #tpu.memory_space<vmem>>, %arg3: memref<64x64xbf16, #tpu.memory_space<vmem>>, %arg4: memref<1x64xf32, #tpu.memory_space<vmem>>, %arg5: memref<1x64xf32, #tpu.memory_space<vmem>>, %arg6: memref<64x64xbf16, #tpu.memory_space<vmem>>) attributes {dimension_semantics = [#tpu.dimension_semantics<parallel>, #tpu.dimension_semantics<parallel>], iteration_bounds = array<i64: 2, 1>, scalar_prefetch = 0 : i64, scratch_operands = 0 : i64, tpu.core_type = #tpu.core_type<tc>, window_params = [{transform_indices = @transform_0, window_bounds = array<i64: 64, 64>}, {transform_indices = @transform_1, window_bounds = array<i64: 64, 64>}, {transform_indices = @transform_2, window_bounds = array<i64: 1, 64>}, {transform_indices = @transform_3, window_bounds = array<i64: 1, 64>}, {transform_indices = @transform_4, window_bounds = array<i64: 64, 64>}]} {
    %c0 = arith.constant 0 : index
    %c0_0 = arith.constant 0 : index
    %0 = vector.load %arg2[%c0, %c0_0] : memref<64x64xbf16, #tpu.memory_space<vmem>>, vector<64x64xbf16>
    %c0_1 = arith.constant 0 : index
    %c0_2 = arith.constant 0 : index
    %1 = vector.load %arg3[%c0_1, %c0_2] : memref<64x64xbf16, #tpu.memory_space<vmem>>, vector<64x64xbf16>
    %cst = arith.constant dense<0.000000e+00> : vector<64x64xf32>
    %2 = tpu.matmul %0, %1, %cst {dimension_numbers = #tpu.dot_dimension_numbers<[1], [0], [0], [1], [0, 0, 1, 1], [], []>} : vector<64x64xbf16>, vector<64x64xbf16>, vector<64x64xf32> -> vector<64x64xf32>
    %c0_3 = arith.constant 0 : index
    %c0_4 = arith.constant 0 : index
    %3 = vector.load %arg4[%c0_3, %c0_4] : memref<1x64xf32, #tpu.memory_space<vmem>>, vector<1x64xf32>
    %4 = vector.broadcast %3 : vector<1x64xf32> to vector<64x64xf32>
    %5 = arith.mulf %2, %4 : vector<64x64xf32>
    %c0_5 = arith.constant 0 : index
    %c0_6 = arith.constant 0 : index
    %6 = vector.load %arg5[%c0_5, %c0_6] : memref<1x64xf32, #tpu.memory_space<vmem>>, vector<1x64xf32>
    %7 = vector.broadcast %6 : vector<1x64xf32> to vector<64x64xf32>
    %8 = arith.addf %5, %7 : vector<64x64xf32>
    %9 = arith.truncf %8 : vector<64x64xf32> to vector<64x64xbf16>
    %c0_7 = arith.constant 0 : index
    %c0_8 = arith.constant 0 : index
    %10 = vector.load %arg6[%c0_7, %c0_8] : memref<64x64xbf16, #tpu.memory_space<vmem>>, vector<64x64xbf16>
    tpu.vector_store %arg6[%c0_7, %c0_8], %9 {strides = array<i32>} : memref<64x64xbf16, #tpu.memory_space<vmem>>, vector<64x64xbf16>,
    return
  }
  func.func @transform_0(%arg0: i32, %arg1: i32) -> (i32, i32) {
    %c0_i32 = arith.constant 0 : i32
    %c0_i32_0 = arith.constant 0 : i32
    return %arg0, %c0_i32 : i32, i32
  }
  func.func @transform_1(%arg0: i32, %arg1: i32) -> (i32, i32) {
    %c0_i32 = arith.constant 0 : i32
    %c0_i32_0 = arith.constant 0 : i32
    return %c0_i32, %arg1 : i32, i32
  }
  func.func @transform_2(%arg0: i32, %arg1: i32) -> (i32, i32) {
    %c0_i32 = arith.constant 0 : i32
    %c0_i32_0 = arith.constant 0 : i32
    return %c0_i32, %arg1 : i32, i32
  }
  func.func @transform_3(%arg0: i32, %arg1: i32) -> (i32, i32) {
    %c0_i32 = arith.constant 0 : i32
    %c0_i32_0 = arith.constant 0 : i32
    return %c0_i32, %arg1 : i32, i32
  }
  func.func @transform_4(%arg0: i32, %arg1: i32) -> (i32, i32) {
    %c0_i32 = arith.constant 0 : i32
    return %arg0, %arg1 : i32, i32
  }
}

module attributes {stable_mosaic.version = 11 : i64} {
  func.func @_mm_res_kernel(%arg0: i32, %arg1: i32, %arg2: memref<64x1728xbf16, #tpu.memory_space<vmem>>, %arg3: memref<1728x64xbf16, #tpu.memory_space<vmem>>, %arg4: memref<1x64xf32, #tpu.memory_space<vmem>>, %arg5: memref<1x64xf32, #tpu.memory_space<vmem>>, %arg6: memref<64x64xbf16, #tpu.memory_space<vmem>>, %arg7: memref<64x64xbf16, #tpu.memory_space<vmem>>) attributes {dimension_semantics = [#tpu.dimension_semantics<parallel>, #tpu.dimension_semantics<parallel>], iteration_bounds = array<i64: 2, 1>, scalar_prefetch = 0 : i64, scratch_operands = 0 : i64, tpu.core_type = #tpu.core_type<tc>, window_params = [{transform_indices = @transform_0, window_bounds = array<i64: 64, 1728>}, {transform_indices = @transform_1, window_bounds = array<i64: 1728, 64>}, {transform_indices = @transform_2, window_bounds = array<i64: 1, 64>}, {transform_indices = @transform_3, window_bounds = array<i64: 1, 64>}, {transform_indices = @transform_4, window_bounds = array<i64: 64, 64>}, {transform_indices = @transform_5, window_bounds = array<i64: 64, 64>}]} {
    %c0 = arith.constant 0 : index
    %c0_0 = arith.constant 0 : index
    %0 = vector.load %arg2[%c0, %c0_0] : memref<64x1728xbf16, #tpu.memory_space<vmem>>, vector<64x1728xbf16>
    %c0_1 = arith.constant 0 : index
    %c0_2 = arith.constant 0 : index
    %1 = vector.load %arg3[%c0_1, %c0_2] : memref<1728x64xbf16, #tpu.memory_space<vmem>>, vector<1728x64xbf16>
    %cst = arith.constant dense<0.000000e+00> : vector<64x64xf32>
    %2 = tpu.matmul %0, %1, %cst {dimension_numbers = #tpu.dot_dimension_numbers<[1], [0], [0], [1], [0, 0, 1, 1], [], []>} : vector<64x1728xbf16>, vector<1728x64xbf16>, vector<64x64xf32> -> vector<64x64xf32>
    %c0_3 = arith.constant 0 : index
    %c0_4 = arith.constant 0 : index
    %3 = vector.load %arg4[%c0_3, %c0_4] : memref<1x64xf32, #tpu.memory_space<vmem>>, vector<1x64xf32>
    %4 = vector.broadcast %3 : vector<1x64xf32> to vector<64x64xf32>
    %5 = arith.mulf %2, %4 : vector<64x64xf32>
    %c0_5 = arith.constant 0 : index
    %c0_6 = arith.constant 0 : index
    %6 = vector.load %arg5[%c0_5, %c0_6] : memref<1x64xf32, #tpu.memory_space<vmem>>, vector<1x64xf32>
    %7 = vector.broadcast %6 : vector<1x64xf32> to vector<64x64xf32>
    %8 = arith.addf %5, %7 : vector<64x64xf32>
    %c0_7 = arith.constant 0 : index
    %c0_8 = arith.constant 0 : index
    %9 = vector.load %arg6[%c0_7, %c0_8] : memref<64x64xbf16, #tpu.memory_space<vmem>>, vector<64x64xbf16>
    %10 = arith.extf %9 : vector<64x64xbf16> to vector<64x64xf32>
    %11 = arith.addf %8, %10 : vector<64x64xf32>
    %cst_9 = arith.constant 0.000000e+00 : f32
    %12 = vector.broadcast %cst_9 : f32 to vector<64x64xf32>
    %13 = arith.maximumf %11, %12 : vector<64x64xf32>
    %14 = arith.truncf %13 : vector<64x64xf32> to vector<64x64xbf16>
    %c0_10 = arith.constant 0 : index
    %c0_11 = arith.constant 0 : index
    %15 = vector.load %arg7[%c0_10, %c0_11] : memref<64x64xbf16, #tpu.memory_space<vmem>>, vector<64x64xbf16>
    tpu.vector_store %arg7[%c0_10, %c0_11], %14 {strides = array<i32>} : memref<64x64xbf16, #tpu.memory_space<vmem>>, vector<64x64xbf16>,
    return
  }
  func.func @transform_0(%arg0: i32, %arg1: i32) -> (i32, i32) {
    %c0_i32 = arith.constant 0 : i32
    %c0_i32_0 = arith.constant 0 : i32
    return %arg0, %c0_i32 : i32, i32
  }
  func.func @transform_1(%arg0: i32, %arg1: i32) -> (i32, i32) {
    %c0_i32 = arith.constant 0 : i32
    %c0_i32_0 = arith.constant 0 : i32
    return %c0_i32, %arg1 : i32, i32
  }
  func.func @transform_2(%arg0: i32, %arg1: i32) -> (i32, i32) {
    %c0_i32 = arith.constant 0 : i32
    %c0_i32_0 = arith.constant 0 : i32
    return %c0_i32, %arg1 : i32, i32
  }
  func.func @transform_3(%arg0: i32, %arg1: i32) -> (i32, i32) {
    %c0_i32 = arith.constant 0 : i32
    %c0_i32_0 = arith.constant 0 : i32
    return %c0_i32, %arg1 : i32, i32
  }
  func.func @transform_4(%arg0: i32, %arg1: i32) -> (i32, i32) {
    %c0_i32 = arith.constant 0 : i32
    return %arg0, %arg1 : i32, i32
  }
  func.func @transform_5(%arg0: i32, %arg1: i32) -> (i32, i32) {
    %c0_i32 = arith.constant 0 : i32
    return %arg0, %arg1 : i32, i32
  }
}

module attributes {stable_mosaic.version = 11 : i64} {
  func.func @_mm_kernel(%arg0: i32, %arg1: i32, %arg2: memref<16x1728xbf16, #tpu.memory_space<vmem>>, %arg3: memref<1728x128xbf16, #tpu.memory_space<vmem>>, %arg4: memref<1x128xf32, #tpu.memory_space<vmem>>, %arg5: memref<1x128xf32, #tpu.memory_space<vmem>>, %arg6: memref<16x128xbf16, #tpu.memory_space<vmem>>) attributes {dimension_semantics = [#tpu.dimension_semantics<parallel>, #tpu.dimension_semantics<parallel>], iteration_bounds = array<i64: 1, 1>, scalar_prefetch = 0 : i64, scratch_operands = 0 : i64, tpu.core_type = #tpu.core_type<tc>, window_params = [{transform_indices = @transform_0, window_bounds = array<i64: 16, 1728>}, {transform_indices = @transform_1, window_bounds = array<i64: 1728, 128>}, {transform_indices = @transform_2, window_bounds = array<i64: 1, 128>}, {transform_indices = @transform_3, window_bounds = array<i64: 1, 128>}, {transform_indices = @transform_4, window_bounds = array<i64: 16, 128>}]} {
    %c0 = arith.constant 0 : index
    %c0_0 = arith.constant 0 : index
    %0 = vector.load %arg2[%c0, %c0_0] : memref<16x1728xbf16, #tpu.memory_space<vmem>>, vector<16x1728xbf16>
    %c0_1 = arith.constant 0 : index
    %c0_2 = arith.constant 0 : index
    %1 = vector.load %arg3[%c0_1, %c0_2] : memref<1728x128xbf16, #tpu.memory_space<vmem>>, vector<1728x128xbf16>
    %cst = arith.constant dense<0.000000e+00> : vector<16x128xf32>
    %2 = tpu.matmul %0, %1, %cst {dimension_numbers = #tpu.dot_dimension_numbers<[1], [0], [0], [1], [0, 0, 1, 1], [], []>} : vector<16x1728xbf16>, vector<1728x128xbf16>, vector<16x128xf32> -> vector<16x128xf32>
    %c0_3 = arith.constant 0 : index
    %c0_4 = arith.constant 0 : index
    %3 = vector.load %arg4[%c0_3, %c0_4] : memref<1x128xf32, #tpu.memory_space<vmem>>, vector<1x128xf32>
    %4 = vector.broadcast %3 : vector<1x128xf32> to vector<16x128xf32>
    %5 = arith.mulf %2, %4 : vector<16x128xf32>
    %c0_5 = arith.constant 0 : index
    %c0_6 = arith.constant 0 : index
    %6 = vector.load %arg5[%c0_5, %c0_6] : memref<1x128xf32, #tpu.memory_space<vmem>>, vector<1x128xf32>
    %7 = vector.broadcast %6 : vector<1x128xf32> to vector<16x128xf32>
    %8 = arith.addf %5, %7 : vector<16x128xf32>
    %cst_7 = arith.constant 0.000000e+00 : f32
    %9 = vector.broadcast %cst_7 : f32 to vector<16x128xf32>
    %10 = arith.maximumf %8, %9 : vector<16x128xf32>
    %11 = arith.truncf %10 : vector<16x128xf32> to vector<16x128xbf16>
    %c0_8 = arith.constant 0 : index
    %c0_9 = arith.constant 0 : index
    %12 = vector.load %arg6[%c0_8, %c0_9] : memref<16x128xbf16, #tpu.memory_space<vmem>>, vector<16x128xbf16>
    tpu.vector_store %arg6[%c0_8, %c0_9], %11 {strides = array<i32>} : memref<16x128xbf16, #tpu.memory_space<vmem>>, vector<16x128xbf16>,
    return
  }
  func.func @transform_0(%arg0: i32, %arg1: i32) -> (i32, i32) {
    %c0_i32 = arith.constant 0 : i32
    %c0_i32_0 = arith.constant 0 : i32
    return %arg0, %c0_i32 : i32, i32
  }
  func.func @transform_1(%arg0: i32, %arg1: i32) -> (i32, i32) {
    %c0_i32 = arith.constant 0 : i32
    %c0_i32_0 = arith.constant 0 : i32
    return %c0_i32, %arg1 : i32, i32
  }
  func.func @transform_2(%arg0: i32, %arg1: i32) -> (i32, i32) {
    %c0_i32 = arith.constant 0 : i32
    %c0_i32_0 = arith.constant 0 : i32
    return %c0_i32, %arg1 : i32, i32
  }
  func.func @transform_3(%arg0: i32, %arg1: i32) -> (i32, i32) {
    %c0_i32 = arith.constant 0 : i32
    %c0_i32_0 = arith.constant 0 : i32
    return %c0_i32, %arg1 : i32, i32
  }
  func.func @transform_4(%arg0: i32, %arg1: i32) -> (i32, i32) {
    %c0_i32 = arith.constant 0 : i32
    return %arg0, %arg1 : i32, i32
  }
}

module attributes {stable_mosaic.version = 11 : i64} {
  func.func @_mm_res_kernel(%arg0: i32, %arg1: i32, %arg2: memref<16x3456xbf16, #tpu.memory_space<vmem>>, %arg3: memref<3456x128xbf16, #tpu.memory_space<vmem>>, %arg4: memref<1x128xf32, #tpu.memory_space<vmem>>, %arg5: memref<1x128xf32, #tpu.memory_space<vmem>>, %arg6: memref<16x128xbf16, #tpu.memory_space<vmem>>, %arg7: memref<16x128xbf16, #tpu.memory_space<vmem>>) attributes {dimension_semantics = [#tpu.dimension_semantics<parallel>, #tpu.dimension_semantics<parallel>], iteration_bounds = array<i64: 1, 1>, scalar_prefetch = 0 : i64, scratch_operands = 0 : i64, tpu.core_type = #tpu.core_type<tc>, window_params = [{transform_indices = @transform_0, window_bounds = array<i64: 16, 3456>}, {transform_indices = @transform_1, window_bounds = array<i64: 3456, 128>}, {transform_indices = @transform_2, window_bounds = array<i64: 1, 128>}, {transform_indices = @transform_3, window_bounds = array<i64: 1, 128>}, {transform_indices = @transform_4, window_bounds = array<i64: 16, 128>}, {transform_indices = @transform_5, window_bounds = array<i64: 16, 128>}]} {
    %c0 = arith.constant 0 : index
    %c0_0 = arith.constant 0 : index
    %0 = vector.load %arg2[%c0, %c0_0] : memref<16x3456xbf16, #tpu.memory_space<vmem>>, vector<16x3456xbf16>
    %c0_1 = arith.constant 0 : index
    %c0_2 = arith.constant 0 : index
    %1 = vector.load %arg3[%c0_1, %c0_2] : memref<3456x128xbf16, #tpu.memory_space<vmem>>, vector<3456x128xbf16>
    %cst = arith.constant dense<0.000000e+00> : vector<16x128xf32>
    %2 = tpu.matmul %0, %1, %cst {dimension_numbers = #tpu.dot_dimension_numbers<[1], [0], [0], [1], [0, 0, 1, 1], [], []>} : vector<16x3456xbf16>, vector<3456x128xbf16>, vector<16x128xf32> -> vector<16x128xf32>
    %c0_3 = arith.constant 0 : index
    %c0_4 = arith.constant 0 : index
    %3 = vector.load %arg4[%c0_3, %c0_4] : memref<1x128xf32, #tpu.memory_space<vmem>>, vector<1x128xf32>
    %4 = vector.broadcast %3 : vector<1x128xf32> to vector<16x128xf32>
    %5 = arith.mulf %2, %4 : vector<16x128xf32>
    %c0_5 = arith.constant 0 : index
    %c0_6 = arith.constant 0 : index
    %6 = vector.load %arg5[%c0_5, %c0_6] : memref<1x128xf32, #tpu.memory_space<vmem>>, vector<1x128xf32>
    %7 = vector.broadcast %6 : vector<1x128xf32> to vector<16x128xf32>
    %8 = arith.addf %5, %7 : vector<16x128xf32>
    %c0_7 = arith.constant 0 : index
    %c0_8 = arith.constant 0 : index
    %9 = vector.load %arg6[%c0_7, %c0_8] : memref<16x128xbf16, #tpu.memory_space<vmem>>, vector<16x128xbf16>
    %10 = arith.extf %9 : vector<16x128xbf16> to vector<16x128xf32>
    %11 = arith.addf %8, %10 : vector<16x128xf32>
    %cst_9 = arith.constant 0.000000e+00 : f32
    %12 = vector.broadcast %cst_9 : f32 to vector<16x128xf32>
    %13 = arith.maximumf %11, %12 : vector<16x128xf32>
    %14 = arith.truncf %13 : vector<16x128xf32> to vector<16x128xbf16>
    %c0_10 = arith.constant 0 : index
    %c0_11 = arith.constant 0 : index
    %15 = vector.load %arg7[%c0_10, %c0_11] : memref<16x128xbf16, #tpu.memory_space<vmem>>, vector<16x128xbf16>
    tpu.vector_store %arg7[%c0_10, %c0_11], %14 {strides = array<i32>} : memref<16x128xbf16, #tpu.memory_space<vmem>>, vector<16x128xbf16>,
    return
  }
  func.func @transform_0(%arg0: i32, %arg1: i32) -> (i32, i32) {
    %c0_i32 = arith.constant 0 : i32
    %c0_i32_0 = arith.constant 0 : i32
    return %arg0, %c0_i32 : i32, i32
  }
  func.func @transform_1(%arg0: i32, %arg1: i32) -> (i32, i32) {
    %c0_i32 = arith.constant 0 : i32
    %c0_i32_0 = arith.constant 0 : i32
    return %c0_i32, %arg1 : i32, i32
  }
  func.func @transform_2(%arg0: i32, %arg1: i32) -> (i32, i32) {
    %c0_i32 = arith.constant 0 : i32
    %c0_i32_0 = arith.constant 0 : i32
    return %c0_i32, %arg1 : i32, i32
  }
  func.func @transform_3(%arg0: i32, %arg1: i32) -> (i32, i32) {
    %c0_i32 = arith.constant 0 : i32
    %c0_i32_0 = arith.constant 0 : i32
    return %c0_i32, %arg1 : i32, i32
  }
  func.func @transform_4(%arg0: i32, %arg1: i32) -> (i32, i32) {
    %c0_i32 = arith.constant 0 : i32
    return %arg0, %arg1 : i32, i32
  }
  func.func @transform_5(%arg0: i32, %arg1: i32) -> (i32, i32) {
    %c0_i32 = arith.constant 0 : i32
    return %arg0, %arg1 : i32, i32
  }
}

module attributes {stable_mosaic.version = 11 : i64} {
  func.func @_mm_kernel(%arg0: i32, %arg1: i32, %arg2: memref<16x64xbf16, #tpu.memory_space<vmem>>, %arg3: memref<64x128xbf16, #tpu.memory_space<vmem>>, %arg4: memref<1x128xf32, #tpu.memory_space<vmem>>, %arg5: memref<1x128xf32, #tpu.memory_space<vmem>>, %arg6: memref<16x128xbf16, #tpu.memory_space<vmem>>) attributes {dimension_semantics = [#tpu.dimension_semantics<parallel>, #tpu.dimension_semantics<parallel>], iteration_bounds = array<i64: 1, 1>, scalar_prefetch = 0 : i64, scratch_operands = 0 : i64, tpu.core_type = #tpu.core_type<tc>, window_params = [{transform_indices = @transform_0, window_bounds = array<i64: 16, 64>}, {transform_indices = @transform_1, window_bounds = array<i64: 64, 128>}, {transform_indices = @transform_2, window_bounds = array<i64: 1, 128>}, {transform_indices = @transform_3, window_bounds = array<i64: 1, 128>}, {transform_indices = @transform_4, window_bounds = array<i64: 16, 128>}]} {
    %c0 = arith.constant 0 : index
    %c0_0 = arith.constant 0 : index
    %0 = vector.load %arg2[%c0, %c0_0] : memref<16x64xbf16, #tpu.memory_space<vmem>>, vector<16x64xbf16>
    %c0_1 = arith.constant 0 : index
    %c0_2 = arith.constant 0 : index
    %1 = vector.load %arg3[%c0_1, %c0_2] : memref<64x128xbf16, #tpu.memory_space<vmem>>, vector<64x128xbf16>
    %cst = arith.constant dense<0.000000e+00> : vector<16x128xf32>
    %2 = tpu.matmul %0, %1, %cst {dimension_numbers = #tpu.dot_dimension_numbers<[1], [0], [0], [1], [0, 0, 1, 1], [], []>} : vector<16x64xbf16>, vector<64x128xbf16>, vector<16x128xf32> -> vector<16x128xf32>
    %c0_3 = arith.constant 0 : index
    %c0_4 = arith.constant 0 : index
    %3 = vector.load %arg4[%c0_3, %c0_4] : memref<1x128xf32, #tpu.memory_space<vmem>>, vector<1x128xf32>
    %4 = vector.broadcast %3 : vector<1x128xf32> to vector<16x128xf32>
    %5 = arith.mulf %2, %4 : vector<16x128xf32>
    %c0_5 = arith.constant 0 : index
    %c0_6 = arith.constant 0 : index
    %6 = vector.load %arg5[%c0_5, %c0_6] : memref<1x128xf32, #tpu.memory_space<vmem>>, vector<1x128xf32>
    %7 = vector.broadcast %6 : vector<1x128xf32> to vector<16x128xf32>
    %8 = arith.addf %5, %7 : vector<16x128xf32>
    %9 = arith.truncf %8 : vector<16x128xf32> to vector<16x128xbf16>
    %c0_7 = arith.constant 0 : index
    %c0_8 = arith.constant 0 : index
    %10 = vector.load %arg6[%c0_7, %c0_8] : memref<16x128xbf16, #tpu.memory_space<vmem>>, vector<16x128xbf16>
    tpu.vector_store %arg6[%c0_7, %c0_8], %9 {strides = array<i32>} : memref<16x128xbf16, #tpu.memory_space<vmem>>, vector<16x128xbf16>,
    return
  }
  func.func @transform_0(%arg0: i32, %arg1: i32) -> (i32, i32) {
    %c0_i32 = arith.constant 0 : i32
    %c0_i32_0 = arith.constant 0 : i32
    return %arg0, %c0_i32 : i32, i32
  }
  func.func @transform_1(%arg0: i32, %arg1: i32) -> (i32, i32) {
    %c0_i32 = arith.constant 0 : i32
    %c0_i32_0 = arith.constant 0 : i32
    return %c0_i32, %arg1 : i32, i32
  }
  func.func @transform_2(%arg0: i32, %arg1: i32) -> (i32, i32) {
    %c0_i32 = arith.constant 0 : i32
    %c0_i32_0 = arith.constant 0 : i32
    return %c0_i32, %arg1 : i32, i32
  }
  func.func @transform_3(%arg0: i32, %arg1: i32) -> (i32, i32) {
    %c0_i32 = arith.constant 0 : i32
    %c0_i32_0 = arith.constant 0 : i32
    return %c0_i32, %arg1 : i32, i32
  }
  func.func @transform_4(%arg0: i32, %arg1: i32) -> (i32, i32) {
    %c0_i32 = arith.constant 0 : i32
    return %arg0, %arg1 : i32, i32
  }
}

module attributes {stable_mosaic.version = 11 : i64} {
  func.func @_block_kernel(%arg0: i32, %arg1: memref<2x256xbf16, #tpu.memory_space<vmem>>, %arg2: memref<2x256xbf16, #tpu.memory_space<vmem>>, %arg3: memref<256x512xbf16, #tpu.memory_space<vmem>>, %arg4: memref<1x512xf32, #tpu.memory_space<vmem>>, %arg5: memref<1x512xf32, #tpu.memory_space<vmem>>, %arg6: memref<512x512xbf16, #tpu.memory_space<vmem>>, %arg7: memref<1x512xf32, #tpu.memory_space<vmem>>, %arg8: memref<1x512xf32, #tpu.memory_space<vmem>>, %arg9: memref<256x512xbf16, #tpu.memory_space<vmem>>, %arg10: memref<1x512xf32, #tpu.memory_space<vmem>>, %arg11: memref<1x512xf32, #tpu.memory_space<vmem>>, %arg12: memref<2x512xbf16, #tpu.memory_space<vmem>>) attributes {dimension_semantics = [#tpu.dimension_semantics<arbitrary>], iteration_bounds = array<i64: 1>, scalar_prefetch = 0 : i64, scratch_operands = 0 : i64, tpu.core_type = #tpu.core_type<tc>, window_params = [{pipeline_mode = #tpu.pipeline_mode<synchronous>, transform_indices = @transform_0, window_bounds = array<i64: 2, 256>}, {pipeline_mode = #tpu.pipeline_mode<synchronous>, transform_indices = @transform_1, window_bounds = array<i64: 2, 256>}, {pipeline_mode = #tpu.pipeline_mode<synchronous>, transform_indices = @transform_2, window_bounds = array<i64: 256, 512>}, {pipeline_mode = #tpu.pipeline_mode<synchronous>, transform_indices = @transform_3, window_bounds = array<i64: 1, 512>}, {pipeline_mode = #tpu.pipeline_mode<synchronous>, transform_indices = @transform_4, window_bounds = array<i64: 1, 512>}, {pipeline_mode = #tpu.pipeline_mode<synchronous>, transform_indices = @transform_5, window_bounds = array<i64: 512, 512>}, {pipeline_mode = #tpu.pipeline_mode<synchronous>, transform_indices = @transform_6, window_bounds = array<i64: 1, 512>}, {pipeline_mode = #tpu.pipeline_mode<synchronous>, transform_indices = @transform_7, window_bounds = array<i64: 1, 512>}, {pipeline_mode = #tpu.pipeline_mode<synchronous>, transform_indices = @transform_8, window_bounds = array<i64: 256, 512>}, {pipeline_mode = #tpu.pipeline_mode<synchronous>, transform_indices = @transform_9, window_bounds = array<i64: 1, 512>}, {pipeline_mode = #tpu.pipeline_mode<synchronous>, transform_indices = @transform_10, window_bounds = array<i64: 1, 512>}, {pipeline_mode = #tpu.pipeline_mode<synchronous>, transform_indices = @transform_11, window_bounds = array<i64: 2, 512>}]} {
    %c0 = arith.constant 0 : index
    %c0_0 = arith.constant 0 : index
    %0 = vector.load %arg2[%c0, %c0_0] : memref<2x256xbf16, #tpu.memory_space<vmem>>, vector<2x256xbf16>
    %c0_1 = arith.constant 0 : index
    %c0_2 = arith.constant 0 : index
    %1 = vector.load %arg9[%c0_1, %c0_2] : memref<256x512xbf16, #tpu.memory_space<vmem>>, vector<256x512xbf16>
    %cst = arith.constant dense<0.000000e+00> : vector<2x512xf32>
    %2 = tpu.matmul %0, %1, %cst {dimension_numbers = #tpu.dot_dimension_numbers<[1], [0], [0], [1], [0, 0, 1, 1], [], []>} : vector<2x256xbf16>, vector<256x512xbf16>, vector<2x512xf32> -> vector<2x512xf32>
    %c0_3 = arith.constant 0 : index
    %c0_4 = arith.constant 0 : index
    %3 = vector.load %arg10[%c0_3, %c0_4] : memref<1x512xf32, #tpu.memory_space<vmem>>, vector<1x512xf32>
    %4 = vector.broadcast %3 : vector<1x512xf32> to vector<2x512xf32>
    %5 = arith.mulf %2, %4 : vector<2x512xf32>
    %c0_5 = arith.constant 0 : index
    %c0_6 = arith.constant 0 : index
    %6 = vector.load %arg11[%c0_5, %c0_6] : memref<1x512xf32, #tpu.memory_space<vmem>>, vector<1x512xf32>
    %7 = vector.broadcast %6 : vector<1x512xf32> to vector<2x512xf32>
    %8 = arith.addf %5, %7 : vector<2x512xf32>
    %c0_7 = arith.constant 0 : index
    %c0_8 = arith.constant 0 : index
    %9 = vector.load %arg1[%c0_7, %c0_8] : memref<2x256xbf16, #tpu.memory_space<vmem>>, vector<2x256xbf16>
    %c0_9 = arith.constant 0 : index
    %c0_10 = arith.constant 0 : index
    %10 = vector.load %arg3[%c0_9, %c0_10] : memref<256x512xbf16, #tpu.memory_space<vmem>>, vector<256x512xbf16>
    %cst_11 = arith.constant dense<0.000000e+00> : vector<2x512xf32>
    %11 = tpu.matmul %9, %10, %cst_11 {dimension_numbers = #tpu.dot_dimension_numbers<[1], [0], [0], [1], [0, 0, 1, 1], [], []>} : vector<2x256xbf16>, vector<256x512xbf16>, vector<2x512xf32> -> vector<2x512xf32>
    %c0_12 = arith.constant 0 : index
    %c0_13 = arith.constant 0 : index
    %12 = vector.load %arg4[%c0_12, %c0_13] : memref<1x512xf32, #tpu.memory_space<vmem>>, vector<1x512xf32>
    %13 = vector.broadcast %12 : vector<1x512xf32> to vector<2x512xf32>
    %14 = arith.mulf %11, %13 : vector<2x512xf32>
    %c0_14 = arith.constant 0 : index
    %c0_15 = arith.constant 0 : index
    %15 = vector.load %arg5[%c0_14, %c0_15] : memref<1x512xf32, #tpu.memory_space<vmem>>, vector<1x512xf32>
    %16 = vector.broadcast %15 : vector<1x512xf32> to vector<2x512xf32>
    %17 = arith.addf %14, %16 : vector<2x512xf32>
    %cst_16 = arith.constant 0.000000e+00 : f32
    %18 = vector.broadcast %cst_16 : f32 to vector<2x512xf32>
    %19 = arith.maximumf %17, %18 : vector<2x512xf32>
    %20 = arith.truncf %19 : vector<2x512xf32> to vector<2x512xbf16>
    %c0_17 = arith.constant 0 : index
    %c0_18 = arith.constant 0 : index
    %21 = vector.load %arg6[%c0_17, %c0_18] : memref<512x512xbf16, #tpu.memory_space<vmem>>, vector<512x512xbf16>
    %cst_19 = arith.constant dense<0.000000e+00> : vector<2x512xf32>
    %22 = tpu.matmul %20, %21, %cst_19 {dimension_numbers = #tpu.dot_dimension_numbers<[1], [0], [0], [1], [0, 0, 1, 1], [], []>} : vector<2x512xbf16>, vector<512x512xbf16>, vector<2x512xf32> -> vector<2x512xf32>
    %c0_20 = arith.constant 0 : index
    %c0_21 = arith.constant 0 : index
    %23 = vector.load %arg7[%c0_20, %c0_21] : memref<1x512xf32, #tpu.memory_space<vmem>>, vector<1x512xf32>
    %24 = vector.broadcast %23 : vector<1x512xf32> to vector<2x512xf32>
    %25 = arith.mulf %22, %24 : vector<2x512xf32>
    %c0_22 = arith.constant 0 : index
    %c0_23 = arith.constant 0 : index
    %26 = vector.load %arg8[%c0_22, %c0_23] : memref<1x512xf32, #tpu.memory_space<vmem>>, vector<1x512xf32>
    %27 = vector.broadcast %26 : vector<1x512xf32> to vector<2x512xf32>
    %28 = arith.addf %25, %27 : vector<2x512xf32>
    %29 = arith.addf %28, %8 : vector<2x512xf32>
    %cst_24 = arith.constant 0.000000e+00 : f32
    %30 = vector.broadcast %cst_24 : f32 to vector<2x512xf32>
    %31 = arith.maximumf %29, %30 : vector<2x512xf32>
    %32 = arith.truncf %31 : vector<2x512xf32> to vector<2x512xbf16>
    %c0_25 = arith.constant 0 : index
    %c0_26 = arith.constant 0 : index
    %33 = vector.load %arg12[%c0_25, %c0_26] : memref<2x512xbf16, #tpu.memory_space<vmem>>, vector<2x512xbf16>
    tpu.vector_store %arg12[%c0_25, %c0_26], %32 {strides = array<i32>} : memref<2x512xbf16, #tpu.memory_space<vmem>>, vector<2x512xbf16>,
    return
  }
  func.func @transform_0(%arg0: i32) -> (i32, i32) {
    %c0_i32 = arith.constant 0 : i32
    %c0_i32_0 = arith.constant 0 : i32
    %c0_i32_1 = arith.constant 0 : i32
    return %c0_i32, %c0_i32_0 : i32, i32
  }
  func.func @transform_1(%arg0: i32) -> (i32, i32) {
    %c0_i32 = arith.constant 0 : i32
    %c0_i32_0 = arith.constant 0 : i32
    %c0_i32_1 = arith.constant 0 : i32
    return %c0_i32, %c0_i32_0 : i32, i32
  }
  func.func @transform_2(%arg0: i32) -> (i32, i32) {
    %c0_i32 = arith.constant 0 : i32
    %c0_i32_0 = arith.constant 0 : i32
    %c0_i32_1 = arith.constant 0 : i32
    return %c0_i32, %c0_i32_0 : i32, i32
  }
  func.func @transform_3(%arg0: i32) -> (i32, i32) {
    %c0_i32 = arith.constant 0 : i32
    %c0_i32_0 = arith.constant 0 : i32
    %c0_i32_1 = arith.constant 0 : i32
    return %c0_i32, %c0_i32_0 : i32, i32
  }
  func.func @transform_4(%arg0: i32) -> (i32, i32) {
    %c0_i32 = arith.constant 0 : i32
    %c0_i32_0 = arith.constant 0 : i32
    %c0_i32_1 = arith.constant 0 : i32
    return %c0_i32, %c0_i32_0 : i32, i32
  }
  func.func @transform_5(%arg0: i32) -> (i32, i32) {
    %c0_i32 = arith.constant 0 : i32
    %c0_i32_0 = arith.constant 0 : i32
    %c0_i32_1 = arith.constant 0 : i32
    return %c0_i32, %c0_i32_0 : i32, i32
  }
  func.func @transform_6(%arg0: i32) -> (i32, i32) {
    %c0_i32 = arith.constant 0 : i32
    %c0_i32_0 = arith.constant 0 : i32
    %c0_i32_1 = arith.constant 0 : i32
    return %c0_i32, %c0_i32_0 : i32, i32
  }
  func.func @transform_7(%arg0: i32) -> (i32, i32) {
    %c0_i32 = arith.constant 0 : i32
    %c0_i32_0 = arith.constant 0 : i32
    %c0_i32_1 = arith.constant 0 : i32
    return %c0_i32, %c0_i32_0 : i32, i32
  }
  func.func @transform_8(%arg0: i32) -> (i32, i32) {
    %c0_i32 = arith.constant 0 : i32
    %c0_i32_0 = arith.constant 0 : i32
    %c0_i32_1 = arith.constant 0 : i32
    return %c0_i32, %c0_i32_0 : i32, i32
  }
  func.func @transform_9(%arg0: i32) -> (i32, i32) {
    %c0_i32 = arith.constant 0 : i32
    %c0_i32_0 = arith.constant 0 : i32
    %c0_i32_1 = arith.constant 0 : i32
    return %c0_i32, %c0_i32_0 : i32, i32
  }
  func.func @transform_10(%arg0: i32) -> (i32, i32) {
    %c0_i32 = arith.constant 0 : i32
    %c0_i32_0 = arith.constant 0 : i32
    %c0_i32_1 = arith.constant 0 : i32
    return %c0_i32, %c0_i32_0 : i32, i32
  }
  func.func @transform_11(%arg0: i32) -> (i32, i32) {
    %c0_i32 = arith.constant 0 : i32
    %c0_i32_0 = arith.constant 0 : i32
    %c0_i32_1 = arith.constant 0 : i32
    return %c0_i32, %c0_i32_0 : i32, i32
  }
}

module attributes {stable_mosaic.version = 11 : i64} {
  func.func @_block_kernel(%arg0: i32, %arg1: memref<2x1024xbf16, #tpu.memory_space<vmem>>, %arg2: memref<2x128xbf16, #tpu.memory_space<vmem>>, %arg3: memref<1024x256xbf16, #tpu.memory_space<vmem>>, %arg4: memref<1x256xf32, #tpu.memory_space<vmem>>, %arg5: memref<1x256xf32, #tpu.memory_space<vmem>>, %arg6: memref<256x256xbf16, #tpu.memory_space<vmem>>, %arg7: memref<1x256xf32, #tpu.memory_space<vmem>>, %arg8: memref<1x256xf32, #tpu.memory_space<vmem>>, %arg9: memref<128x256xbf16, #tpu.memory_space<vmem>>, %arg10: memref<1x256xf32, #tpu.memory_space<vmem>>, %arg11: memref<1x256xf32, #tpu.memory_space<vmem>>, %arg12: memref<2x256xbf16, #tpu.memory_space<vmem>>) attributes {dimension_semantics = [#tpu.dimension_semantics<arbitrary>], iteration_bounds = array<i64: 1>, scalar_prefetch = 0 : i64, scratch_operands = 0 : i64, tpu.core_type = #tpu.core_type<tc>, window_params = [{pipeline_mode = #tpu.pipeline_mode<synchronous>, transform_indices = @transform_0, window_bounds = array<i64: 2, 1024>}, {pipeline_mode = #tpu.pipeline_mode<synchronous>, transform_indices = @transform_1, window_bounds = array<i64: 2, 128>}, {pipeline_mode = #tpu.pipeline_mode<synchronous>, transform_indices = @transform_2, window_bounds = array<i64: 1024, 256>}, {pipeline_mode = #tpu.pipeline_mode<synchronous>, transform_indices = @transform_3, window_bounds = array<i64: 1, 256>}, {pipeline_mode = #tpu.pipeline_mode<synchronous>, transform_indices = @transform_4, window_bounds = array<i64: 1, 256>}, {pipeline_mode = #tpu.pipeline_mode<synchronous>, transform_indices = @transform_5, window_bounds = array<i64: 256, 256>}, {pipeline_mode = #tpu.pipeline_mode<synchronous>, transform_indices = @transform_6, window_bounds = array<i64: 1, 256>}, {pipeline_mode = #tpu.pipeline_mode<synchronous>, transform_indices = @transform_7, window_bounds = array<i64: 1, 256>}, {pipeline_mode = #tpu.pipeline_mode<synchronous>, transform_indices = @transform_8, window_bounds = array<i64: 128, 256>}, {pipeline_mode = #tpu.pipeline_mode<synchronous>, transform_indices = @transform_9, window_bounds = array<i64: 1, 256>}, {pipeline_mode = #tpu.pipeline_mode<synchronous>, transform_indices = @transform_10, window_bounds = array<i64: 1, 256>}, {pipeline_mode = #tpu.pipeline_mode<synchronous>, transform_indices = @transform_11, window_bounds = array<i64: 2, 256>}]} {
    %c0 = arith.constant 0 : index
    %c0_0 = arith.constant 0 : index
    %0 = vector.load %arg2[%c0, %c0_0] : memref<2x128xbf16, #tpu.memory_space<vmem>>, vector<2x128xbf16>
    %c0_1 = arith.constant 0 : index
    %c0_2 = arith.constant 0 : index
    %1 = vector.load %arg9[%c0_1, %c0_2] : memref<128x256xbf16, #tpu.memory_space<vmem>>, vector<128x256xbf16>
    %cst = arith.constant dense<0.000000e+00> : vector<2x256xf32>
    %2 = tpu.matmul %0, %1, %cst {dimension_numbers = #tpu.dot_dimension_numbers<[1], [0], [0], [1], [0, 0, 1, 1], [], []>} : vector<2x128xbf16>, vector<128x256xbf16>, vector<2x256xf32> -> vector<2x256xf32>
    %c0_3 = arith.constant 0 : index
    %c0_4 = arith.constant 0 : index
    %3 = vector.load %arg10[%c0_3, %c0_4] : memref<1x256xf32, #tpu.memory_space<vmem>>, vector<1x256xf32>
    %4 = vector.broadcast %3 : vector<1x256xf32> to vector<2x256xf32>
    %5 = arith.mulf %2, %4 : vector<2x256xf32>
    %c0_5 = arith.constant 0 : index
    %c0_6 = arith.constant 0 : index
    %6 = vector.load %arg11[%c0_5, %c0_6] : memref<1x256xf32, #tpu.memory_space<vmem>>, vector<1x256xf32>
    %7 = vector.broadcast %6 : vector<1x256xf32> to vector<2x256xf32>
    %8 = arith.addf %5, %7 : vector<2x256xf32>
    %c0_7 = arith.constant 0 : index
    %c0_8 = arith.constant 0 : index
    %9 = vector.load %arg1[%c0_7, %c0_8] : memref<2x1024xbf16, #tpu.memory_space<vmem>>, vector<2x1024xbf16>
    %c0_9 = arith.constant 0 : index
    %c0_10 = arith.constant 0 : index
    %10 = vector.load %arg3[%c0_9, %c0_10] : memref<1024x256xbf16, #tpu.memory_space<vmem>>, vector<1024x256xbf16>
    %cst_11 = arith.constant dense<0.000000e+00> : vector<2x256xf32>
    %11 = tpu.matmul %9, %10, %cst_11 {dimension_numbers = #tpu.dot_dimension_numbers<[1], [0], [0], [1], [0, 0, 1, 1], [], []>} : vector<2x1024xbf16>, vector<1024x256xbf16>, vector<2x256xf32> -> vector<2x256xf32>
    %c0_12 = arith.constant 0 : index
    %c0_13 = arith.constant 0 : index
    %12 = vector.load %arg4[%c0_12, %c0_13] : memref<1x256xf32, #tpu.memory_space<vmem>>, vector<1x256xf32>
    %13 = vector.broadcast %12 : vector<1x256xf32> to vector<2x256xf32>
    %14 = arith.mulf %11, %13 : vector<2x256xf32>
    %c0_14 = arith.constant 0 : index
    %c0_15 = arith.constant 0 : index
    %15 = vector.load %arg5[%c0_14, %c0_15] : memref<1x256xf32, #tpu.memory_space<vmem>>, vector<1x256xf32>
    %16 = vector.broadcast %15 : vector<1x256xf32> to vector<2x256xf32>
    %17 = arith.addf %14, %16 : vector<2x256xf32>
    %cst_16 = arith.constant 0.000000e+00 : f32
    %18 = vector.broadcast %cst_16 : f32 to vector<2x256xf32>
    %19 = arith.maximumf %17, %18 : vector<2x256xf32>
    %20 = arith.truncf %19 : vector<2x256xf32> to vector<2x256xbf16>
    %c0_17 = arith.constant 0 : index
    %c0_18 = arith.constant 0 : index
    %21 = vector.load %arg6[%c0_17, %c0_18] : memref<256x256xbf16, #tpu.memory_space<vmem>>, vector<256x256xbf16>
    %cst_19 = arith.constant dense<0.000000e+00> : vector<2x256xf32>
    %22 = tpu.matmul %20, %21, %cst_19 {dimension_numbers = #tpu.dot_dimension_numbers<[1], [0], [0], [1], [0, 0, 1, 1], [], []>} : vector<2x256xbf16>, vector<256x256xbf16>, vector<2x256xf32> -> vector<2x256xf32>
    %c0_20 = arith.constant 0 : index
    %c0_21 = arith.constant 0 : index
    %23 = vector.load %arg7[%c0_20, %c0_21] : memref<1x256xf32, #tpu.memory_space<vmem>>, vector<1x256xf32>
    %24 = vector.broadcast %23 : vector<1x256xf32> to vector<2x256xf32>
    %25 = arith.mulf %22, %24 : vector<2x256xf32>
    %c0_22 = arith.constant 0 : index
    %c0_23 = arith.constant 0 : index
    %26 = vector.load %arg8[%c0_22, %c0_23] : memref<1x256xf32, #tpu.memory_space<vmem>>, vector<1x256xf32>
    %27 = vector.broadcast %26 : vector<1x256xf32> to vector<2x256xf32>
    %28 = arith.addf %25, %27 : vector<2x256xf32>
    %29 = arith.addf %28, %8 : vector<2x256xf32>
    %cst_24 = arith.constant 0.000000e+00 : f32
    %30 = vector.broadcast %cst_24 : f32 to vector<2x256xf32>
    %31 = arith.maximumf %29, %30 : vector<2x256xf32>
    %32 = arith.truncf %31 : vector<2x256xf32> to vector<2x256xbf16>
    %c0_25 = arith.constant 0 : index
    %c0_26 = arith.constant 0 : index
    %33 = vector.load %arg12[%c0_25, %c0_26] : memref<2x256xbf16, #tpu.memory_space<vmem>>, vector<2x256xbf16>
    tpu.vector_store %arg12[%c0_25, %c0_26], %32 {strides = array<i32>} : memref<2x256xbf16, #tpu.memory_space<vmem>>, vector<2x256xbf16>,
    return
  }
  func.func @transform_0(%arg0: i32) -> (i32, i32) {
    %c0_i32 = arith.constant 0 : i32
    %c0_i32_0 = arith.constant 0 : i32
    %c0_i32_1 = arith.constant 0 : i32
    return %c0_i32, %c0_i32_0 : i32, i32
  }
  func.func @transform_1(%arg0: i32) -> (i32, i32) {
    %c0_i32 = arith.constant 0 : i32
    %c0_i32_0 = arith.constant 0 : i32
    %c0_i32_1 = arith.constant 0 : i32
    return %c0_i32, %c0_i32_0 : i32, i32
  }
  func.func @transform_2(%arg0: i32) -> (i32, i32) {
    %c0_i32 = arith.constant 0 : i32
    %c0_i32_0 = arith.constant 0 : i32
    %c0_i32_1 = arith.constant 0 : i32
    return %c0_i32, %c0_i32_0 : i32, i32
  }
  func.func @transform_3(%arg0: i32) -> (i32, i32) {
    %c0_i32 = arith.constant 0 : i32
    %c0_i32_0 = arith.constant 0 : i32
    %c0_i32_1 = arith.constant 0 : i32
    return %c0_i32, %c0_i32_0 : i32, i32
  }
  func.func @transform_4(%arg0: i32) -> (i32, i32) {
    %c0_i32 = arith.constant 0 : i32
    %c0_i32_0 = arith.constant 0 : i32
    %c0_i32_1 = arith.constant 0 : i32
    return %c0_i32, %c0_i32_0 : i32, i32
  }
  func.func @transform_5(%arg0: i32) -> (i32, i32) {
    %c0_i32 = arith.constant 0 : i32
    %c0_i32_0 = arith.constant 0 : i32
    %c0_i32_1 = arith.constant 0 : i32
    return %c0_i32, %c0_i32_0 : i32, i32
  }
  func.func @transform_6(%arg0: i32) -> (i32, i32) {
    %c0_i32 = arith.constant 0 : i32
    %c0_i32_0 = arith.constant 0 : i32
    %c0_i32_1 = arith.constant 0 : i32
    return %c0_i32, %c0_i32_0 : i32, i32
  }
  func.func @transform_7(%arg0: i32) -> (i32, i32) {
    %c0_i32 = arith.constant 0 : i32
    %c0_i32_0 = arith.constant 0 : i32
    %c0_i32_1 = arith.constant 0 : i32
    return %c0_i32, %c0_i32_0 : i32, i32
  }
  func.func @transform_8(%arg0: i32) -> (i32, i32) {
    %c0_i32 = arith.constant 0 : i32
    %c0_i32_0 = arith.constant 0 : i32
    %c0_i32_1 = arith.constant 0 : i32
    return %c0_i32, %c0_i32_0 : i32, i32
  }
  func.func @transform_9(%arg0: i32) -> (i32, i32) {
    %c0_i32 = arith.constant 0 : i32
    %c0_i32_0 = arith.constant 0 : i32
    %c0_i32_1 = arith.constant 0 : i32
    return %c0_i32, %c0_i32_0 : i32, i32
  }
  func.func @transform_10(%arg0: i32) -> (i32, i32) {
    %c0_i32 = arith.constant 0 : i32
    %c0_i32_0 = arith.constant 0 : i32
    %c0_i32_1 = arith.constant 0 : i32
    return %c0_i32, %c0_i32_0 : i32, i32
  }
  func.func @transform_11(%arg0: i32) -> (i32, i32) {
    %c0_i32 = arith.constant 0 : i32
    %c0_i32_0 = arith.constant 0 : i32
    %c0_i32_1 = arith.constant 0 : i32
    return %c0_i32, %c0_i32_0 : i32, i32
  }
}

module attributes {stable_mosaic.version = 11 : i64} {
  func.func @_head_kernel(%arg0: i32, %arg1: memref<2x513xf32, #tpu.memory_space<vmem>>, %arg2: memref<513x1024xf32, #tpu.memory_space<vmem>>, %arg3: memref<1x1024xf32, #tpu.memory_space<vmem>>, %arg4: memref<1x1024xf32, #tpu.memory_space<vmem>>, %arg5: memref<1x1xf32, #tpu.memory_space<vmem>>, %arg6: memref<2x1xf32, #tpu.memory_space<vmem>>) attributes {dimension_semantics = [#tpu.dimension_semantics<arbitrary>], iteration_bounds = array<i64: 1>, scalar_prefetch = 0 : i64, scratch_operands = 0 : i64, tpu.core_type = #tpu.core_type<tc>, window_params = [{pipeline_mode = #tpu.pipeline_mode<synchronous>, transform_indices = @transform_0, window_bounds = array<i64: 2, 513>}, {pipeline_mode = #tpu.pipeline_mode<synchronous>, transform_indices = @transform_1, window_bounds = array<i64: 513, 1024>}, {pipeline_mode = #tpu.pipeline_mode<synchronous>, transform_indices = @transform_2, window_bounds = array<i64: 1, 1024>}, {pipeline_mode = #tpu.pipeline_mode<synchronous>, transform_indices = @transform_3, window_bounds = array<i64: 1, 1024>}, {pipeline_mode = #tpu.pipeline_mode<synchronous>, transform_indices = @transform_4, window_bounds = array<i64: 1, 1>}, {pipeline_mode = #tpu.pipeline_mode<synchronous>, transform_indices = @transform_5, window_bounds = array<i64: 2, 1>}]} {
    %c0 = arith.constant 0 : index
    %c0_0 = arith.constant 0 : index
    %0 = vector.load %arg1[%c0, %c0_0] : memref<2x513xf32, #tpu.memory_space<vmem>>, vector<2x513xf32>
    %c0_1 = arith.constant 0 : index
    %c0_2 = arith.constant 0 : index
    %1 = vector.load %arg2[%c0_1, %c0_2] : memref<513x1024xf32, #tpu.memory_space<vmem>>, vector<513x1024xf32>
    %cst = arith.constant dense<0.000000e+00> : vector<2x1024xf32>
    %2 = tpu.matmul %0, %1, %cst {dimension_numbers = #tpu.dot_dimension_numbers<[1], [0], [0], [1], [0, 0, 1, 1], [], []>} : vector<2x513xf32>, vector<513x1024xf32>, vector<2x1024xf32> -> vector<2x1024xf32>
    %c0_3 = arith.constant 0 : index
    %c0_4 = arith.constant 0 : index
    %3 = vector.load %arg3[%c0_3, %c0_4] : memref<1x1024xf32, #tpu.memory_space<vmem>>, vector<1x1024xf32>
    %4 = vector.broadcast %3 : vector<1x1024xf32> to vector<2x1024xf32>
    %5 = arith.addf %2, %4 : vector<2x1024xf32>
    %cst_5 = arith.constant 0.000000e+00 : f32
    %6 = vector.broadcast %cst_5 : f32 to vector<2x1024xf32>
    %7 = arith.maximumf %5, %6 : vector<2x1024xf32>
    %c0_6 = arith.constant 0 : index
    %c0_7 = arith.constant 0 : index
    %8 = vector.load %arg4[%c0_6, %c0_7] : memref<1x1024xf32, #tpu.memory_space<vmem>>, vector<1x1024xf32>
    %9 = vector.broadcast %8 : vector<1x1024xf32> to vector<2x1024xf32>
    %10 = arith.mulf %7, %9 : vector<2x1024xf32>
    %cst_8 = arith.constant dense<0.000000e+00> : vector<2xf32>
    %11 = vector.multi_reduction <add>, %10, %cst_8 [1] : vector<2x1024xf32> to vector<2xf32>
    %12 = vector.shape_cast %11 : vector<2xf32> to vector<2x1xf32>
    %c0_9 = arith.constant 0 : index
    %c0_10 = arith.constant 0 : index
    %13 = vector.load %arg5[%c0_9, %c0_10] : memref<1x1xf32, #tpu.memory_space<vmem>>, vector<1x1xf32>
    %14 = vector.broadcast %13 : vector<1x1xf32> to vector<2x1xf32>
    %15 = arith.addf %12, %14 : vector<2x1xf32>
    %c0_11 = arith.constant 0 : index
    %c0_12 = arith.constant 0 : index
    %16 = vector.load %arg6[%c0_11, %c0_12] : memref<2x1xf32, #tpu.memory_space<vmem>>, vector<2x1xf32>
    tpu.vector_store %arg6[%c0_11, %c0_12], %15 {strides = array<i32>} : memref<2x1xf32, #tpu.memory_space<vmem>>, vector<2x1xf32>,
    return
  }
  func.func @transform_0(%arg0: i32) -> (i32, i32) {
    %c0_i32 = arith.constant 0 : i32
    %c0_i32_0 = arith.constant 0 : i32
    %c0_i32_1 = arith.constant 0 : i32
    return %c0_i32, %c0_i32_0 : i32, i32
  }
  func.func @transform_1(%arg0: i32) -> (i32, i32) {
    %c0_i32 = arith.constant 0 : i32
    %c0_i32_0 = arith.constant 0 : i32
    %c0_i32_1 = arith.constant 0 : i32
    return %c0_i32, %c0_i32_0 : i32, i32
  }
  func.func @transform_2(%arg0: i32) -> (i32, i32) {
    %c0_i32 = arith.constant 0 : i32
    %c0_i32_0 = arith.constant 0 : i32
    %c0_i32_1 = arith.constant 0 : i32
    return %c0_i32, %c0_i32_0 : i32, i32
  }
  func.func @transform_3(%arg0: i32) -> (i32, i32) {
    %c0_i32 = arith.constant 0 : i32
    %c0_i32_0 = arith.constant 0 : i32
    %c0_i32_1 = arith.constant 0 : i32
    return %c0_i32, %c0_i32_0 : i32, i32
  }
  func.func @transform_4(%arg0: i32) -> (i32, i32) {
    %c0_i32 = arith.constant 0 : i32
    %c0_i32_0 = arith.constant 0 : i32
    %c0_i32_1 = arith.constant 0 : i32
    return %c0_i32, %c0_i32_0 : i32, i32
  }
  func.func @transform_5(%arg0: i32) -> (i32, i32) {
    %c0_i32 = arith.constant 0 : i32
    %c0_i32_0 = arith.constant 0 : i32
    %c0_i32_1 = arith.constant 0 : i32
    return %c0_i32, %c0_i32_0 : i32, i32
  }
}

</mosaic_0001>

<bundles_post_ra>
// kernel: rasternet_forward.10
= control target key start
LH: loop header
LB: loop body
LE: loop exit
PB: predicated region body
PF: predicated region fallthrough
CT: control target
= control target key end

     0   :  { %s3041_s15 = smov 0   ;;  %s3043_s16 = smov 0   ;;  %s3715_s0 = inlined_call_operand.vmem [shape: bf16[1024,343], index: 0, kind: input, shape index: {}]   ;;  %s3716_s1 = inlined_call_operand.vmem [shape: bf16[343,64], index: 1, kind: input, shape index: {}]   ;;  %s3717_s2 = inlined_call_operand.vmem [shape: f32[1,64], index: 2, kind: input, shape index: {}]   ;;  %s3718_s3 = inlined_call_operand.vmem [shape: f32[1,64], index: 3, kind: input, shape index: {}]   ;;  %s3719_s4 = inlined_call_operand.vmem [shape: bf16[1024,64], index: 4, kind: output, shape index: {}]  }
   0x1   :  { %s3045_s17 = smov 0  }
   0x2 LB: > { %s26_s18 = sadd.s32 1, %s3008_s16  ;;  %p2380_p0 = scmp.ge.s32.totalorder %s3012_s17, 1  ;;  %s3012_s17 = sphi %s3045_s17, %s14_s17   ;;  %s3008_s16 = sphi %s3043_s16, %s3721_s16   ;;  %s3004_s15 = sphi %s3041_s15, %s3720_s15  }
   0x3   : > { %p28_p1 = scmp.ge.s32.totalorder %s26_s18, 2  ;;  %p203_p2 = scmp.lt.s32.totalorder %s3012_s17, 3 }
   0x5   : > { %s3723_s18 = smov (%p28_p1, %s26_s18), 0  ;;  %p204_p3 = pnand %p2380_p0, %p203_p2 }
   0x6   : > { %v2840_v0 = vld [vmem:[%s3716_s1] sm:$0xff] (!%p204_p3)   ;;  %v3014_v1 = vmov (!%p204_p3), 0   ;;  %s2381_s21 = sshll.u32 (!%p204_p3), %s3004_s15, 6  ;;  %v2841_v2 = vld [vmem:[%s3716_s1 + $0x8] sm:$0xff] (!%p204_p3)   ;;  %v2842_v3 = vld [vmem:[%s3716_s1 + $0x10] sm:$0xff] (!%p204_p3)   ;;  %vm1147_vm0 = vcmask (!%p204_p3), 1042432  }
   0x7   : > { %207 = sbr.rel (%p204_p3) target bundleno = 483 (0x1e3), region = 36  ;;  %1154 = vmatprep.subr.bf16.mxu0 (!%p204_p3), %v3014_v1  ;;  %2781 = vmatprep.subr.bf16.mxu1 (!%p204_p3), %v3014_v1  ;;  %p244_p4 = scmp.lt.s32.totalorder (!%p204_p3), %s2381_s21, 127  ;;  %v2843_v4 = vld [vmem:[%s3716_s1 + $0x18] sm:$0xff] (!%p204_p3)   ;;  %v2844_v5 = vld [vmem:[%s3716_s1 + $0x20] sm:$0xff] (!%p204_p3)   ;;  %v2845_v7 = vld [vmem:[%s3716_s1 + $0x28] sm:$0xff] (!%p204_p3)   ;;  %vm1148_vm1 = vcmask (!%p204_p3), 1043456  }
   0x8   : > { %1155 = vmatpush1.bf16.msra.mxu0 (!%p204_p3), %v2840_v0  ;;  %2797 = vmatpush1.bf16.msra.mxu1 (!%p204_p3), %v2840_v0  ;;  %v2846_v9 = vld [vmem:[%s3716_s1 + $0x30] sm:$0xff] (!%p204_p3)   ;;  %v2847_v10 = vld [vmem:[%s3716_s1 + $0x38] sm:$0xff] (!%p204_p3)   ;;  %v2848_v11 = vld [vmem:[%s3716_s1 + $0x40] sm:$0xff] (!%p204_p3)   ;;  %v3015_v31 = vmov (!%p204_p3), 65535   ;;  %vm1050_vm2 = vcmask (!%p204_p3), 711680   ;;  %vm2194_vm3 = vcmask (!%p204_p3), 519168  }
   0x9   : > { %1156 = vmatprep.subr.bf16.mxu0 (!%p204_p3), %v3014_v1  ;;  %2782 = vmatprep.subr.bf16.mxu1 (!%p204_p3), %v3014_v1  ;;  %v2849_v12 = vld [vmem:[%s3716_s1 + $0x48] sm:$0xff] (!%p204_p3)   ;;  %v2850_v13 = vld [vmem:[%s3716_s1 + $0x50] sm:$0xff] (!%p204_p3)   ;;  %v2851_v14 = vld [vmem:[%s3716_s1 + $0x58] sm:$0xff] (!%p204_p3)   ;;  %v1149_v32 = vsel (!%p204_p3), %vm1147_vm0, 4294967295, %v3015_v31 }
   0xa   : > { %v2852_v15 = vld [vmem:[%s3716_s1 + $0x60] sm:$0xff] (!%p204_p3)   ;;  %v2853_v16 = vld [vmem:[%s3716_s1 + $0x68] sm:$0xff] (!%p204_p3)   ;;  %v2854_v17 = vld [vmem:[%s3716_s1 + $0x70] sm:$0xff] (!%p204_p3)   ;;  %v1150_v36 = vsel (!%p204_p3), %vm1148_vm1, %v1149_v32, 0 }
   0xb   : > { %v2855_v18 = vld [vmem:[%s3716_s1 + $0x78] sm:$0xff] (!%p204_p3)   ;;  %v2862_v19 = vld [vmem:[%s3716_s1 + $0x80] sm:$0xff] (!%p204_p3)   ;;  %v2869_v24 = vld [vmem:[%s3716_s1 + $0x88] sm:$0xff] (!%p204_p3)  }
   0xc   : > { %1157 = vmatpush1.bf16.msra.mxu0 (!%p204_p3), %v2841_v2  ;;  %2798 = vmatpush1.bf16.msra.mxu1 (!%p204_p3), %v2841_v2  ;;  %v2876_v25 = vld [vmem:[%s3716_s1 + $0x90] sm:$0xff] (!%p204_p3)   ;;  %v2889_v30 = vld [vmem:[%s3716_s1 + $0x98] sm:$0xff] (!%p204_p3)   ;;  %v2896_v34 = vld [vmem:[%s3716_s1 + $0xa0] sm:$0xff] (!%p204_p3)  }
   0xd   : > { %1158 = vmatprep.subr.bf16.mxu0 (!%p204_p3), %v3014_v1  ;;  %2783 = vmatprep.subr.bf16.mxu1 (!%p204_p3), %v3014_v1  ;;  %v2903_v35 = vld [vmem:[%s3716_s1 + $0xa8] ss:$0 sps:$4 sm:$0xff] (!%p204_p3)  }
   0xe   : > { %s3725_s21 = smov (!%p244_p4, %s2381_s21), 127  ;;  %v1152_v40 = vand.u32 %v2903_v35, %v1150_v36 }
   0xf   : > { %s2813_s28 = smul.u32 12, %s3725_s21 }
  0x10   : > { %1159 = vmatpush1.bf16.msra.mxu0 %v2842_v3  ;;  %2799 = vmatpush1.bf16.msra.mxu1 %v2842_v3 }
  0x11   : > { %1160 = vmatprep.subr.bf16.mxu0 %v3014_v1  ;;  %2784 = vmatprep.subr.bf16.mxu1 %v3014_v1  ;;  %s3088_s7 = scalar_lea.vmem %s3715_s0, %s2813_s28  ;;  %s2384_s28 = sshll.u32 %s3725_s21, 2 }
  0x12   : > { %v2858_v6 = vld [vmem:[%s3088_s7 + $0x4] ss:$12 sps:$4 sm:$0xff]   ;;  %v2856_v20 = vld [vmem:[%s3088_s7] ss:$12 sps:$4 sm:$0xff]   ;;  %v2863_v22 = vld [vmem:[%s3088_s7 + $0x1c] ss:$12 sps:$4 sm:$0xff]   ;;  %s3383_s5 = scalar_lea.vmem %s3719_s4, %s2384_s28 }
  0x13   : > { %v2861_v8 = vld [vmem:[%s3088_s7 + $0x244] ss:$12 sps:$4 sm:$0xff]   ;;  %1186 = vmatprep.mubr.bf16.mxu0 %v2858_v6  ;;  %v2859_v21 = vld [vmem:[%s3088_s7 + $0x240] ss:$12 sps:$4 sm:$0xff]   ;;  %v2865_v23 = vld [vmem:[%s3088_s7 + $0x25c] ss:$12 sps:$4 sm:$0xff]  }
  0x14   : > { %1161 = vmatpush1.bf16.msra.mxu0 %v2843_v4  ;;  %2800 = vmatpush1.bf16.msra.mxu1 %v2843_v4  ;;  %v2867_v26 = vld [vmem:[%s3088_s7 + $0x18] ss:$12 sps:$4 sm:$0xff]   ;;  %v2870_v28 = vld [vmem:[%s3088_s7 + $0x34] ss:$12 sps:$4 sm:$0xff]   ;;  %v2874_v33 = vld [vmem:[%s3088_s7 + $0x30] ss:$12 sps:$4 sm:$0xff]  }
  0x15   : > { %1162 = vmatprep.subr.bf16.mxu0 %v3014_v1  ;;  %2785 = vmatprep.subr.bf16.mxu1 %v3014_v1  ;;  %v2868_v27 = vld [vmem:[%s3088_s7 + $0x258] ss:$12 sps:$4 sm:$0xff]   ;;  %v2872_v29 = vld [vmem:[%s3088_s7 + $0x274] ss:$12 sps:$4 sm:$0xff]   ;;  %v2875_v37 = vld [vmem:[%s3088_s7 + $0x270] ss:$12 sps:$4 sm:$0xff]  }
  0x16   : > { %1378 = vmatprep.mubr.bf16.mxu1 %v2861_v8  ;;  %v2877_v38 = vld [vmem:[%s3088_s7 + $0x4c] ss:$12 sps:$4 sm:$0xff]   ;;  %v2881_v41 = vld [vmem:[%s3088_s7 + $0x48] ss:$12 sps:$4 sm:$0xff]   ;;  %v2883_v43 = vld [vmem:[%s3088_s7 + $0x64] ss:$12 sps:$4 sm:$0xff]  }
  0x17   : > { %v2879_v39 = vld [vmem:[%s3088_s7 + $0x28c] ss:$12 sps:$4 sm:$0xff]   ;;  %v2882_v42 = vld [vmem:[%s3088_s7 + $0x288] ss:$12 sps:$4 sm:$0xff]   ;;  %v2885_v44 = vld [vmem:[%s3088_s7 + $0x2a4] ss:$12 sps:$4 sm:$0xff]  }
  0x18   : > { %1163 = vmatpush1.bf16.msra.mxu0 %v2844_v5  ;;  %2801 = vmatpush1.bf16.msra.mxu1 %v2844_v5  ;;  %v2887_v45 = vld [vmem:[%s3088_s7 + $0x60] ss:$12 sps:$4 sm:$0xff]   ;;  %v2890_v47 = vld [vmem:[%s3088_s7 + $0x7c] ss:$12 sps:$4 sm:$0xff]   ;;  %v2894_v49 = vld [vmem:[%s3088_s7 + $0x78] ss:$12 sps:$4 sm:$0xff]  }
  0x19   : > { %1164 = vmatprep.subr.bf16.mxu0 %v3014_v1  ;;  %2786 = vmatprep.subr.bf16.mxu1 %v3014_v1  ;;  %v2888_v46 = vld [vmem:[%s3088_s7 + $0x2a0] ss:$12 sps:$4 sm:$0xff]   ;;  %v2892_v48 = vld [vmem:[%s3088_s7 + $0x2bc] ss:$12 sps:$4 sm:$0xff]   ;;  %v2895_v50 = vld [vmem:[%s3088_s7 + $0x2b8] ss:$12 sps:$4 sm:$0xff]  }
  0x1a   : > { %v2897_v51 = vld [vmem:[%s3088_s7 + $0x94] ss:$12 sps:$4 sm:$0xff]   ;;  %v2901_v53 = vld [vmem:[%s3088_s7 + $0x90] ss:$12 sps:$4 sm:$0xff]   ;;  %v2904_v55 = vld [vmem:[%s3088_s7 + $0xac] ss:$12 sps:$4 sm:$0xff]  }
  0x1b   : > { %v2899_v52 = vld [vmem:[%s3088_s7 + $0x2d4] ss:$12 sps:$4 sm:$0xff]   ;;  %v2902_v54 = vld [vmem:[%s3088_s7 + $0x2d0] ss:$12 sps:$4 sm:$0xff]   ;;  %v2906_v56 = vld [vmem:[%s3088_s7 + $0x2ec] ss:$12 sps:$4 sm:$0xff]  }
  0x1c   : > { %1165 = vmatpush1.bf16.msra.mxu0 %v2845_v7  ;;  %2802 = vmatpush1.bf16.msra.mxu1 %v2845_v7  ;;  %v2908_v57 = vld [vmem:[%s3088_s7 + $0xa8] ss:$12 sps:$4 sm:$0xff]   ;;  %v2910_v59 = vld [vmem:[%s3088_s7 + $0xc4] ss:$12 sps:$4 sm:$0xff]   ;;  %v2913_v61 = vld [vmem:[%s3088_s7 + $0xc0] ss:$12 sps:$4 sm:$0xff]  }
  0x1d   : > { %1166 = vmatprep.subr.bf16.mxu0 %v3014_v1  ;;  %2787 = vmatprep.subr.bf16.mxu1 %v3014_v1  ;;  %v2909_v58 = vld [vmem:[%s3088_s7 + $0x2e8] ss:$12 sps:$4 sm:$0xff]   ;;  %v2914_v62 = vld [vmem:[%s3088_s7 + $0x20] ss:$12 sps:$4 sm:$0xff]   ;;  %v2917_v0 = vld [vmem:[%s3088_s7 + $0x38] ss:$12 sps:$4 sm:$0xff]  }
  0x1e   : > { %v2912_v60 = vld [vmem:[%s3088_s7 + $0x8] ss:$12 sps:$4 sm:$0xff]   ;;  %v2919_v2 = vld [vmem:[%s3088_s7 + $0x50] ss:$12 sps:$4 sm:$0xff]   ;;  %v2924_v6 = vld [vmem:[%s3088_s7 + $0x80] ss:$12 sps:$4 sm:$0xff]  }
  0x1f   : > { %v2915_v63 = vld [vmem:[%s3088_s7 + $0xdc] ss:$12 sps:$4 sm:$0xff]   ;;  %v2920_v3 = vld [vmem:[%s3088_s7 + $0xf4] ss:$12 sps:$4 sm:$0xff]   ;;  %v2925_v7 = vld [vmem:[%s3088_s7 + $0x10c] ss:$12 sps:$4 sm:$0xff]  }
  0x20   : > { %1167 = vmatpush1.bf16.msra.mxu0 %v2846_v9  ;;  %2803 = vmatpush1.bf16.msra.mxu1 %v2846_v9  ;;  %v2922_v4 = vld [vmem:[%s3088_s7 + $0x68] ss:$12 sps:$4 sm:$0xff]   ;;  %v2923_v5 = vld [vmem:[%s3088_s7 + $0xf0] ss:$12 sps:$4 sm:$0xff]   ;;  %v2927_v8 = vld [vmem:[%s3088_s7 + $0x98] ss:$12 sps:$4 sm:$0xff]  }
  0x21   : > { %1168 = vmatprep.subr.bf16.mxu0 %v3014_v1  ;;  %2788 = vmatprep.subr.bf16.mxu1 %v3014_v1  ;;  %v2928_v9 = vld [vmem:[%s3088_s7 + $0x108] ss:$12 sps:$4 sm:$0xff]   ;;  %v2957_v32 = vld [vmem:[%s3088_s7 + $0x1b8] ss:$12 sps:$4 sm:$0xff]  }
  0x22   : > { %v2955_v31 = vld [vmem:[%s3088_s7 + $0x19c] ss:$12 sps:$4 sm:$0xff]   ;;  %v2960_v35 = vld [vmem:[%s3088_s7 + $0x1b4] ss:$12 sps:$4 sm:$0xff]  }
  0x23   : > { %v2962_v36 = vld [vmem:[%s3088_s7 + $0x1e8] ss:$12 sps:$4 sm:$0xff]  }
  0x24   : > { %1169 = vmatpush1.bf16.msra.mxu0 %v2847_v10  ;;  %2804 = vmatpush1.bf16.msra.mxu1 %v2847_v10  ;;  %v2929_v10 = vld [vmem:[%s3088_s7 + $0xb0] ss:$12 sps:$4 sm:$0xff]  }
  0x25   : > { %1170 = vmatprep.subr.bf16.mxu0 %v3014_v1  ;;  %2789 = vmatprep.subr.bf16.mxu1 %v3014_v1 }
  0x28   : > { %1171 = vmatpush1.bf16.msra.mxu0 %v2848_v11  ;;  %2805 = vmatpush1.bf16.msra.mxu1 %v2848_v11  ;;  %v2930_v11 = vld [vmem:[%s3088_s7 + $0x124] ss:$12 sps:$4 sm:$0xff]  }
  0x29   : > { %1172 = vmatprep.subr.bf16.mxu0 %v3014_v1  ;;  %2790 = vmatprep.subr.bf16.mxu1 %v3014_v1 }
  0x2c   : > { %1173 = vmatpush1.bf16.msra.mxu0 %v2849_v12  ;;  %2806 = vmatpush1.bf16.msra.mxu1 %v2849_v12  ;;  %v2932_v12 = vld [vmem:[%s3088_s7 + $0xc8] ss:$12 sps:$4 sm:$0xff]  }
  0x2d   : > { %1174 = vmatprep.subr.bf16.mxu0 %v3014_v1  ;;  %2791 = vmatprep.subr.bf16.mxu1 %v3014_v1 }
  0x30   : > { %1175 = vmatpush1.bf16.msra.mxu0 %v2850_v13  ;;  %2807 = vmatpush1.bf16.msra.mxu1 %v2850_v13  ;;  %v2933_v13 = vld [vmem:[%s3088_s7 + $0x120] ss:$12 sps:$4 sm:$0xff]  }
  0x31   : > { %1176 = vmatprep.subr.bf16.mxu0 %v3014_v1  ;;  %2792 = vmatprep.subr.bf16.mxu1 %v3014_v1 }
  0x34   : > { %1177 = vmatpush1.bf16.msra.mxu0 %v2851_v14  ;;  %2808 = vmatpush1.bf16.msra.mxu1 %v2851_v14  ;;  %v2934_v14 = vld [vmem:[%s3088_s7 + $0xe0] ss:$12 sps:$4 sm:$0xff]  }
  0x35   : > { %1178 = vmatprep.subr.bf16.mxu0 %v3014_v1  ;;  %2793 = vmatprep.subr.bf16.mxu1 %v3014_v1 }
  0x38   : > { %1179 = vmatpush1.bf16.msra.mxu0 %v2852_v15  ;;  %2809 = vmatpush1.bf16.msra.mxu1 %v2852_v15  ;;  %v2935_v15 = vld [vmem:[%s3088_s7 + $0x13c] ss:$12 sps:$4 sm:$0xff]  }
  0x39   : > { %1180 = vmatprep.subr.bf16.mxu0 %v3014_v1  ;;  %2794 = vmatprep.subr.bf16.mxu1 %v3014_v1 }
  0x3c   : > { %1181 = vmatpush1.bf16.msra.mxu0 %v2853_v16  ;;  %2810 = vmatpush1.bf16.msra.mxu1 %v2853_v16  ;;  %v2937_v16 = vld [vmem:[%s3088_s7 + $0xf8] ss:$12 sps:$4 sm:$0xff]  }
  0x3d   : > { %1182 = vmatprep.subr.bf16.mxu0 %v3014_v1  ;;  %2795 = vmatprep.subr.bf16.mxu1 %v3014_v1 }
  0x40   : > { %1183 = vmatpush1.bf16.msra.mxu0 %v2854_v17  ;;  %2811 = vmatpush1.bf16.msra.mxu1 %v2854_v17  ;;  %v2938_v17 = vld [vmem:[%s3088_s7 + $0x138] ss:$12 sps:$4 sm:$0xff]  }
  0x41   : > { %1184 = vmatprep.subr.bf16.mxu0 %v3014_v1  ;;  %2796 = vmatprep.subr.bf16.mxu1 %v3014_v1  ;;  %v2918_v1 = vld [vmem:[%s3088_s7 + $0xd8] ss:$12 sps:$4 sm:$0xff]  }
  0x44   : > { %1185 = vmatpush1.bf16.msra.mxu0 %v2855_v18  ;;  %2812 = vmatpush1.bf16.msra.mxu1 %v2855_v18  ;;  %v2939_v18 = vld [vmem:[%s3088_s7 + $0x110] ss:$12 sps:$4 sm:$0xff]  }
  0x45   : > { %2705 = vmatprep.subr.bf16.mxu1 %v2862_v19 }
  0x47   : > { %1187 = vmatmul.mubr.bf16.vlgmr.msra.gmra.mrb[0].mxu0 %v2856_v20  ;;  %1379 = vmatmul.mubr.bf16.vlgmr.msra.gmra.mrb[0].mxu1 %v2859_v21  ;;  %v2942_v20 = vld [vmem:[%s3088_s7 + $0x128] ss:$12 sps:$4 sm:$0xff]   ;;  %v2943_v21 = vld [vmem:[%s3088_s7 + $0x150] ss:$12 sps:$4 sm:$0xff]  }
  0x48   : > { %2706 = vmatpush3.bf16.msra.mxu1 %v2862_v19  ;;  %1194 = vmatprep.mubr.bf16.mxu0 %v2863_v22  ;;  %v2940_v19 = vld [vmem:[%s3088_s7 + $0x154] ss:$12 sps:$4 sm:$0xff]  }
  0x49   : > { %1386 = vmatprep.mubr.bf16.mxu1 %v2865_v23  ;;  %2707 = vmatprep.subr.bf16.mxu1 %v2869_v24  ;;  %v2944_v22 = vld [vmem:[%s3088_s7 + $0x140] ss:$12 sps:$4 sm:$0xff]  }
  0x4a   : > { %v2945_v23 = vld [vmem:[%s3088_s7 + $0x16c] ss:$12 sps:$4 sm:$0xff]  }
  0x4c   : > { %2708 = vmatpush3.bf16.msra.mxu1 %v2869_v24  ;;  %v2947_v24 = vld [vmem:[%s3088_s7 + $0x158] ss:$12 sps:$4 sm:$0xff]  }
  0x4d   : > { %2709 = vmatprep.subr.bf16.mxu1 %v2876_v25 }
  0x4f   : > { %1195 = vmatmul.mubr.bf16.gmra.mrb[4].mxu0 %v2867_v26  ;;  %1387 = vmatmul.mubr.bf16.gmra.mrb[4].mxu1 %v2868_v27  ;;  %v2949_v26 = vld [vmem:[%s3088_s7 + $0x170] ss:$12 sps:$4 sm:$0xff]  }
  0x50   : > { %1202 = vmatprep.mubr.bf16.mxu0 %v2870_v28  ;;  %1394 = vmatprep.mubr.bf16.mxu1 %v2872_v29  ;;  %v2950_v27 = vld [vmem:[%s3088_s7 + $0x184] ss:$12 sps:$4 sm:$0xff]   ;;  %v2952_v28 = vld [vmem:[%s3088_s7 + $0x188] ss:$12 sps:$4 sm:$0xff]   ;;  %v2953_v29 = vld [vmem:[%s3088_s7 + $0x180] ss:$12 sps:$4 sm:$0xff]  }
  0x51   : > { %2710 = vmatpush3.bf16.msra.mxu1 %v2876_v25  ;;  %v2948_v25 = vld [vmem:[%s3088_s7 + $0x168] ss:$12 sps:$4 sm:$0xff]  }
  0x52   : > { %2711 = vmatprep.subr.bf16.mxu1 %v2889_v30 }
  0x55   : > { %2712 = vmatpush3.bf16.msra.mxu1 %v2889_v30  ;;  %v2954_v30 = vld [vmem:[%s3088_s7 + $0x1a0] ss:$12 sps:$4 sm:$0xff]  }
  0x56   : > { %2713 = vmatprep.subr.bf16.mxu1 %v2896_v34 }
  0x57   : > { %1203 = vmatmul.mubr.bf16.gmra.mrb[8].mxu0 %v2874_v33  ;;  %1395 = vmatmul.mubr.bf16.gmra.mrb[8].mxu1 %v2875_v37  ;;  %v2958_v33 = vld [vmem:[%s3088_s7 + $0x198] ss:$12 sps:$4 sm:$0xff]   ;;  %v2963_v37 = vld [vmem:[%s3088_s7 + $0x1b0] ss:$12 sps:$4 sm:$0xff]  }
  0x58   : > { %1210 = vmatprep.mubr.bf16.mxu0 %v2877_v38  ;;  %1402 = vmatprep.mubr.bf16.mxu1 %v2879_v39  ;;  %v2964_v38 = vld [vmem:[%s3088_s7 + $0x200] ss:$12 sps:$4 sm:$0xff]  }
  0x59   : > { %2714 = vmatpush3.bf16.msra.mxu1 %v2896_v34  ;;  %v2959_v34 = vld [vmem:[%s3088_s7 + $0x1d0] ss:$12 sps:$4 sm:$0xff]   ;;  %v2965_v39 = vld [vmem:[%s3088_s7 + $0x1cc] ss:$12 sps:$4 sm:$0xff]  }
  0x5a   : > { %2715 = vmatprep.subr.bf16.mxu1 %v1152_v40 }
  0x5d   : > { %2716 = vmatpush3.bf16.msra.mxu1 %v1152_v40  ;;  %v2967_v40 = vld [vmem:[%s3088_s7 + $0x218] ss:$12 sps:$4 sm:$0xff]  }
  0x5f   : > { %1211 = vmatmul.mubr.bf16.gmra.mrb[12].mxu0 %v2881_v41  ;;  %1403 = vmatmul.mubr.bf16.gmra.mrb[12].mxu1 %v2882_v42  ;;  %v2968_v41 = vld [vmem:[%s3088_s7 + $0x1c8] ss:$12 sps:$4 sm:$0xff]   ;;  %v2969_v42 = vld [vmem:[%s3088_s7 + $0x230] ss:$12 sps:$4 sm:$0xff]  }
  0x60   : > { %1218 = vmatprep.mubr.bf16.mxu0 %v2883_v43  ;;  %1410 = vmatprep.mubr.bf16.mxu1 %v2885_v44  ;;  %v2970_v43 = vld [vmem:[%s3088_s7 + $0x1e4] ss:$12 sps:$4 sm:$0xff]   ;;  %v2972_v44 = vld [vmem:[%s3088_s7 + $0x248] ss:$12 sps:$4 sm:$0xff]  }
  0x67   : > { %1219 = vmatmul.mubr.bf16.gmra.mrb[16].mxu0 %v2887_v45  ;;  %1411 = vmatmul.mubr.bf16.gmra.mrb[16].mxu1 %v2888_v46  ;;  %v2973_v45 = vld [vmem:[%s3088_s7 + $0x1e0] ss:$12 sps:$4 sm:$0xff]  }
  0x68   : > { %1226 = vmatprep.mubr.bf16.mxu0 %v2890_v47  ;;  %1418 = vmatprep.mubr.bf16.mxu1 %v2892_v48  ;;  %v2974_v46 = vld [vmem:[%s3088_s7 + $0x260] ss:$12 sps:$4 sm:$0xff]   ;;  %v2975_v47 = vld [vmem:[%s3088_s7 + $0x1fc] ss:$12 sps:$4 sm:$0xff]   ;;  %v2977_v48 = vld [vmem:[%s3088_s7 + $0x278] ss:$12 sps:$4 sm:$0xff]  }
  0x6f   : > { %1227 = vmatmul.mubr.bf16.gmra.mrb[20].mxu0 %v2894_v49  ;;  %1419 = vmatmul.mubr.bf16.gmra.mrb[20].mxu1 %v2895_v50  ;;  %v2978_v49 = vld [vmem:[%s3088_s7 + $0x1f8] ss:$12 sps:$4 sm:$0xff]   ;;  %v2979_v50 = vld [vmem:[%s3088_s7 + $0x290] ss:$12 sps:$4 sm:$0xff]  }
  0x70   : > { %1234 = vmatprep.mubr.bf16.mxu0 %v2897_v51  ;;  %1426 = vmatprep.mubr.bf16.mxu1 %v2899_v52  ;;  %v2980_v51 = vld [vmem:[%s3088_s7 + $0x214] ss:$12 sps:$4 sm:$0xff]  }
  0x71   : > { %v2982_v52 = vld [vmem:[%s3088_s7 + $0x2a8] ss:$12 sps:$4 sm:$0xff]  }
  0x77   : > { %1235 = vmatmul.mubr.bf16.gmra.mrb[24].mxu0 %v2901_v53  ;;  %1427 = vmatmul.mubr.bf16.gmra.mrb[24].mxu1 %v2902_v54  ;;  %v2983_v53 = vld [vmem:[%s3088_s7 + $0x210] ss:$12 sps:$4 sm:$0xff]   ;;  %v2984_v54 = vld [vmem:[%s3088_s7 + $0x2c0] ss:$12 sps:$4 sm:$0xff]  }
  0x78   : > { %1242 = vmatprep.mubr.bf16.mxu0 %v2904_v55  ;;  %1434 = vmatprep.mubr.bf16.mxu1 %v2906_v56  ;;  %v2985_v55 = vld [vmem:[%s3088_s7 + $0x22c] ss:$12 sps:$4 sm:$0xff]  }
  0x79   : > { %v2987_v56 = vld [vmem:[%s3088_s7 + $0x2d8] ss:$12 sps:$4 sm:$0xff]  }
  0x7f   : > { %1243 = vmatmul.mubr.bf16.gmra.mrb[28].mxu0 %v2908_v57  ;;  %1435 = vmatmul.mubr.bf16.gmra.mrb[28].mxu1 %v2909_v58  ;;  %v2988_v57 = vld [vmem:[%s3088_s7 + $0x228] ss:$12 sps:$4 sm:$0xff]   ;;  %v2989_v58 = vld [vmem:[%s3088_s7 + $0x2f0] ss:$12 sps:$4 sm:$0xff]  }
  0x80   : > { %1250 = vmatprep.mubr.bf16.mxu0 %v2910_v59  ;;  %2717 = vmatprep.mubr.msk.bf16.mxu1 %vm1050_vm2, %v2912_v60 }
  0x87   : > { %1251 = vmatmul.mubr.bf16.gmra.mrb[32].mxu0 %v2913_v61  ;;  %2718 = vmatmul.mubr.msk.bf16.vlgmr.msra.gmra.mrb[32].mxu1 %vm1050_vm2, %v2914_v62 }
  0x88   : > { %1258 = vmatprep.mubr.bf16.mxu0 %v2915_v63  ;;  %2721 = vmatprep.mubr.msk.bf16.mxu1 %vm1050_vm2, %v2917_v0 }
  0x8f   : > { %1259 = vmatmul.mubr.bf16.gmra.mrb[36].mxu0 %v2918_v1  ;;  %2722 = vmatmul.mubr.msk.bf16.gmra.mrb[36].mxu1 %vm1050_vm2, %v2919_v2 }
  0x90   : > { %1266 = vmatprep.mubr.bf16.mxu0 %v2920_v3  ;;  %2725 = vmatprep.mubr.msk.bf16.mxu1 %vm1050_vm2, %v2922_v4 }
  0x97   : > { %1267 = vmatmul.mubr.bf16.gmra.mrb[40].mxu0 %v2923_v5  ;;  %2726 = vmatmul.mubr.msk.bf16.gmra.mrb[40].mxu1 %vm1050_vm2, %v2924_v6 }
  0x98   : > { %1274 = vmatprep.mubr.bf16.mxu0 %v2925_v7  ;;  %2729 = vmatprep.mubr.msk.bf16.mxu1 %vm1050_vm2, %v2927_v8 }
  0x9f   : > { %1275 = vmatmul.mubr.bf16.gmra.mrb[44].mxu0 %v2928_v9  ;;  %2730 = vmatmul.mubr.msk.bf16.gmra.mrb[44].mxu1 %vm1050_vm2, %v2929_v10 }
  0xa0   : > { %1282 = vmatprep.mubr.bf16.mxu0 %v2930_v11  ;;  %2733 = vmatprep.mubr.msk.bf16.mxu1 %vm1050_vm2, %v2932_v12 }
  0xa7   : > { %1283 = vmatmul.mubr.bf16.gmra.mrb[48].mxu0 %v2933_v13  ;;  %2734 = vmatmul.mubr.msk.bf16.gmra.mrb[48].mxu1 %vm1050_vm2, %v2934_v14 }
  0xa8   : > { %1290 = vmatprep.mubr.bf16.mxu0 %v2935_v15  ;;  %2737 = vmatprep.mubr.msk.bf16.mxu1 %vm1050_vm2, %v2937_v16 }
  0xaf   : > { %1291 = vmatmul.mubr.bf16.gmra.mrb[52].mxu0 %v2938_v17  ;;  %2738 = vmatmul.mubr.msk.bf16.gmra.mrb[52].mxu1 %vm1050_vm2, %v2939_v18 }
  0xb0   : > { %1298 = vmatprep.mubr.bf16.mxu0 %v2940_v19  ;;  %2741 = vmatprep.mubr.msk.bf16.mxu1 %vm1050_vm2, %v2942_v20 }
  0xb7   : > { %1299 = vmatmul.mubr.bf16.gmra.mrb[56].mxu0 %v2943_v21  ;;  %2742 = vmatmul.mubr.msk.bf16.gmra.mrb[56].mxu1 %vm1050_vm2, %v2944_v22 }
  0xb8   : > { %1306 = vmatprep.mubr.bf16.mxu0 %v2945_v23  ;;  %2745 = vmatprep.mubr.msk.bf16.mxu1 %vm1050_vm2, %v2947_v24 }
  0xbf   : > { %1307 = vmatmul.mubr.bf16.gmra.mrb[60].mxu0 %v2948_v25  ;;  %2746 = vmatmul.mubr.msk.bf16.gmra.mrb[60].mxu1 %vm1050_vm2, %v2949_v26 }
  0xc0   : > { %1314 = vmatprep.mubr.bf16.mxu0 %v2950_v27  ;;  %2749 = vmatprep.mubr.msk.bf16.mxu1 %vm1050_vm2, %v2952_v28 }
  0xc7   : > { %1315 = vmatmul.mubr.bf16.gmra.mrb[64].mxu0 %v2953_v29  ;;  %2750 = vmatmul.mubr.msk.bf16.gmra.mrb[64].mxu1 %vm1050_vm2, %v2954_v30 }
  0xc8   : > { %1322 = vmatprep.mubr.bf16.mxu0 %v2955_v31  ;;  %2753 = vmatprep.mubr.msk.bf16.mxu1 %vm1050_vm2, %v2957_v32 }
  0xcf   : > { %1323 = vmatmul.mubr.bf16.gmra.mrb[68].mxu0 %v2958_v33  ;;  %2754 = vmatmul.mubr.msk.bf16.gmra.mrb[68].mxu1 %vm1050_vm2, %v2959_v34 }
  0xd0   : > { %1330 = vmatprep.mubr.bf16.mxu0 %v2960_v35  ;;  %2757 = vmatprep.mubr.msk.bf16.mxu1 %vm1050_vm2, %v2962_v36 }
  0xd7   : > { %1331 = vmatmul.mubr.bf16.gmra.mrb[72].mxu0 %v2963_v37  ;;  %2758 = vmatmul.mubr.msk.bf16.gmra.mrb[72].mxu1 %vm1050_vm2, %v2964_v38 }
  0xd8   : > { %1338 = vmatprep.mubr.bf16.mxu0 %v2965_v39  ;;  %2761 = vmatprep.mubr.msk.bf16.mxu1 %vm1050_vm2, %v2967_v40 }
  0xdf   : > { %1339 = vmatmul.mubr.bf16.gmra.mrb[76].mxu0 %v2968_v41  ;;  %2762 = vmatmul.mubr.msk.bf16.gmra.mrb[76].mxu1 %vm1050_vm2, %v2969_v42 }
  0xe0   : > { %1346 = vmatprep.mubr.bf16.mxu0 %v2970_v43  ;;  %2765 = vmatprep.mubr.msk.bf16.mxu1 %vm1050_vm2, %v2972_v44 }
  0xe7   : > { %1347 = vmatmul.mubr.bf16.gmra.mrb[80].mxu0 %v2973_v45  ;;  %2766 = vmatmul.mubr.msk.bf16.gmra.mrb[80].mxu1 %vm1050_vm2, %v2974_v46 }
  0xe8   : > { %1354 = vmatprep.mubr.bf16.mxu0 %v2975_v47  ;;  %2769 = vmatprep.mubr.msk.bf16.mxu1 %vm1050_vm2, %v2977_v48 }
  0xef   : > { %1355 = vmatmul.mubr.bf16.gmra.mrb[84].mxu0 %v2978_v49  ;;  %2770 = vmatmul.mubr.msk.bf16.gmra.mrb[84].mxu1 %vm1050_vm2, %v2979_v50 }
  0xf0   : > { %1362 = vmatprep.mubr.bf16.mxu0 %v2980_v51  ;;  %2773 = vmatprep.mubr.msk.bf16.mxu1 %vm1050_vm2, %v2982_v52 }
  0xf7   : > { %1363 = vmatmul.mubr.bf16.gmra.mrb[88].mxu0 %v2983_v53  ;;  %2774 = vmatmul.mubr.msk.bf16.gmra.mrb[88].mxu1 %vm1050_vm2, %v2984_v54 }
  0xf8   : > { %1370 = vmatprep.mubr.bf16.mxu0 %v2985_v55  ;;  %2777 = vmatprep.mubr.msk.bf16.mxu1 %vm1050_vm2, %v2987_v56 }
  0xff   : > { %1371 = vmatmul.mubr.bf16.gmra.mrb[92].mxu0 %v2988_v57  ;;  %2778 = vmatmul.mubr.msk.bf16.gmra.mrb[92].mxu1 %vm1050_vm2, %v2989_v58 }
 0x11a   : > { %v3293_v59 = vpop.f32.mrb[0].mxu0  ;;  %v3295_v60 = vpop.f32.mrb[0].mxu1 }
 0x11b   : > { %v1190_v61 = vpop.f32.mrb[1].mxu0  ;;  %v1382_v62 = vpop.f32.mrb[1].mxu1 }
 0x11c   : > { %v3297_v63 = vpop.f32.mrb[2].mxu0  ;;  %v3299_v0 = vpop.f32.mrb[2].mxu1 }
 0x11d   : > { %v1193_v1 = vpop.f32.mrb[3].mxu0  ;;  %v1385_v2 = vpop.f32.mrb[3].mxu1 }
 0x11e   : > { %v3360_v1 = vld [vmem:[%s3717_s2] ss:$0 sm:$0xff] }
 0x122   : > { %v1196_v3 = vpop.f32.mrb[4].mxu0  ;;  %v3301_v4 = vpop.f32.mrb[4].mxu1 }
 0x123   : > { %v1198_v5 = vpop.f32.mrb[5].mxu0  ;;  %v1390_v6 = vpop.f32.mrb[5].mxu1 }
 0x124   : > { %v3303_v7 = vpop.f32.mrb[6].mxu0  ;;  %v3305_v8 = vpop.f32.mrb[6].mxu1 }
 0x125   : > { %v1201_v9 = vpop.f32.mrb[7].mxu0  ;;  %v1393_v10 = vpop.f32.mrb[7].mxu1 }
 0x126   : > { %v3365_v9 = vld [vmem:[%s3718_s3] ss:$0 sm:$0xff] }
 0x12a   : > { %v3307_v11 = vpop.f32.mrb[8].mxu0  ;;  %v3309_v12 = vpop.f32.mrb[8].mxu1 }
 0x12b   : > { %v1206_v13 = vpop.f32.mrb[9].mxu0  ;;  %v1398_v14 = vpop.f32.mrb[9].mxu1 }
 0x12c   : > { %v3311_v15 = vpop.f32.mrb[10].mxu0  ;;  %v3313_v16 = vpop.f32.mrb[10].mxu1 }
 0x12d   : > { %v1209_v17 = vpop.f32.mrb[11].mxu0  ;;  %v1401_v18 = vpop.f32.mrb[11].mxu1 }
 0x132   : > { %v3315_v19 = vpop.f32.mrb[12].mxu0  ;;  %v3317_v20 = vpop.f32.mrb[12].mxu1 }
 0x133   : > { %v1214_v21 = vpop.f32.mrb[13].mxu0  ;;  %v1406_v22 = vpop.f32.mrb[13].mxu1 }
 0x134   : > { %v3319_v23 = vpop.f32.mrb[14].mxu0  ;;  %v3321_v24 = vpop.f32.mrb[14].mxu1 }
 0x135   : > { %v1217_v25 = vpop.f32.mrb[15].mxu0  ;;  %v1409_v26 = vpop.f32.mrb[15].mxu1 }
 0x13a   : > { %v3323_v27 = vpop.f32.mrb[16].mxu0  ;;  %v3325_v28 = vpop.f32.mrb[16].mxu1 }
 0x13b   : > { %v1222_v29 = vpop.f32.mrb[17].mxu0  ;;  %v1414_v30 = vpop.f32.mrb[17].mxu1 }
 0x13c   : > { %v3327_v31 = vpop.f32.mrb[18].mxu0  ;;  %v3329_v32 = vpop.f32.mrb[18].mxu1 }
 0x13d   : > { %v1225_v33 = vpop.f32.mrb[19].mxu0  ;;  %v1417_v34 = vpop.f32.mrb[19].mxu1 }
 0x142   : > { %v3331_v35 = vpop.f32.mrb[20].mxu0  ;;  %v3333_v36 = vpop.f32.mrb[20].mxu1 }
 0x143   : > { %v1230_v37 = vpop.f32.mrb[21].mxu0  ;;  %v1422_v38 = vpop.f32.mrb[21].mxu1 }
 0x144   : > { %v3335_v39 = vpop.f32.mrb[22].mxu0  ;;  %v3337_v40 = vpop.f32.mrb[22].mxu1 }
 0x145   : > { %v1233_v41 = vpop.f32.mrb[23].mxu0  ;;  %v1425_v42 = vpop.f32.mrb[23].mxu1 }
 0x14a   : > { %v3339_v43 = vpop.f32.mrb[24].mxu0  ;;  %v3341_v44 = vpop.f32.mrb[24].mxu1 }
 0x14b   : > { %v1238_v45 = vpop.f32.mrb[25].mxu0  ;;  %v1430_v46 = vpop.f32.mrb[25].mxu1 }
 0x14c   : > { %v3343_v47 = vpop.f32.mrb[26].mxu0  ;;  %v3345_v48 = vpop.f32.mrb[26].mxu1 }
 0x14d   : > { %v1241_v49 = vpop.f32.mrb[27].mxu0  ;;  %v1433_v50 = vpop.f32.mrb[27].mxu1 }
 0x152   : > { %v3347_v51 = vpop.f32.mrb[28].mxu0  ;;  %v3349_v52 = vpop.f32.mrb[28].mxu1 }
 0x153   : > { %v1246_v53 = vpop.f32.mrb[29].mxu0  ;;  %v1438_v54 = vpop.f32.mrb[29].mxu1 }
 0x154   : > { %v3351_v55 = vpop.f32.mrb[30].mxu0  ;;  %v3353_v56 = vpop.f32.mrb[30].mxu1 }
 0x155   : > { %v1249_v57 = vpop.f32.mrb[31].mxu0  ;;  %v1441_v58 = vpop.f32.mrb[31].mxu1 }
 0x15a   : > { %v3355_v61 = vpop.f32.mrb[32].mxu0  ;;  %v2719_v62 = vpop.f32.mrb[32].mxu1 }
 0x15b   : > { %v1486_v2 = vadd.f32 %v2719_v62, %v1196_v3  ;;  %v1254_v5 = vpop.f32.mrb[33].mxu0  ;;  %v1477_v6 = vpop.f32.mrb[33].mxu1 }
 0x15c   : > { %v1478_v10 = vadd.f32 %v1477_v6, %v3293_v59  ;;  %v3368_v13 = vpop.f32.mrb[34].mxu0  ;;  %v2720_v14 = vpop.f32.mrb[34].mxu1 }
 0x15d   : > { %v1741_v17 = vmul.f32 %v3360_v1, %v1486_v2  ;;  %v1489_v18 = vadd.f32 %v2720_v14, %v3303_v7  ;;  %v1257_v21 = vpop.f32.mrb[35].mxu0  ;;  %v1480_v22 = vpop.f32.mrb[35].mxu1 }
 0x15e   : > { %v1739_v3 = vmul.f32 %v3360_v1, %v1478_v10  ;;  %v1481_v25 = vadd.f32 %v1480_v22, %v3297_v63 }
 0x15f   : > { %v1812_v26 = vadd.f32 %v3365_v9, %v1741_v17  ;;  %v1742_v29 = vmul.f32 %v3360_v1, %v1489_v18 }
 0x160   : > { %v1810_v59 = vadd.f32 %v3365_v9, %v1739_v3  ;;  %v1740_v30 = vmul.f32 %v3360_v1, %v1481_v25 }
 0x161   : > { %v1876_v33 = vmax.f32 %v1812_v26, 0.0  ;;  %v1813_v34 = vadd.f32 %v3365_v9, %v1742_v29 }
 0x162   : > { %v1874_v63 = vmax.f32 %v1810_v59, 0.0  ;;  %v1811_v7 = vadd.f32 %v3365_v9, %v1740_v30  ;;  %v3386_v37 = vpop.f32.mrb[36].mxu0  ;;  %v2723_v38 = vpop.f32.mrb[36].mxu1 }
 0x163   : > { %v2605_v41 = vpack.c.bf16 %v1876_v33, %v1876_v33  ;;  %v1877_v42 = vmax.f32 %v1813_v34, 0.0  ;;  %v1502_v45 = vadd.f32 %v2723_v38, %v3315_v19  ;;  %v1262_v46 = vpop.f32.mrb[37].mxu0  ;;  %v1493_v49 = vpop.f32.mrb[37].mxu1 }
 0x164   : > { %v2603_v50 = vpack.c.bf16 %v1874_v63, %v1874_v63  ;;  %v1875_v53 = vmax.f32 %v1811_v7, 0.0  ;;  %v1494_v54 = vadd.f32 %v1493_v49, %v3307_v11  ;;  %v3390_v57 = vpop.f32.mrb[38].mxu0  ;;  %v2724_v58 = vpop.f32.mrb[38].mxu1 }
 0x165   : > { %2197 = vst.msk [vmem:[%s3383_s5 + $0x8] sm:$0xf] %vm2194_vm3, %v2605_v41  ;;  %v2606_v62 = vpack.c.bf16 %v1877_v42, %v1877_v42  ;;  %v1745_v2 = vmul.f32 %v3360_v1, %v1502_v45  ;;  %v1505_v5 = vadd.f32 %v2724_v58, %v3319_v23  ;;  %v1265_v6 = vpop.f32.mrb[39].mxu0  ;;  %v1496_v19 = vpop.f32.mrb[39].mxu1 }
 0x166   : > { %2195 = vst.msk [vmem:[%s3383_s5] sm:$0xf] %vm2194_vm3, %v2603_v50  ;;  %v2604_v10 = vpack.c.bf16 %v1875_v53, %v1875_v53  ;;  %v1743_v14 = vmul.f32 %v3360_v1, %v1494_v54  ;;  %v1497_v11 = vadd.f32 %v1496_v19, %v3311_v15 }
 0x167   : > { %2198 = vst.msk [vmem:[%s3383_s5 + $0xc] sm:$0xf] %vm2194_vm3, %v2606_v62  ;;  %v1816_v17 = vadd.f32 %v3365_v9, %v1745_v2  ;;  %v1746_v18 = vmul.f32 %v3360_v1, %v1505_v5 }
 0x168   : > { %2196 = vst.msk [vmem:[%s3383_s5 + $0x4] sm:$0xf] %vm2194_vm3, %v2604_v10  ;;  %v1814_v21 = vadd.f32 %v3365_v9, %v1743_v14  ;;  %v1744_v23 = vmul.f32 %v3360_v1, %v1497_v11 }
 0x169   : > { %v1880_v22 = vmax.f32 %v1816_v17, 0.0  ;;  %v1817_v3 = vadd.f32 %v3365_v9, %v1746_v18 }
 0x16a   : > { %v1878_v25 = vmax.f32 %v1814_v21, 0.0  ;;  %v1815_v26 = vadd.f32 %v3365_v9, %v1744_v23  ;;  %v3410_v15 = vpop.f32.mrb[40].mxu0  ;;  %v2727_v29 = vpop.f32.mrb[40].mxu1 }
 0x16b   : > { %v2609_v59 = vpack.c.bf16 %v1880_v22, %v1880_v22  ;;  %v1881_v30 = vmax.f32 %v1817_v3, 0.0  ;;  %v1518_v33 = vadd.f32 %v2727_v29, %v3331_v35  ;;  %v1270_v34 = vpop.f32.mrb[41].mxu0  ;;  %v1509_v63 = vpop.f32.mrb[41].mxu1 }
 0x16c   : > { %v2607_v7 = vpack.c.bf16 %v1878_v25, %v1878_v25  ;;  %v1879_v38 = vmax.f32 %v1815_v26, 0.0  ;;  %v1510_v41 = vadd.f32 %v1509_v63, %v3323_v27  ;;  %v3414_v42 = vpop.f32.mrb[42].mxu0  ;;  %v2728_v45 = vpop.f32.mrb[42].mxu1 }
 0x16d   : > { %2201 = vst.msk [vmem:[%s3383_s5 + $0x18] sm:$0xf] %vm2194_vm3, %v2609_v59  ;;  %v2610_v46 = vpack.c.bf16 %v1881_v30, %v1881_v30  ;;  %v1749_v49 = vmul.f32 %v3360_v1, %v1518_v33  ;;  %v1521_v50 = vadd.f32 %v2728_v45, %v3335_v39  ;;  %v1273_v53 = vpop.f32.mrb[43].mxu0  ;;  %v1512_v35 = vpop.f32.mrb[43].mxu1 }
 0x16e   : > { %2199 = vst.msk [vmem:[%s3383_s5 + $0x10] sm:$0xf] %vm2194_vm3, %v2607_v7  ;;  %v2608_v54 = vpack.c.bf16 %v1879_v38, %v1879_v38  ;;  %v1747_v58 = vmul.f32 %v3360_v1, %v1510_v41  ;;  %v1513_v27 = vadd.f32 %v1512_v35, %v3327_v31 }
 0x16f   : > { %2202 = vst.msk [vmem:[%s3383_s5 + $0x1c] sm:$0xf] %vm2194_vm3, %v2610_v46  ;;  %v1820_v62 = vadd.f32 %v3365_v9, %v1749_v49  ;;  %v1750_v2 = vmul.f32 %v3360_v1, %v1521_v50 }
 0x170   : > { %2200 = vst.msk [vmem:[%s3383_s5 + $0x14] sm:$0xf] %vm2194_vm3, %v2608_v54  ;;  %v1818_v5 = vadd.f32 %v3365_v9, %v1747_v58  ;;  %v1748_v39 = vmul.f32 %v3360_v1, %v1513_v27 }
 0x171   : > { %v1884_v6 = vmax.f32 %v1820_v62, 0.0  ;;  %v1821_v19 = vadd.f32 %v3365_v9, %v1750_v2 }
 0x172   : > { %v1882_v10 = vmax.f32 %v1818_v5, 0.0  ;;  %v1819_v14 = vadd.f32 %v3365_v9, %v1748_v39  ;;  %v3434_v31 = vpop.f32.mrb[44].mxu0  ;;  %v2731_v11 = vpop.f32.mrb[44].mxu1 }
 0x173   : > { %v2613_v17 = vpack.c.bf16 %v1884_v6, %v1884_v6  ;;  %v1885_v18 = vmax.f32 %v1821_v19, 0.0  ;;  %v1534_v21 = vadd.f32 %v2731_v11, %v3347_v51  ;;  %v1278_v23 = vpop.f32.mrb[45].mxu0  ;;  %v1525_v22 = vpop.f32.mrb[45].mxu1 }
 0x174   : > { %v2611_v3 = vpack.c.bf16 %v1882_v10, %v1882_v10  ;;  %v1883_v25 = vmax.f32 %v1819_v14, 0.0  ;;  %v1526_v26 = vadd.f32 %v1525_v22, %v3339_v43  ;;  %v3438_v29 = vpop.f32.mrb[46].mxu0  ;;  %v2732_v59 = vpop.f32.mrb[46].mxu1 }
 0x175   : > { %2205 = vst.msk [vmem:[%s3383_s5 + $0x28] sm:$0xf] %vm2194_vm3, %v2613_v17  ;;  %v2614_v30 = vpack.c.bf16 %v1885_v18, %v1885_v18  ;;  %v1753_v33 = vmul.f32 %v3360_v1, %v1534_v21  ;;  %v1537_v34 = vadd.f32 %v2732_v59, %v3351_v55  ;;  %v1281_v63 = vpop.f32.mrb[47].mxu0  ;;  %v1528_v51 = vpop.f32.mrb[47].mxu1 }
 0x176   : > { %2203 = vst.msk [vmem:[%s3383_s5 + $0x20] sm:$0xf] %vm2194_vm3, %v2611_v3  ;;  %v2612_v7 = vpack.c.bf16 %v1883_v25, %v1883_v25  ;;  %v1751_v38 = vmul.f32 %v3360_v1, %v1526_v26  ;;  %v1529_v43 = vadd.f32 %v1528_v51, %v3343_v47 }
 0x177   : > { %2206 = vst.msk [vmem:[%s3383_s5 + $0x2c] sm:$0xf] %vm2194_vm3, %v2614_v30  ;;  %v1824_v41 = vadd.f32 %v3365_v9, %v1753_v33  ;;  %v1754_v45 = vmul.f32 %v3360_v1, %v1537_v34 }
 0x178   : > { %2204 = vst.msk [vmem:[%s3383_s5 + $0x24] sm:$0xf] %vm2194_vm3, %v2612_v7  ;;  %v1822_v46 = vadd.f32 %v3365_v9, %v1751_v38  ;;  %v1752_v55 = vmul.f32 %v3360_v1, %v1529_v43 }
 0x179   : > { %v1888_v49 = vmax.f32 %v1824_v41, 0.0  ;;  %v1825_v50 = vadd.f32 %v3365_v9, %v1754_v45 }
 0x17a   : > { %v1886_v53 = vmax.f32 %v1822_v46, 0.0  ;;  %v1823_v35 = vadd.f32 %v3365_v9, %v1752_v55  ;;  %v3458_v47 = vpop.f32.mrb[48].mxu0  ;;  %v2735_v54 = vpop.f32.mrb[48].mxu1 }
 0x17b   : > { %v2617_v58 = vpack.c.bf16 %v1888_v49, %v1888_v49  ;;  %v1889_v27 = vmax.f32 %v1825_v50, 0.0  ;;  %v1550_v62 = vadd.f32 %v2735_v54, %v3386_v37  ;;  %v1286_v2 = vpop.f32.mrb[49].mxu0  ;;  %v1541_v5 = vpop.f32.mrb[49].mxu1 }
 0x17c   : > { %v2615_v39 = vpack.c.bf16 %v1886_v53, %v1886_v53  ;;  %v1887_v6 = vmax.f32 %v1823_v35, 0.0  ;;  %v1542_v19 = vadd.f32 %v1541_v5, %v3355_v61  ;;  %v3462_v10 = vpop.f32.mrb[50].mxu0  ;;  %v2736_v14 = vpop.f32.mrb[50].mxu1 }
 0x17d   : > { %2209 = vst.msk [vmem:[%s3383_s5 + $0x38] sm:$0xf] %vm2194_vm3, %v2617_v58  ;;  %v2618_v11 = vpack.c.bf16 %v1889_v27, %v1889_v27  ;;  %v1757_v17 = vmul.f32 %v3360_v1, %v1550_v62  ;;  %v1553_v18 = vadd.f32 %v2736_v14, %v3390_v57  ;;  %v1289_v21 = vpop.f32.mrb[51].mxu0  ;;  %v1544_v37 = vpop.f32.mrb[51].mxu1 }
 0x17e   : > { %2207 = vst.msk [vmem:[%s3383_s5 + $0x30] sm:$0xf] %vm2194_vm3, %v2615_v39  ;;  %v2616_v23 = vpack.c.bf16 %v1887_v6, %v1887_v6  ;;  %v1755_v22 = vmul.f32 %v3360_v1, %v1542_v19  ;;  %v1545_v61 = vadd.f32 %v1544_v37, %v3368_v13 }
 0x17f   : > { %2210 = vst.msk [vmem:[%s3383_s5 + $0x3c] sm:$0xf] %vm2194_vm3, %v2618_v11  ;;  %v1828_v3 = vadd.f32 %v3365_v9, %v1757_v17  ;;  %v1758_v25 = vmul.f32 %v3360_v1, %v1553_v18 }
 0x180   : > { %2208 = vst.msk [vmem:[%s3383_s5 + $0x34] sm:$0xf] %vm2194_vm3, %v2616_v23  ;;  %v1826_v26 = vadd.f32 %v3365_v9, %v1755_v22  ;;  %v1756_v57 = vmul.f32 %v3360_v1, %v1545_v61 }
 0x181   : > { %v1892_v59 = vmax.f32 %v1828_v3, 0.0  ;;  %v1829_v30 = vadd.f32 %v3365_v9, %v1758_v25 }
 0x182   : > { %v1890_v33 = vmax.f32 %v1826_v26, 0.0  ;;  %v1827_v34 = vadd.f32 %v3365_v9, %v1756_v57  ;;  %v1292_v13 = vpop.f32.mrb[52].mxu0  ;;  %v2739_v63 = vpop.f32.mrb[52].mxu1 }
 0x183   : > { %v2621_v51 = vpack.c.bf16 %v1892_v59, %v1892_v59  ;;  %v1893_v7 = vmax.f32 %v1829_v30, 0.0  ;;  %v1566_v38 = vadd.f32 %v2739_v63, %v3434_v31  ;;  %v1294_v43 = vpop.f32.mrb[53].mxu0  ;;  %v1557_v41 = vpop.f32.mrb[53].mxu1 }
 0x184   : > { %v2619_v45 = vpack.c.bf16 %v1890_v33, %v1890_v33  ;;  %v1891_v46 = vmax.f32 %v1827_v34, 0.0  ;;  %v1558_v55 = vadd.f32 %v1557_v41, %v3410_v15  ;;  %v1295_v49 = vpop.f32.mrb[54].mxu0  ;;  %v2740_v50 = vpop.f32.mrb[54].mxu1 }
 0x185   : > { %2213 = vst.msk [vmem:[%s3383_s5 + $0x48] sm:$0xf] %vm2194_vm3, %v2621_v51  ;;  %v2622_v53 = vpack.c.bf16 %v1893_v7, %v1893_v7  ;;  %v1761_v35 = vmul.f32 %v3360_v1, %v1566_v38  ;;  %v1569_v54 = vadd.f32 %v2740_v50, %v3438_v29  ;;  %v1297_v58 = vpop.f32.mrb[55].mxu0  ;;  %v1560_v27 = vpop.f32.mrb[55].mxu1 }
 0x186   : > { %2211 = vst.msk [vmem:[%s3383_s5 + $0x40] sm:$0xf] %vm2194_vm3, %v2619_v45  ;;  %v2620_v31 = vpack.c.bf16 %v1891_v46, %v1891_v46  ;;  %v1759_v62 = vmul.f32 %v3360_v1, %v1558_v55  ;;  %v1561_v2 = vadd.f32 %v1560_v27, %v3414_v42 }
 0x187   : > { %2214 = vst.msk [vmem:[%s3383_s5 + $0x4c] sm:$0xf] %vm2194_vm3, %v2622_v53  ;;  %v1832_v15 = vadd.f32 %v3365_v9, %v1761_v35  ;;  %v1762_v5 = vmul.f32 %v3360_v1, %v1569_v54 }
 0x188   : > { %2212 = vst.msk [vmem:[%s3383_s5 + $0x44] sm:$0xf] %vm2194_vm3, %v2620_v31  ;;  %v1830_v39 = vadd.f32 %v3365_v9, %v1759_v62  ;;  %v1760_v29 = vmul.f32 %v3360_v1, %v1561_v2 }
 0x189   : > { %v1896_v6 = vmax.f32 %v1832_v15, 0.0  ;;  %v1833_v19 = vadd.f32 %v3365_v9, %v1762_v5 }
 0x18a   : > { %v1894_v14 = vmax.f32 %v1830_v39, 0.0  ;;  %v1831_v11 = vadd.f32 %v3365_v9, %v1760_v29  ;;  %v1300_v42 = vpop.f32.mrb[56].mxu0  ;;  %v2743_v17 = vpop.f32.mrb[56].mxu1 }
 0x18b   : > { %v2625_v18 = vpack.c.bf16 %v1896_v6, %v1896_v6  ;;  %v1897_v21 = vmax.f32 %v1833_v19, 0.0  ;;  %v1582_v37 = vadd.f32 %v2743_v17, %v1292_v13  ;;  %v1302_v23 = vpop.f32.mrb[57].mxu0  ;;  %v1573_v22 = vpop.f32.mrb[57].mxu1 }
 0x18c   : > { %v2623_v61 = vpack.c.bf16 %v1894_v14, %v1894_v14  ;;  %v1895_v3 = vmax.f32 %v1831_v11, 0.0  ;;  %v1574_v25 = vadd.f32 %v1573_v22, %v3458_v47  ;;  %v1303_v26 = vpop.f32.mrb[58].mxu0  ;;  %v2744_v57 = vpop.f32.mrb[58].mxu1 }
 0x18d   : > { %2217 = vst.msk [vmem:[%s3383_s5 + $0x58] sm:$0xf] %vm2194_vm3, %v2625_v18  ;;  %v2626_v59 = vpack.c.bf16 %v1897_v21, %v1897_v21  ;;  %v1765_v30 = vmul.f32 %v3360_v1, %v1582_v37  ;;  %v1585_v33 = vadd.f32 %v2744_v57, %v1295_v49  ;;  %v1305_v34 = vpop.f32.mrb[59].mxu0  ;;  %v1576_v63 = vpop.f32.mrb[59].mxu1 }
 0x18e   : > { %2215 = vst.msk [vmem:[%s3383_s5 + $0x50] sm:$0xf] %vm2194_vm3, %v2623_v61  ;;  %v2624_v13 = vpack.c.bf16 %v1895_v3, %v1895_v3  ;;  %v1763_v51 = vmul.f32 %v3360_v1, %v1574_v25  ;;  %v1577_v7 = vadd.f32 %v1576_v63, %v3462_v10 }
 0x18f   : > { %2218 = vst.msk [vmem:[%s3383_s5 + $0x5c] sm:$0xf] %vm2194_vm3, %v2626_v59  ;;  %v1836_v47 = vadd.f32 %v3365_v9, %v1765_v30  ;;  %v1766_v38 = vmul.f32 %v3360_v1, %v1585_v33 }
 0x190   : > { %2216 = vst.msk [vmem:[%s3383_s5 + $0x54] sm:$0xf] %vm2194_vm3, %v2624_v13  ;;  %v1834_v43 = vadd.f32 %v3365_v9, %v1763_v51  ;;  %v1764_v41 = vmul.f32 %v3360_v1, %v1577_v7 }
 0x191   : > { %v1900_v45 = vmax.f32 %v1836_v47, 0.0  ;;  %v1837_v46 = vadd.f32 %v3365_v9, %v1766_v38 }
 0x192   : > { %v1898_v55 = vmax.f32 %v1834_v43, 0.0  ;;  %v1835_v49 = vadd.f32 %v3365_v9, %v1764_v41  ;;  %v1308_v10 = vpop.f32.mrb[60].mxu0  ;;  %v2747_v50 = vpop.f32.mrb[60].mxu1 }
 0x193   : > { %v2629_v53 = vpack.c.bf16 %v1900_v45, %v1900_v45  ;;  %v1901_v35 = vmax.f32 %v1837_v46, 0.0  ;;  %v1598_v54 = vadd.f32 %v2747_v50, %v1308_v10  ;;  %v1310_v58 = vpop.f32.mrb[61].mxu0  ;;  %v1589_v27 = vpop.f32.mrb[61].mxu1 }
 0x194   : > { %v2627_v31 = vpack.c.bf16 %v1898_v55, %v1898_v55  ;;  %v1899_v62 = vmax.f32 %v1835_v49, 0.0  ;;  %v1590_v2 = vadd.f32 %v1589_v27, %v1300_v42  ;;  %v1311_v15 = vpop.f32.mrb[62].mxu0  ;;  %v2748_v5 = vpop.f32.mrb[62].mxu1 }
 0x195   : > { %2221 = vst.msk [vmem:[%s3383_s5 + $0x68] sm:$0xf] %vm2194_vm3, %v2629_v53  ;;  %v2630_v39 = vpack.c.bf16 %v1901_v35, %v1901_v35  ;;  %v1769_v29 = vmul.f32 %v3360_v1, %v1598_v54  ;;  %v1601_v6 = vadd.f32 %v2748_v5, %v1311_v15  ;;  %v1313_v19 = vpop.f32.mrb[63].mxu0  ;;  %v1592_v14 = vpop.f32.mrb[63].mxu1 }
 0x196   : > { %2219 = vst.msk [vmem:[%s3383_s5 + $0x60] sm:$0xf] %vm2194_vm3, %v2627_v31  ;;  %v2628_v11 = vpack.c.bf16 %v1899_v62, %v1899_v62  ;;  %v1767_v17 = vmul.f32 %v3360_v1, %v1590_v2  ;;  %v1593_v18 = vadd.f32 %v1592_v14, %v1303_v26 }
 0x197   : > { %2222 = vst.msk [vmem:[%s3383_s5 + $0x6c] sm:$0xf] %vm2194_vm3, %v2630_v39  ;;  %v1840_v42 = vadd.f32 %v3365_v9, %v1769_v29  ;;  %v1770_v21 = vmul.f32 %v3360_v1, %v1601_v6 }
 0x198   : > { %2220 = vst.msk [vmem:[%s3383_s5 + $0x64] sm:$0xf] %vm2194_vm3, %v2628_v11  ;;  %v1838_v37 = vadd.f32 %v3365_v9, %v1767_v17  ;;  %v1768_v23 = vmul.f32 %v3360_v1, %v1593_v18 }
 0x199   : > { %v1904_v22 = vmax.f32 %v1840_v42, 0.0  ;;  %v1841_v61 = vadd.f32 %v3365_v9, %v1770_v21 }
 0x19a   : > { %v1902_v3 = vmax.f32 %v1838_v37, 0.0  ;;  %v1839_v25 = vadd.f32 %v3365_v9, %v1768_v23  ;;  %v1316_v26 = vpop.f32.mrb[64].mxu0  ;;  %v2751_v57 = vpop.f32.mrb[64].mxu1 }
 0x19b   : > { %v2633_v59 = vpack.c.bf16 %v1904_v22, %v1904_v22  ;;  %v1905_v30 = vmax.f32 %v1841_v61, 0.0  ;;  %v1318_v33 = vpop.f32.mrb[65].mxu0  ;;  %v1605_v34 = vpop.f32.mrb[65].mxu1 }
 0x19c   : > { %v2631_v63 = vpack.c.bf16 %v1902_v3, %v1902_v3  ;;  %v1903_v13 = vmax.f32 %v1839_v25, 0.0  ;;  %v1606_v51 = vadd.f32 %v1605_v34, %v1316_v26  ;;  %v1319_v7 = vpop.f32.mrb[66].mxu0  ;;  %v2752_v47 = vpop.f32.mrb[66].mxu1 }
 0x19d   : > { %2225 = vst.msk [vmem:[%s3383_s5 + $0x78] sm:$0xf] %vm2194_vm3, %v2633_v59  ;;  %v2634_v38 = vpack.c.bf16 %v1905_v30, %v1905_v30  ;;  %v1321_v43 = vpop.f32.mrb[67].mxu0  ;;  %v1608_v41 = vpop.f32.mrb[67].mxu1 }
 0x19e   : > { %2223 = vst.msk [vmem:[%s3383_s5 + $0x70] sm:$0xf] %vm2194_vm3, %v2631_v63  ;;  %v2632_v45 = vpack.c.bf16 %v1903_v13, %v1903_v13  ;;  %v1771_v46 = vmul.f32 %v3360_v1, %v1606_v51  ;;  %v1609_v55 = vadd.f32 %v1608_v41, %v1319_v7 }
 0x19f   : > { %2226 = vst.msk [vmem:[%s3383_s5 + $0x7c] sm:$0xf] %vm2194_vm3, %v2634_v38 }
 0x1a0   : > { %2224 = vst.msk [vmem:[%s3383_s5 + $0x74] sm:$0xf] %vm2194_vm3, %v2632_v45  ;;  %v1842_v49 = vadd.f32 %v3365_v9, %v1771_v46  ;;  %v1772_v10 = vmul.f32 %v3360_v1, %v1609_v55 }
 0x1a2   : > { %v1906_v50 = vmax.f32 %v1842_v49, 0.0  ;;  %v1843_v53 = vadd.f32 %v3365_v9, %v1772_v10  ;;  %v1324_v35 = vpop.f32.mrb[68].mxu0  ;;  %v2755_v54 = vpop.f32.mrb[68].mxu1 }
 0x1a3   : > { %v1614_v58 = vadd.f32 %v2751_v57, %v1324_v35  ;;  %v1326_v27 = vpop.f32.mrb[69].mxu0  ;;  %v1621_v31 = vpop.f32.mrb[69].mxu1 }
 0x1a4   : > { %v2635_v62 = vpack.c.bf16 %v1906_v50, %v1906_v50  ;;  %v1907_v2 = vmax.f32 %v1843_v53, 0.0  ;;  %v1327_v15 = vpop.f32.mrb[70].mxu0  ;;  %v2756_v5 = vpop.f32.mrb[70].mxu1 }
 0x1a5   : > { %v1773_v39 = vmul.f32 %v3360_v1, %v1614_v58  ;;  %v1617_v29 = vadd.f32 %v2752_v47, %v1327_v15  ;;  %v1329_v6 = vpop.f32.mrb[71].mxu0  ;;  %v1624_v19 = vpop.f32.mrb[71].mxu1 }
 0x1a6   : > { %2227 = vst.msk [vmem:[%s3383_s5 + $0x80] sm:$0xf] %vm2194_vm3, %v2635_v62  ;;  %v2636_v14 = vpack.c.bf16 %v1907_v2, %v1907_v2 }
 0x1a7   : > { %v1844_v11 = vadd.f32 %v3365_v9, %v1773_v39  ;;  %v1774_v17 = vmul.f32 %v3360_v1, %v1617_v29 }
 0x1a8   : > { %2228 = vst.msk [vmem:[%s3383_s5 + $0x84] sm:$0xf] %vm2194_vm3, %v2636_v14 }
 0x1a9   : > { %v1908_v18 = vmax.f32 %v1844_v11, 0.0  ;;  %v1845_v42 = vadd.f32 %v3365_v9, %v1774_v17 }
 0x1aa   : > { %v1332_v21 = vpop.f32.mrb[72].mxu0  ;;  %v3556_v37 = vpop.f32.mrb[72].mxu1 }
 0x1ab   : > { %v2637_v23 = vpack.c.bf16 %v1908_v18, %v1908_v18  ;;  %v1909_v22 = vmax.f32 %v1845_v42, 0.0  ;;  %v1622_v61 = vadd.f32 %v1621_v31, %v1332_v21  ;;  %v1334_v3 = vpop.f32.mrb[73].mxu0  ;;  %v1637_v25 = vpop.f32.mrb[73].mxu1 }
 0x1ac   : > { %v1335_v26 = vpop.f32.mrb[74].mxu0  ;;  %v3558_v57 = vpop.f32.mrb[74].mxu1 }
 0x1ad   : > { %2229 = vst.msk [vmem:[%s3383_s5 + $0x88] sm:$0xf] %vm2194_vm3, %v2637_v23  ;;  %v2638_v59 = vpack.c.bf16 %v1909_v22, %v1909_v22  ;;  %v1775_v30 = vmul.f32 %v3360_v1, %v1622_v61  ;;  %v1625_v33 = vadd.f32 %v1624_v19, %v1335_v26  ;;  %v1337_v34 = vpop.f32.mrb[75].mxu0  ;;  %v1640_v63 = vpop.f32.mrb[75].mxu1 }
 0x1af   : > { %2230 = vst.msk [vmem:[%s3383_s5 + $0x8c] sm:$0xf] %vm2194_vm3, %v2638_v59  ;;  %v1846_v13 = vadd.f32 %v3365_v9, %v1775_v30  ;;  %v1776_v51 = vmul.f32 %v3360_v1, %v1625_v33 }
 0x1b1   : > { %v1910_v7 = vmax.f32 %v1846_v13, 0.0  ;;  %v1847_v47 = vadd.f32 %v3365_v9, %v1776_v51 }
 0x1b2   : > { %v1340_v38 = vpop.f32.mrb[76].mxu0  ;;  %v3568_v43 = vpop.f32.mrb[76].mxu1 }
 0x1b3   : > { %v2639_v41 = vpack.c.bf16 %v1910_v7, %v1910_v7  ;;  %v1911_v45 = vmax.f32 %v1847_v47, 0.0  ;;  %v1630_v46 = vadd.f32 %v2755_v54, %v1340_v38  ;;  %v1342_v55 = vpop.f32.mrb[77].mxu0  ;;  %v3570_v49 = vpop.f32.mrb[77].mxu1 }
 0x1b4   : > { %v1343_v10 = vpop.f32.mrb[78].mxu0  ;;  %v3572_v50 = vpop.f32.mrb[78].mxu1 }
 0x1b5   : > { %2231 = vst.msk [vmem:[%s3383_s5 + $0x90] sm:$0xf] %vm2194_vm3, %v2639_v41  ;;  %v2640_v53 = vpack.c.bf16 %v1911_v45, %v1911_v45  ;;  %v1777_v35 = vmul.f32 %v3360_v1, %v1630_v46  ;;  %v1633_v58 = vadd.f32 %v2756_v5, %v1343_v10  ;;  %v1345_v27 = vpop.f32.mrb[79].mxu0  ;;  %v3577_v31 = vpop.f32.mrb[79].mxu1 }
 0x1b7   : > { %2232 = vst.msk [vmem:[%s3383_s5 + $0x94] sm:$0xf] %vm2194_vm3, %v2640_v53  ;;  %v1848_v54 = vadd.f32 %v3365_v9, %v1777_v35  ;;  %v1778_v62 = vmul.f32 %v3360_v1, %v1633_v58 }
 0x1b9   : > { %v1912_v2 = vmax.f32 %v1848_v54, 0.0  ;;  %v1849_v15 = vadd.f32 %v3365_v9, %v1778_v62 }
 0x1ba   : > { %v1348_v39 = vpop.f32.mrb[80].mxu0  ;;  %v2767_v29 = vpop.f32.mrb[80].mxu1 }
 0x1bb   : > { %v2641_v6 = vpack.c.bf16 %v1912_v2, %v1912_v2  ;;  %v1913_v19 = vmax.f32 %v1849_v15, 0.0  ;;  %v1638_v14 = vadd.f32 %v1637_v25, %v1348_v39  ;;  %v1678_v5 = vadd.f32 %v2767_v29, %v3301_v4  ;;  %v1350_v11 = vpop.f32.mrb[81].mxu0  ;;  %v1669_v17 = vpop.f32.mrb[81].mxu1 }
 0x1bc   : > { %v1670_v18 = vadd.f32 %v1669_v17, %v3295_v60  ;;  %v1351_v42 = vpop.f32.mrb[82].mxu0  ;;  %v2768_v21 = vpop.f32.mrb[82].mxu1 }
 0x1bd   : > { %2233 = vst.msk [vmem:[%s3383_s5 + $0x98] sm:$0xf] %vm2194_vm3, %v2641_v6  ;;  %v2642_v23 = vpack.c.bf16 %v1913_v19, %v1913_v19  ;;  %v1779_v22 = vmul.f32 %v3360_v1, %v1638_v14  ;;  %v1789_v61 = vmul.f32 %v3360_v1, %v1678_v5  ;;  %v1641_v3 = vadd.f32 %v1640_v63, %v1351_v42  ;;  %v1353_v26 = vpop.f32.mrb[83].mxu0  ;;  %v1672_v59 = vpop.f32.mrb[83].mxu1 }
 0x1be   : > { %v1787_v25 = vmul.f32 %v3360_v1, %v1670_v18  ;;  %v1681_v4 = vadd.f32 %v2768_v21, %v3305_v8  ;;  %v1673_v30 = vadd.f32 %v1672_v59, %v3299_v0 }
 0x1bf   : > { %2234 = vst.msk [vmem:[%s3383_s5 + $0x9c] sm:$0xf] %vm2194_vm3, %v2642_v23  ;;  %v1850_v60 = vadd.f32 %v3365_v9, %v1779_v22  ;;  %v1860_v33 = vadd.f32 %v3365_v9, %v1789_v61  ;;  %v1780_v34 = vmul.f32 %v3360_v1, %v1641_v3 }
 0x1c0   : > { %v1858_v13 = vadd.f32 %v3365_v9, %v1787_v25  ;;  %v1790_v63 = vmul.f32 %v3360_v1, %v1681_v4  ;;  %v1788_v51 = vmul.f32 %v3360_v1, %v1673_v30 }
 0x1c1   : > { %v1914_v7 = vmax.f32 %v1850_v60, 0.0  ;;  %v1924_v47 = vmax.f32 %v1860_v33, 0.0  ;;  %v1851_v8 = vadd.f32 %v3365_v9, %v1780_v34 }
 0x1c2   : > { %v1922_v38 = vmax.f32 %v1858_v13, 0.0  ;;  %v1861_v0 = vadd.f32 %v3365_v9, %v1790_v63  ;;  %v1859_v41 = vadd.f32 %v3365_v9, %v1788_v51  ;;  %v1356_v45 = vpop.f32.mrb[84].mxu0  ;;  %v2771_v46 = vpop.f32.mrb[84].mxu1 }
 0x1c3   : > { %v2643_v55 = vpack.c.bf16 %v1914_v7, %v1914_v7  ;;  %v2653_v10 = vpack.c.bf16 %v1924_v47, %v1924_v47  ;;  %v1915_v53 = vmax.f32 %v1851_v8, 0.0  ;;  %v1646_v35 = vadd.f32 %v3556_v37, %v1356_v45  ;;  %v1358_v58 = vpop.f32.mrb[85].mxu0  ;;  %v1685_v27 = vpop.f32.mrb[85].mxu1 }
 0x1c4   : > { %v2651_v54 = vpack.c.bf16 %v1922_v38, %v1922_v38  ;;  %v1925_v62 = vmax.f32 %v1861_v0, 0.0  ;;  %v1923_v2 = vmax.f32 %v1859_v41, 0.0  ;;  %v1694_v15 = vadd.f32 %v2771_v46, %v3317_v20  ;;  %v1359_v39 = vpop.f32.mrb[86].mxu0  ;;  %v2772_v29 = vpop.f32.mrb[86].mxu1 }
 0x1c5   : > { %2235 = vst.msk [vmem:[%s3383_s5 + $0xa0] sm:$0xf] %vm2194_vm3, %v2643_v55  ;;  %2245 = vst.msk [vmem:[%s3383_s5 + $0xc8] sm:$0xf] %vm2194_vm3, %v2653_v10  ;;  %v2644_v6 = vpack.c.bf16 %v1915_v53, %v1915_v53  ;;  %v1781_v19 = vmul.f32 %v3360_v1, %v1646_v35  ;;  %v1686_v37 = vadd.f32 %v1685_v27, %v3309_v12  ;;  %v1361_v5 = vpop.f32.mrb[87].mxu0  ;;  %v1688_v11 = vpop.f32.mrb[87].mxu1 }
 0x1c6   : > { %v1649_v14 = vadd.f32 %v3558_v57, %v1359_v39  ;;  %2243 = vst.msk [vmem:[%s3383_s5 + $0xc0] sm:$0xf] %vm2194_vm3, %v2651_v54  ;;  %v2654_v20 = vpack.c.bf16 %v1925_v62, %v1925_v62  ;;  %v2652_v17 = vpack.c.bf16 %v1923_v2, %v1923_v2  ;;  %v1793_v18 = vmul.f32 %v3360_v1, %v1694_v15 }
 0x1c7   : > { %v1697_v42 = vadd.f32 %v2772_v29, %v3321_v24  ;;  %2236 = vst.msk [vmem:[%s3383_s5 + $0xa4] sm:$0xf] %vm2194_vm3, %v2644_v6  ;;  %v1852_v21 = vadd.f32 %v3365_v9, %v1781_v19  ;;  %v1791_v23 = vmul.f32 %v3360_v1, %v1686_v37  ;;  %v1689_v57 = vadd.f32 %v1688_v11, %v3313_v16 }
 0x1c8   : > { %v1782_v12 = vmul.f32 %v3360_v1, %v1649_v14  ;;  %2246 = vst.msk [vmem:[%s3383_s5 + $0xcc] sm:$0xf] %vm2194_vm3, %v2654_v20  ;;  %2244 = vst.msk [vmem:[%s3383_s5 + $0xc4] sm:$0xf] %vm2194_vm3, %v2652_v17  ;;  %v1864_v22 = vadd.f32 %v3365_v9, %v1793_v18 }
 0x1c9   : > { %v1794_v61 = vmul.f32 %v3360_v1, %v1697_v42  ;;  %v1916_v3 = vmax.f32 %v1852_v21, 0.0  ;;  %v1862_v24 = vadd.f32 %v3365_v9, %v1791_v23  ;;  %v1792_v59 = vmul.f32 %v3360_v1, %v1689_v57 }
 0x1ca   : > { %v1853_v26 = vadd.f32 %v3365_v9, %v1782_v12  ;;  %v1928_v25 = vmax.f32 %v1864_v22, 0.0  ;;  %v1364_v16 = vpop.f32.mrb[88].mxu0  ;;  %v2775_v30 = vpop.f32.mrb[88].mxu1 }
 0x1cb   : > { %v1865_v4 = vadd.f32 %v3365_v9, %v1794_v61  ;;  %v2645_v60 = vpack.c.bf16 %v1916_v3, %v1916_v3  ;;  %v1926_v33 = vmax.f32 %v1862_v24, 0.0  ;;  %v1863_v13 = vadd.f32 %v3365_v9, %v1792_v59  ;;  %v1366_v63 = vpop.f32.mrb[89].mxu0  ;;  %v1701_v51 = vpop.f32.mrb[89].mxu1 }
 0x1cc   : > { %v1917_v34 = vmax.f32 %v1853_v26, 0.0  ;;  %v2657_v7 = vpack.c.bf16 %v1928_v25, %v1928_v25  ;;  %v1654_v8 = vadd.f32 %v3570_v49, %v1364_v16  ;;  %v1710_v38 = vadd.f32 %v2775_v30, %v3333_v36  ;;  %v1367_v0 = vpop.f32.mrb[90].mxu0  ;;  %v2776_v41 = vpop.f32.mrb[90].mxu1 }
 0x1cd   : > { %v1929_v47 = vmax.f32 %v1865_v4, 0.0  ;;  %2237 = vst.msk [vmem:[%s3383_s5 + $0xa8] sm:$0xf] %vm2194_vm3, %v2645_v60  ;;  %v2655_v45 = vpack.c.bf16 %v1926_v33, %v1926_v33  ;;  %v1927_v55 = vmax.f32 %v1863_v13, 0.0  ;;  %v1702_v10 = vadd.f32 %v1701_v51, %v3325_v28  ;;  %v1369_v53 = vpop.f32.mrb[91].mxu0  ;;  %v1704_v35 = vpop.f32.mrb[91].mxu1 }
 0x1ce   : > { %v2646_v46 = vpack.c.bf16 %v1917_v34, %v1917_v34  ;;  %2249 = vst.msk [vmem:[%s3383_s5 + $0xd8] sm:$0xf] %vm2194_vm3, %v2657_v7  ;;  %v1783_v58 = vmul.f32 %v3360_v1, %v1654_v8  ;;  %v1797_v36 = vmul.f32 %v3360_v1, %v1710_v38  ;;  %v1657_v27 = vadd.f32 %v3577_v31, %v1367_v0 }
 0x1cf   : > { %v2658_v49 = vpack.c.bf16 %v1929_v47, %v1929_v47  ;;  %2247 = vst.msk [vmem:[%s3383_s5 + $0xd0] sm:$0xf] %vm2194_vm3, %v2655_v45  ;;  %v2656_v54 = vpack.c.bf16 %v1927_v55, %v1927_v55  ;;  %v1795_v62 = vmul.f32 %v3360_v1, %v1702_v10  ;;  %v1713_v28 = vadd.f32 %v2776_v41, %v3337_v40 }
 0x1d0   : > { %2238 = vst.msk [vmem:[%s3383_s5 + $0xac] sm:$0xf] %vm2194_vm3, %v2646_v46  ;;  %v1705_v2 = vadd.f32 %v1704_v35, %v3329_v32  ;;  %v1854_v15 = vadd.f32 %v3365_v9, %v1783_v58  ;;  %v1868_v39 = vadd.f32 %v3365_v9, %v1797_v36  ;;  %v1784_v29 = vmul.f32 %v3360_v1, %v1657_v27 }
 0x1d1   : > { %2250 = vst.msk [vmem:[%s3383_s5 + $0xdc] sm:$0xf] %vm2194_vm3, %v2658_v49  ;;  %2248 = vst.msk [vmem:[%s3383_s5 + $0xd4] sm:$0xf] %vm2194_vm3, %v2656_v54  ;;  %v1866_v31 = vadd.f32 %v3365_v9, %v1795_v62  ;;  %v1798_v6 = vmul.f32 %v3360_v1, %v1713_v28 }
 0x1d2   : > { %v1796_v19 = vmul.f32 %v3360_v1, %v1705_v2  ;;  %v1918_v37 = vmax.f32 %v1854_v15, 0.0  ;;  %v1932_v40 = vmax.f32 %v1868_v39, 0.0  ;;  %v1855_v32 = vadd.f32 %v3365_v9, %v1784_v29  ;;  %v1372_v14 = vpop.f32.mrb[92].mxu0  ;;  %v2779_v5 = vpop.f32.mrb[92].mxu1 }
 0x1d3   : > { %v1930_v11 = vmax.f32 %v1866_v31, 0.0  ;;  %v1869_v20 = vadd.f32 %v3365_v9, %v1798_v6  ;;  %v1662_v18 = vadd.f32 %v3568_v43, %v1372_v14  ;;  %v1374_v42 = vpop.f32.mrb[93].mxu0  ;;  %v1717_v21 = vpop.f32.mrb[93].mxu1  ;;  %v1726_v22 = vadd.f32 %v2779_v5, %v3349_v52 }
 0x1d4   : > { %v1867_v17 = vadd.f32 %v3365_v9, %v1796_v19  ;;  %v2647_v23 = vpack.c.bf16 %v1918_v37, %v1918_v37  ;;  %v2661_v12 = vpack.c.bf16 %v1932_v40, %v1932_v40  ;;  %v1919_v57 = vmax.f32 %v1855_v32, 0.0  ;;  %v1375_v61 = vpop.f32.mrb[94].mxu0  ;;  %v2780_v3 = vpop.f32.mrb[94].mxu1 }
 0x1d5   : > { %v2659_v24 = vpack.c.bf16 %v1930_v11, %v1930_v11  ;;  %v1933_v26 = vmax.f32 %v1869_v20, 0.0  ;;  %v1785_v25 = vmul.f32 %v3360_v1, %v1662_v18  ;;  %v1377_v4 = vpop.f32.mrb[95].mxu0  ;;  %v1720_v16 = vpop.f32.mrb[95].mxu1  ;;  %v1801_v30 = vmul.f32 %v3360_v1, %v1726_v22 }
 0x1d6   : > { %v1931_v59 = vmax.f32 %v1867_v17, 0.0  ;;  %2239 = vst.msk [vmem:[%s3383_s5 + $0xb0] sm:$0xf] %vm2194_vm3, %v2647_v23  ;;  %2253 = vst.msk [vmem:[%s3383_s5 + $0xe8] sm:$0xf] %vm2194_vm3, %v2661_v12  ;;  %v2648_v43 = vpack.c.bf16 %v1919_v57, %v1919_v57  ;;  %v1718_v52 = vadd.f32 %v1717_v21, %v3341_v44  ;;  %v1665_v60 = vadd.f32 %v3572_v50, %v1375_v61 }
 0x1d7   : > { %2251 = vst.msk [vmem:[%s3383_s5 + $0xe0] sm:$0xf] %vm2194_vm3, %v2659_v24  ;;  %v2662_v33 = vpack.c.bf16 %v1933_v26, %v1933_v26  ;;  %v1856_v13 = vadd.f32 %v3365_v9, %v1785_v25  ;;  %v1729_v63 = vadd.f32 %v2780_v3, %v3353_v56  ;;  %v1872_v51 = vadd.f32 %v3365_v9, %v1801_v30 }
 0x1d8   : > { %v2660_v34 = vpack.c.bf16 %v1931_v59, %v1931_v59  ;;  %2240 = vst.msk [vmem:[%s3383_s5 + $0xb4] sm:$0xf] %vm2194_vm3, %v2648_v43  ;;  %v1799_v7 = vmul.f32 %v3360_v1, %v1718_v52  ;;  %v1786_v47 = vmul.f32 %v3360_v1, %v1665_v60  ;;  %v1721_v44 = vadd.f32 %v1720_v16, %v3345_v48 }
 0x1d9   : > { %2254 = vst.msk [vmem:[%s3383_s5 + $0xec] sm:$0xf] %vm2194_vm3, %v2662_v33  ;;  %v1920_v50 = vmax.f32 %v1856_v13, 0.0  ;;  %v1802_v8 = vmul.f32 %v3360_v1, %v1729_v63  ;;  %v1936_v56 = vmax.f32 %v1872_v51, 0.0 }
 0x1da   : > { %2252 = vst.msk [vmem:[%s3383_s5 + $0xe4] sm:$0xf] %vm2194_vm3, %v2660_v34  ;;  %v1870_v38 = vadd.f32 %v3365_v9, %v1799_v7  ;;  %v1857_v0 = vadd.f32 %v3365_v9, %v1786_v47  ;;  %v1800_v41 = vmul.f32 %v3360_v1, %v1721_v44 }
 0x1db   : > { %v2649_v45 = vpack.c.bf16 %v1920_v50, %v1920_v50  ;;  %v1873_v48 = vadd.f32 %v3365_v9, %v1802_v8  ;;  %v2665_v46 = vpack.c.bf16 %v1936_v56, %v1936_v56 }
 0x1dc   : > { %v1934_v55 = vmax.f32 %v1870_v38, 0.0  ;;  %v1921_v10 = vmax.f32 %v1857_v0, 0.0  ;;  %v1871_v53 = vadd.f32 %v3365_v9, %v1800_v41 }
 0x1dd   : > { %2241 = vst.msk [vmem:[%s3383_s5 + $0xb8] sm:$0xf] %vm2194_vm3, %v2649_v45  ;;  %v1937_v35 = vmax.f32 %v1873_v48, 0.0  ;;  %2257 = vst.msk [vmem:[%s3383_s5 + $0xf8] sm:$0xf] %vm2194_vm3, %v2665_v46 }
 0x1de   : > { %v2663_v49 = vpack.c.bf16 %v1934_v55, %v1934_v55  ;;  %v2650_v58 = vpack.c.bf16 %v1921_v10, %v1921_v10  ;;  %v1935_v36 = vmax.f32 %v1871_v53, 0.0 }
 0x1df   : > { %v2666_v27 = vpack.c.bf16 %v1937_v35, %v1937_v35 }
 0x1e0   : > { %2255 = vst.msk [vmem:[%s3383_s5 + $0xf0] sm:$0xf] %vm2194_vm3, %v2663_v49  ;;  %2242 = vst.msk [vmem:[%s3383_s5 + $0xbc] sm:$0xf] %vm2194_vm3, %v2650_v58  ;;  %v2664_v1 = vpack.c.bf16 %v1935_v36, %v1935_v36 }
 0x1e1   : > { %2258 = vst.msk [vmem:[%s3383_s5 + $0xfc] sm:$0xf] %vm2194_vm3, %v2666_v27 }
 0x1e2   : > { %2256 = vst.msk [vmem:[%s3383_s5 + $0xf4] sm:$0xf] %vm2194_vm3, %v2664_v1 }
 0x1e3 PF: > { %s14_s17 = sadd.s32 1, %s3012_s17   ;;  %s3720_s15 = smov %s3008_s16 }
 0x1e4   : > { %p11_p5 = scmp.ge.s32.totalorder %s14_s17, 4   ;;  %s3721_s16 = smov %s3723_s18 }
 0x1e6   :  { %13 = sbr.rel (!%p11_p5) target bundleno = 2 (0x2), region = 75 }

// kernel: rasternet_forward.12
= control target key start
LH: loop header
LB: loop body
LE: loop exit
PB: predicated region body
PF: predicated region fallthrough
CT: control target
= control target key end

     0   :  { %s2835_s15 = smov 0   ;;  %s2837_s16 = smov 0   ;;  %s3338_s0 = inlined_call_operand.vmem [shape: bf16[128,1728], index: 0, kind: input, shape index: {}]   ;;  %s3339_s1 = inlined_call_operand.vmem [shape: bf16[1728,64], index: 1, kind: input, shape index: {}]   ;;  %s3340_s2 = inlined_call_operand.vmem [shape: f32[1,64], index: 2, kind: input, shape index: {}]   ;;  %s3341_s3 = inlined_call_operand.vmem [shape: f32[1,64], index: 3, kind: input, shape index: {}]   ;;  %s3342_s4 = inlined_call_operand.vmem [shape: bf16[128,64], index: 4, kind: output, shape index: {}]  }
   0x1   :  { %s2839_s17 = smov 0  }
   0x2 LB: > { %s26_s18 = sadd.s32 1, %s2803_s16  ;;  %p2134_p0 = scmp.ge.s32.totalorder %s2807_s17, 1  ;;  %s2807_s17 = sphi %s2839_s17, %s14_s17   ;;  %s2803_s16 = sphi %s2837_s16, %s3344_s16   ;;  %s2799_s15 = sphi %s2835_s15, %s3343_s15  }
   0x3   : > { %p28_p1 = scmp.ge.s32.totalorder %s26_s18, 2  ;;  %p203_p2 = scmp.lt.s32.totalorder %s2807_s17, 3 }
   0x5   : > { %s3346_s18 = smov (%p28_p1, %s26_s18), 0  ;;  %p204_p3 = pnand %p2134_p0, %p203_p2 }
   0x6   : > { %v2593_v0 = vld [vmem:[%s3339_s1 + $0x40] sm:$0xff] (!%p204_p3)   ;;  %v2595_v2 = vld [vmem:[%s3339_s1 + $0x48] sm:$0xff] (!%p204_p3)   ;;  %v2597_v4 = vld [vmem:[%s3339_s1 + $0x50] sm:$0xff] (!%p204_p3)   ;;  %s2135_s29 = sshll.u32 (!%p204_p3), %s2799_s15, 3  ;;  %vm1466_vm0 = vcmask (!%p204_p3), 523264   ;;  %vm2004_vm1 = vcmask (!%p204_p3), 519168  }
   0x7   : > { %207 = sbr.rel (%p204_p3) target bundleno = 389 (0x185), region = 36  ;;  %v2594_v1 = vld [vmem:[%s3339_s1] sm:$0xff] (!%p204_p3)   ;;  %2327 = vmatprep.subr.bf16.mxu1 (!%p204_p3), %v2593_v0  ;;  %v2596_v3 = vld [vmem:[%s3339_s1 + $0x8] sm:$0xff] (!%p204_p3)   ;;  %v2598_v5 = vld [vmem:[%s3339_s1 + $0x10] sm:$0xff] (!%p204_p3)   ;;  %p244_p4 = scmp.lt.s32.totalorder (!%p204_p3), %s2135_s29, 15 }
   0x8   : > { %2328 = vmatpush3.bf16.msra.mxu1 (!%p204_p3), %v2594_v1  ;;  %v2599_v6 = vld [vmem:[%s3339_s1 + $0x58] sm:$0xff] (!%p204_p3)   ;;  %v2603_v8 = vld [vmem:[%s3339_s1 + $0x140] sm:$0xff] (!%p204_p3)   ;;  %v2607_v12 = vld [vmem:[%s3339_s1 + $0x148] sm:$0xff] (!%p204_p3)  }
   0x9   : > { %2329 = vmatprep.subr.bf16.mxu1 (!%p204_p3), %v2595_v2  ;;  %v2600_v7 = vld [vmem:[%s3339_s1 + $0x18] sm:$0xff] (!%p204_p3)   ;;  %v2601_v9 = vld [vmem:[%s3339_s1 + $0x60] sm:$0xff] (!%p204_p3)   ;;  %2407 = vmatprep.subr.bf16.mxu0 (!%p204_p3), %v2603_v8  ;;  %v2604_v13 = vld [vmem:[%s3339_s1 + $0x68] sm:$0xff] (!%p204_p3)  }
   0xa   : > { %v2605_v10 = vld [vmem:[%s3339_s1 + $0x100] sm:$0xff] (!%p204_p3)   ;;  %v2609_v14 = vld [vmem:[%s3339_s1 + $0x108] sm:$0xff] (!%p204_p3)   ;;  %v2611_v16 = vld [vmem:[%s3339_s1 + $0x150] sm:$0xff] (!%p204_p3)  }
   0xb   : > { %v2602_v11 = vld [vmem:[%s3339_s1 + $0x20] sm:$0xff] (!%p204_p3)   ;;  %2408 = vmatpush3.bf16.msra.mxu0 (!%p204_p3), %v2605_v10  ;;  %v2606_v15 = vld [vmem:[%s3339_s1 + $0x28] sm:$0xff] (!%p204_p3)   ;;  %v2608_v17 = vld [vmem:[%s3339_s1 + $0x70] sm:$0xff] (!%p204_p3)  }
   0xc   : > { %2330 = vmatpush3.bf16.msra.mxu1 (!%p204_p3), %v2596_v3  ;;  %2409 = vmatprep.subr.bf16.mxu0 (!%p204_p3), %v2607_v12  ;;  %v2613_v18 = vld [vmem:[%s3339_s1 + $0x110] sm:$0xff] (!%p204_p3)   ;;  %v2612_v20 = vld [vmem:[%s3339_s1 + $0x78] sm:$0xff] (!%p204_p3)   ;;  %v2619_v25 = vld [vmem:[%s3339_s1 + $0xc0] sm:$0xff] (!%p204_p3)  }
   0xd   : > { %2331 = vmatprep.subr.bf16.mxu1 (!%p204_p3), %v2597_v4  ;;  %v2610_v19 = vld [vmem:[%s3339_s1 + $0x30] sm:$0xff] (!%p204_p3)   ;;  %v2618_v22 = vld [vmem:[%s3339_s1 + $0x158] sm:$0xff] (!%p204_p3)   ;;  %v2622_v27 = vld [vmem:[%s3339_s1 + $0x160] sm:$0xff] (!%p204_p3)  }
   0xe   : > { %s3348_s29 = smov (!%p244_p4, %s2135_s29), 15  ;;  %v2614_v23 = vld [vmem:[%s3339_s1 + $0x38] sm:$0xff]   ;;  %v2621_v28 = vld [vmem:[%s3339_s1 + $0x80] sm:$0xff]   ;;  %v2623_v30 = vld [vmem:[%s3339_s1 + $0xc8] sm:$0xff]  }
   0xf   : > { %s2567_s27 = smul.u32 56, %s3348_s29  ;;  %2410 = vmatpush3.bf16.msra.mxu0 %v2609_v14  ;;  %v2620_v24 = vld [vmem:[%s3339_s1 + $0x118] sm:$0xff]   ;;  %v2624_v29 = vld [vmem:[%s3339_s1 + $0x120] sm:$0xff]   ;;  %v2628_v32 = vld [vmem:[%s3339_s1 + $0x168] sm:$0xff]   ;;  %s2138_s5 = sshll.u32 %s3348_s29, 2 }
  0x10   : > { %2332 = vmatpush3.bf16.msra.mxu1 %v2598_v5  ;;  %2411 = vmatprep.subr.bf16.mxu0 %v2611_v16  ;;  %v2625_v33 = vld [vmem:[%s3339_s1 + $0x88] sm:$0xff]   ;;  %v2630_v36 = vld [vmem:[%s3339_s1 + $0xd0] sm:$0xff]   ;;  %v2634_v40 = vld [vmem:[%s3339_s1 + $0xd8] sm:$0xff]   ;;  %s3294_s29 = scalar_lea.vmem %s3342_s4, %s2138_s5 }
  0x11   : > { %2333 = vmatprep.subr.bf16.mxu1 %v2599_v6  ;;  %s2919_s13 = scalar_lea.vmem %s3338_s0, %s2567_s27  ;;  %v2631_v34 = vld [vmem:[%s3339_s1 + $0x128] sm:$0xff]   ;;  %v2633_v37 = vld [vmem:[%s3339_s1 + $0x170] sm:$0xff]   ;;  %v2636_v42 = vld [vmem:[%s3339_s1 + $0x98] sm:$0xff]  }
  0x12   : > { %v2617_v21 = vld [vmem:[%s2919_s13 + $0x4] ss:$56 sps:$4 sm:$0xff]   ;;  %v2615_v26 = vld [vmem:[%s2919_s13] ss:$56 sps:$4 sm:$0xff]   ;;  %v2626_v31 = vld [vmem:[%s2919_s13 + $0x74] ss:$56 sps:$4 sm:$0xff]  }
  0x13   : > { %2412 = vmatpush3.bf16.msra.mxu0 %v2613_v18  ;;  %1511 = vmatprep.mubr.bf16.mxu1 %v2617_v21  ;;  %v2629_v35 = vld [vmem:[%s2919_s13 + $0x70] ss:$56 sps:$4 sm:$0xff]   ;;  %v2637_v41 = vld [vmem:[%s2919_s13 + $0xe4] ss:$56 sps:$4 sm:$0xff]   ;;  %v2640_v45 = vld [vmem:[%s2919_s13 + $0xe0] ss:$56 sps:$4 sm:$0xff]  }
  0x14   : > { %2334 = vmatpush3.bf16.msra.mxu1 %v2600_v7  ;;  %2413 = vmatprep.subr.bf16.mxu0 %v2618_v22  ;;  %v2632_v38 = vld [vmem:[%s3339_s1 + $0x90] sm:$0xff]   ;;  %v2639_v43 = vld [vmem:[%s3339_s1 + $0x178] sm:$0xff]   ;;  %v2641_v44 = vld [vmem:[%s3339_s1 + $0xe0] sm:$0xff]  }
  0x15   : > { %2335 = vmatprep.subr.bf16.mxu1 %v2601_v9  ;;  %v2635_v39 = vld [vmem:[%s3339_s1 + $0x130] sm:$0xff]   ;;  %v2642_v46 = vld [vmem:[%s3339_s1 + $0x138] sm:$0xff]   ;;  %v2643_v47 = vld [vmem:[%s3339_s1 + $0xa0] sm:$0xff]  }
  0x16   : > { %v2644_v48 = vld [vmem:[%s2919_s13 + $0x10] ss:$56 sps:$4 sm:$0xff]   ;;  %v2646_v49 = vld [vmem:[%s2919_s13 + $0x14] ss:$56 sps:$4 sm:$0xff]   ;;  %v2647_v50 = vld [vmem:[%s3339_s1 + $0x240] sm:$0xff]  }
  0x17   : > { %2414 = vmatpush3.bf16.msra.mxu0 %v2620_v24  ;;  %1641 = vmatprep.mubr.bf16.mxu0 %v2646_v49  ;;  %v2648_v51 = vld [vmem:[%s3339_s1 + $0xe8] sm:$0xff]   ;;  %v2649_v52 = vld [vmem:[%s3339_s1 + $0x200] sm:$0xff]   ;;  %v2655_v57 = vld [vmem:[%s3339_s1 + $0xf0] sm:$0xff]  }
  0x18   : > { %2336 = vmatpush3.bf16.msra.mxu1 %v2602_v11  ;;  %2415 = vmatprep.subr.bf16.mxu0 %v2622_v27  ;;  %v2650_v53 = vld [vmem:[%s3339_s1 + $0xa8] sm:$0xff]   ;;  %v2657_v59 = vld [vmem:[%s3339_s1 + $0xb0] sm:$0xff]   ;;  %v2658_v60 = vld [vmem:[%s2919_s13 + $0x84] ss:$56 sps:$4 sm:$0xff]  }
  0x19   : > { %2337 = vmatprep.subr.bf16.mxu1 %v2604_v13  ;;  %v2651_v54 = vld [vmem:[%s2919_s13 + $0x154] ss:$56 sps:$4 sm:$0xff]   ;;  %v2654_v56 = vld [vmem:[%s2919_s13 + $0x150] ss:$56 sps:$4 sm:$0xff]   ;;  %v2661_v62 = vld [vmem:[%s3339_s1 + $0xf8] sm:$0xff]  }
  0x1a   : > { %v2653_v55 = vld [vmem:[%s3339_s1 + $0x248] sm:$0xff]   ;;  %v2660_v61 = vld [vmem:[%s3339_s1 + $0x250] sm:$0xff]   ;;  %v2662_v63 = vld [vmem:[%s2919_s13 + $0x80] ss:$56 sps:$4 sm:$0xff]  }
  0x1b   : > { %2416 = vmatpush3.bf16.msra.mxu0 %v2624_v29  ;;  %v2656_v58 = vld [vmem:[%s3339_s1 + $0x208] sm:$0xff]   ;;  %v2663_v0 = vld [vmem:[%s3339_s1 + $0x210] sm:$0xff]   ;;  %v2664_v1 = vld [vmem:[%s3339_s1 + $0xb8] sm:$0xff]  }
  0x1c   : > { %2338 = vmatpush3.bf16.msra.mxu1 %v2606_v15  ;;  %2417 = vmatprep.subr.bf16.mxu0 %v2628_v32  ;;  %v2665_v2 = vld [vmem:[%s2919_s13 + $0x8] ss:$56 sps:$4 sm:$0xff]   ;;  %v2667_v3 = vld [vmem:[%s2919_s13 + $0xc] ss:$56 sps:$4 sm:$0xff]   ;;  %v2668_v4 = vld [vmem:[%s3339_s1 + $0x258] sm:$0xff]  }
  0x1d   : > { %2339 = vmatprep.subr.bf16.mxu1 %v2608_v17  ;;  %v2669_v5 = vld [vmem:[%s3339_s1 + $0x1c0] sm:$0xff]   ;;  %v2670_v6 = vld [vmem:[%s3339_s1 + $0x218] sm:$0xff]   ;;  %v2672_v8 = vld [vmem:[%s2919_s13 + $0xf4] ss:$56 sps:$4 sm:$0xff]  }
  0x1e   : > { %v2671_v7 = vld [vmem:[%s3339_s1 + $0x180] sm:$0xff]   ;;  %v2675_v10 = vld [vmem:[%s2919_s13 + $0xf0] ss:$56 sps:$4 sm:$0xff]   ;;  %v2679_v14 = vld [vmem:[%s2919_s13 + $0x7c] ss:$56 sps:$4 sm:$0xff]  }
  0x1f   : > { %2418 = vmatpush3.bf16.msra.mxu0 %v2631_v34  ;;  %v2674_v9 = vld [vmem:[%s3339_s1 + $0x260] sm:$0xff]   ;;  %v2676_v11 = vld [vmem:[%s3339_s1 + $0x1c8] sm:$0xff]   ;;  %v2682_v16 = vld [vmem:[%s2919_s13 + $0x78] ss:$56 sps:$4 sm:$0xff]   ;;  %v2809_v34 = vmov 0  }
  0x20   : > { %2340 = vmatpush3.bf16.msra.mxu1 %v2610_v19  ;;  %2419 = vmatprep.subr.bf16.mxu0 %v2633_v37  ;;  %v2677_v12 = vld [vmem:[%s3339_s1 + $0x220] sm:$0xff]   ;;  %v2678_v13 = vld [vmem:[%s3339_s1 + $0x188] sm:$0xff]   ;;  %v2683_v17 = vld [vmem:[%s3339_s1 + $0x1d0] sm:$0xff]  }
  0x21   : > { %2341 = vmatprep.subr.bf16.mxu1 %v2612_v20  ;;  %v2681_v15 = vld [vmem:[%s3339_s1 + $0x268] sm:$0xff]   ;;  %v2685_v19 = vld [vmem:[%s3339_s1 + $0x190] sm:$0xff]   ;;  %v2686_v20 = vld [vmem:[%s2919_s13 + $0x164] ss:$56 sps:$4 sm:$0xff]  }
  0x22   : > { %v2684_v18 = vld [vmem:[%s3339_s1 + $0x228] sm:$0xff]   ;;  %v2688_v21 = vld [vmem:[%s3339_s1 + $0x270] sm:$0xff]   ;;  %v2689_v22 = vld [vmem:[%s2919_s13 + $0x160] ss:$56 sps:$4 sm:$0xff]  }
  0x23   : > { %2420 = vmatpush3.bf16.msra.mxu0 %v2635_v39  ;;  %v2691_v24 = vld [vmem:[%s3339_s1 + $0x230] sm:$0xff]   ;;  %v2695_v27 = vld [vmem:[%s3339_s1 + $0x278] sm:$0xff]   ;;  %v2697_v29 = vld [vmem:[%s3339_s1 + $0x1e0] sm:$0xff]  }
  0x24   : > { %2342 = vmatpush3.bf16.msra.mxu1 %v2614_v23  ;;  %2421 = vmatprep.subr.bf16.mxu0 %v2639_v43  ;;  %v2690_v23 = vld [vmem:[%s3339_s1 + $0x1d8] sm:$0xff]   ;;  %v2705_v37 = vld [vmem:[%s3339_s1 + $0x1a8] sm:$0xff]  }
  0x25   : > { %2367 = vmatprep.subr.bf16.mxu1 %v2619_v25  ;;  %v2692_v25 = vld [vmem:[%s3339_s1 + $0x198] sm:$0xff]  }
  0x26   : > { %v2700_v32 = vld [vmem:[%s2919_s13 + $0x20] ss:$56 sps:$4 sm:$0xff]  }
  0x27   : > { %1512 = vmatmul.mubr.bf16.vlgmr.msra.gmra.mrb[0].mxu1 %v2615_v26  ;;  %2422 = vmatpush3.bf16.msra.mxu0 %v2642_v46  ;;  %v2693_v26 = vld [vmem:[%s2919_s13 + $0xec] ss:$56 sps:$4 sm:$0xff]   ;;  %v2708_v39 = vld [vmem:[%s2919_s13 + $0x158] ss:$56 sps:$4 sm:$0xff]  }
  0x28   : > { %2368 = vmatpush3.bf16.msra.mxu1 %v2621_v28  ;;  %1519 = vmatprep.mubr.bf16.mxu1 %v2626_v31  ;;  %v2696_v28 = vld [vmem:[%s2919_s13 + $0xe8] ss:$56 sps:$4 sm:$0xff]   ;;  %v2712_v43 = vld [vmem:[%s3339_s1 + $0x1f8] sm:$0xff]  }
  0x29   : > { %2369 = vmatprep.subr.bf16.mxu1 %v2623_v30  ;;  %2487 = vmatprep.subr.bf16.mxu0 %v2647_v50  ;;  %v2698_v30 = vld [vmem:[%s3339_s1 + $0x238] sm:$0xff]   ;;  %v2699_v31 = vld [vmem:[%s3339_s1 + $0x1a0] sm:$0xff]  }
  0x2a   : > { %1642 = vmatmul.mubr.bf16.vlgmr.msra.gmra.mrb[0].mxu0 %v2644_v48  ;;  %v2715_v46 = vld [vmem:[%s2919_s13 + $0x18] ss:$56 sps:$4 sm:$0xff]   ;;  %v2718_v48 = vld [vmem:[%s3339_s1 + $0x2c0] sm:$0xff]  }
  0x2b   : > { %2488 = vmatpush3.bf16.msra.mxu0 %v2649_v52  ;;  %1649 = vmatprep.mubr.bf16.mxu0 %v2658_v60  ;;  %v2719_v49 = vld [vmem:[%s3339_s1 + $0x318] sm:$0xff]   ;;  %v2720_v50 = vld [vmem:[%s3339_s1 + $0x280] sm:$0xff]   ;;  %v2732_v60 = vld [vmem:[%s2919_s13 + $0x90] ss:$56 sps:$4 sm:$0xff]  }
  0x2c   : > { %2370 = vmatpush3.bf16.msra.mxu1 %v2625_v33  ;;  %2489 = vmatprep.subr.bf16.mxu0 %v2653_v55  ;;  %v2702_v33 = vld [vmem:[%s2919_s13 + $0x24] ss:$56 sps:$4 sm:$0xff]   ;;  %v2726_v55 = vld [vmem:[%s2919_s13 + $0x88] ss:$56 sps:$4 sm:$0xff]  }
  0x2d   : > { %2371 = vmatprep.subr.bf16.mxu1 %v2630_v36  ;;  %v2704_v36 = vld [vmem:[%s3339_s1 + $0x300] sm:$0xff]  }
  0x2e   : > { %v2722_v52 = vld [vmem:[%s3339_s1 + $0x320] sm:$0xff]  }
  0x2f   : > { %1520 = vmatmul.mubr.bf16.gmra.mrb[4].mxu1 %v2629_v35  ;;  %2490 = vmatpush3.bf16.msra.mxu0 %v2656_v58  ;;  %v2703_v35 = vld [vmem:[%s3339_s1 + $0x1e8] sm:$0xff]  }
  0x30   : > { %2372 = vmatpush3.bf16.msra.mxu1 %v2632_v38  ;;  %1527 = vmatprep.mubr.bf16.mxu1 %v2637_v41  ;;  %v2706_v38 = vld [vmem:[%s2919_s13 + $0x15c] ss:$56 sps:$4 sm:$0xff]   ;;  %v2710_v41 = vld [vmem:[%s3339_s1 + $0x308] sm:$0xff]  }
  0x31   : > { %2373 = vmatprep.subr.bf16.mxu1 %v2634_v40  ;;  %2491 = vmatprep.subr.bf16.mxu0 %v2660_v61  ;;  %v2709_v40 = vld [vmem:[%s3339_s1 + $0x1f0] sm:$0xff]   ;;  %v2733_v61 = vld [vmem:[%s3339_s1 + $0x2d8] sm:$0xff]  }
  0x32   : > { %1650 = vmatmul.mubr.bf16.gmra.mrb[4].mxu0 %v2662_v63  ;;  %v2729_v58 = vld [vmem:[%s2919_s13 + $0x94] ss:$56 sps:$4 sm:$0xff]   ;;  %v2735_v63 = vld [vmem:[%s3339_s1 + $0x298] sm:$0xff]  }
  0x33   : > { %2492 = vmatpush3.bf16.msra.mxu0 %v2663_v0  ;;  %1657 = vmatprep.mubr.bf16.mxu0 %v2672_v8  ;;  %v2736_v0 = vld [vmem:[%s2919_s13 + $0xfc] ss:$56 sps:$4 sm:$0xff]   ;;  %v2746_v8 = vld [vmem:[%s3339_s1 + $0x340] sm:$0xff]  }
  0x34   : > { %2374 = vmatpush3.bf16.msra.mxu1 %v2636_v42  ;;  %2493 = vmatprep.subr.bf16.mxu0 %v2668_v4  ;;  %v2711_v42 = vld [vmem:[%s3339_s1 + $0x1b0] sm:$0xff]   ;;  %v2741_v4 = vld [vmem:[%s2919_s13 + $0x104] ss:$56 sps:$4 sm:$0xff]  }
  0x35   : > { %2375 = vmatprep.subr.bf16.mxu1 %v2641_v44  ;;  %v2713_v44 = vld [vmem:[%s3339_s1 + $0x310] sm:$0xff]  }
  0x37   : > { %1528 = vmatmul.mubr.bf16.gmra.mrb[8].mxu1 %v2640_v45  ;;  %2494 = vmatpush3.bf16.msra.mxu0 %v2670_v6  ;;  %v2714_v45 = vld [vmem:[%s3339_s1 + $0x1b8] sm:$0xff]  }
  0x38   : > { %2376 = vmatpush3.bf16.msra.mxu1 %v2643_v47  ;;  %1535 = vmatprep.mubr.bf16.mxu1 %v2651_v54  ;;  %v2717_v47 = vld [vmem:[%s2919_s13 + $0x1c] ss:$56 sps:$4 sm:$0xff]   ;;  %v2724_v54 = vld [vmem:[%s2919_s13 + $0x8c] ss:$56 sps:$4 sm:$0xff]   ;;  %v2744_v6 = vld [vmem:[%s2919_s13 + $0x100] ss:$56 sps:$4 sm:$0xff]  }
  0x39   : > { %2377 = vmatprep.subr.bf16.mxu1 %v2648_v51  ;;  %2495 = vmatprep.subr.bf16.mxu0 %v2674_v9  ;;  %v2721_v51 = vld [vmem:[%s3339_s1 + $0x2c8] sm:$0xff]  }
  0x3a   : > { %1658 = vmatmul.mubr.bf16.gmra.mrb[8].mxu0 %v2675_v10  ;;  %v2747_v9 = vld [vmem:[%s3339_s1 + $0x2a8] sm:$0xff]  }
  0x3b   : > { %2496 = vmatpush3.bf16.msra.mxu0 %v2677_v12  ;;  %1665 = vmatprep.mubr.bf16.mxu0 %v2686_v20  ;;  %v2748_v10 = vld [vmem:[%s2919_s13 + $0x16c] ss:$56 sps:$4 sm:$0xff]   ;;  %v2751_v12 = vld [vmem:[%s3339_s1 + $0x2f0] sm:$0xff]   ;;  %v2760_v20 = vld [vmem:[%s2919_s13 + $0x28] ss:$56 sps:$4 sm:$0xff]  }
  0x3c   : > { %2378 = vmatpush3.bf16.msra.mxu1 %v2650_v53  ;;  %2497 = vmatprep.subr.bf16.mxu0 %v2681_v15  ;;  %v2723_v53 = vld [vmem:[%s3339_s1 + $0x288] sm:$0xff]   ;;  %v2755_v15 = vld [vmem:[%s3339_s1 + $0x2b0] sm:$0xff]  }
  0x3d   : > { %2379 = vmatprep.subr.bf16.mxu1 %v2655_v57  ;;  %v2728_v57 = vld [vmem:[%s3339_s1 + $0x328] sm:$0xff]  }
  0x3f   : > { %1536 = vmatmul.mubr.bf16.gmra.mrb[12].mxu1 %v2654_v56  ;;  %2498 = vmatpush3.bf16.msra.mxu0 %v2684_v18  ;;  %v2727_v56 = vld [vmem:[%s3339_s1 + $0x2d0] sm:$0xff]  }
  0x40   : > { %2380 = vmatpush3.bf16.msra.mxu1 %v2657_v59  ;;  %1576 = vmatprep.mubr.bf16.mxu1 %v2667_v3  ;;  %v2731_v59 = vld [vmem:[%s3339_s1 + $0x290] sm:$0xff]   ;;  %v2740_v3 = vld [vmem:[%s3339_s1 + $0x338] sm:$0xff]  }
  0x41   : > { %2381 = vmatprep.subr.bf16.mxu1 %v2661_v62  ;;  %2499 = vmatprep.subr.bf16.mxu0 %v2688_v21  ;;  %v2734_v62 = vld [vmem:[%s3339_s1 + $0x330] sm:$0xff]   ;;  %v2762_v21 = vld [vmem:[%s2919_s13 + $0x2c] ss:$56 sps:$4 sm:$0xff]  }
  0x42   : > { %1666 = vmatmul.mubr.bf16.gmra.mrb[12].mxu0 %v2689_v22  ;;  %v2758_v18 = vld [vmem:[%s3339_s1 + $0x350] sm:$0xff]   ;;  %v2763_v22 = vld [vmem:[%s3339_s1 + $0x358] sm:$0xff]  }
  0x43   : > { %2500 = vmatpush3.bf16.msra.mxu0 %v2691_v24  ;;  %1771 = vmatprep.mubr.bf16.mxu0 %v2702_v33  ;;  %v2766_v24 = vld [vmem:[%s2919_s13 + $0x34] ss:$56 sps:$4 sm:$0xff]   ;;  %v2778_v33 = vld [vmem:[%s2919_s13 + $0x110] ss:$56 sps:$4 sm:$0xff]  }
  0x44   : > { %2382 = vmatpush3.bf16.msra.mxu1 %v2664_v1  ;;  %2501 = vmatprep.subr.bf16.mxu0 %v2695_v27  ;;  %v2738_v1 = vld [vmem:[%s2919_s13 + $0xf8] ss:$56 sps:$4 sm:$0xff]  }
  0x45   : > { %2447 = vmatprep.subr.bf16.mxu1 %v2669_v5  ;;  %v2743_v5 = vld [vmem:[%s3339_s1 + $0x2a0] sm:$0xff]   ;;  %v2769_v27 = vld [vmem:[%s2919_s13 + $0x98] ss:$56 sps:$4 sm:$0xff]  }
  0x47   : > { %1577 = vmatmul.mubr.bf16.vlgmr.msra.gmra.mrb[16].mxu1 %v2665_v2  ;;  %2502 = vmatpush3.bf16.msra.mxu0 %v2698_v30  ;;  %v2739_v2 = vld [vmem:[%s3339_s1 + $0x2e0] sm:$0xff]   ;;  %v2776_v30 = vld [vmem:[%s2919_s13 + $0x114] ss:$56 sps:$4 sm:$0xff]  }
  0x48   : > { %2448 = vmatpush3.bf16.msra.mxu1 %v2671_v7  ;;  %1584 = vmatprep.mubr.bf16.mxu1 %v2679_v14  ;;  %v2745_v7 = vld [vmem:[%s3339_s1 + $0x2e8] sm:$0xff]  }
  0x49   : > { %2449 = vmatprep.subr.bf16.mxu1 %v2676_v11  ;;  %1869 = vmatprep.subr.bf16.mxu0 %v2809_v34  ;;  %v2750_v11 = vld [vmem:[%s2919_s13 + $0x168] ss:$56 sps:$4 sm:$0xff]   ;;  %v2753_v14 = vld [vmem:[%s2919_s13 + $0x174] ss:$56 sps:$4 sm:$0xff]  }
  0x4a   : > { %1772 = vmatmul.mubr.bf16.vlgmr.msra.gmra.mrb[16].mxu0 %v2700_v32  ;;  %v2779_v32 = vld [vmem:[%s2919_s13 + $0x17c] ss:$56 sps:$4 sm:$0xff]  }
  0x4b   : > { %1870 = vmatpush1.bf16.msra.mxu0 %v2704_v36  ;;  %1779 = vmatprep.mubr.bf16.mxu0 %v2729_v58  ;;  %v2784_v36 = vld [vmem:[%s2919_s13 + $0x180] ss:$56 sps:$4 sm:$0xff]  }
  0x4c   : > { %2450 = vmatpush3.bf16.msra.mxu1 %v2678_v13  ;;  %1871 = vmatprep.subr.bf16.mxu0 %v2809_v34  ;;  %v2752_v13 = vld [vmem:[%s3339_s1 + $0x348] sm:$0xff]  }
  0x4d   : > { %2451 = vmatprep.subr.bf16.mxu1 %v2683_v17  ;;  %v2757_v17 = vld [vmem:[%s3339_s1 + $0x2f8] sm:$0xff]  }
  0x4f   : > { %1585 = vmatmul.mubr.bf16.gmra.mrb[20].mxu1 %v2682_v16  ;;  %1872 = vmatpush1.bf16.msra.mxu0 %v2710_v41  ;;  %v2756_v16 = vld [vmem:[%s2919_s13 + $0x170] ss:$56 sps:$4 sm:$0xff]  }
  0x50   : > { %2452 = vmatpush3.bf16.msra.mxu1 %v2685_v19  ;;  %1592 = vmatprep.mubr.bf16.mxu1 %v2693_v26  ;;  %v2759_v19 = vld [vmem:[%s3339_s1 + $0x2b8] sm:$0xff]  }
  0x51   : > { %2453 = vmatprep.subr.bf16.mxu1 %v2690_v23  ;;  %1873 = vmatprep.subr.bf16.mxu0 %v2809_v34  ;;  %v2764_v23 = vld [vmem:[%s2919_s13 + $0x30] ss:$56 sps:$4 sm:$0xff]   ;;  %v2770_v26 = vld [vmem:[%s2919_s13 + $0xa4] ss:$56 sps:$4 sm:$0xff]  }
  0x52   : > { %1780 = vmatmul.mubr.bf16.gmra.mrb[20].mxu0 %v2732_v60 }
  0x53   : > { %1874 = vmatpush1.bf16.msra.mxu0 %v2713_v44  ;;  %1787 = vmatprep.mubr.bf16.mxu0 %v2741_v4 }
  0x54   : > { %2454 = vmatpush3.bf16.msra.mxu1 %v2692_v25  ;;  %1875 = vmatprep.subr.bf16.mxu0 %v2809_v34  ;;  %v2767_v25 = vld [vmem:[%s2919_s13 + $0x9c] ss:$56 sps:$4 sm:$0xff]  }
  0x55   : > { %2455 = vmatprep.subr.bf16.mxu1 %v2697_v29  ;;  %v2772_v29 = vld [vmem:[%s2919_s13 + $0xa0] ss:$56 sps:$4 sm:$0xff]  }
  0x57   : > { %1593 = vmatmul.mubr.bf16.gmra.mrb[24].mxu1 %v2696_v28  ;;  %1876 = vmatpush1.bf16.msra.mxu0 %v2719_v49  ;;  %v2773_v28 = vld [vmem:[%s2919_s13 + $0x10c] ss:$56 sps:$4 sm:$0xff]  }
  0x58   : > { %2456 = vmatpush3.bf16.msra.mxu1 %v2699_v31  ;;  %1600 = vmatprep.mubr.bf16.mxu1 %v2706_v38  ;;  %v2775_v31 = vld [vmem:[%s2919_s13 + $0x108] ss:$56 sps:$4 sm:$0xff]  }
  0x59   : > { %2457 = vmatprep.subr.bf16.mxu1 %v2703_v35  ;;  %1877 = vmatprep.subr.bf16.mxu0 %v2809_v34  ;;  %v2781_v35 = vld [vmem:[%s2919_s13 + $0x178] ss:$56 sps:$4 sm:$0xff]  }
  0x5a   : > { %1788 = vmatmul.mubr.bf16.gmra.mrb[24].mxu0 %v2744_v6 }
  0x5b   : > { %1878 = vmatpush1.bf16.msra.mxu0 %v2722_v52  ;;  %1795 = vmatprep.mubr.bf16.mxu0 %v2753_v14 }
  0x5c   : > { %2458 = vmatpush3.bf16.msra.mxu1 %v2705_v37  ;;  %1879 = vmatprep.subr.bf16.mxu0 %v2809_v34 }
  0x5d   : > { %2459 = vmatprep.subr.bf16.mxu1 %v2709_v40 }
  0x5f   : > { %1601 = vmatmul.mubr.bf16.gmra.mrb[28].mxu1 %v2708_v39  ;;  %1880 = vmatpush1.bf16.msra.mxu0 %v2728_v57 }
  0x60   : > { %2460 = vmatpush3.bf16.msra.mxu1 %v2711_v42  ;;  %1706 = vmatprep.mubr.bf16.mxu1 %v2717_v47 }
  0x61   : > { %2461 = vmatprep.subr.bf16.mxu1 %v2712_v43  ;;  %1881 = vmatprep.subr.bf16.mxu0 %v2809_v34 }
  0x62   : > { %1796 = vmatmul.mubr.bf16.gmra.mrb[28].mxu0 %v2756_v16 }
  0x63   : > { %1882 = vmatpush1.bf16.msra.mxu0 %v2734_v62  ;;  %2303 = vmatprep.mubr.msk.bf16.mxu0 %vm1466_vm0, %v2766_v24 }
  0x64   : > { %2462 = vmatpush3.bf16.msra.mxu1 %v2714_v45  ;;  %1883 = vmatprep.subr.bf16.mxu0 %v2809_v34 }
  0x65   : > { %2527 = vmatprep.subr.bf16.mxu1 %v2718_v48 }
  0x67   : > { %1707 = vmatmul.mubr.bf16.vlgmr.msra.gmra.mrb[32].mxu1 %v2715_v46  ;;  %1884 = vmatpush1.bf16.msra.mxu0 %v2740_v3 }
  0x68   : > { %2528 = vmatpush3.bf16.msra.mxu1 %v2720_v50  ;;  %1714 = vmatprep.mubr.bf16.mxu1 %v2724_v54 }
  0x69   : > { %2529 = vmatprep.subr.bf16.mxu1 %v2721_v51  ;;  %1885 = vmatprep.subr.bf16.mxu0 %v2809_v34 }
  0x6b   : > { %1886 = vmatpush1.bf16.msra.mxu0 %v2746_v8 }
  0x6c   : > { %2530 = vmatpush3.bf16.msra.mxu1 %v2723_v53  ;;  %1887 = vmatprep.subr.bf16.mxu0 %v2809_v34 }
  0x6d   : > { %2531 = vmatprep.subr.bf16.mxu1 %v2727_v56 }
  0x6f   : > { %1715 = vmatmul.mubr.bf16.gmra.mrb[36].mxu1 %v2726_v55  ;;  %1888 = vmatpush1.bf16.msra.mxu0 %v2752_v13 }
  0x70   : > { %2532 = vmatpush3.bf16.msra.mxu1 %v2731_v59  ;;  %1722 = vmatprep.mubr.bf16.mxu1 %v2736_v0 }
  0x71   : > { %2533 = vmatprep.subr.bf16.mxu1 %v2733_v61  ;;  %1889 = vmatprep.subr.bf16.mxu0 %v2809_v34 }
  0x73   : > { %1890 = vmatpush1.bf16.msra.mxu0 %v2758_v18 }
  0x74   : > { %2534 = vmatpush3.bf16.msra.mxu1 %v2735_v63  ;;  %1891 = vmatprep.subr.bf16.mxu0 %v2809_v34  ;;  %v2782_v34 = vld [vmem:[%s2919_s13 + $0x184] ss:$56 sps:$4 sm:$0xff]  }
  0x75   : > { %2535 = vmatprep.subr.bf16.mxu1 %v2739_v2 }
  0x77   : > { %1723 = vmatmul.mubr.bf16.gmra.mrb[40].mxu1 %v2738_v1  ;;  %1892 = vmatpush1.bf16.msra.mxu0 %v2763_v22 }
  0x78   : > { %2536 = vmatpush3.bf16.msra.mxu1 %v2743_v5  ;;  %1730 = vmatprep.mubr.bf16.mxu1 %v2748_v10 }
  0x79   : > { %2537 = vmatprep.subr.bf16.mxu1 %v2745_v7 }
  0x7a   : > { %1902 = vmatmul.mubr.bf16.vlgmr.msra.gmra.mrb[32].mxu0 %v2764_v23 }
  0x7b   : > { %2304 = vmatprep.mubr.msk.bf16.mxu0 %vm1466_vm0, %v2770_v26 }
  0x7c   : > { %2538 = vmatpush3.bf16.msra.mxu1 %v2747_v9 }
  0x7d   : > { %2539 = vmatprep.subr.bf16.mxu1 %v2751_v12 }
  0x7f   : > { %1731 = vmatmul.mubr.bf16.gmra.mrb[44].mxu1 %v2750_v11 }
  0x80   : > { %2540 = vmatpush3.bf16.msra.mxu1 %v2755_v15  ;;  %1836 = vmatprep.mubr.bf16.mxu1 %v2762_v21 }
  0x81   : > { %2541 = vmatprep.subr.bf16.mxu1 %v2757_v17 }
  0x82   : > { %1910 = vmatmul.mubr.bf16.gmra.mrb[36].mxu0 %v2772_v29 }
  0x83   : > { %2305 = vmatprep.mubr.msk.bf16.mxu0 %vm1466_vm0, %v2776_v30 }
  0x84   : > { %2542 = vmatpush3.bf16.msra.mxu1 %v2759_v19 }
  0x87   : > { %1837 = vmatmul.mubr.bf16.vlgmr.msra.gmra.mrb[48].mxu1 %v2760_v20 }
  0x88   : > { %1844 = vmatprep.mubr.bf16.mxu1 %v2767_v25 }
  0x8a   : > { %1918 = vmatmul.mubr.bf16.gmra.mrb[40].mxu0 %v2778_v33 }
  0x8b   : > { %2306 = vmatprep.mubr.msk.bf16.mxu0 %vm1466_vm0, %v2782_v34 }
  0x8f   : > { %1845 = vmatmul.mubr.bf16.gmra.mrb[52].mxu1 %v2769_v27 }
  0x90   : > { %1852 = vmatprep.mubr.bf16.mxu1 %v2773_v28 }
  0x92   : > { %1926 = vmatmul.mubr.bf16.gmra.mrb[44].mxu0 %v2784_v36 }
  0x97   : > { %1853 = vmatmul.mubr.bf16.gmra.mrb[56].mxu1 %v2775_v31 }
  0x98   : > { %1860 = vmatprep.mubr.bf16.mxu1 %v2779_v32 }
  0x9f   : > { %1861 = vmatmul.mubr.bf16.gmra.mrb[60].mxu1 %v2781_v35 }
  0xfa   : > { %v2343_v37 = vpop.f32.mrb[0].mxu1 }
  0xfb   : > { %v2344_v38 = vpop.f32.mrb[1].mxu1 }
  0xfc   : > { %v2345_v39 = vadd.f32 %v2344_v38, %v2343_v37  ;;  %v2346_v40 = vpop.f32.mrb[2].mxu1 }
  0xfd   : > { %v2347_v41 = vpop.f32.mrb[3].mxu1  ;;  %v2423_v51 = vpop.f32.mrb[0].mxu0 }
  0xfe   : > { %v2348_v42 = vadd.f32 %v2347_v41, %v2346_v40  ;;  %v2424_v54 = vpop.f32.mrb[1].mxu0 }
  0xff   : > { %v2425_v56 = vadd.f32 %v2424_v54, %v2423_v51  ;;  %v2426_v57 = vpop.f32.mrb[2].mxu0 }
 0x100   : > { %v2427_v59 = vpop.f32.mrb[3].mxu0 }
 0x101   : > { %v2428_v60 = vadd.f32 %v2427_v59, %v2426_v57 }
 0x102   : > { %v2349_v43 = vpop.f32.mrb[4].mxu1 }
 0x103   : > { %v2350_v44 = vpop.f32.mrb[5].mxu1 }
 0x104   : > { %v2351_v45 = vadd.f32 %v2350_v44, %v2349_v43  ;;  %v2352_v46 = vpop.f32.mrb[6].mxu1 }
 0x105   : > { %v2353_v47 = vpop.f32.mrb[7].mxu1  ;;  %v2429_v2 = vpop.f32.mrb[4].mxu0 }
 0x106   : > { %v2354_v48 = vadd.f32 %v2353_v47, %v2352_v46  ;;  %v2430_v4 = vpop.f32.mrb[5].mxu0 }
 0x107   : > { %v2431_v5 = vadd.f32 %v2430_v4, %v2429_v2  ;;  %v2432_v6 = vpop.f32.mrb[6].mxu0 }
 0x108   : > { %v2433_v7 = vpop.f32.mrb[7].mxu0 }
 0x109   : > { %v2434_v8 = vadd.f32 %v2433_v7, %v2432_v6 }
 0x10a   : > { %v2355_v49 = vpop.f32.mrb[8].mxu1 }
 0x10b   : > { %v2356_v50 = vpop.f32.mrb[9].mxu1 }
 0x10c   : > { %v2357_v52 = vadd.f32 %v2356_v50, %v2355_v49  ;;  %v2358_v53 = vpop.f32.mrb[10].mxu1 }
 0x10d   : > { %v2359_v55 = vpop.f32.mrb[11].mxu1  ;;  %v2435_v16 = vpop.f32.mrb[8].mxu0 }
 0x10e   : > { %v2360_v58 = vadd.f32 %v2359_v55, %v2358_v53  ;;  %v2436_v18 = vpop.f32.mrb[9].mxu0 }
 0x10f   : > { %v2437_v20 = vadd.f32 %v2436_v18, %v2435_v16  ;;  %v2438_v21 = vpop.f32.mrb[10].mxu0 }
 0x110   : > { %v2439_v22 = vpop.f32.mrb[11].mxu0 }
 0x111   : > { %v2440_v24 = vadd.f32 %v2439_v22, %v2438_v21 }
 0x112   : > { %v2361_v61 = vpop.f32.mrb[12].mxu1 }
 0x113   : > { %v2362_v62 = vpop.f32.mrb[13].mxu1 }
 0x114   : > { %v3260_v63 = vadd.f32 %v2362_v62, %v2361_v61  ;;  %v2364_v0 = vpop.f32.mrb[14].mxu1 }
 0x115   : > { %v2365_v1 = vpop.f32.mrb[15].mxu1  ;;  %v2441_v33 = vpop.f32.mrb[12].mxu0 }
 0x116   : > { %v2366_v3 = vadd.f32 %v2365_v1, %v2364_v0  ;;  %v2442_v35 = vpop.f32.mrb[13].mxu0 }
 0x117   : > { %v2443_v36 = vadd.f32 %v2442_v35, %v2441_v33  ;;  %v2444_v37 = vpop.f32.mrb[14].mxu0 }
 0x11a   : > { %v2383_v9 = vpop.f32.mrb[16].mxu1 }
 0x11b   : > { %v2384_v10 = vpop.f32.mrb[17].mxu1 }
 0x11c   : > { %v2385_v11 = vadd.f32 %v2384_v10, %v2383_v9  ;;  %v2386_v12 = vpop.f32.mrb[18].mxu1 }
 0x11d   : > { %v2387_v13 = vpop.f32.mrb[19].mxu1 }
 0x11e   : > { %v1579_v14 = vadd.f32 %v2385_v11, %v2345_v39  ;;  %v2388_v15 = vadd.f32 %v2387_v13, %v2386_v12  ;;  %v2445_v39 = vpop.f32.mrb[15].mxu0 }
 0x11f   : > { %v2446_v40 = vadd.f32 %v2445_v39, %v2444_v37  ;;  %v2503_v50 = vpop.f32.mrb[16].mxu0 }
 0x120   : > { %v1582_v17 = vadd.f32 %v2388_v15, %v2348_v42  ;;  %v1644_v19 = vadd.f32 %v2425_v56, %v1579_v14 }
 0x122   : > { %v1647_v23 = vadd.f32 %v2428_v60, %v1582_v17  ;;  %v2389_v25 = vpop.f32.mrb[20].mxu1 }
 0x123   : > { %v2390_v26 = vpop.f32.mrb[21].mxu1 }
 0x124   : > { %v2391_v27 = vadd.f32 %v2390_v26, %v2389_v25  ;;  %v2392_v28 = vpop.f32.mrb[22].mxu1 }
 0x125   : > { %v2393_v29 = vpop.f32.mrb[23].mxu1 }
 0x126   : > { %v1587_v30 = vadd.f32 %v2391_v27, %v2351_v45  ;;  %v2394_v31 = vadd.f32 %v2393_v29, %v2392_v28  ;;  %v2504_v45 = vpop.f32.mrb[17].mxu0 }
 0x127   : > { %v2506_v54 = vpop.f32.mrb[18].mxu0 }
 0x128   : > { %v1590_v32 = vadd.f32 %v2394_v31, %v2354_v48  ;;  %v1652_v34 = vadd.f32 %v2431_v5, %v1587_v30  ;;  %v2505_v48 = vadd.f32 %v2504_v45, %v2503_v50  ;;  %v2507_v55 = vpop.f32.mrb[19].mxu0 }
 0x129   : > { %v2508_v57 = vadd.f32 %v2507_v55, %v2506_v54  ;;  %v2509_v17 = vpop.f32.mrb[20].mxu0 }
 0x12a   : > { %v1655_v38 = vadd.f32 %v2434_v8, %v1590_v32  ;;  %v2395_v41 = vpop.f32.mrb[24].mxu1 }
 0x12b   : > { %v2396_v42 = vpop.f32.mrb[25].mxu1 }
 0x12c   : > { %v2397_v43 = vadd.f32 %v2396_v42, %v2395_v41  ;;  %v2398_v44 = vpop.f32.mrb[26].mxu1 }
 0x12d   : > { %v2399_v46 = vpop.f32.mrb[27].mxu1 }
 0x12e   : > { %v1595_v47 = vadd.f32 %v2397_v43, %v2357_v52  ;;  %v2400_v49 = vadd.f32 %v2399_v46, %v2398_v44 }
 0x130   : > { %v1598_v51 = vadd.f32 %v2400_v49, %v2360_v58  ;;  %v1660_v53 = vadd.f32 %v2437_v20, %v1595_v47 }
 0x132   : > { %v1663_v56 = vadd.f32 %v2440_v24, %v1598_v51  ;;  %v2401_v59 = vpop.f32.mrb[28].mxu1 }
 0x133   : > { %v2402_v60 = vpop.f32.mrb[29].mxu1 }
 0x134   : > { %v2403_v61 = vadd.f32 %v2402_v60, %v2401_v59  ;;  %v2404_v62 = vpop.f32.mrb[30].mxu1 }
 0x135   : > { %v2405_v0 = vpop.f32.mrb[31].mxu1 }
 0x136   : > { %v1603_v1 = vadd.f32 %v2403_v61, %v3260_v63  ;;  %v2406_v2 = vadd.f32 %v2405_v0, %v2404_v62  ;;  %v2510_v63 = vpop.f32.mrb[21].mxu0 }
 0x137   : > { %v2512_v22 = vpop.f32.mrb[22].mxu0 }
 0x138   : > { %v1606_v4 = vadd.f32 %v2406_v2, %v2366_v3  ;;  %v1668_v52 = vadd.f32 %v2443_v36, %v1603_v1  ;;  %v2511_v3 = vadd.f32 %v2510_v63, %v2509_v17  ;;  %v2513_v26 = vpop.f32.mrb[23].mxu0 }
 0x139   : > { %v2514_v27 = vadd.f32 %v2513_v26, %v2512_v22  ;;  %v2515_v33 = vpop.f32.mrb[24].mxu0 }
 0x13a   : > { %v1671_v5 = vadd.f32 %v2446_v40, %v1606_v4  ;;  %v2463_v6 = vpop.f32.mrb[32].mxu1  ;;  %v2516_v36 = vpop.f32.mrb[25].mxu0 }
 0x13b   : > { %v2464_v58 = vpop.f32.mrb[33].mxu1  ;;  %v2517_v40 = vadd.f32 %v2516_v36, %v2515_v33  ;;  %v2518_v41 = vpop.f32.mrb[26].mxu0 }
 0x13c   : > { %v2465_v7 = vadd.f32 %v2464_v58, %v2463_v6  ;;  %v2466_v8 = vpop.f32.mrb[34].mxu1 }
 0x13d   : > { %v2467_v9 = vpop.f32.mrb[35].mxu1 }
 0x13e   : > { %v1709_v10 = vadd.f32 %v2465_v7, %v1644_v19  ;;  %v2468_v11 = vadd.f32 %v2467_v9, %v2466_v8 }
 0x140   : > { %v1712_v12 = vadd.f32 %v2468_v11, %v1647_v23  ;;  %v1774_v13 = vadd.f32 %v2505_v48, %v1709_v10 }
 0x142   : > { %v2469_v14 = vpop.f32.mrb[36].mxu1  ;;  %v1777_v15 = vadd.f32 %v2508_v57, %v1712_v12 }
 0x143   : > { %v2470_v16 = vpop.f32.mrb[37].mxu1 }
 0x144   : > { %v2471_v18 = vadd.f32 %v2470_v16, %v2469_v14  ;;  %v2472_v20 = vpop.f32.mrb[38].mxu1  ;;  %v3283_v14 = vld [vmem:[%s3341_s3] ss:$0 sm:$0xff] }
 0x145   : > { %v2473_v21 = vpop.f32.mrb[39].mxu1 }
 0x146   : > { %v1717_v24 = vadd.f32 %v2471_v18, %v1652_v34  ;;  %v2474_v25 = vadd.f32 %v2473_v21, %v2472_v20  ;;  %v2519_v34 = vpop.f32.mrb[27].mxu0 }
 0x147   : > { %v2521_v51 = vpop.f32.mrb[28].mxu0 }
 0x148   : > { %v1720_v28 = vadd.f32 %v2474_v25, %v1655_v38  ;;  %v3263_v29 = vadd.f32 %v2511_v3, %v1717_v24  ;;  %v2520_v38 = vadd.f32 %v2519_v34, %v2518_v41  ;;  %v2522_v48 = vpop.f32.mrb[29].mxu0 }
 0x149   : > { %v2524_v57 = vpop.f32.mrb[30].mxu0 }
 0x14a   : > { %v3265_v19 = vadd.f32 %v2514_v27, %v1720_v28  ;;  %v2475_v23 = vpop.f32.mrb[40].mxu1  ;;  %v2525_v59 = vpop.f32.mrb[31].mxu0 }
 0x14b   : > { %v2476_v30 = vpop.f32.mrb[41].mxu1 }
 0x14c   : > { %v2477_v31 = vadd.f32 %v2476_v30, %v2475_v23  ;;  %v2478_v32 = vpop.f32.mrb[42].mxu1 }
 0x14d   : > { %v2479_v35 = vpop.f32.mrb[43].mxu1  ;;  %v1903_v6 = vpop.f32.mrb[32].mxu0 }
 0x14e   : > { %v1725_v37 = vadd.f32 %v2477_v31, %v1660_v53  ;;  %v2480_v39 = vadd.f32 %v2479_v35, %v2478_v32  ;;  %v2523_v53 = vadd.f32 %v2522_v48, %v2521_v51  ;;  %v1905_v7 = vpop.f32.mrb[33].mxu0 }
 0x14f   : > { %v1906_v9 = vpop.f32.mrb[34].mxu0 }
 0x150   : > { %v1728_v42 = vadd.f32 %v2480_v39, %v1663_v56  ;;  %v3267_v43 = vadd.f32 %v2517_v40, %v1725_v37  ;;  %v2526_v56 = vadd.f32 %v2525_v59, %v2524_v57  ;;  %v1908_v10 = vpop.f32.mrb[35].mxu0 }
 0x152   : > { %v3269_v44 = vadd.f32 %v2520_v38, %v1728_v42  ;;  %v2481_v46 = vpop.f32.mrb[44].mxu1 }
 0x153   : > { %v2482_v47 = vpop.f32.mrb[45].mxu1 }
 0x154   : > { %v2483_v49 = vadd.f32 %v2482_v47, %v2481_v46  ;;  %v2484_v50 = vpop.f32.mrb[46].mxu1 }
 0x155   : > { %v2485_v45 = vpop.f32.mrb[47].mxu1  ;;  %v1911_v22 = vpop.f32.mrb[36].mxu0 }
 0x156   : > { %v1733_v54 = vadd.f32 %v2483_v49, %v1668_v52  ;;  %v2486_v55 = vadd.f32 %v2485_v45, %v2484_v50 }
 0x158   : > { %v1736_v60 = vadd.f32 %v2486_v55, %v1671_v5  ;;  %v3271_v61 = vadd.f32 %v2523_v53, %v1733_v54  ;;  %v3278_v5 = vld [vmem:[%s3340_s2] ss:$0 sm:$0xff] }
 0x15a   : > { %v3273_v62 = vadd.f32 %v2526_v56, %v1736_v60  ;;  %v2543_v0 = vpop.f32.mrb[48].mxu1 }
 0x15b   : > { %v2544_v1 = vpop.f32.mrb[49].mxu1 }
 0x15c   : > { %v2545_v2 = vadd.f32 %v2544_v1, %v2543_v0  ;;  %v2546_v4 = vpop.f32.mrb[50].mxu1 }
 0x15d   : > { %v2547_v58 = vpop.f32.mrb[51].mxu1 }
 0x15e   : > { %v2548_v8 = vadd.f32 %v2547_v58, %v2546_v4  ;;  %v1839_v52 = vadd.f32 %v2545_v2, %v1774_v13 }
 0x160   : > { %v1904_v11 = vadd.f32 %v1903_v6, %v1839_v52  ;;  %v1842_v12 = vadd.f32 %v2548_v8, %v1777_v15  ;;  %v1913_v15 = vpop.f32.mrb[37].mxu0 }
 0x161   : > { %v1914_v23 = vpop.f32.mrb[38].mxu0 }
 0x162   : > { %v1941_v16 = vmul.f32 %v3278_v5, %v1904_v11  ;;  %v1907_v17 = vadd.f32 %v1906_v9, %v1842_v12  ;;  %v2549_v18 = vpop.f32.mrb[52].mxu1  ;;  %v1916_v30 = vpop.f32.mrb[39].mxu0 }
 0x163   : > { %v2550_v20 = vpop.f32.mrb[53].mxu1  ;;  %v1919_v46 = vpop.f32.mrb[40].mxu0 }
 0x164   : > { %v1956_v13 = vadd.f32 %v3283_v14, %v1941_v16  ;;  %v1942_v63 = vmul.f32 %v3278_v5, %v1907_v17  ;;  %v2551_v21 = vadd.f32 %v2550_v20, %v2549_v18  ;;  %v2552_v3 = vpop.f32.mrb[54].mxu1 }
 0x165   : > { %v2553_v24 = vpop.f32.mrb[55].mxu1 }
 0x166   : > { %v1964_v25 = vmax.f32 %v1956_v13, 0.0  ;;  %v1957_v26 = vadd.f32 %v3283_v14, %v1942_v63  ;;  %v2554_v27 = vadd.f32 %v2553_v24, %v2552_v3  ;;  %v1847_v28 = vadd.f32 %v2551_v21, %v3263_v29 }
 0x168   : > { %v2319_v31 = vpack.c.bf16 %v1964_v25, %v1964_v25  ;;  %v1965_v32 = vmax.f32 %v1957_v26, 0.0  ;;  %v1912_v33 = vadd.f32 %v1911_v22, %v1847_v28  ;;  %v1850_v35 = vadd.f32 %v2554_v27, %v3265_v19  ;;  %v1921_v19 = vpop.f32.mrb[41].mxu0 }
 0x169   : > { %v1922_v48 = vpop.f32.mrb[42].mxu0 }
 0x16a   : > { %2005 = vst.msk [vmem:[%s3294_s29] sm:$0xf] %vm2004_vm1, %v2319_v31  ;;  %v2320_v36 = vpack.c.bf16 %v1965_v32, %v1965_v32  ;;  %v1943_v29 = vmul.f32 %v3278_v5, %v1912_v33  ;;  %v1915_v37 = vadd.f32 %v1914_v23, %v1850_v35  ;;  %v2555_v39 = vpop.f32.mrb[56].mxu1  ;;  %v1924_v54 = vpop.f32.mrb[43].mxu0 }
 0x16b   : > { %v2556_v40 = vpop.f32.mrb[57].mxu1  ;;  %v1927_v7 = vpop.f32.mrb[44].mxu0 }
 0x16c   : > { %2006 = vst.msk [vmem:[%s3294_s29 + $0x4] sm:$0xf] %vm2004_vm1, %v2320_v36  ;;  %v1958_v41 = vadd.f32 %v3283_v14, %v1943_v29  ;;  %v1944_v34 = vmul.f32 %v3278_v5, %v1915_v37  ;;  %v2557_v42 = vadd.f32 %v2556_v40, %v2555_v39  ;;  %v2558_v38 = vpop.f32.mrb[58].mxu1 }
 0x16d   : > { %v2559_v47 = vpop.f32.mrb[59].mxu1 }
 0x16e   : > { %v1966_v49 = vmax.f32 %v1958_v41, 0.0  ;;  %v1959_v50 = vadd.f32 %v3283_v14, %v1944_v34  ;;  %v2560_v51 = vadd.f32 %v2559_v47, %v2558_v38  ;;  %v1855_v45 = vadd.f32 %v2557_v42, %v3267_v43 }
 0x170   : > { %v2321_v55 = vpack.c.bf16 %v1966_v49, %v1966_v49  ;;  %v1967_v53 = vmax.f32 %v1959_v50, 0.0  ;;  %v1920_v57 = vadd.f32 %v1919_v46, %v1855_v45  ;;  %v1858_v59 = vadd.f32 %v2560_v51, %v3269_v44  ;;  %v1929_v44 = vpop.f32.mrb[45].mxu0 }
 0x171   : > { %v1930_v12 = vpop.f32.mrb[46].mxu0 }
 0x172   : > { %2007 = vst.msk [vmem:[%s3294_s29 + $0x8] sm:$0xf] %vm2004_vm1, %v2321_v55  ;;  %v2322_v60 = vpack.c.bf16 %v1967_v53, %v1967_v53  ;;  %v1945_v56 = vmul.f32 %v3278_v5, %v1920_v57  ;;  %v1923_v0 = vadd.f32 %v1922_v48, %v1858_v59  ;;  %v2561_v1 = vpop.f32.mrb[60].mxu1  ;;  %v1932_v16 = vpop.f32.mrb[47].mxu0 }
 0x173   : > { %v2562_v2 = vpop.f32.mrb[61].mxu1 }
 0x174   : > { %2008 = vst.msk [vmem:[%s3294_s29 + $0xc] sm:$0xf] %vm2004_vm1, %v2322_v60  ;;  %v1960_v4 = vadd.f32 %v3283_v14, %v1945_v56  ;;  %v1946_v43 = vmul.f32 %v3278_v5, %v1923_v0  ;;  %v2563_v6 = vadd.f32 %v2562_v2, %v2561_v1  ;;  %v2564_v58 = vpop.f32.mrb[62].mxu1 }
 0x175   : > { %v2565_v8 = vpop.f32.mrb[63].mxu1 }
 0x176   : > { %v1968_v52 = vmax.f32 %v1960_v4, 0.0  ;;  %v1961_v9 = vadd.f32 %v3283_v14, %v1946_v43  ;;  %v2566_v10 = vadd.f32 %v2565_v8, %v2564_v58  ;;  %v1863_v11 = vadd.f32 %v2563_v6, %v3271_v61 }
 0x178   : > { %v2323_v17 = vpack.c.bf16 %v1968_v52, %v1968_v52  ;;  %v1969_v18 = vmax.f32 %v1961_v9, 0.0  ;;  %v1928_v20 = vadd.f32 %v1927_v7, %v1863_v11  ;;  %v1866_v13 = vadd.f32 %v2566_v10, %v3273_v62 }
 0x17a   : > { %2009 = vst.msk [vmem:[%s3294_s29 + $0x10] sm:$0xf] %vm2004_vm1, %v2323_v17  ;;  %v2324_v63 = vpack.c.bf16 %v1969_v18, %v1969_v18  ;;  %v1947_v21 = vmul.f32 %v3278_v5, %v1928_v20  ;;  %v1931_v3 = vadd.f32 %v1930_v12, %v1866_v13 }
 0x17c   : > { %2010 = vst.msk [vmem:[%s3294_s29 + $0x14] sm:$0xf] %vm2004_vm1, %v2324_v63  ;;  %v1962_v22 = vadd.f32 %v3283_v14, %v1947_v21  ;;  %v1948_v61 = vmul.f32 %v3278_v5, %v1931_v3 }
 0x17e   : > { %v1970_v24 = vmax.f32 %v1962_v22, 0.0  ;;  %v1963_v15 = vadd.f32 %v3283_v14, %v1948_v61 }
 0x180   : > { %v2325_v25 = vpack.c.bf16 %v1970_v24, %v1970_v24  ;;  %v1971_v26 = vmax.f32 %v1963_v15, 0.0 }
 0x182   : > { %2011 = vst.msk [vmem:[%s3294_s29 + $0x18] sm:$0xf] %vm2004_vm1, %v2325_v25  ;;  %v2326_v62 = vpack.c.bf16 %v1971_v26, %v1971_v26 }
 0x184   : > { %2012 = vst.msk [vmem:[%s3294_s29 + $0x1c] sm:$0xf] %vm2004_vm1, %v2326_v62 }
 0x185 PF: > { %s14_s17 = sadd.s32 1, %s2807_s17   ;;  %s3343_s15 = smov %s2803_s16 }
 0x186   : > { %p11_p5 = scmp.ge.s32.totalorder %s14_s17, 4   ;;  %s3344_s16 = smov %s3346_s18 }
 0x188   :  { %13 = sbr.rel (!%p11_p5) target bundleno = 2 (0x2), region = 75 }

// kernel: rasternet_forward.11
= control target key start
LH: loop header
LB: loop body
LE: loop exit
PB: predicated region body
PF: predicated region fallthrough
CT: control target
= control target key end

     0   :  { %s747_s15 = smov 0   ;;  %s749_s16 = smov 0   ;;  %s817_s0 = inlined_call_operand.vmem [shape: bf16[128,64], index: 0, kind: input, shape index: {}]   ;;  %s818_s1 = inlined_call_operand.vmem [shape: bf16[64,64], index: 1, kind: input, shape index: {}]   ;;  %s819_s2 = inlined_call_operand.vmem [shape: f32[1,64], index: 2, kind: input, shape index: {}]   ;;  %s820_s3 = inlined_call_operand.vmem [shape: f32[1,64], index: 3, kind: input, shape index: {}]   ;;  %s821_s4 = inlined_call_operand.vmem [shape: bf16[128,64], index: 4, kind: output, shape index: {}]  }
   0x1   :  { %s751_s17 = smov 0  }
   0x2 LB: > { %s26_s18 = sadd.s32 1, %s716_s16  ;;  %p597_p0 = scmp.ge.s32.totalorder %s720_s17, 1  ;;  %s720_s17 = sphi %s751_s17, %s14_s17   ;;  %s716_s16 = sphi %s749_s16, %s823_s16   ;;  %s712_s15 = sphi %s747_s15, %s822_s15  }
   0x3   : > { %p28_p1 = scmp.ge.s32.totalorder %s26_s18, 2  ;;  %p202_p2 = scmp.lt.s32.totalorder %s720_s17, 3 }
   0x5   : > { %s825_s18 = smov (%p28_p1, %s26_s18), 0  ;;  %p203_p3 = pnand %p597_p0, %p202_p2 }
   0x6   : > { %v690_v0 = vld [vmem:[%s818_s1] sm:$0xff] (!%p203_p3)   ;;  %s598_s21 = sshll.u32 (!%p203_p3), %s712_s15, 3  ;;  %v691_v1 = vld [vmem:[%s818_s1 + $0x8] sm:$0xff] (!%p203_p3)   ;;  %v692_v2 = vld [vmem:[%s818_s1 + $0x10] sm:$0xff] (!%p203_p3)   ;;  %vm327_vm0 = vcmask (!%p203_p3), 523264   ;;  %vm467_vm1 = vcmask (!%p203_p3), 519168  }
   0x7   : > { %206 = sbr.rel (%p203_p3) target bundleno = 245 (0xf5), region = 36  ;;  %p242_p4 = scmp.lt.s32.totalorder (!%p203_p3), %s598_s21, 15  ;;  %642 = vmatprep.subr.bf16.mxu0 (!%p203_p3), %v690_v0  ;;  %658 = vmatprep.subr.bf16.mxu1 (!%p203_p3), %v690_v0  ;;  %v693_v3 = vld [vmem:[%s818_s1 + $0x18] sm:$0xff] (!%p203_p3)   ;;  %v614_v8 = vld [vmem:[%s819_s2] ss:$0 sm:$0xff] (!%p203_p3) }
   0x8   : > { %643 = vmatpush3.bf16.msra.mxu0 (!%p203_p3), %v690_v0  ;;  %662 = vmatpush3.bf16.msra.mxu1 (!%p203_p3), %v690_v0  ;;  %v615_v10 = vld [vmem:[%s820_s3] ss:$0 sm:$0xff] (!%p203_p3) }
   0x9   : > { %644 = vmatprep.subr.bf16.mxu0 (!%p203_p3), %v691_v1  ;;  %659 = vmatprep.subr.bf16.mxu1 (!%p203_p3), %v691_v1 }
   0xc   : > { %645 = vmatpush3.bf16.msra.mxu0 (!%p203_p3), %v691_v1  ;;  %663 = vmatpush3.bf16.msra.mxu1 (!%p203_p3), %v691_v1 }
   0xd   : > { %646 = vmatprep.subr.bf16.mxu0 (!%p203_p3), %v692_v2  ;;  %660 = vmatprep.subr.bf16.mxu1 (!%p203_p3), %v692_v2 }
   0xe   : > { %s827_s21 = smov (!%p242_p4, %s598_s21), 15 }
   0xf   : > { %s599_s26 = sshll.u32 %s827_s21, 2 }
  0x10   : > { %s245_s5 = scalar_lea.vmem %s817_s0, %s599_s26  ;;  %647 = vmatpush3.bf16.msra.mxu0 %v692_v2  ;;  %664 = vmatpush3.bf16.msra.mxu1 %v692_v2  ;;  %s264_s12 = scalar_lea.vmem %s821_s4, %s599_s26 }
  0x11   : > { %v694_v4 = vld [vmem:[%s245_s5] sm:$0xff]   ;;  %v695_v5 = vld [vmem:[%s245_s5 + $0x10] sm:$0xff]   ;;  %648 = vmatprep.subr.bf16.mxu0 %v693_v3  ;;  %661 = vmatprep.subr.bf16.mxu1 %v693_v3  ;;  %v696_v6 = vld [vmem:[%s245_s5 + $0x8] sm:$0xff]  }
  0x12   : > { %650 = vmatprep.mubr.msk.bf16.mxu0 %vm327_vm0, %v694_v4  ;;  %654 = vmatprep.mubr.msk.bf16.mxu1 %vm327_vm0, %v695_v5  ;;  %v697_v7 = vld [vmem:[%s245_s5 + $0x18] sm:$0xff]  }
  0x14   : > { %649 = vmatpush3.bf16.msra.mxu0 %v693_v3  ;;  %665 = vmatpush3.bf16.msra.mxu1 %v693_v3 }
  0x17   : > { %651 = vmatmul.mubr.msk.bf16.vlgmr.msra.gmra.mrb[0].mxu0 %vm327_vm0, %v696_v6  ;;  %655 = vmatmul.mubr.msk.bf16.vlgmr.msra.gmra.mrb[0].mxu1 %vm327_vm0, %v697_v7 }
  0xea   : > { %v652_v9 = vpop.f32.mrb[0].mxu0  ;;  %v656_v11 = vpop.f32.mrb[0].mxu1 }
  0xeb   : > { %v414_v12 = vmul.f32 %v652_v9, %v614_v8  ;;  %v418_v13 = vmul.f32 %v656_v11, %v614_v8  ;;  %v374_v14 = vpop.f32.mrb[1].mxu0  ;;  %v390_v15 = vpop.f32.mrb[1].mxu1 }
  0xec   : > { %v412_v16 = vmul.f32 %v614_v8, %v374_v14  ;;  %v416_v17 = vmul.f32 %v614_v8, %v390_v15  ;;  %v653_v18 = vpop.f32.mrb[2].mxu0  ;;  %v657_v19 = vpop.f32.mrb[2].mxu1 }
  0xed   : > { %v429_v20 = vadd.f32 %v615_v10, %v414_v12  ;;  %v433_v21 = vadd.f32 %v615_v10, %v418_v13  ;;  %v415_v22 = vmul.f32 %v653_v18, %v614_v8  ;;  %v419_v23 = vmul.f32 %v657_v19, %v614_v8  ;;  %v377_v24 = vpop.f32.mrb[3].mxu0  ;;  %v393_v25 = vpop.f32.mrb[3].mxu1 }
  0xee   : > { %v427_v26 = vadd.f32 %v615_v10, %v412_v16  ;;  %v431_v27 = vadd.f32 %v615_v10, %v416_v17  ;;  %v413_v28 = vmul.f32 %v614_v8, %v377_v24  ;;  %v417_v29 = vmul.f32 %v614_v8, %v393_v25 }
  0xef   : > { %v628_v30 = vpack.c.bf16 %v429_v20, %v429_v20  ;;  %v632_v31 = vpack.c.bf16 %v433_v21, %v433_v21  ;;  %v430_v32 = vadd.f32 %v615_v10, %v415_v22  ;;  %v434_v33 = vadd.f32 %v615_v10, %v419_v23 }
  0xf0   : > { %v626_v34 = vpack.c.bf16 %v427_v26, %v427_v26  ;;  %v630_v35 = vpack.c.bf16 %v431_v27, %v431_v27  ;;  %v428_v36 = vadd.f32 %v615_v10, %v413_v28  ;;  %v432_v37 = vadd.f32 %v615_v10, %v417_v29 }
  0xf1   : > { %470 = vst.msk [vmem:[%s264_s12 + $0x8] sm:$0xf] %vm467_vm1, %v628_v30  ;;  %474 = vst.msk [vmem:[%s264_s12 + $0x18] sm:$0xf] %vm467_vm1, %v632_v31  ;;  %v629_v38 = vpack.c.bf16 %v430_v32, %v430_v32  ;;  %v633_v39 = vpack.c.bf16 %v434_v33, %v434_v33 }
  0xf2   : > { %468 = vst.msk [vmem:[%s264_s12] sm:$0xf] %vm467_vm1, %v626_v34  ;;  %472 = vst.msk [vmem:[%s264_s12 + $0x10] sm:$0xf] %vm467_vm1, %v630_v35  ;;  %v627_v40 = vpack.c.bf16 %v428_v36, %v428_v36  ;;  %v631_v41 = vpack.c.bf16 %v432_v37, %v432_v37 }
  0xf3   : > { %471 = vst.msk [vmem:[%s264_s12 + $0xc] sm:$0xf] %vm467_vm1, %v629_v38  ;;  %475 = vst.msk [vmem:[%s264_s12 + $0x1c] sm:$0xf] %vm467_vm1, %v633_v39 }
  0xf4   : > { %469 = vst.msk [vmem:[%s264_s12 + $0x4] sm:$0xf] %vm467_vm1, %v627_v40  ;;  %473 = vst.msk [vmem:[%s264_s12 + $0x14] sm:$0xf] %vm467_vm1, %v631_v41 }
  0xf5 PF: > { %s14_s17 = sadd.s32 1, %s720_s17   ;;  %s822_s15 = smov %s716_s16 }
  0xf6   : > { %p11_p5 = scmp.ge.s32.totalorder %s14_s17, 4   ;;  %s823_s16 = smov %s825_s18 }
  0xf8   :  { %13 = sbr.rel (!%p11_p5) target bundleno = 2 (0x2), region = 75 }

// kernel: rasternet_forward.13
= control target key start
LH: loop header
LB: loop body
LE: loop exit
PB: predicated region body
PF: predicated region fallthrough
CT: control target
= control target key end

     0   :  { %s2960_s18 = smov 0   ;;  %s2962_s19 = smov 0   ;;  %s3479_s0 = inlined_call_operand.vmem [shape: bf16[128,1728], index: 0, kind: input, shape index: {}]   ;;  %s3480_s1 = inlined_call_operand.vmem [shape: bf16[1728,64], index: 1, kind: input, shape index: {}]   ;;  %s3481_s2 = inlined_call_operand.vmem [shape: f32[1,64], index: 2, kind: input, shape index: {}]   ;;  %s3482_s3 = inlined_call_operand.vmem [shape: f32[1,64], index: 3, kind: input, shape index: {}]   ;;  %s3483_s4 = inlined_call_operand.vmem [shape: bf16[128,64], index: 4, kind: input, shape index: {}]   ;;  %s3484_s5 = inlined_call_operand.vmem [shape: bf16[128,64], index: 5, kind: output, shape index: {}]  }
   0x1   :  { %s2964_s20 = smov 0  }
   0x2 LB: > { %s27_s21 = sadd.s32 1, %s2923_s19  ;;  %p2233_p0 = scmp.ge.s32.totalorder %s2927_s20, 1  ;;  %s2927_s20 = sphi %s2964_s20, %s15_s20   ;;  %s2923_s19 = sphi %s2962_s19, %s3486_s19   ;;  %s2919_s18 = sphi %s2960_s18, %s3485_s18  }
   0x3   : > { %p29_p1 = scmp.ge.s32.totalorder %s27_s21, 2  ;;  %p244_p2 = scmp.lt.s32.totalorder %s2927_s20, 3 }
   0x5   : > { %s3488_s21 = smov (%p29_p1, %s27_s21), 0  ;;  %p245_p3 = pnand %p2233_p0, %p244_p2 }
   0x6   : > { %v2713_v0 = vld [vmem:[%s3480_s1 + $0x40] sm:$0xff] (!%p245_p3)   ;;  %v2715_v2 = vld [vmem:[%s3480_s1 + $0x48] sm:$0xff] (!%p245_p3)   ;;  %v2717_v4 = vld [vmem:[%s3480_s1 + $0x50] sm:$0xff] (!%p245_p3)   ;;  %s2234_s7 = sshll.u32 (!%p245_p3), %s2919_s18, 3  ;;  %vm1526_vm0 = vcmask (!%p245_p3), 523264   ;;  %vm2088_vm1 = vcmask (!%p245_p3), 519168  }
   0x7   : > { %248 = sbr.rel (%p245_p3) target bundleno = 391 (0x187), region = 40  ;;  %v2714_v1 = vld [vmem:[%s3480_s1] sm:$0xff] (!%p245_p3)   ;;  %2447 = vmatprep.subr.bf16.mxu1 (!%p245_p3), %v2713_v0  ;;  %v2716_v3 = vld [vmem:[%s3480_s1 + $0x8] sm:$0xff] (!%p245_p3)   ;;  %v2718_v5 = vld [vmem:[%s3480_s1 + $0x10] sm:$0xff] (!%p245_p3)   ;;  %p295_p4 = scmp.lt.s32.totalorder (!%p245_p3), %s2234_s7, 15 }
   0x8   : > { %2448 = vmatpush3.bf16.msra.mxu1 (!%p245_p3), %v2714_v1  ;;  %v2719_v6 = vld [vmem:[%s3480_s1 + $0x58] sm:$0xff] (!%p245_p3)   ;;  %v2723_v8 = vld [vmem:[%s3480_s1 + $0x140] sm:$0xff] (!%p245_p3)   ;;  %v2727_v12 = vld [vmem:[%s3480_s1 + $0x148] sm:$0xff] (!%p245_p3)  }
   0x9   : > { %2449 = vmatprep.subr.bf16.mxu1 (!%p245_p3), %v2715_v2  ;;  %v2720_v7 = vld [vmem:[%s3480_s1 + $0x18] sm:$0xff] (!%p245_p3)   ;;  %v2721_v9 = vld [vmem:[%s3480_s1 + $0x60] sm:$0xff] (!%p245_p3)   ;;  %2527 = vmatprep.subr.bf16.mxu0 (!%p245_p3), %v2723_v8  ;;  %v2724_v13 = vld [vmem:[%s3480_s1 + $0x68] sm:$0xff] (!%p245_p3)  }
   0xa   : > { %v2725_v10 = vld [vmem:[%s3480_s1 + $0x100] sm:$0xff] (!%p245_p3)   ;;  %v2729_v14 = vld [vmem:[%s3480_s1 + $0x108] sm:$0xff] (!%p245_p3)   ;;  %v2731_v16 = vld [vmem:[%s3480_s1 + $0x150] sm:$0xff] (!%p245_p3)  }
   0xb   : > { %v2722_v11 = vld [vmem:[%s3480_s1 + $0x20] sm:$0xff] (!%p245_p3)   ;;  %2528 = vmatpush3.bf16.msra.mxu0 (!%p245_p3), %v2725_v10  ;;  %v2726_v15 = vld [vmem:[%s3480_s1 + $0x28] sm:$0xff] (!%p245_p3)   ;;  %v2728_v17 = vld [vmem:[%s3480_s1 + $0x70] sm:$0xff] (!%p245_p3)  }
   0xc   : > { %2450 = vmatpush3.bf16.msra.mxu1 (!%p245_p3), %v2716_v3  ;;  %2529 = vmatprep.subr.bf16.mxu0 (!%p245_p3), %v2727_v12  ;;  %v2733_v18 = vld [vmem:[%s3480_s1 + $0x110] sm:$0xff] (!%p245_p3)   ;;  %v2732_v20 = vld [vmem:[%s3480_s1 + $0x78] sm:$0xff] (!%p245_p3)   ;;  %v2739_v25 = vld [vmem:[%s3480_s1 + $0xc0] sm:$0xff] (!%p245_p3)  }
   0xd   : > { %2451 = vmatprep.subr.bf16.mxu1 (!%p245_p3), %v2717_v4  ;;  %v2730_v19 = vld [vmem:[%s3480_s1 + $0x30] sm:$0xff] (!%p245_p3)   ;;  %v2738_v22 = vld [vmem:[%s3480_s1 + $0x158] sm:$0xff] (!%p245_p3)   ;;  %v2742_v27 = vld [vmem:[%s3480_s1 + $0x160] sm:$0xff] (!%p245_p3)  }
   0xe   : > { %s3490_s7 = smov (!%p295_p4, %s2234_s7), 15  ;;  %v2734_v23 = vld [vmem:[%s3480_s1 + $0x38] sm:$0xff]   ;;  %v2741_v28 = vld [vmem:[%s3480_s1 + $0x80] sm:$0xff]   ;;  %v2743_v30 = vld [vmem:[%s3480_s1 + $0xc8] sm:$0xff]  }
   0xf   : > { %s2687_s6 = smul.u32 56, %s3490_s7  ;;  %2530 = vmatpush3.bf16.msra.mxu0 %v2729_v14  ;;  %v2740_v24 = vld [vmem:[%s3480_s1 + $0x118] sm:$0xff]   ;;  %v2744_v29 = vld [vmem:[%s3480_s1 + $0x120] sm:$0xff]   ;;  %v2748_v32 = vld [vmem:[%s3480_s1 + $0x168] sm:$0xff]  }
  0x10   : > { %2452 = vmatpush3.bf16.msra.mxu1 %v2718_v5  ;;  %2531 = vmatprep.subr.bf16.mxu0 %v2731_v16  ;;  %v2745_v33 = vld [vmem:[%s3480_s1 + $0x88] sm:$0xff]   ;;  %v2750_v36 = vld [vmem:[%s3480_s1 + $0xd0] sm:$0xff]   ;;  %v2754_v40 = vld [vmem:[%s3480_s1 + $0xd8] sm:$0xff]  }
  0x11   : > { %2453 = vmatprep.subr.bf16.mxu1 %v2719_v6  ;;  %s3044_s18 = scalar_lea.vmem %s3479_s0, %s2687_s6  ;;  %v2751_v34 = vld [vmem:[%s3480_s1 + $0x128] sm:$0xff]   ;;  %v2753_v37 = vld [vmem:[%s3480_s1 + $0x170] sm:$0xff]   ;;  %v2756_v42 = vld [vmem:[%s3480_s1 + $0x98] sm:$0xff]  }
  0x12   : > { %v2737_v21 = vld [vmem:[%s3044_s18 + $0x4] ss:$56 sps:$4 sm:$0xff]   ;;  %v2735_v26 = vld [vmem:[%s3044_s18] ss:$56 sps:$4 sm:$0xff]   ;;  %v2746_v31 = vld [vmem:[%s3044_s18 + $0x74] ss:$56 sps:$4 sm:$0xff]  }
  0x13   : > { %2532 = vmatpush3.bf16.msra.mxu0 %v2733_v18  ;;  %1571 = vmatprep.mubr.bf16.mxu1 %v2737_v21  ;;  %v2749_v35 = vld [vmem:[%s3044_s18 + $0x70] ss:$56 sps:$4 sm:$0xff]   ;;  %v2757_v41 = vld [vmem:[%s3044_s18 + $0xe4] ss:$56 sps:$4 sm:$0xff]   ;;  %v2760_v45 = vld [vmem:[%s3044_s18 + $0xe0] ss:$56 sps:$4 sm:$0xff]  }
  0x14   : > { %2454 = vmatpush3.bf16.msra.mxu1 %v2720_v7  ;;  %2533 = vmatprep.subr.bf16.mxu0 %v2738_v22  ;;  %v2752_v38 = vld [vmem:[%s3480_s1 + $0x90] sm:$0xff]   ;;  %v2759_v43 = vld [vmem:[%s3480_s1 + $0x178] sm:$0xff]   ;;  %v2761_v44 = vld [vmem:[%s3480_s1 + $0xe0] sm:$0xff]  }
  0x15   : > { %2455 = vmatprep.subr.bf16.mxu1 %v2721_v9  ;;  %v2755_v39 = vld [vmem:[%s3480_s1 + $0x130] sm:$0xff]   ;;  %v2762_v46 = vld [vmem:[%s3480_s1 + $0x138] sm:$0xff]   ;;  %v2763_v47 = vld [vmem:[%s3480_s1 + $0xa0] sm:$0xff]  }
  0x16   : > { %v2764_v48 = vld [vmem:[%s3044_s18 + $0x10] ss:$56 sps:$4 sm:$0xff]   ;;  %v2766_v49 = vld [vmem:[%s3044_s18 + $0x14] ss:$56 sps:$4 sm:$0xff]   ;;  %v2767_v50 = vld [vmem:[%s3480_s1 + $0x240] sm:$0xff]  }
  0x17   : > { %2534 = vmatpush3.bf16.msra.mxu0 %v2740_v24  ;;  %1701 = vmatprep.mubr.bf16.mxu0 %v2766_v49  ;;  %v2768_v51 = vld [vmem:[%s3480_s1 + $0xe8] sm:$0xff]   ;;  %v2769_v52 = vld [vmem:[%s3480_s1 + $0x200] sm:$0xff]   ;;  %v2775_v57 = vld [vmem:[%s3480_s1 + $0xf0] sm:$0xff]  }
  0x18   : > { %2456 = vmatpush3.bf16.msra.mxu1 %v2722_v11  ;;  %2535 = vmatprep.subr.bf16.mxu0 %v2742_v27  ;;  %v2770_v53 = vld [vmem:[%s3480_s1 + $0xa8] sm:$0xff]   ;;  %v2777_v59 = vld [vmem:[%s3480_s1 + $0xb0] sm:$0xff]   ;;  %v2778_v60 = vld [vmem:[%s3044_s18 + $0x84] ss:$56 sps:$4 sm:$0xff]  }
  0x19   : > { %2457 = vmatprep.subr.bf16.mxu1 %v2724_v13  ;;  %v2771_v54 = vld [vmem:[%s3044_s18 + $0x154] ss:$56 sps:$4 sm:$0xff]   ;;  %v2774_v56 = vld [vmem:[%s3044_s18 + $0x150] ss:$56 sps:$4 sm:$0xff]   ;;  %v2781_v62 = vld [vmem:[%s3480_s1 + $0xf8] sm:$0xff]  }
  0x1a   : > { %v2773_v55 = vld [vmem:[%s3480_s1 + $0x248] sm:$0xff]   ;;  %v2780_v61 = vld [vmem:[%s3480_s1 + $0x250] sm:$0xff]   ;;  %v2782_v63 = vld [vmem:[%s3044_s18 + $0x80] ss:$56 sps:$4 sm:$0xff]  }
  0x1b   : > { %2536 = vmatpush3.bf16.msra.mxu0 %v2744_v29  ;;  %v2776_v58 = vld [vmem:[%s3480_s1 + $0x208] sm:$0xff]   ;;  %v2783_v0 = vld [vmem:[%s3480_s1 + $0x210] sm:$0xff]   ;;  %v2784_v1 = vld [vmem:[%s3480_s1 + $0xb8] sm:$0xff]  }
  0x1c   : > { %2458 = vmatpush3.bf16.msra.mxu1 %v2726_v15  ;;  %2537 = vmatprep.subr.bf16.mxu0 %v2748_v32  ;;  %v2785_v2 = vld [vmem:[%s3044_s18 + $0x8] ss:$56 sps:$4 sm:$0xff]   ;;  %v2787_v3 = vld [vmem:[%s3044_s18 + $0xc] ss:$56 sps:$4 sm:$0xff]   ;;  %v2788_v4 = vld [vmem:[%s3480_s1 + $0x258] sm:$0xff]  }
  0x1d   : > { %2459 = vmatprep.subr.bf16.mxu1 %v2728_v17  ;;  %v2789_v5 = vld [vmem:[%s3480_s1 + $0x1c0] sm:$0xff]   ;;  %v2790_v6 = vld [vmem:[%s3480_s1 + $0x218] sm:$0xff]   ;;  %v2792_v8 = vld [vmem:[%s3044_s18 + $0xf4] ss:$56 sps:$4 sm:$0xff]  }
  0x1e   : > { %v2791_v7 = vld [vmem:[%s3480_s1 + $0x180] sm:$0xff]   ;;  %v2795_v10 = vld [vmem:[%s3044_s18 + $0xf0] ss:$56 sps:$4 sm:$0xff]   ;;  %v2799_v14 = vld [vmem:[%s3044_s18 + $0x7c] ss:$56 sps:$4 sm:$0xff]  }
  0x1f   : > { %2538 = vmatpush3.bf16.msra.mxu0 %v2751_v34  ;;  %v2794_v9 = vld [vmem:[%s3480_s1 + $0x260] sm:$0xff]   ;;  %v2796_v11 = vld [vmem:[%s3480_s1 + $0x1c8] sm:$0xff]   ;;  %v2802_v16 = vld [vmem:[%s3044_s18 + $0x78] ss:$56 sps:$4 sm:$0xff]   ;;  %v2929_v34 = vmov 0  }
  0x20   : > { %2460 = vmatpush3.bf16.msra.mxu1 %v2730_v19  ;;  %2539 = vmatprep.subr.bf16.mxu0 %v2753_v37  ;;  %v2797_v12 = vld [vmem:[%s3480_s1 + $0x220] sm:$0xff]   ;;  %v2798_v13 = vld [vmem:[%s3480_s1 + $0x188] sm:$0xff]   ;;  %v2803_v17 = vld [vmem:[%s3480_s1 + $0x1d0] sm:$0xff]  }
  0x21   : > { %2461 = vmatprep.subr.bf16.mxu1 %v2732_v20  ;;  %v2801_v15 = vld [vmem:[%s3480_s1 + $0x268] sm:$0xff]   ;;  %v2805_v19 = vld [vmem:[%s3480_s1 + $0x190] sm:$0xff]   ;;  %v2806_v20 = vld [vmem:[%s3044_s18 + $0x164] ss:$56 sps:$4 sm:$0xff]  }
  0x22   : > { %v2804_v18 = vld [vmem:[%s3480_s1 + $0x228] sm:$0xff]   ;;  %v2808_v21 = vld [vmem:[%s3480_s1 + $0x270] sm:$0xff]   ;;  %v2809_v22 = vld [vmem:[%s3044_s18 + $0x160] ss:$56 sps:$4 sm:$0xff]  }
  0x23   : > { %2540 = vmatpush3.bf16.msra.mxu0 %v2755_v39  ;;  %v2811_v24 = vld [vmem:[%s3480_s1 + $0x230] sm:$0xff]   ;;  %v2815_v27 = vld [vmem:[%s3480_s1 + $0x278] sm:$0xff]   ;;  %v2817_v29 = vld [vmem:[%s3480_s1 + $0x1e0] sm:$0xff]  }
  0x24   : > { %2462 = vmatpush3.bf16.msra.mxu1 %v2734_v23  ;;  %2541 = vmatprep.subr.bf16.mxu0 %v2759_v43  ;;  %v2810_v23 = vld [vmem:[%s3480_s1 + $0x1d8] sm:$0xff]   ;;  %v2825_v37 = vld [vmem:[%s3480_s1 + $0x1a8] sm:$0xff]  }
  0x25   : > { %2487 = vmatprep.subr.bf16.mxu1 %v2739_v25  ;;  %v2812_v25 = vld [vmem:[%s3480_s1 + $0x198] sm:$0xff]  }
  0x26   : > { %v2820_v32 = vld [vmem:[%s3044_s18 + $0x20] ss:$56 sps:$4 sm:$0xff]  }
  0x27   : > { %1572 = vmatmul.mubr.bf16.vlgmr.msra.gmra.mrb[0].mxu1 %v2735_v26  ;;  %2542 = vmatpush3.bf16.msra.mxu0 %v2762_v46  ;;  %v2813_v26 = vld [vmem:[%s3044_s18 + $0xec] ss:$56 sps:$4 sm:$0xff]   ;;  %v2828_v39 = vld [vmem:[%s3044_s18 + $0x158] ss:$56 sps:$4 sm:$0xff]  }
  0x28   : > { %2488 = vmatpush3.bf16.msra.mxu1 %v2741_v28  ;;  %1579 = vmatprep.mubr.bf16.mxu1 %v2746_v31  ;;  %v2816_v28 = vld [vmem:[%s3044_s18 + $0xe8] ss:$56 sps:$4 sm:$0xff]   ;;  %v2832_v43 = vld [vmem:[%s3480_s1 + $0x1f8] sm:$0xff]  }
  0x29   : > { %2489 = vmatprep.subr.bf16.mxu1 %v2743_v30  ;;  %2607 = vmatprep.subr.bf16.mxu0 %v2767_v50  ;;  %v2818_v30 = vld [vmem:[%s3480_s1 + $0x238] sm:$0xff]   ;;  %v2819_v31 = vld [vmem:[%s3480_s1 + $0x1a0] sm:$0xff]  }
  0x2a   : > { %1702 = vmatmul.mubr.bf16.vlgmr.msra.gmra.mrb[0].mxu0 %v2764_v48  ;;  %v2835_v46 = vld [vmem:[%s3044_s18 + $0x18] ss:$56 sps:$4 sm:$0xff]   ;;  %v2838_v48 = vld [vmem:[%s3480_s1 + $0x2c0] sm:$0xff]  }
  0x2b   : > { %2608 = vmatpush3.bf16.msra.mxu0 %v2769_v52  ;;  %1709 = vmatprep.mubr.bf16.mxu0 %v2778_v60  ;;  %v2839_v49 = vld [vmem:[%s3480_s1 + $0x318] sm:$0xff]   ;;  %v2840_v50 = vld [vmem:[%s3480_s1 + $0x280] sm:$0xff]   ;;  %v2852_v60 = vld [vmem:[%s3044_s18 + $0x90] ss:$56 sps:$4 sm:$0xff]  }
  0x2c   : > { %2490 = vmatpush3.bf16.msra.mxu1 %v2745_v33  ;;  %2609 = vmatprep.subr.bf16.mxu0 %v2773_v55  ;;  %v2822_v33 = vld [vmem:[%s3044_s18 + $0x24] ss:$56 sps:$4 sm:$0xff]   ;;  %v2846_v55 = vld [vmem:[%s3044_s18 + $0x88] ss:$56 sps:$4 sm:$0xff]  }
  0x2d   : > { %2491 = vmatprep.subr.bf16.mxu1 %v2750_v36  ;;  %v2824_v36 = vld [vmem:[%s3480_s1 + $0x300] sm:$0xff]  }
  0x2e   : > { %v2842_v52 = vld [vmem:[%s3480_s1 + $0x320] sm:$0xff]  }
  0x2f   : > { %1580 = vmatmul.mubr.bf16.gmra.mrb[4].mxu1 %v2749_v35  ;;  %2610 = vmatpush3.bf16.msra.mxu0 %v2776_v58  ;;  %v2823_v35 = vld [vmem:[%s3480_s1 + $0x1e8] sm:$0xff]  }
  0x30   : > { %2492 = vmatpush3.bf16.msra.mxu1 %v2752_v38  ;;  %1587 = vmatprep.mubr.bf16.mxu1 %v2757_v41  ;;  %v2826_v38 = vld [vmem:[%s3044_s18 + $0x15c] ss:$56 sps:$4 sm:$0xff]   ;;  %v2830_v41 = vld [vmem:[%s3480_s1 + $0x308] sm:$0xff]  }
  0x31   : > { %2493 = vmatprep.subr.bf16.mxu1 %v2754_v40  ;;  %2611 = vmatprep.subr.bf16.mxu0 %v2780_v61  ;;  %v2829_v40 = vld [vmem:[%s3480_s1 + $0x1f0] sm:$0xff]   ;;  %v2853_v61 = vld [vmem:[%s3480_s1 + $0x2d8] sm:$0xff]  }
  0x32   : > { %1710 = vmatmul.mubr.bf16.gmra.mrb[4].mxu0 %v2782_v63  ;;  %v2849_v58 = vld [vmem:[%s3044_s18 + $0x94] ss:$56 sps:$4 sm:$0xff]   ;;  %v2855_v63 = vld [vmem:[%s3480_s1 + $0x298] sm:$0xff]  }
  0x33   : > { %2612 = vmatpush3.bf16.msra.mxu0 %v2783_v0  ;;  %1717 = vmatprep.mubr.bf16.mxu0 %v2792_v8  ;;  %v2856_v0 = vld [vmem:[%s3044_s18 + $0xfc] ss:$56 sps:$4 sm:$0xff]   ;;  %v2866_v8 = vld [vmem:[%s3480_s1 + $0x340] sm:$0xff]  }
  0x34   : > { %2494 = vmatpush3.bf16.msra.mxu1 %v2756_v42  ;;  %2613 = vmatprep.subr.bf16.mxu0 %v2788_v4  ;;  %v2831_v42 = vld [vmem:[%s3480_s1 + $0x1b0] sm:$0xff]   ;;  %v2861_v4 = vld [vmem:[%s3044_s18 + $0x104] ss:$56 sps:$4 sm:$0xff]  }
  0x35   : > { %2495 = vmatprep.subr.bf16.mxu1 %v2761_v44  ;;  %v2833_v44 = vld [vmem:[%s3480_s1 + $0x310] sm:$0xff]  }
  0x37   : > { %1588 = vmatmul.mubr.bf16.gmra.mrb[8].mxu1 %v2760_v45  ;;  %2614 = vmatpush3.bf16.msra.mxu0 %v2790_v6  ;;  %v2834_v45 = vld [vmem:[%s3480_s1 + $0x1b8] sm:$0xff]  }
  0x38   : > { %2496 = vmatpush3.bf16.msra.mxu1 %v2763_v47  ;;  %1595 = vmatprep.mubr.bf16.mxu1 %v2771_v54  ;;  %v2837_v47 = vld [vmem:[%s3044_s18 + $0x1c] ss:$56 sps:$4 sm:$0xff]   ;;  %v2844_v54 = vld [vmem:[%s3044_s18 + $0x8c] ss:$56 sps:$4 sm:$0xff]   ;;  %v2864_v6 = vld [vmem:[%s3044_s18 + $0x100] ss:$56 sps:$4 sm:$0xff]  }
  0x39   : > { %2497 = vmatprep.subr.bf16.mxu1 %v2768_v51  ;;  %2615 = vmatprep.subr.bf16.mxu0 %v2794_v9  ;;  %v2841_v51 = vld [vmem:[%s3480_s1 + $0x2c8] sm:$0xff]  }
  0x3a   : > { %1718 = vmatmul.mubr.bf16.gmra.mrb[8].mxu0 %v2795_v10  ;;  %v2867_v9 = vld [vmem:[%s3480_s1 + $0x2a8] sm:$0xff]  }
  0x3b   : > { %2616 = vmatpush3.bf16.msra.mxu0 %v2797_v12  ;;  %1725 = vmatprep.mubr.bf16.mxu0 %v2806_v20  ;;  %v2868_v10 = vld [vmem:[%s3044_s18 + $0x16c] ss:$56 sps:$4 sm:$0xff]   ;;  %v2871_v12 = vld [vmem:[%s3480_s1 + $0x2f0] sm:$0xff]   ;;  %v2880_v20 = vld [vmem:[%s3044_s18 + $0x28] ss:$56 sps:$4 sm:$0xff]  }
  0x3c   : > { %2498 = vmatpush3.bf16.msra.mxu1 %v2770_v53  ;;  %2617 = vmatprep.subr.bf16.mxu0 %v2801_v15  ;;  %v2843_v53 = vld [vmem:[%s3480_s1 + $0x288] sm:$0xff]   ;;  %v2875_v15 = vld [vmem:[%s3480_s1 + $0x2b0] sm:$0xff]  }
  0x3d   : > { %2499 = vmatprep.subr.bf16.mxu1 %v2775_v57  ;;  %v2848_v57 = vld [vmem:[%s3480_s1 + $0x328] sm:$0xff]  }
  0x3f   : > { %1596 = vmatmul.mubr.bf16.gmra.mrb[12].mxu1 %v2774_v56  ;;  %2618 = vmatpush3.bf16.msra.mxu0 %v2804_v18  ;;  %v2847_v56 = vld [vmem:[%s3480_s1 + $0x2d0] sm:$0xff]  }
  0x40   : > { %2500 = vmatpush3.bf16.msra.mxu1 %v2777_v59  ;;  %1636 = vmatprep.mubr.bf16.mxu1 %v2787_v3  ;;  %v2851_v59 = vld [vmem:[%s3480_s1 + $0x290] sm:$0xff]   ;;  %v2860_v3 = vld [vmem:[%s3480_s1 + $0x338] sm:$0xff]  }
  0x41   : > { %2501 = vmatprep.subr.bf16.mxu1 %v2781_v62  ;;  %2619 = vmatprep.subr.bf16.mxu0 %v2808_v21  ;;  %v2854_v62 = vld [vmem:[%s3480_s1 + $0x330] sm:$0xff]   ;;  %v2882_v21 = vld [vmem:[%s3044_s18 + $0x2c] ss:$56 sps:$4 sm:$0xff]  }
  0x42   : > { %1726 = vmatmul.mubr.bf16.gmra.mrb[12].mxu0 %v2809_v22  ;;  %v2878_v18 = vld [vmem:[%s3480_s1 + $0x350] sm:$0xff]   ;;  %v2883_v22 = vld [vmem:[%s3480_s1 + $0x358] sm:$0xff]  }
  0x43   : > { %2620 = vmatpush3.bf16.msra.mxu0 %v2811_v24  ;;  %1831 = vmatprep.mubr.bf16.mxu0 %v2822_v33  ;;  %v2886_v24 = vld [vmem:[%s3044_s18 + $0x34] ss:$56 sps:$4 sm:$0xff]   ;;  %v2898_v33 = vld [vmem:[%s3044_s18 + $0x110] ss:$56 sps:$4 sm:$0xff]  }
  0x44   : > { %2502 = vmatpush3.bf16.msra.mxu1 %v2784_v1  ;;  %2621 = vmatprep.subr.bf16.mxu0 %v2815_v27  ;;  %v2858_v1 = vld [vmem:[%s3044_s18 + $0xf8] ss:$56 sps:$4 sm:$0xff]  }
  0x45   : > { %2567 = vmatprep.subr.bf16.mxu1 %v2789_v5  ;;  %v2863_v5 = vld [vmem:[%s3480_s1 + $0x2a0] sm:$0xff]   ;;  %v2889_v27 = vld [vmem:[%s3044_s18 + $0x98] ss:$56 sps:$4 sm:$0xff]  }
  0x47   : > { %1637 = vmatmul.mubr.bf16.vlgmr.msra.gmra.mrb[16].mxu1 %v2785_v2  ;;  %2622 = vmatpush3.bf16.msra.mxu0 %v2818_v30  ;;  %v2859_v2 = vld [vmem:[%s3480_s1 + $0x2e0] sm:$0xff]   ;;  %v2896_v30 = vld [vmem:[%s3044_s18 + $0x114] ss:$56 sps:$4 sm:$0xff]  }
  0x48   : > { %2568 = vmatpush3.bf16.msra.mxu1 %v2791_v7  ;;  %1644 = vmatprep.mubr.bf16.mxu1 %v2799_v14  ;;  %v2865_v7 = vld [vmem:[%s3480_s1 + $0x2e8] sm:$0xff]  }
  0x49   : > { %2569 = vmatprep.subr.bf16.mxu1 %v2796_v11  ;;  %1929 = vmatprep.subr.bf16.mxu0 %v2929_v34  ;;  %v2870_v11 = vld [vmem:[%s3044_s18 + $0x168] ss:$56 sps:$4 sm:$0xff]   ;;  %v2873_v14 = vld [vmem:[%s3044_s18 + $0x174] ss:$56 sps:$4 sm:$0xff]  }
  0x4a   : > { %1832 = vmatmul.mubr.bf16.vlgmr.msra.gmra.mrb[16].mxu0 %v2820_v32  ;;  %v2899_v32 = vld [vmem:[%s3044_s18 + $0x17c] ss:$56 sps:$4 sm:$0xff]  }
  0x4b   : > { %1930 = vmatpush1.bf16.msra.mxu0 %v2824_v36  ;;  %1839 = vmatprep.mubr.bf16.mxu0 %v2849_v58  ;;  %v2904_v36 = vld [vmem:[%s3044_s18 + $0x180] ss:$56 sps:$4 sm:$0xff]  }
  0x4c   : > { %2570 = vmatpush3.bf16.msra.mxu1 %v2798_v13  ;;  %1931 = vmatprep.subr.bf16.mxu0 %v2929_v34  ;;  %v2872_v13 = vld [vmem:[%s3480_s1 + $0x348] sm:$0xff]  }
  0x4d   : > { %2571 = vmatprep.subr.bf16.mxu1 %v2803_v17  ;;  %v2877_v17 = vld [vmem:[%s3480_s1 + $0x2f8] sm:$0xff]  }
  0x4f   : > { %1645 = vmatmul.mubr.bf16.gmra.mrb[20].mxu1 %v2802_v16  ;;  %1932 = vmatpush1.bf16.msra.mxu0 %v2830_v41  ;;  %v2876_v16 = vld [vmem:[%s3044_s18 + $0x170] ss:$56 sps:$4 sm:$0xff]  }
  0x50   : > { %2572 = vmatpush3.bf16.msra.mxu1 %v2805_v19  ;;  %1652 = vmatprep.mubr.bf16.mxu1 %v2813_v26  ;;  %v2879_v19 = vld [vmem:[%s3480_s1 + $0x2b8] sm:$0xff]  }
  0x51   : > { %2573 = vmatprep.subr.bf16.mxu1 %v2810_v23  ;;  %1933 = vmatprep.subr.bf16.mxu0 %v2929_v34  ;;  %v2884_v23 = vld [vmem:[%s3044_s18 + $0x30] ss:$56 sps:$4 sm:$0xff]   ;;  %v2890_v26 = vld [vmem:[%s3044_s18 + $0xa4] ss:$56 sps:$4 sm:$0xff]  }
  0x52   : > { %1840 = vmatmul.mubr.bf16.gmra.mrb[20].mxu0 %v2852_v60 }
  0x53   : > { %1934 = vmatpush1.bf16.msra.mxu0 %v2833_v44  ;;  %1847 = vmatprep.mubr.bf16.mxu0 %v2861_v4 }
  0x54   : > { %2574 = vmatpush3.bf16.msra.mxu1 %v2812_v25  ;;  %1935 = vmatprep.subr.bf16.mxu0 %v2929_v34  ;;  %v2887_v25 = vld [vmem:[%s3044_s18 + $0x9c] ss:$56 sps:$4 sm:$0xff]  }
  0x55   : > { %2575 = vmatprep.subr.bf16.mxu1 %v2817_v29  ;;  %v2892_v29 = vld [vmem:[%s3044_s18 + $0xa0] ss:$56 sps:$4 sm:$0xff]  }
  0x57   : > { %1653 = vmatmul.mubr.bf16.gmra.mrb[24].mxu1 %v2816_v28  ;;  %1936 = vmatpush1.bf16.msra.mxu0 %v2839_v49  ;;  %v2893_v28 = vld [vmem:[%s3044_s18 + $0x10c] ss:$56 sps:$4 sm:$0xff]  }
  0x58   : > { %2576 = vmatpush3.bf16.msra.mxu1 %v2819_v31  ;;  %1660 = vmatprep.mubr.bf16.mxu1 %v2826_v38  ;;  %v2895_v31 = vld [vmem:[%s3044_s18 + $0x108] ss:$56 sps:$4 sm:$0xff]  }
  0x59   : > { %2577 = vmatprep.subr.bf16.mxu1 %v2823_v35  ;;  %1937 = vmatprep.subr.bf16.mxu0 %v2929_v34  ;;  %v2901_v35 = vld [vmem:[%s3044_s18 + $0x178] ss:$56 sps:$4 sm:$0xff]  }
  0x5a   : > { %1848 = vmatmul.mubr.bf16.gmra.mrb[24].mxu0 %v2864_v6 }
  0x5b   : > { %1938 = vmatpush1.bf16.msra.mxu0 %v2842_v52  ;;  %1855 = vmatprep.mubr.bf16.mxu0 %v2873_v14 }
  0x5c   : > { %2578 = vmatpush3.bf16.msra.mxu1 %v2825_v37  ;;  %1939 = vmatprep.subr.bf16.mxu0 %v2929_v34 }
  0x5d   : > { %2579 = vmatprep.subr.bf16.mxu1 %v2829_v40 }
  0x5f   : > { %1661 = vmatmul.mubr.bf16.gmra.mrb[28].mxu1 %v2828_v39  ;;  %1940 = vmatpush1.bf16.msra.mxu0 %v2848_v57 }
  0x60   : > { %2580 = vmatpush3.bf16.msra.mxu1 %v2831_v42  ;;  %1766 = vmatprep.mubr.bf16.mxu1 %v2837_v47 }
  0x61   : > { %2581 = vmatprep.subr.bf16.mxu1 %v2832_v43  ;;  %1941 = vmatprep.subr.bf16.mxu0 %v2929_v34 }
  0x62   : > { %1856 = vmatmul.mubr.bf16.gmra.mrb[28].mxu0 %v2876_v16 }
  0x63   : > { %1942 = vmatpush1.bf16.msra.mxu0 %v2854_v62  ;;  %2404 = vmatprep.mubr.msk.bf16.mxu0 %vm1526_vm0, %v2886_v24 }
  0x64   : > { %2582 = vmatpush3.bf16.msra.mxu1 %v2834_v45  ;;  %1943 = vmatprep.subr.bf16.mxu0 %v2929_v34 }
  0x65   : > { %2647 = vmatprep.subr.bf16.mxu1 %v2838_v48 }
  0x67   : > { %1767 = vmatmul.mubr.bf16.vlgmr.msra.gmra.mrb[32].mxu1 %v2835_v46  ;;  %1944 = vmatpush1.bf16.msra.mxu0 %v2860_v3 }
  0x68   : > { %2648 = vmatpush3.bf16.msra.mxu1 %v2840_v50  ;;  %1774 = vmatprep.mubr.bf16.mxu1 %v2844_v54 }
  0x69   : > { %2649 = vmatprep.subr.bf16.mxu1 %v2841_v51  ;;  %1945 = vmatprep.subr.bf16.mxu0 %v2929_v34 }
  0x6b   : > { %1946 = vmatpush1.bf16.msra.mxu0 %v2866_v8 }
  0x6c   : > { %2650 = vmatpush3.bf16.msra.mxu1 %v2843_v53  ;;  %1947 = vmatprep.subr.bf16.mxu0 %v2929_v34 }
  0x6d   : > { %2651 = vmatprep.subr.bf16.mxu1 %v2847_v56 }
  0x6f   : > { %1775 = vmatmul.mubr.bf16.gmra.mrb[36].mxu1 %v2846_v55  ;;  %1948 = vmatpush1.bf16.msra.mxu0 %v2872_v13 }
  0x70   : > { %2652 = vmatpush3.bf16.msra.mxu1 %v2851_v59  ;;  %1782 = vmatprep.mubr.bf16.mxu1 %v2856_v0 }
  0x71   : > { %2653 = vmatprep.subr.bf16.mxu1 %v2853_v61  ;;  %1949 = vmatprep.subr.bf16.mxu0 %v2929_v34 }
  0x73   : > { %1950 = vmatpush1.bf16.msra.mxu0 %v2878_v18 }
  0x74   : > { %2654 = vmatpush3.bf16.msra.mxu1 %v2855_v63  ;;  %1951 = vmatprep.subr.bf16.mxu0 %v2929_v34  ;;  %v2902_v34 = vld [vmem:[%s3044_s18 + $0x184] ss:$56 sps:$4 sm:$0xff]   ;;  %s2237_s18 = sshll.u32 %s3490_s7, 2 }
  0x75   : > { %2655 = vmatprep.subr.bf16.mxu1 %v2859_v2  ;;  %s3408_s22 = scalar_lea.vmem %s3483_s4, %s2237_s18  ;;  %s3434_s29 = scalar_lea.vmem %s3484_s5, %s2237_s18 }
  0x77   : > { %1783 = vmatmul.mubr.bf16.gmra.mrb[40].mxu1 %v2858_v1  ;;  %1952 = vmatpush1.bf16.msra.mxu0 %v2883_v22 }
  0x78   : > { %2656 = vmatpush3.bf16.msra.mxu1 %v2863_v5  ;;  %1790 = vmatprep.mubr.bf16.mxu1 %v2868_v10 }
  0x79   : > { %2657 = vmatprep.subr.bf16.mxu1 %v2865_v7 }
  0x7a   : > { %1962 = vmatmul.mubr.bf16.vlgmr.msra.gmra.mrb[32].mxu0 %v2884_v23 }
  0x7b   : > { %2405 = vmatprep.mubr.msk.bf16.mxu0 %vm1526_vm0, %v2890_v26 }
  0x7c   : > { %2658 = vmatpush3.bf16.msra.mxu1 %v2867_v9 }
  0x7d   : > { %2659 = vmatprep.subr.bf16.mxu1 %v2871_v12 }
  0x7f   : > { %1791 = vmatmul.mubr.bf16.gmra.mrb[44].mxu1 %v2870_v11 }
  0x80   : > { %2660 = vmatpush3.bf16.msra.mxu1 %v2875_v15  ;;  %1896 = vmatprep.mubr.bf16.mxu1 %v2882_v21 }
  0x81   : > { %2661 = vmatprep.subr.bf16.mxu1 %v2877_v17 }
  0x82   : > { %1970 = vmatmul.mubr.bf16.gmra.mrb[36].mxu0 %v2892_v29 }
  0x83   : > { %2406 = vmatprep.mubr.msk.bf16.mxu0 %vm1526_vm0, %v2896_v30 }
  0x84   : > { %2662 = vmatpush3.bf16.msra.mxu1 %v2879_v19 }
  0x87   : > { %1897 = vmatmul.mubr.bf16.vlgmr.msra.gmra.mrb[48].mxu1 %v2880_v20 }
  0x88   : > { %1904 = vmatprep.mubr.bf16.mxu1 %v2887_v25 }
  0x8a   : > { %1978 = vmatmul.mubr.bf16.gmra.mrb[40].mxu0 %v2898_v33 }
  0x8b   : > { %2407 = vmatprep.mubr.msk.bf16.mxu0 %vm1526_vm0, %v2902_v34 }
  0x8f   : > { %1905 = vmatmul.mubr.bf16.gmra.mrb[52].mxu1 %v2889_v27 }
  0x90   : > { %1912 = vmatprep.mubr.bf16.mxu1 %v2893_v28 }
  0x92   : > { %1986 = vmatmul.mubr.bf16.gmra.mrb[44].mxu0 %v2904_v36 }
  0x97   : > { %1913 = vmatmul.mubr.bf16.gmra.mrb[56].mxu1 %v2895_v31 }
  0x98   : > { %1920 = vmatprep.mubr.bf16.mxu1 %v2899_v32 }
  0x9f   : > { %1921 = vmatmul.mubr.bf16.gmra.mrb[60].mxu1 %v2901_v35 }
  0xfa   : > { %v2463_v37 = vpop.f32.mrb[0].mxu1 }
  0xfb   : > { %v2464_v38 = vpop.f32.mrb[1].mxu1 }
  0xfc   : > { %v2465_v39 = vadd.f32 %v2464_v38, %v2463_v37  ;;  %v2466_v40 = vpop.f32.mrb[2].mxu1 }
  0xfd   : > { %v2467_v41 = vpop.f32.mrb[3].mxu1  ;;  %v2543_v51 = vpop.f32.mrb[0].mxu0 }
  0xfe   : > { %v2468_v42 = vadd.f32 %v2467_v41, %v2466_v40  ;;  %v2544_v54 = vpop.f32.mrb[1].mxu0 }
  0xff   : > { %v2545_v56 = vadd.f32 %v2544_v54, %v2543_v51  ;;  %v2546_v57 = vpop.f32.mrb[2].mxu0 }
 0x100   : > { %v2547_v59 = vpop.f32.mrb[3].mxu0 }
 0x101   : > { %v2548_v60 = vadd.f32 %v2547_v59, %v2546_v57 }
 0x102   : > { %v2469_v43 = vpop.f32.mrb[4].mxu1 }
 0x103   : > { %v2470_v44 = vpop.f32.mrb[5].mxu1 }
 0x104   : > { %v2471_v45 = vadd.f32 %v2470_v44, %v2469_v43  ;;  %v2472_v46 = vpop.f32.mrb[6].mxu1 }
 0x105   : > { %v2473_v47 = vpop.f32.mrb[7].mxu1  ;;  %v2549_v2 = vpop.f32.mrb[4].mxu0 }
 0x106   : > { %v2474_v48 = vadd.f32 %v2473_v47, %v2472_v46  ;;  %v2550_v4 = vpop.f32.mrb[5].mxu0 }
 0x107   : > { %v2551_v5 = vadd.f32 %v2550_v4, %v2549_v2  ;;  %v2552_v6 = vpop.f32.mrb[6].mxu0 }
 0x108   : > { %v2553_v7 = vpop.f32.mrb[7].mxu0 }
 0x109   : > { %v2554_v8 = vadd.f32 %v2553_v7, %v2552_v6 }
 0x10a   : > { %v2475_v49 = vpop.f32.mrb[8].mxu1 }
 0x10b   : > { %v2476_v50 = vpop.f32.mrb[9].mxu1 }
 0x10c   : > { %v2477_v52 = vadd.f32 %v2476_v50, %v2475_v49  ;;  %v2478_v53 = vpop.f32.mrb[10].mxu1 }
 0x10d   : > { %v2479_v55 = vpop.f32.mrb[11].mxu1  ;;  %v2555_v16 = vpop.f32.mrb[8].mxu0 }
 0x10e   : > { %v2480_v58 = vadd.f32 %v2479_v55, %v2478_v53  ;;  %v2556_v18 = vpop.f32.mrb[9].mxu0 }
 0x10f   : > { %v2557_v20 = vadd.f32 %v2556_v18, %v2555_v16  ;;  %v2558_v21 = vpop.f32.mrb[10].mxu0 }
 0x110   : > { %v2559_v22 = vpop.f32.mrb[11].mxu0 }
 0x111   : > { %v2560_v24 = vadd.f32 %v2559_v22, %v2558_v21 }
 0x112   : > { %v2481_v61 = vpop.f32.mrb[12].mxu1 }
 0x113   : > { %v2482_v62 = vpop.f32.mrb[13].mxu1 }
 0x114   : > { %v3385_v63 = vadd.f32 %v2482_v62, %v2481_v61  ;;  %v2484_v0 = vpop.f32.mrb[14].mxu1 }
 0x115   : > { %v2485_v1 = vpop.f32.mrb[15].mxu1  ;;  %v2561_v33 = vpop.f32.mrb[12].mxu0 }
 0x116   : > { %v2486_v3 = vadd.f32 %v2485_v1, %v2484_v0  ;;  %v2562_v35 = vpop.f32.mrb[13].mxu0 }
 0x117   : > { %v2563_v36 = vadd.f32 %v2562_v35, %v2561_v33  ;;  %v2564_v37 = vpop.f32.mrb[14].mxu0 }
 0x11a   : > { %v2503_v9 = vpop.f32.mrb[16].mxu1 }
 0x11b   : > { %v2504_v10 = vpop.f32.mrb[17].mxu1 }
 0x11c   : > { %v2505_v11 = vadd.f32 %v2504_v10, %v2503_v9  ;;  %v2506_v12 = vpop.f32.mrb[18].mxu1 }
 0x11d   : > { %v2507_v13 = vpop.f32.mrb[19].mxu1 }
 0x11e   : > { %v1639_v14 = vadd.f32 %v2505_v11, %v2465_v39  ;;  %v2508_v15 = vadd.f32 %v2507_v13, %v2506_v12  ;;  %v2565_v39 = vpop.f32.mrb[15].mxu0 }
 0x11f   : > { %v2566_v40 = vadd.f32 %v2565_v39, %v2564_v37  ;;  %v2623_v50 = vpop.f32.mrb[16].mxu0 }
 0x120   : > { %v1642_v17 = vadd.f32 %v2508_v15, %v2468_v42  ;;  %v1704_v19 = vadd.f32 %v2545_v56, %v1639_v14 }
 0x122   : > { %v1707_v23 = vadd.f32 %v2548_v60, %v1642_v17  ;;  %v2509_v25 = vpop.f32.mrb[20].mxu1 }
 0x123   : > { %v2510_v26 = vpop.f32.mrb[21].mxu1 }
 0x124   : > { %v2511_v27 = vadd.f32 %v2510_v26, %v2509_v25  ;;  %v2512_v28 = vpop.f32.mrb[22].mxu1 }
 0x125   : > { %v2513_v29 = vpop.f32.mrb[23].mxu1 }
 0x126   : > { %v1647_v30 = vadd.f32 %v2511_v27, %v2471_v45  ;;  %v2514_v31 = vadd.f32 %v2513_v29, %v2512_v28  ;;  %v2624_v45 = vpop.f32.mrb[17].mxu0 }
 0x127   : > { %v2626_v54 = vpop.f32.mrb[18].mxu0 }
 0x128   : > { %v1650_v32 = vadd.f32 %v2514_v31, %v2474_v48  ;;  %v1712_v34 = vadd.f32 %v2551_v5, %v1647_v30  ;;  %v2625_v48 = vadd.f32 %v2624_v45, %v2623_v50  ;;  %v2627_v55 = vpop.f32.mrb[19].mxu0 }
 0x129   : > { %v2628_v57 = vadd.f32 %v2627_v55, %v2626_v54  ;;  %v2629_v17 = vpop.f32.mrb[20].mxu0 }
 0x12a   : > { %v1715_v38 = vadd.f32 %v2554_v8, %v1650_v32  ;;  %v2515_v41 = vpop.f32.mrb[24].mxu1 }
 0x12b   : > { %v2516_v42 = vpop.f32.mrb[25].mxu1 }
 0x12c   : > { %v2517_v43 = vadd.f32 %v2516_v42, %v2515_v41  ;;  %v2518_v44 = vpop.f32.mrb[26].mxu1 }
 0x12d   : > { %v2519_v46 = vpop.f32.mrb[27].mxu1 }
 0x12e   : > { %v1655_v47 = vadd.f32 %v2517_v43, %v2477_v52  ;;  %v2520_v49 = vadd.f32 %v2519_v46, %v2518_v44 }
 0x130   : > { %v1658_v51 = vadd.f32 %v2520_v49, %v2480_v58  ;;  %v1720_v53 = vadd.f32 %v2557_v20, %v1655_v47  ;;  %v2630_v20 = vpop.f32.mrb[21].mxu0 }
 0x131   : > { %v2631_v21 = vadd.f32 %v2630_v20, %v2629_v17  ;;  %v2632_v22 = vpop.f32.mrb[22].mxu0 }
 0x132   : > { %v1723_v56 = vadd.f32 %v2560_v24, %v1658_v51  ;;  %v2521_v59 = vpop.f32.mrb[28].mxu1  ;;  %v2633_v26 = vpop.f32.mrb[23].mxu0 }
 0x133   : > { %v2522_v60 = vpop.f32.mrb[29].mxu1  ;;  %v2634_v27 = vadd.f32 %v2633_v26, %v2632_v22  ;;  %v2635_v33 = vpop.f32.mrb[24].mxu0 }
 0x134   : > { %v2523_v61 = vadd.f32 %v2522_v60, %v2521_v59  ;;  %v2524_v62 = vpop.f32.mrb[30].mxu1 }
 0x135   : > { %v2525_v0 = vpop.f32.mrb[31].mxu1 }
 0x136   : > { %v1663_v1 = vadd.f32 %v2523_v61, %v3385_v63  ;;  %v2526_v2 = vadd.f32 %v2525_v0, %v2524_v62 }
 0x138   : > { %v1666_v4 = vadd.f32 %v2526_v2, %v2486_v3  ;;  %v1728_v52 = vadd.f32 %v2563_v36, %v1663_v1  ;;  %v2636_v36 = vpop.f32.mrb[25].mxu0 }
 0x139   : > { %v2638_v41 = vpop.f32.mrb[26].mxu0 }
 0x13a   : > { %v1731_v5 = vadd.f32 %v2566_v40, %v1666_v4  ;;  %v2583_v6 = vpop.f32.mrb[32].mxu1  ;;  %v2637_v40 = vadd.f32 %v2636_v36, %v2635_v33 }
 0x13b   : > { %v2584_v58 = vpop.f32.mrb[33].mxu1 }
 0x13c   : > { %v2585_v7 = vadd.f32 %v2584_v58, %v2583_v6  ;;  %v2586_v8 = vpop.f32.mrb[34].mxu1 }
 0x13d   : > { %v2587_v9 = vpop.f32.mrb[35].mxu1 }
 0x13e   : > { %v1769_v10 = vadd.f32 %v2585_v7, %v1704_v19  ;;  %v2588_v11 = vadd.f32 %v2587_v9, %v2586_v8  ;;  %v3413_v9 = vld [vmem:[%s3481_s2] ss:$0 sm:$0xff] }
 0x140   : > { %v1772_v12 = vadd.f32 %v2588_v11, %v1707_v23  ;;  %v1834_v13 = vadd.f32 %v2625_v48, %v1769_v10  ;;  %v2429_v10 = vld [vmem:[%s3408_s22] sm:$0xff]  }
 0x141   : > { %v2431_v22 = vunpack.c.h.bf16 %v2429_v10 }
 0x142   : > { %v2589_v14 = vpop.f32.mrb[36].mxu1  ;;  %v3388_v15 = vadd.f32 %v2628_v57, %v1772_v12 }
 0x143   : > { %v2590_v16 = vpop.f32.mrb[37].mxu1 }
 0x144   : > { %v2591_v18 = vadd.f32 %v2590_v16, %v2589_v14  ;;  %v2592_v63 = vpop.f32.mrb[38].mxu1  ;;  %v3420_v16 = vld [vmem:[%s3482_s3] ss:$0 sm:$0xff] }
 0x145   : > { %v2593_v3 = vpop.f32.mrb[39].mxu1 }
 0x146   : > { %v1777_v24 = vadd.f32 %v2591_v18, %v1712_v34  ;;  %v2594_v25 = vadd.f32 %v2593_v3, %v2592_v63  ;;  %v2639_v34 = vpop.f32.mrb[27].mxu0  ;;  %v2430_v18 = vunpack.c.l.bf16 %v2429_v10 }
 0x147   : > { %v2641_v51 = vpop.f32.mrb[28].mxu0 }
 0x148   : > { %v1780_v28 = vadd.f32 %v2594_v25, %v1715_v38  ;;  %v3390_v19 = vadd.f32 %v2631_v21, %v1777_v24  ;;  %v2640_v38 = vadd.f32 %v2639_v34, %v2638_v41  ;;  %v2642_v48 = vpop.f32.mrb[29].mxu0 }
 0x149   : > { %v2643_v55 = vadd.f32 %v2642_v48, %v2641_v51  ;;  %v2644_v57 = vpop.f32.mrb[30].mxu0 }
 0x14a   : > { %v3392_v23 = vadd.f32 %v2634_v27, %v1780_v28  ;;  %v2595_v29 = vpop.f32.mrb[40].mxu1  ;;  %v2645_v59 = vpop.f32.mrb[31].mxu0 }
 0x14b   : > { %v2596_v30 = vpop.f32.mrb[41].mxu1  ;;  %v2646_v61 = vadd.f32 %v2645_v59, %v2644_v57 }
 0x14c   : > { %v2597_v31 = vadd.f32 %v2596_v30, %v2595_v29  ;;  %v2598_v32 = vpop.f32.mrb[42].mxu1 }
 0x14d   : > { %v2599_v35 = vpop.f32.mrb[43].mxu1 }
 0x14e   : > { %v1785_v37 = vadd.f32 %v2597_v31, %v1720_v53  ;;  %v2600_v39 = vadd.f32 %v2599_v35, %v2598_v32  ;;  %v2444_v32 = vld [vmem:[%s3408_s22 + $0x8] sm:$0xff]  }
 0x14f   : > { %v2434_v41 = vunpack.c.l.bf16 %v2444_v32 }
 0x150   : > { %v1788_v42 = vadd.f32 %v2600_v39, %v1723_v56  ;;  %v3394_v43 = vadd.f32 %v2637_v40, %v1785_v37 }
 0x152   : > { %v3396_v44 = vadd.f32 %v2640_v38, %v1788_v42  ;;  %v2601_v46 = vpop.f32.mrb[44].mxu1 }
 0x153   : > { %v2602_v47 = vpop.f32.mrb[45].mxu1 }
 0x154   : > { %v2603_v49 = vadd.f32 %v2602_v47, %v2601_v46  ;;  %v2604_v50 = vpop.f32.mrb[46].mxu1  ;;  %v2435_v47 = vunpack.c.h.bf16 %v2444_v32 }
 0x155   : > { %v2605_v45 = vpop.f32.mrb[47].mxu1 }
 0x156   : > { %v1793_v53 = vadd.f32 %v2603_v49, %v1728_v52  ;;  %v2606_v54 = vadd.f32 %v2605_v45, %v2604_v50  ;;  %v1963_v52 = vpop.f32.mrb[32].mxu0 }
 0x158   : > { %v1796_v56 = vadd.f32 %v2606_v54, %v1731_v5  ;;  %v3398_v60 = vadd.f32 %v2643_v55, %v1793_v53  ;;  %v1965_v5 = vpop.f32.mrb[33].mxu0 }
 0x159   : > { %v1966_v8 = vpop.f32.mrb[34].mxu0 }
 0x15a   : > { %v3400_v62 = vadd.f32 %v2646_v61, %v1796_v56  ;;  %v2663_v0 = vpop.f32.mrb[48].mxu1  ;;  %v1968_v11 = vpop.f32.mrb[35].mxu0 }
 0x15b   : > { %v2664_v1 = vpop.f32.mrb[49].mxu1  ;;  %v1971_v25 = vpop.f32.mrb[36].mxu0 }
 0x15c   : > { %v2665_v2 = vadd.f32 %v2664_v1, %v2663_v0  ;;  %v2666_v4 = vpop.f32.mrb[50].mxu1  ;;  %v1973_v27 = vpop.f32.mrb[37].mxu0  ;;  %v2445_v0 = vld [vmem:[%s3408_s22 + $0x10] sm:$0xff]  }
 0x15d   : > { %v2667_v6 = vpop.f32.mrb[51].mxu1  ;;  %v1974_v33 = vpop.f32.mrb[38].mxu0 }
 0x15e   : > { %v2668_v58 = vadd.f32 %v2667_v6, %v2666_v4  ;;  %v1899_v7 = vadd.f32 %v2665_v2, %v1834_v13  ;;  %v1976_v35 = vpop.f32.mrb[39].mxu0 }
 0x15f   : > { %v1979_v53 = vpop.f32.mrb[40].mxu0 }
 0x160   : > { %v1964_v12 = vadd.f32 %v1963_v52, %v1899_v7  ;;  %v1902_v14 = vadd.f32 %v2668_v58, %v3388_v15  ;;  %v1981_v55 = vpop.f32.mrb[41].mxu0  ;;  %v2438_v58 = vunpack.c.l.bf16 %v2445_v0 }
 0x161   : > { %v1982_v1 = vpop.f32.mrb[42].mxu0 }
 0x162   : > { %v2001_v17 = vmul.f32 %v3413_v9, %v1964_v12  ;;  %v1967_v13 = vadd.f32 %v1966_v8, %v1902_v14  ;;  %v2669_v63 = vpop.f32.mrb[52].mxu1  ;;  %v1984_v2 = vpop.f32.mrb[43].mxu0  ;;  %v2439_v14 = vunpack.c.h.bf16 %v2445_v0 }
 0x163   : > { %v2670_v20 = vpop.f32.mrb[53].mxu1 }
 0x164   : > { %v2016_v3 = vadd.f32 %v3420_v16, %v2001_v17  ;;  %v2002_v21 = vmul.f32 %v3413_v9, %v1967_v13  ;;  %v2671_v24 = vadd.f32 %v2670_v20, %v2669_v63  ;;  %v2672_v15 = vpop.f32.mrb[54].mxu1 }
 0x165   : > { %v2673_v26 = vpop.f32.mrb[55].mxu1  ;;  %v1987_v20 = vpop.f32.mrb[44].mxu0 }
 0x166   : > { %v2040_v28 = vadd.f32 %v2430_v18, %v2016_v3  ;;  %v2017_v29 = vadd.f32 %v3420_v16, %v2002_v21  ;;  %v2674_v30 = vadd.f32 %v2673_v26, %v2672_v15  ;;  %v1907_v31 = vadd.f32 %v2671_v24, %v3390_v19  ;;  %v1989_v21 = vpop.f32.mrb[45].mxu0  ;;  %v2446_v26 = vld [vmem:[%s3408_s22 + $0x18] sm:$0xff]  }
 0x167   : > { %v1990_v27 = vpop.f32.mrb[46].mxu0 }
 0x168   : > { %v2048_v36 = vmax.f32 %v2040_v28, 0.0  ;;  %v2041_v37 = vadd.f32 %v2431_v22, %v2017_v29  ;;  %v1972_v39 = vadd.f32 %v1971_v25, %v1907_v31  ;;  %v1910_v40 = vadd.f32 %v2674_v30, %v3392_v23  ;;  %v1992_v28 = vpop.f32.mrb[47].mxu0 }
 0x16a   : > { %v2420_v34 = vpack.c.bf16 %v2048_v36, %v2048_v36  ;;  %v2049_v19 = vmax.f32 %v2041_v37, 0.0  ;;  %v2003_v42 = vmul.f32 %v3413_v9, %v1972_v39  ;;  %v1975_v38 = vadd.f32 %v1974_v33, %v1910_v40  ;;  %v2675_v46 = vpop.f32.mrb[56].mxu1 }
 0x16b   : > { %v2676_v49 = vpop.f32.mrb[57].mxu1  ;;  %v2442_v33 = vunpack.c.l.bf16 %v2446_v26 }
 0x16c   : > { %2089 = vst.msk [vmem:[%s3434_s29] sm:$0xf] %vm2088_vm1, %v2420_v34  ;;  %v2421_v23 = vpack.c.bf16 %v2049_v19, %v2049_v19  ;;  %v2018_v50 = vadd.f32 %v3420_v16, %v2003_v42  ;;  %v2004_v51 = vmul.f32 %v3413_v9, %v1975_v38  ;;  %v2677_v45 = vadd.f32 %v2676_v49, %v2675_v46  ;;  %v2678_v48 = vpop.f32.mrb[58].mxu1 }
 0x16d   : > { %v2679_v54 = vpop.f32.mrb[59].mxu1  ;;  %v2443_v34 = vunpack.c.h.bf16 %v2446_v26 }
 0x16e   : > { %2090 = vst.msk [vmem:[%s3434_s29 + $0x4] sm:$0xf] %vm2088_vm1, %v2421_v23  ;;  %v2042_v57 = vadd.f32 %v2434_v41, %v2018_v50  ;;  %v2019_v59 = vadd.f32 %v3420_v16, %v2004_v51  ;;  %v2680_v56 = vadd.f32 %v2679_v54, %v2678_v48  ;;  %v1915_v61 = vadd.f32 %v2677_v45, %v3394_v43 }
 0x170   : > { %v2050_v4 = vmax.f32 %v2042_v57, 0.0  ;;  %v2043_v52 = vadd.f32 %v2435_v47, %v2019_v59  ;;  %v1980_v6 = vadd.f32 %v1979_v53, %v1915_v61  ;;  %v1918_v5 = vadd.f32 %v2680_v56, %v3396_v44 }
 0x172   : > { %v2422_v7 = vpack.c.bf16 %v2050_v4, %v2050_v4  ;;  %v2051_v8 = vmax.f32 %v2043_v52, 0.0  ;;  %v2005_v10 = vmul.f32 %v3413_v9, %v1980_v6  ;;  %v1983_v11 = vadd.f32 %v1982_v1, %v1918_v5  ;;  %v2681_v12 = vpop.f32.mrb[60].mxu1 }
 0x173   : > { %v2682_v43 = vpop.f32.mrb[61].mxu1 }
 0x174   : > { %2091 = vst.msk [vmem:[%s3434_s29 + $0x8] sm:$0xf] %vm2088_vm1, %v2422_v7  ;;  %v2423_v17 = vpack.c.bf16 %v2051_v8, %v2051_v8  ;;  %v2020_v18 = vadd.f32 %v3420_v16, %v2005_v10  ;;  %v2006_v13 = vmul.f32 %v3413_v9, %v1983_v11  ;;  %v2683_v63 = vadd.f32 %v2682_v43, %v2681_v12  ;;  %v2684_v44 = vpop.f32.mrb[62].mxu1 }
 0x175   : > { %v2685_v3 = vpop.f32.mrb[63].mxu1 }
 0x176   : > { %2092 = vst.msk [vmem:[%s3434_s29 + $0xc] sm:$0xf] %vm2088_vm1, %v2423_v17  ;;  %v2044_v22 = vadd.f32 %v2438_v58, %v2020_v18  ;;  %v2021_v24 = vadd.f32 %v3420_v16, %v2006_v13  ;;  %v2686_v15 = vadd.f32 %v2685_v3, %v2684_v44  ;;  %v1923_v25 = vadd.f32 %v2683_v63, %v3398_v60 }
 0x178   : > { %v2052_v29 = vmax.f32 %v2044_v22, 0.0  ;;  %v2045_v30 = vadd.f32 %v2439_v14, %v2021_v24  ;;  %v1988_v31 = vadd.f32 %v1987_v20, %v1923_v25  ;;  %v1926_v32 = vadd.f32 %v2686_v15, %v3400_v62 }
 0x17a   : > { %v2424_v35 = vpack.c.bf16 %v2052_v29, %v2052_v29  ;;  %v2053_v36 = vmax.f32 %v2045_v30, 0.0  ;;  %v2007_v37 = vmul.f32 %v3413_v9, %v1988_v31  ;;  %v1991_v39 = vadd.f32 %v1990_v27, %v1926_v32 }
 0x17c   : > { %2093 = vst.msk [vmem:[%s3434_s29 + $0x10] sm:$0xf] %vm2088_vm1, %v2424_v35  ;;  %v2425_v60 = vpack.c.bf16 %v2053_v36, %v2053_v36  ;;  %v2022_v40 = vadd.f32 %v3420_v16, %v2007_v37  ;;  %v2008_v41 = vmul.f32 %v3413_v9, %v1991_v39 }
 0x17e   : > { %2094 = vst.msk [vmem:[%s3434_s29 + $0x14] sm:$0xf] %vm2088_vm1, %v2425_v60  ;;  %v2046_v19 = vadd.f32 %v2442_v33, %v2022_v40  ;;  %v2023_v62 = vadd.f32 %v3420_v16, %v2008_v41 }
 0x180   : > { %v2054_v42 = vmax.f32 %v2046_v19, 0.0  ;;  %v2047_v38 = vadd.f32 %v2443_v34, %v2023_v62 }
 0x182   : > { %v2426_v46 = vpack.c.bf16 %v2054_v42, %v2054_v42  ;;  %v2055_v47 = vmax.f32 %v2047_v38, 0.0 }
 0x184   : > { %2095 = vst.msk [vmem:[%s3434_s29 + $0x18] sm:$0xf] %vm2088_vm1, %v2426_v46  ;;  %v2427_v49 = vpack.c.bf16 %v2055_v47, %v2055_v47 }
 0x186   : > { %2096 = vst.msk [vmem:[%s3434_s29 + $0x1c] sm:$0xf] %vm2088_vm1, %v2427_v49 }
 0x187 PF: > { %s15_s20 = sadd.s32 1, %s2927_s20   ;;  %s3485_s18 = smov %s2923_s19 }
 0x188   : > { %p12_p5 = scmp.ge.s32.totalorder %s15_s20, 4   ;;  %s3486_s19 = smov %s3488_s21 }
 0x18a   :  { %14 = sbr.rel (!%p12_p5) target bundleno = 2 (0x2), region = 82 }

// kernel: rasternet_forward.15
= control target key start
LH: loop header
LB: loop body
LE: loop exit
PB: predicated region body
PF: predicated region fallthrough
CT: control target
= control target key end

     0   :  { %vm965_vm0 = vcmask 523264   ;;  %s2099_s1 = inlined_call_operand.vmem [shape: bf16[1728,128], index: 1, kind: input, shape index: {}]   ;;  %s2100_s0 = inlined_call_operand.vmem [shape: bf16[16,1728], index: 0, kind: input, shape index: {}]   ;;  %s2101_s2 = inlined_call_operand.vmem [shape: f32[1,128], index: 2, kind: input, shape index: {}]   ;;  %s2102_s3 = inlined_call_operand.vmem [shape: f32[1,128], index: 3, kind: input, shape index: {}]   ;;  %s2103_s4 = inlined_call_operand.vmem [shape: bf16[16,128], index: 4, kind: output, shape index: {}]  }
   0x1   :  { %v1557_v0 = vld [vmem:[%s2099_s1 + $0x40] sm:$0xff]   ;;  %v1559_v2 = vld [vmem:[%s2099_s1 + $0x48] sm:$0xff]   ;;  %v1561_v4 = vld [vmem:[%s2099_s1 + $0x50] sm:$0xff]  }
   0x2   :  { %v1558_v1 = vld [vmem:[%s2099_s1] sm:$0xff]   ;;  %1424 = vmatprep.subr.bf16.mxu1 %v1557_v0  ;;  %v1560_v3 = vld [vmem:[%s2099_s1 + $0x8] sm:$0xff]   ;;  %v1562_v5 = vld [vmem:[%s2099_s1 + $0x10] sm:$0xff]  }
   0x3   :  { %1425 = vmatpush3.bf16.msra.mxu1 %v1558_v1  ;;  %v1563_v6 = vld [vmem:[%s2099_s1 + $0x58] sm:$0xff]   ;;  %v1567_v8 = vld [vmem:[%s2099_s1 + $0x140] sm:$0xff]   ;;  %v1571_v12 = vld [vmem:[%s2099_s1 + $0x148] sm:$0xff]  }
   0x4   :  { %1426 = vmatprep.subr.bf16.mxu1 %v1559_v2  ;;  %v1564_v7 = vld [vmem:[%s2099_s1 + $0x18] sm:$0xff]   ;;  %v1568_v9 = vld [vmem:[%s2099_s1 + $0x100] sm:$0xff]   ;;  %1468 = vmatprep.subr.bf16.mxu0 %v1567_v8  ;;  %v1572_v13 = vld [vmem:[%s2099_s1 + $0x108] sm:$0xff]  }
   0x5   :  { %v1565_v10 = vld [vmem:[%s2099_s1 + $0x60] sm:$0xff]   ;;  %1469 = vmatpush3.bf16.msra.mxu0 %v1568_v9  ;;  %v1569_v14 = vld [vmem:[%s2099_s1 + $0x68] sm:$0xff]   ;;  %v1575_v16 = vld [vmem:[%s2099_s1 + $0x150] sm:$0xff]  }
   0x6   :  { %v1566_v11 = vld [vmem:[%s2099_s1 + $0x20] sm:$0xff]   ;;  %1470 = vmatprep.subr.bf16.mxu0 %v1571_v12  ;;  %v1570_v15 = vld [vmem:[%s2099_s1 + $0x28] sm:$0xff]   ;;  %v1576_v17 = vld [vmem:[%s2099_s1 + $0x110] sm:$0xff]  }
   0x7   :  { %1427 = vmatpush3.bf16.msra.mxu1 %v1560_v3  ;;  %v1573_v18 = vld [vmem:[%s2099_s1 + $0x70] sm:$0xff]   ;;  %v1579_v20 = vld [vmem:[%s2099_s1 + $0x158] sm:$0xff]   ;;  %v1584_v25 = vld [vmem:[%s2099_s1 + $0xc0] sm:$0xff]  }
   0x8   :  { %1428 = vmatprep.subr.bf16.mxu1 %v1561_v4  ;;  %v1574_v19 = vld [vmem:[%s2099_s1 + $0x30] sm:$0xff]   ;;  %v1577_v21 = vld [vmem:[%s2099_s1 + $0x78] sm:$0xff]   ;;  %v1586_v27 = vld [vmem:[%s2099_s1 + $0x160] sm:$0xff]  }
   0x9   :  { %1471 = vmatpush3.bf16.msra.mxu0 %v1572_v13  ;;  %v1582_v22 = vld [vmem:[%s2100_s0 + $0x4] ss:$56 sps:$4 sm:$0xff]   ;;  %v1580_v26 = vld [vmem:[%s2100_s0] ss:$56 sps:$4 sm:$0xff]   ;;  %v1588_v30 = vld [vmem:[%s2099_s1 + $0xc8] sm:$0xff]  }
   0xa   :  { %1472 = vmatprep.subr.bf16.mxu0 %v1575_v16  ;;  %v1583_v23 = vld [vmem:[%s2099_s1 + $0x118] sm:$0xff]   ;;  %1001 = vmatprep.mubr.bf16.mxu1 %v1582_v22  ;;  %v1587_v28 = vld [vmem:[%s2099_s1 + $0x120] sm:$0xff]   ;;  %v1590_v31 = vld [vmem:[%s2099_s1 + $0x168] sm:$0xff]  }
   0xb   :  { %1429 = vmatpush3.bf16.msra.mxu1 %v1562_v5  ;;  %v1578_v24 = vld [vmem:[%s2099_s1 + $0x38] sm:$0xff]   ;;  %v1585_v29 = vld [vmem:[%s2099_s1 + $0x80] sm:$0xff]   ;;  %v1591_v32 = vld [vmem:[%s2099_s1 + $0x128] sm:$0xff]  }
   0xc   :  { %1430 = vmatprep.subr.bf16.mxu1 %v1563_v6  ;;  %v1589_v33 = vld [vmem:[%s2099_s1 + $0x88] sm:$0xff]   ;;  %v1592_v34 = vld [vmem:[%s2099_s1 + $0xd0] sm:$0xff]   ;;  %v1596_v38 = vld [vmem:[%s2099_s1 + $0xd8] sm:$0xff]  }
   0xd   :  { %1473 = vmatpush3.bf16.msra.mxu0 %v1576_v17  ;;  %v1594_v35 = vld [vmem:[%s2099_s1 + $0x170] sm:$0xff]   ;;  %v1598_v39 = vld [vmem:[%s2099_s1 + $0x178] sm:$0xff]   ;;  %v1600_v42 = vld [vmem:[%s2099_s1 + $0xe0] sm:$0xff]   ;;  %v1686_v17 = vmov 0  }
   0xe   :  { %1474 = vmatprep.subr.bf16.mxu0 %v1579_v20  ;;  %v1595_v36 = vld [vmem:[%s2099_s1 + $0x130] sm:$0xff]   ;;  %v1599_v40 = vld [vmem:[%s2099_s1 + $0x138] sm:$0xff]   ;;  %v1605_v45 = vld [vmem:[%s2099_s1 + $0x240] sm:$0xff]  }
   0xf   :  { %1431 = vmatpush3.bf16.msra.mxu1 %v1564_v7  ;;  %v1593_v37 = vld [vmem:[%s2099_s1 + $0x90] sm:$0xff]   ;;  %v1597_v41 = vld [vmem:[%s2099_s1 + $0x98] sm:$0xff]   ;;  %v1606_v46 = vld [vmem:[%s2099_s1 + $0x200] sm:$0xff]  }
  0x10   :  { %1432 = vmatprep.subr.bf16.mxu1 %v1565_v10  ;;  %v1602_v43 = vld [vmem:[%s2100_s0 + $0x10] ss:$56 sps:$4 sm:$0xff]   ;;  %v1604_v44 = vld [vmem:[%s2100_s0 + $0x14] ss:$56 sps:$4 sm:$0xff]   ;;  %v1601_v47 = vld [vmem:[%s2099_s1 + $0xa0] sm:$0xff]  }
  0x11   :  { %1475 = vmatpush3.bf16.msra.mxu0 %v1583_v23  ;;  %1083 = vmatprep.mubr.bf16.mxu0 %v1604_v44  ;;  %v1607_v48 = vld [vmem:[%s2099_s1 + $0xe8] sm:$0xff]   ;;  %v1611_v52 = vld [vmem:[%s2099_s1 + $0xf0] sm:$0xff]   ;;  %v1615_v56 = vld [vmem:[%s2099_s1 + $0xf8] sm:$0xff]  }
  0x12   :  { %1476 = vmatprep.subr.bf16.mxu0 %v1586_v27  ;;  %v1609_v49 = vld [vmem:[%s2099_s1 + $0x248] sm:$0xff]   ;;  %v1613_v53 = vld [vmem:[%s2099_s1 + $0x250] sm:$0xff]   ;;  %v1617_v57 = vld [vmem:[%s2099_s1 + $0x258] sm:$0xff]  }
  0x13   :  { %1433 = vmatpush3.bf16.msra.mxu1 %v1566_v11  ;;  %v1610_v50 = vld [vmem:[%s2099_s1 + $0x208] sm:$0xff]   ;;  %v1614_v54 = vld [vmem:[%s2099_s1 + $0x210] sm:$0xff]   ;;  %v1616_v58 = vld [vmem:[%s2099_s1 + $0xb8] sm:$0xff]  }
  0x14   :  { %1434 = vmatprep.subr.bf16.mxu1 %v1569_v14  ;;  %v1608_v51 = vld [vmem:[%s2099_s1 + $0xa8] sm:$0xff]   ;;  %v1612_v55 = vld [vmem:[%s2099_s1 + $0xb0] sm:$0xff]   ;;  %v1621_v60 = vld [vmem:[%s2099_s1 + $0x218] sm:$0xff]  }
  0x15   :  { %1477 = vmatpush3.bf16.msra.mxu0 %v1587_v28  ;;  %v1620_v59 = vld [vmem:[%s2100_s0 + $0xc] ss:$56 sps:$4 sm:$0xff]   ;;  %v1618_v61 = vld [vmem:[%s2100_s0 + $0x8] ss:$56 sps:$4 sm:$0xff]   ;;  %v1630_v6 = vld [vmem:[%s2099_s1 + $0x1d0] sm:$0xff]  }
  0x16   :  { %1478 = vmatprep.subr.bf16.mxu0 %v1590_v31  ;;  %v1622_v62 = vld [vmem:[%s2099_s1 + $0x1c0] sm:$0xff]   ;;  %v1626_v2 = vld [vmem:[%s2099_s1 + $0x1c8] sm:$0xff]   ;;  %v1631_v7 = vld [vmem:[%s2099_s1 + $0x190] sm:$0xff]  }
  0x17   :  { %1435 = vmatpush3.bf16.msra.mxu1 %v1570_v15  ;;  %v1623_v63 = vld [vmem:[%s2099_s1 + $0x180] sm:$0xff]   ;;  %v1627_v3 = vld [vmem:[%s2099_s1 + $0x188] sm:$0xff]   ;;  %v1632_v8 = vld [vmem:[%s2099_s1 + $0x270] sm:$0xff]  }
  0x18   :  { %1436 = vmatprep.subr.bf16.mxu1 %v1573_v18  ;;  %v1624_v0 = vld [vmem:[%s2099_s1 + $0x260] sm:$0xff]   ;;  %v1628_v4 = vld [vmem:[%s2099_s1 + $0x268] sm:$0xff]   ;;  %v1633_v9 = vld [vmem:[%s2099_s1 + $0x230] sm:$0xff]  }
  0x19   :  { %1479 = vmatpush3.bf16.msra.mxu0 %v1591_v32  ;;  %v1625_v1 = vld [vmem:[%s2099_s1 + $0x220] sm:$0xff]   ;;  %v1629_v5 = vld [vmem:[%s2099_s1 + $0x228] sm:$0xff]   ;;  %v1634_v10 = vld [vmem:[%s2099_s1 + $0x1d8] sm:$0xff]  }
  0x1a   :  { %1480 = vmatprep.subr.bf16.mxu0 %v1594_v35  ;;  %v1635_v11 = vld [vmem:[%s2099_s1 + $0x198] sm:$0xff]   ;;  %v1638_v14 = vld [vmem:[%s2099_s1 + $0x1e0] sm:$0xff]   ;;  %v1644_v20 = vld [vmem:[%s2099_s1 + $0x1e8] sm:$0xff]  }
  0x1b   :  { %1437 = vmatpush3.bf16.msra.mxu1 %v1574_v19  ;;  %v1636_v12 = vld [vmem:[%s2099_s1 + $0x278] sm:$0xff]   ;;  %v1639_v15 = vld [vmem:[%s2099_s1 + $0x1a0] sm:$0xff]   ;;  %v1646_v22 = vld [vmem:[%s2099_s1 + $0x308] sm:$0xff]  }
  0x1c   :  { %1438 = vmatprep.subr.bf16.mxu1 %v1577_v21  ;;  %v1637_v13 = vld [vmem:[%s2099_s1 + $0x238] sm:$0xff]   ;;  %v1643_v19 = vld [vmem:[%s2099_s1 + $0x300] sm:$0xff]   ;;  %v1645_v21 = vld [vmem:[%s2099_s1 + $0x1a8] sm:$0xff]  }
  0x1d   :  { %1481 = vmatpush3.bf16.msra.mxu0 %v1595_v36  ;;  %v1640_v16 = vld [vmem:[%s2100_s0 + $0x20] ss:$56 sps:$4 sm:$0xff]   ;;  %v1642_v18 = vld [vmem:[%s2100_s0 + $0x24] ss:$56 sps:$4 sm:$0xff]   ;;  %v1647_v23 = vld [vmem:[%s2099_s1 + $0x1f0] sm:$0xff]  }
  0x1e   :  { %1482 = vmatprep.subr.bf16.mxu0 %v1598_v39  ;;  %v1654_v27 = vld [vmem:[%s2100_s0 + $0x1c] ss:$56 sps:$4 sm:$0xff]   ;;  %v1652_v31 = vld [vmem:[%s2100_s0 + $0x18] ss:$56 sps:$4 sm:$0xff]   ;;  %v1657_v32 = vld [vmem:[%s2099_s1 + $0x280] sm:$0xff]  }
  0x1f   :  { %1439 = vmatpush3.bf16.msra.mxu1 %v1578_v24  ;;  %v1648_v24 = vld [vmem:[%s2099_s1 + $0x1b0] sm:$0xff]   ;;  %v1651_v28 = vld [vmem:[%s2099_s1 + $0x1b8] sm:$0xff]   ;;  %v1660_v35 = vld [vmem:[%s2099_s1 + $0x288] sm:$0xff]  }
  0x20   :  { %1446 = vmatprep.subr.bf16.mxu1 %v1584_v25  ;;  %v1649_v25 = vld [vmem:[%s2099_s1 + $0x310] sm:$0xff]   ;;  %v1661_v36 = vld [vmem:[%s2099_s1 + $0x328] sm:$0xff]   ;;  %v1669_v44 = vld [vmem:[%s2099_s1 + $0x2a0] sm:$0xff]  }
  0x21   :  { %1483 = vmatpush3.bf16.msra.mxu0 %v1599_v40  ;;  %v1664_v39 = vld [vmem:[%s2099_s1 + $0x330] sm:$0xff]   ;;  %v1665_v40 = vld [vmem:[%s2099_s1 + $0x2d8] sm:$0xff]  }
  0x22   :  { %1002 = vmatmul.mubr.bf16.vlgmr.msra.gmra.mrb[0].mxu1 %v1580_v26  ;;  %1512 = vmatprep.subr.bf16.mxu0 %v1605_v45  ;;  %v1650_v26 = vld [vmem:[%s2099_s1 + $0x1f8] sm:$0xff]   ;;  %v1670_v45 = vld [vmem:[%s2099_s1 + $0x340] sm:$0xff]  }
  0x23   :  { %1447 = vmatpush3.bf16.msra.mxu1 %v1585_v29  ;;  %1042 = vmatprep.mubr.bf16.mxu1 %v1620_v59  ;;  %v1655_v29 = vld [vmem:[%s2099_s1 + $0x318] sm:$0xff]  }
  0x24   :  { %1448 = vmatprep.subr.bf16.mxu1 %v1588_v30  ;;  %1084 = vmatmul.mubr.bf16.vlgmr.msra.gmra.mrb[0].mxu0 %v1602_v43  ;;  %v1656_v30 = vld [vmem:[%s2099_s1 + $0x2c0] sm:$0xff]  }
  0x25   :  { %1513 = vmatpush3.bf16.msra.mxu0 %v1606_v46  ;;  %1165 = vmatprep.mubr.bf16.mxu0 %v1642_v18  ;;  %v1668_v43 = vld [vmem:[%s2099_s1 + $0x2e0] sm:$0xff]   ;;  %v1671_v46 = vld [vmem:[%s2099_s1 + $0x2e8] sm:$0xff]  }
  0x26   :  { %1514 = vmatprep.subr.bf16.mxu0 %v1609_v49  ;;  %v1681_v49 = vld [vmem:[%s2100_s0 + $0x2c] ss:$56 sps:$4 sm:$0xff]  }
  0x27   :  { %1449 = vmatpush3.bf16.msra.mxu1 %v1589_v33  ;;  %v1658_v33 = vld [vmem:[%s2099_s1 + $0x320] sm:$0xff]  }
  0x28   :  { %1450 = vmatprep.subr.bf16.mxu1 %v1592_v34  ;;  %v1659_v34 = vld [vmem:[%s2099_s1 + $0x2c8] sm:$0xff]  }
  0x29   :  { %1515 = vmatpush3.bf16.msra.mxu0 %v1610_v50  ;;  %v1674_v50 = vld [vmem:[%s2099_s1 + $0x2f0] sm:$0xff]  }
  0x2a   :  { %1516 = vmatprep.subr.bf16.mxu0 %v1613_v53  ;;  %v1676_v53 = vld [vmem:[%s2099_s1 + $0x350] sm:$0xff]  }
  0x2b   :  { %1451 = vmatpush3.bf16.msra.mxu1 %v1593_v37  ;;  %v1662_v37 = vld [vmem:[%s2099_s1 + $0x2d0] sm:$0xff]  }
  0x2c   :  { %1452 = vmatprep.subr.bf16.mxu1 %v1596_v38  ;;  %v1663_v38 = vld [vmem:[%s2099_s1 + $0x290] sm:$0xff]  }
  0x2d   :  { %1517 = vmatpush3.bf16.msra.mxu0 %v1614_v54  ;;  %v1677_v54 = vld [vmem:[%s2099_s1 + $0x2f8] sm:$0xff]  }
  0x2e   :  { %1518 = vmatprep.subr.bf16.mxu0 %v1617_v57  ;;  %v1679_v57 = vld [vmem:[%s2100_s0 + $0x28] ss:$56 sps:$4 sm:$0xff]  }
  0x2f   :  { %1453 = vmatpush3.bf16.msra.mxu1 %v1597_v41  ;;  %v1666_v41 = vld [vmem:[%s2099_s1 + $0x298] sm:$0xff]  }
  0x30   :  { %1454 = vmatprep.subr.bf16.mxu1 %v1600_v42  ;;  %v1667_v42 = vld [vmem:[%s2099_s1 + $0x338] sm:$0xff]  }
  0x31   :  { %1519 = vmatpush3.bf16.msra.mxu0 %v1621_v60 }
  0x32   :  { %1520 = vmatprep.subr.bf16.mxu0 %v1624_v0 }
  0x33   :  { %1455 = vmatpush3.bf16.msra.mxu1 %v1601_v47  ;;  %v1672_v47 = vld [vmem:[%s2099_s1 + $0x2a8] sm:$0xff]  }
  0x34   :  { %1456 = vmatprep.subr.bf16.mxu1 %v1607_v48  ;;  %v1673_v48 = vld [vmem:[%s2099_s1 + $0x348] sm:$0xff]  }
  0x35   :  { %1521 = vmatpush3.bf16.msra.mxu0 %v1625_v1 }
  0x36   :  { %1522 = vmatprep.subr.bf16.mxu0 %v1628_v4 }
  0x37   :  { %1457 = vmatpush3.bf16.msra.mxu1 %v1608_v51  ;;  %v1683_v51 = vld [vmem:[%s2100_s0 + $0x34] ss:$56 sps:$4 sm:$0xff]  }
  0x38   :  { %1458 = vmatprep.subr.bf16.mxu1 %v1611_v52  ;;  %v1675_v52 = vld [vmem:[%s2099_s1 + $0x2b0] sm:$0xff]  }
  0x39   :  { %1523 = vmatpush3.bf16.msra.mxu0 %v1629_v5 }
  0x3a   :  { %1524 = vmatprep.subr.bf16.mxu0 %v1632_v8 }
  0x3b   :  { %1459 = vmatpush3.bf16.msra.mxu1 %v1612_v55  ;;  %v1678_v55 = vld [vmem:[%s2099_s1 + $0x2b8] sm:$0xff]  }
  0x3c   :  { %1460 = vmatprep.subr.bf16.mxu1 %v1615_v56  ;;  %v1682_v56 = vld [vmem:[%s2099_s1 + $0x358] sm:$0xff]  }
  0x3d   :  { %1525 = vmatpush3.bf16.msra.mxu0 %v1633_v9 }
  0x3e   :  { %1526 = vmatprep.subr.bf16.mxu0 %v1636_v12 }
  0x3f   :  { %1461 = vmatpush3.bf16.msra.mxu1 %v1616_v58  ;;  %v1685_v58 = vld [vmem:[%s2100_s0 + $0x30] ss:$56 sps:$4 sm:$0xff]  }
  0x40   :  { %1490 = vmatprep.subr.bf16.mxu1 %v1622_v62 }
  0x41   :  { %1527 = vmatpush3.bf16.msra.mxu0 %v1637_v13 }
  0x42   :  { %1043 = vmatmul.mubr.bf16.vlgmr.msra.gmra.mrb[4].mxu1 %v1618_v61  ;;  %1215 = vmatprep.subr.bf16.mxu0 %v1686_v17 }
  0x43   :  { %1491 = vmatpush3.bf16.msra.mxu1 %v1623_v63  ;;  %1124 = vmatprep.mubr.bf16.mxu1 %v1654_v27 }
  0x44   :  { %1492 = vmatprep.subr.bf16.mxu1 %v1626_v2  ;;  %1166 = vmatmul.mubr.bf16.vlgmr.msra.gmra.mrb[4].mxu0 %v1640_v16 }
  0x45   :  { %1216 = vmatpush1.bf16.msra.mxu0 %v1643_v19  ;;  %1412 = vmatprep.mubr.msk.bf16.mxu0 %vm965_vm0, %v1683_v51 }
  0x46   :  { %1217 = vmatprep.subr.bf16.mxu0 %v1686_v17 }
  0x47   :  { %1493 = vmatpush3.bf16.msra.mxu1 %v1627_v3 }
  0x48   :  { %1494 = vmatprep.subr.bf16.mxu1 %v1630_v6 }
  0x49   :  { %1218 = vmatpush1.bf16.msra.mxu0 %v1646_v22 }
  0x4a   :  { %1219 = vmatprep.subr.bf16.mxu0 %v1686_v17 }
  0x4b   :  { %1495 = vmatpush3.bf16.msra.mxu1 %v1631_v7 }
  0x4c   :  { %1496 = vmatprep.subr.bf16.mxu1 %v1634_v10 }
  0x4d   :  { %1220 = vmatpush1.bf16.msra.mxu0 %v1649_v25 }
  0x4e   :  { %1221 = vmatprep.subr.bf16.mxu0 %v1686_v17 }
  0x4f   :  { %1497 = vmatpush3.bf16.msra.mxu1 %v1635_v11 }
  0x50   :  { %1498 = vmatprep.subr.bf16.mxu1 %v1638_v14 }
  0x51   :  { %1222 = vmatpush1.bf16.msra.mxu0 %v1655_v29 }
  0x52   :  { %1223 = vmatprep.subr.bf16.mxu0 %v1686_v17 }
  0x53   :  { %1499 = vmatpush3.bf16.msra.mxu1 %v1639_v15 }
  0x54   :  { %1500 = vmatprep.subr.bf16.mxu1 %v1644_v20 }
  0x55   :  { %1224 = vmatpush1.bf16.msra.mxu0 %v1658_v33 }
  0x56   :  { %1225 = vmatprep.subr.bf16.mxu0 %v1686_v17 }
  0x57   :  { %1501 = vmatpush3.bf16.msra.mxu1 %v1645_v21 }
  0x58   :  { %1502 = vmatprep.subr.bf16.mxu1 %v1647_v23 }
  0x59   :  { %1226 = vmatpush1.bf16.msra.mxu0 %v1661_v36 }
  0x5a   :  { %1227 = vmatprep.subr.bf16.mxu0 %v1686_v17 }
  0x5b   :  { %1503 = vmatpush3.bf16.msra.mxu1 %v1648_v24 }
  0x5c   :  { %1504 = vmatprep.subr.bf16.mxu1 %v1650_v26 }
  0x5d   :  { %1228 = vmatpush1.bf16.msra.mxu0 %v1664_v39 }
  0x5e   :  { %1229 = vmatprep.subr.bf16.mxu0 %v1686_v17 }
  0x5f   :  { %1505 = vmatpush3.bf16.msra.mxu1 %v1651_v28 }
  0x60   :  { %1534 = vmatprep.subr.bf16.mxu1 %v1656_v30 }
  0x61   :  { %1230 = vmatpush1.bf16.msra.mxu0 %v1667_v42 }
  0x62   :  { %1125 = vmatmul.mubr.bf16.vlgmr.msra.gmra.mrb[8].mxu1 %v1652_v31  ;;  %1231 = vmatprep.subr.bf16.mxu0 %v1686_v17 }
  0x63   :  { %1535 = vmatpush3.bf16.msra.mxu1 %v1657_v32  ;;  %1206 = vmatprep.mubr.bf16.mxu1 %v1681_v49 }
  0x64   :  { %1536 = vmatprep.subr.bf16.mxu1 %v1659_v34 }
  0x65   :  { %1232 = vmatpush1.bf16.msra.mxu0 %v1670_v45 }
  0x66   :  { %1233 = vmatprep.subr.bf16.mxu0 %v1686_v17 }
  0x67   :  { %1537 = vmatpush3.bf16.msra.mxu1 %v1660_v35 }
  0x68   :  { %1538 = vmatprep.subr.bf16.mxu1 %v1662_v37 }
  0x69   :  { %1234 = vmatpush1.bf16.msra.mxu0 %v1673_v48 }
  0x6a   :  { %1235 = vmatprep.subr.bf16.mxu0 %v1686_v17 }
  0x6b   :  { %1539 = vmatpush3.bf16.msra.mxu1 %v1663_v38 }
  0x6c   :  { %1540 = vmatprep.subr.bf16.mxu1 %v1665_v40 }
  0x6d   :  { %1236 = vmatpush1.bf16.msra.mxu0 %v1676_v53 }
  0x6e   :  { %1237 = vmatprep.subr.bf16.mxu0 %v1686_v17 }
  0x6f   :  { %1541 = vmatpush3.bf16.msra.mxu1 %v1666_v41 }
  0x70   :  { %1542 = vmatprep.subr.bf16.mxu1 %v1668_v43 }
  0x71   :  { %1238 = vmatpush1.bf16.msra.mxu0 %v1682_v56 }
  0x73   :  { %1543 = vmatpush3.bf16.msra.mxu1 %v1669_v44  ;;  %v1413_v44 = vld [vmem:[%s2101_s2] ss:$0 sm:$0xff] }
  0x74   :  { %1544 = vmatprep.subr.bf16.mxu1 %v1671_v46  ;;  %1248 = vmatmul.mubr.bf16.vlgmr.msra.gmra.mrb[8].mxu0 %v1685_v58 }
  0x77   :  { %1545 = vmatpush3.bf16.msra.mxu1 %v1672_v47  ;;  %v1414_v47 = vld [vmem:[%s2102_s3] ss:$0 sm:$0xff] }
  0x78   :  { %1546 = vmatprep.subr.bf16.mxu1 %v1674_v50 }
  0x7b   :  { %1547 = vmatpush3.bf16.msra.mxu1 %v1675_v52 }
  0x7c   :  { %1548 = vmatprep.subr.bf16.mxu1 %v1677_v54 }
  0x7f   :  { %1549 = vmatpush3.bf16.msra.mxu1 %v1678_v55 }
  0x82   :  { %1207 = vmatmul.mubr.bf16.vlgmr.msra.gmra.mrb[12].mxu1 %v1679_v57 }
  0xf5   :  { %v1440_v59 = vpop.f32.mrb[0].mxu1 }
  0xf6   :  { %v1441_v60 = vpop.f32.mrb[1].mxu1 }
  0xf7   :  { %v1442_v61 = vadd.f32 %v1441_v60, %v1440_v59  ;;  %v1443_v62 = vpop.f32.mrb[2].mxu1  ;;  %v1484_v1 = vpop.f32.mrb[0].mxu0 }
  0xf8   :  { %v1444_v63 = vpop.f32.mrb[3].mxu1  ;;  %v1485_v2 = vpop.f32.mrb[1].mxu0 }
  0xf9   :  { %v1445_v0 = vadd.f32 %v1444_v63, %v1443_v62  ;;  %v1486_v3 = vadd.f32 %v1485_v2, %v1484_v1  ;;  %v1487_v4 = vpop.f32.mrb[2].mxu0 }
  0xfa   :  { %v1488_v5 = vpop.f32.mrb[3].mxu0 }
  0xfb   :  { %v1489_v6 = vadd.f32 %v1488_v5, %v1487_v4 }
 0x115   :  { %v1462_v7 = vpop.f32.mrb[4].mxu1 }
 0x116   :  { %v1463_v8 = vpop.f32.mrb[5].mxu1 }
 0x117   :  { %v1464_v9 = vadd.f32 %v1463_v8, %v1462_v7  ;;  %v1465_v10 = vpop.f32.mrb[6].mxu1  ;;  %v1528_v17 = vpop.f32.mrb[4].mxu0 }
 0x118   :  { %v1466_v11 = vpop.f32.mrb[7].mxu1  ;;  %v1529_v18 = vpop.f32.mrb[5].mxu0 }
 0x119   :  { %v1045_v12 = vadd.f32 %v1464_v9, %v1442_v61  ;;  %v1467_v13 = vadd.f32 %v1466_v11, %v1465_v10  ;;  %v1530_v19 = vadd.f32 %v1529_v18, %v1528_v17  ;;  %v1531_v20 = vpop.f32.mrb[6].mxu0 }
 0x11a   :  { %v1532_v21 = vpop.f32.mrb[7].mxu0 }
 0x11b   :  { %v1048_v14 = vadd.f32 %v1467_v13, %v1445_v0  ;;  %v1086_v15 = vadd.f32 %v1486_v3, %v1045_v12  ;;  %v1533_v22 = vadd.f32 %v1532_v21, %v1531_v20 }
 0x11d   :  { %v1089_v16 = vadd.f32 %v1489_v6, %v1048_v14 }
 0x135   :  { %v1506_v23 = vpop.f32.mrb[8].mxu1 }
 0x136   :  { %v1507_v24 = vpop.f32.mrb[9].mxu1 }
 0x137   :  { %v1508_v25 = vadd.f32 %v1507_v24, %v1506_v23  ;;  %v1509_v26 = vpop.f32.mrb[10].mxu1 }
 0x138   :  { %v1510_v27 = vpop.f32.mrb[11].mxu1 }
 0x139   :  { %v1127_v28 = vadd.f32 %v1508_v25, %v1086_v15  ;;  %v1511_v29 = vadd.f32 %v1510_v27, %v1509_v26 }
 0x13b   :  { %v1130_v30 = vadd.f32 %v1511_v29, %v1089_v16  ;;  %v1168_v31 = vadd.f32 %v1530_v19, %v1127_v28 }
 0x13d   :  { %v1171_v32 = vadd.f32 %v1533_v22, %v1130_v30 }
 0x147   :  { %v1249_v34 = vpop.f32.mrb[8].mxu0 }
 0x148   :  { %v1251_v36 = vpop.f32.mrb[9].mxu0 }
 0x149   :  { %v1252_v39 = vpop.f32.mrb[10].mxu0 }
 0x14a   :  { %v1254_v41 = vpop.f32.mrb[11].mxu0 }
 0x155   :  { %v1550_v33 = vpop.f32.mrb[12].mxu1 }
 0x156   :  { %v1551_v35 = vpop.f32.mrb[13].mxu1 }
 0x157   :  { %v1552_v37 = vadd.f32 %v1551_v35, %v1550_v33  ;;  %v1553_v38 = vpop.f32.mrb[14].mxu1 }
 0x158   :  { %v1554_v40 = vpop.f32.mrb[15].mxu1 }
 0x159   :  { %v1209_v42 = vadd.f32 %v1552_v37, %v1168_v31  ;;  %v1555_v43 = vadd.f32 %v1554_v40, %v1553_v38 }
 0x15b   :  { %v1250_v45 = vadd.f32 %v1249_v34, %v1209_v42  ;;  %v1212_v46 = vadd.f32 %v1555_v43, %v1171_v32 }
 0x15d   :  { %v1263_v48 = vmul.f32 %v1413_v44, %v1250_v45  ;;  %v1253_v49 = vadd.f32 %v1252_v39, %v1212_v46 }
 0x15f   :  { %v1272_v50 = vadd.f32 %v1414_v47, %v1263_v48  ;;  %v1264_v51 = vmul.f32 %v1413_v44, %v1253_v49 }
 0x161   :  { %v1273_v52 = vadd.f32 %v1414_v47, %v1264_v51  ;;  %v1274_v53 = vmax.f32 %v1272_v50, 0.0 }
 0x163   :  { %v1275_v54 = vmax.f32 %v1273_v52, 0.0 }
 0x165   :  { %v1422_v55 = vpack.c.bf16 %v1275_v54, %v1274_v53 }
 0x167   :  { %1423 = vst [vmem:[%s2103_s4] sm:$0xff] %v1422_v55  }

// kernel: rasternet_forward.14
= control target key start
LH: loop header
LB: loop body
LE: loop exit
PB: predicated region body
PF: predicated region fallthrough
CT: control target
= control target key end

     0   :  { %v175_v0 = vmov 0.0   ;;  %vm176_vm0 = vmmov 0   ;;  %vm57_vm1 = vcmask 523264   ;;  %s226_s1 = inlined_call_operand.vmem [shape: bf16[64,128], index: 1, kind: input, shape index: {}]   ;;  %s227_s0 = inlined_call_operand.vmem [shape: bf16[16,64], index: 0, kind: input, shape index: {}]   ;;  %s228_s2 = inlined_call_operand.vmem [shape: f32[1,128], index: 2, kind: input, shape index: {}]   ;;  %s229_s3 = inlined_call_operand.vmem [shape: f32[1,128], index: 3, kind: input, shape index: {}]   ;;  %s230_s4 = inlined_call_operand.vmem [shape: bf16[16,128], index: 4, kind: output, shape index: {}]  }
   0x1   :  { %156 = vmatprep.subr.bf16.mxu0 %v175_v0  ;;  %v170_v1 = vld [vmem:[%s226_s1] sm:$0xff]   ;;  %164 = vmatprep.mubr.msk.bf16.mxu0 %vm176_vm0, %v175_v0  ;;  %v171_v2 = vld [vmem:[%s226_s1 + $0x8] sm:$0xff]   ;;  %v172_v3 = vld [vmem:[%s226_s1 + $0x10] sm:$0xff]  }
   0x2   :  { %157 = vmatpush3.bf16.msra.mxu0 %v170_v1  ;;  %v173_v4 = vld [vmem:[%s226_s1 + $0x18] sm:$0xff]   ;;  %v174_v5 = vld [vmem:[%s227_s0] sm:$0xff]  }
   0x3   :  { %158 = vmatprep.subr.bf16.mxu0 %v175_v0  ;;  %v140_v6 = vld [vmem:[%s228_s2] ss:$0 sm:$0xff] }
   0x4   :  { %v141_v10 = vld [vmem:[%s229_s3] ss:$0 sm:$0xff] }
   0x6   :  { %159 = vmatpush3.bf16.msra.mxu0 %v171_v2 }
   0x7   :  { %160 = vmatprep.subr.bf16.mxu0 %v175_v0 }
   0xa   :  { %161 = vmatpush3.bf16.msra.mxu0 %v172_v3 }
   0xb   :  { %162 = vmatprep.subr.bf16.mxu0 %v175_v0 }
   0xe   :  { %163 = vmatpush3.bf16.msra.mxu0 %v173_v4 }
  0x11   :  { %165 = vmatmul.mubr.msk.bf16.vlgmr.msra.gmra.mrb[0].mxu0 %vm57_vm1, %v174_v5 }
  0xe4   :  { %v95_v7 = vpop.f32.mrb[0].mxu0 }
  0xe5   :  { %v109_v8 = vmul.f32 %v140_v6, %v95_v7  ;;  %v166_v9 = vpop.f32.mrb[1].mxu0 }
  0xe6   :  { %v98_v11 = vpop.f32.mrb[2].mxu0 }
  0xe7   :  { %v110_v12 = vmul.f32 %v140_v6, %v98_v11  ;;  %v167_v13 = vpop.f32.mrb[3].mxu0  ;;  %v118_v14 = vadd.f32 %v141_v10, %v109_v8 }
  0xe9   :  { %v119_v15 = vadd.f32 %v141_v10, %v110_v12 }
  0xeb   :  { %v149_v16 = vpack.c.bf16 %v119_v15, %v118_v14 }
  0xed   :  { %150 = vst [vmem:[%s230_s4] sm:$0xff] %v149_v16  }

// kernel: rasternet_forward.16
= control target key start
LH: loop header
LB: loop body
LE: loop exit
PB: predicated region body
PF: predicated region fallthrough
CT: control target
= control target key end

     0   :  { %vm3359_vm0 = vmmov 0   ;;  %s4131_s1 = inlined_call_operand.vmem [shape: bf16[3456,128], index: 1, kind: input, shape index: {}]   ;;  %s4132_s0 = inlined_call_operand.vmem [shape: bf16[16,3456], index: 0, kind: input, shape index: {}]   ;;  %s4133_s2 = inlined_call_operand.vmem [shape: f32[1,128], index: 2, kind: input, shape index: {}]   ;;  %s4134_s4 = inlined_call_operand.vmem [shape: bf16[16,128], index: 4, kind: input, shape index: {}]   ;;  %s4135_s3 = inlined_call_operand.vmem [shape: f32[1,128], index: 3, kind: input, shape index: {}]   ;;  %s4136_s5 = inlined_call_operand.vmem [shape: bf16[16,128], index: 5, kind: output, shape index: {}]  }
   0x1   :  { %v3102_v0 = vld [vmem:[%s4131_s1 + $0x40] sm:$0xff]   ;;  %v3106_v4 = vld [vmem:[%s4131_s1 + $0x48] sm:$0xff]   ;;  %v3110_v8 = vld [vmem:[%s4131_s1 + $0x50] sm:$0xff]  }
   0x2   :  { %v3103_v1 = vld [vmem:[%s4131_s1 + $0xc0] sm:$0xff]   ;;  %2785 = vmatprep.subr.bf16.mxu0 %v3102_v0  ;;  %v3107_v5 = vld [vmem:[%s4131_s1 + $0xc8] sm:$0xff]   ;;  %v3111_v9 = vld [vmem:[%s4131_s1 + $0xd0] sm:$0xff]  }
   0x3   :  { %v3104_v2 = vld [vmem:[%s4131_s1] sm:$0xff]   ;;  %2807 = vmatprep.subr.bf16.mxu1 %v3103_v1  ;;  %v3108_v6 = vld [vmem:[%s4131_s1 + $0x8] sm:$0xff]   ;;  %v3112_v10 = vld [vmem:[%s4131_s1 + $0x10] sm:$0xff]  }
   0x4   :  { %v3105_v3 = vld [vmem:[%s4131_s1 + $0x80] sm:$0xff]   ;;  %2786 = vmatpush3.bf16.msra.mxu0 %v3104_v2  ;;  %v3109_v7 = vld [vmem:[%s4131_s1 + $0x88] sm:$0xff]   ;;  %v3113_v11 = vld [vmem:[%s4131_s1 + $0x90] sm:$0xff]  }
   0x5   :  { %2808 = vmatpush3.bf16.msra.mxu1 %v3105_v3  ;;  %2787 = vmatprep.subr.bf16.mxu0 %v3106_v4  ;;  %v3114_v12 = vld [vmem:[%s4131_s1 + $0x58] sm:$0xff]   ;;  %v3118_v16 = vld [vmem:[%s4131_s1 + $0x60] sm:$0xff]   ;;  %v3122_v20 = vld [vmem:[%s4131_s1 + $0x68] sm:$0xff]  }
   0x6   :  { %2809 = vmatprep.subr.bf16.mxu1 %v3107_v5  ;;  %v3115_v13 = vld [vmem:[%s4131_s1 + $0xd8] sm:$0xff]   ;;  %v3119_v17 = vld [vmem:[%s4131_s1 + $0xe0] sm:$0xff]   ;;  %v3123_v21 = vld [vmem:[%s4131_s1 + $0xe8] sm:$0xff]  }
   0x7   :  { %v3116_v14 = vld [vmem:[%s4131_s1 + $0x18] sm:$0xff]   ;;  %v3120_v18 = vld [vmem:[%s4131_s1 + $0x20] sm:$0xff]   ;;  %v3124_v22 = vld [vmem:[%s4131_s1 + $0x28] sm:$0xff]  }
   0x8   :  { %2788 = vmatpush3.bf16.msra.mxu0 %v3108_v6  ;;  %v3117_v15 = vld [vmem:[%s4131_s1 + $0x98] sm:$0xff]   ;;  %v3121_v19 = vld [vmem:[%s4131_s1 + $0xa0] sm:$0xff]   ;;  %v3125_v23 = vld [vmem:[%s4131_s1 + $0xa8] sm:$0xff]  }
   0x9   :  { %2810 = vmatpush3.bf16.msra.mxu1 %v3109_v7  ;;  %2789 = vmatprep.subr.bf16.mxu0 %v3110_v8  ;;  %v3126_v24 = vld [vmem:[%s4131_s1 + $0x70] sm:$0xff]   ;;  %v3130_v28 = vld [vmem:[%s4131_s1 + $0x78] sm:$0xff]   ;;  %v3134_v32 = vld [vmem:[%s4132_s0] ss:$108 sps:$4 sm:$0xff]  }
   0xa   :  { %2811 = vmatprep.subr.bf16.mxu1 %v3111_v9  ;;  %v3127_v25 = vld [vmem:[%s4131_s1 + $0xf0] sm:$0xff]   ;;  %v3131_v29 = vld [vmem:[%s4131_s1 + $0xf8] sm:$0xff]   ;;  %v3140_v36 = vld [vmem:[%s4131_s1 + $0x140] sm:$0xff]  }
   0xb   :  { %v3128_v26 = vld [vmem:[%s4131_s1 + $0x30] sm:$0xff]   ;;  %v3132_v30 = vld [vmem:[%s4131_s1 + $0x38] sm:$0xff]   ;;  %v3141_v37 = vld [vmem:[%s4131_s1 + $0x100] sm:$0xff]  }
   0xc   :  { %2790 = vmatpush3.bf16.msra.mxu0 %v3112_v10  ;;  %v3129_v27 = vld [vmem:[%s4131_s1 + $0xb0] sm:$0xff]   ;;  %v3133_v31 = vld [vmem:[%s4131_s1 + $0xb8] sm:$0xff]   ;;  %v3142_v38 = vld [vmem:[%s4131_s1 + $0x1c0] sm:$0xff]  }
   0xd   :  { %2812 = vmatpush3.bf16.msra.mxu1 %v3113_v11  ;;  %2791 = vmatprep.subr.bf16.mxu0 %v3114_v12  ;;  %v3136_v33 = vld [vmem:[%s4132_s0 + $0x4] ss:$108 sps:$4 sm:$0xff]   ;;  %v3137_v34 = vld [vmem:[%s4132_s0 + $0x8] ss:$108 sps:$4 sm:$0xff]   ;;  %v3139_v35 = vld [vmem:[%s4132_s0 + $0xc] ss:$108 sps:$4 sm:$0xff]  }
   0xe   :  { %2813 = vmatprep.subr.bf16.mxu1 %v3115_v13  ;;  %1945 = vmatprep.mubr.bf16.mxu0 %v3136_v33  ;;  %v3143_v39 = vld [vmem:[%s4131_s1 + $0x180] sm:$0xff]   ;;  %v3144_v40 = vld [vmem:[%s4131_s1 + $0x148] sm:$0xff]   ;;  %v3148_v44 = vld [vmem:[%s4131_s1 + $0x150] sm:$0xff]  }
   0xf   :  { %1986 = vmatprep.mubr.bf16.mxu1 %v3139_v35  ;;  %v3145_v41 = vld [vmem:[%s4131_s1 + $0x108] sm:$0xff]   ;;  %v3149_v45 = vld [vmem:[%s4131_s1 + $0x110] sm:$0xff]   ;;  %v3152_v48 = vld [vmem:[%s4131_s1 + $0x158] sm:$0xff]  }
  0x10   :  { %2792 = vmatpush3.bf16.msra.mxu0 %v3116_v14  ;;  %v3146_v42 = vld [vmem:[%s4131_s1 + $0x1c8] sm:$0xff]   ;;  %v3150_v46 = vld [vmem:[%s4131_s1 + $0x1d0] sm:$0xff]   ;;  %v3153_v49 = vld [vmem:[%s4131_s1 + $0x118] sm:$0xff]  }
  0x11   :  { %2814 = vmatpush3.bf16.msra.mxu1 %v3117_v15  ;;  %2793 = vmatprep.subr.bf16.mxu0 %v3118_v16  ;;  %v3147_v43 = vld [vmem:[%s4131_s1 + $0x188] sm:$0xff]   ;;  %v3151_v47 = vld [vmem:[%s4131_s1 + $0x190] sm:$0xff]   ;;  %v3154_v50 = vld [vmem:[%s4131_s1 + $0x1d8] sm:$0xff]  }
  0x12   :  { %2815 = vmatprep.subr.bf16.mxu1 %v3119_v17  ;;  %v3155_v51 = vld [vmem:[%s4131_s1 + $0x198] sm:$0xff]   ;;  %v3156_v52 = vld [vmem:[%s4131_s1 + $0x160] sm:$0xff]   ;;  %v3160_v56 = vld [vmem:[%s4131_s1 + $0x168] sm:$0xff]  }
  0x13   :  { %v3157_v53 = vld [vmem:[%s4131_s1 + $0x120] sm:$0xff]   ;;  %v3161_v57 = vld [vmem:[%s4131_s1 + $0x128] sm:$0xff]   ;;  %v3164_v60 = vld [vmem:[%s4131_s1 + $0x170] sm:$0xff]  }
  0x14   :  { %2794 = vmatpush3.bf16.msra.mxu0 %v3120_v18  ;;  %v3158_v54 = vld [vmem:[%s4131_s1 + $0x1e0] sm:$0xff]   ;;  %v3162_v58 = vld [vmem:[%s4131_s1 + $0x1e8] sm:$0xff]   ;;  %v3165_v61 = vld [vmem:[%s4131_s1 + $0x130] sm:$0xff]  }
  0x15   :  { %2816 = vmatpush3.bf16.msra.mxu1 %v3121_v19  ;;  %2795 = vmatprep.subr.bf16.mxu0 %v3122_v20  ;;  %v3159_v55 = vld [vmem:[%s4131_s1 + $0x1a0] sm:$0xff]   ;;  %v3163_v59 = vld [vmem:[%s4131_s1 + $0x1a8] sm:$0xff]   ;;  %v3166_v62 = vld [vmem:[%s4131_s1 + $0x1f0] sm:$0xff]  }
  0x16   :  { %2817 = vmatprep.subr.bf16.mxu1 %v3123_v21  ;;  %v3167_v63 = vld [vmem:[%s4131_s1 + $0x1b0] sm:$0xff]   ;;  %v3168_v0 = vld [vmem:[%s4131_s1 + $0x178] sm:$0xff]   ;;  %v3175_v6 = vld [vmem:[%s4131_s1 + $0x240] sm:$0xff]  }
  0x17   :  { %v3169_v1 = vld [vmem:[%s4131_s1 + $0x138] sm:$0xff]   ;;  %v3173_v4 = vld [vmem:[%s4132_s0 + $0x14] ss:$108 sps:$4 sm:$0xff]   ;;  %v3182_v12 = vld [vmem:[%s4131_s1 + $0x248] sm:$0xff]  }
  0x18   :  { %2796 = vmatpush3.bf16.msra.mxu0 %v3124_v22  ;;  %v3170_v2 = vld [vmem:[%s4131_s1 + $0x1f8] sm:$0xff]   ;;  %v3179_v9 = vld [vmem:[%s4131_s1 + $0x200] sm:$0xff]   ;;  %v3183_v13 = vld [vmem:[%s4131_s1 + $0x208] sm:$0xff]  }
  0x19   :  { %2818 = vmatpush3.bf16.msra.mxu1 %v3125_v23  ;;  %2797 = vmatprep.subr.bf16.mxu0 %v3126_v24  ;;  %v3171_v3 = vld [vmem:[%s4132_s0 + $0x10] ss:$108 sps:$4 sm:$0xff]   ;;  %v3176_v7 = vld [vmem:[%s4132_s0 + $0x18] ss:$108 sps:$4 sm:$0xff]   ;;  %v3184_v14 = vld [vmem:[%s4131_s1 + $0x2c8] sm:$0xff]  }
  0x1a   :  { %2819 = vmatprep.subr.bf16.mxu1 %v3127_v25  ;;  %v3174_v5 = vld [vmem:[%s4131_s1 + $0x1b8] sm:$0xff]   ;;  %v3180_v10 = vld [vmem:[%s4131_s1 + $0x2c0] sm:$0xff]   ;;  %v3185_v15 = vld [vmem:[%s4131_s1 + $0x288] sm:$0xff]  }
  0x1b   :  { %v3178_v8 = vld [vmem:[%s4132_s0 + $0x1c] ss:$108 sps:$4 sm:$0xff]   ;;  %v3181_v11 = vld [vmem:[%s4131_s1 + $0x280] sm:$0xff]   ;;  %v3186_v16 = vld [vmem:[%s4131_s1 + $0x250] sm:$0xff]  }
  0x1c   :  { %2798 = vmatpush3.bf16.msra.mxu0 %v3128_v26  ;;  %v3187_v17 = vld [vmem:[%s4131_s1 + $0x210] sm:$0xff]   ;;  %v3190_v20 = vld [vmem:[%s4131_s1 + $0x258] sm:$0xff]   ;;  %v3194_v24 = vld [vmem:[%s4131_s1 + $0x260] sm:$0xff]  }
  0x1d   :  { %2820 = vmatpush3.bf16.msra.mxu1 %v3129_v27  ;;  %2799 = vmatprep.subr.bf16.mxu0 %v3130_v28  ;;  %v3188_v18 = vld [vmem:[%s4131_s1 + $0x2d0] sm:$0xff]   ;;  %v3191_v21 = vld [vmem:[%s4131_s1 + $0x218] sm:$0xff]   ;;  %v3195_v25 = vld [vmem:[%s4131_s1 + $0x220] sm:$0xff]  }
  0x1e   :  { %2821 = vmatprep.subr.bf16.mxu1 %v3131_v29  ;;  %v3189_v19 = vld [vmem:[%s4131_s1 + $0x290] sm:$0xff]   ;;  %v3192_v22 = vld [vmem:[%s4131_s1 + $0x2d8] sm:$0xff]   ;;  %v3196_v26 = vld [vmem:[%s4131_s1 + $0x2e0] sm:$0xff]  }
  0x1f   :  { %v3193_v23 = vld [vmem:[%s4131_s1 + $0x298] sm:$0xff]   ;;  %v3197_v27 = vld [vmem:[%s4131_s1 + $0x2a0] sm:$0xff]   ;;  %v3198_v28 = vld [vmem:[%s4131_s1 + $0x268] sm:$0xff]  }
  0x20   :  { %2800 = vmatpush3.bf16.msra.mxu0 %v3132_v30  ;;  %v3199_v29 = vld [vmem:[%s4131_s1 + $0x228] sm:$0xff]   ;;  %v3203_v33 = vld [vmem:[%s4131_s1 + $0x230] sm:$0xff]  }
  0x21   :  { %2822 = vmatpush3.bf16.msra.mxu1 %v3133_v31  ;;  %2829 = vmatprep.subr.bf16.mxu0 %v3140_v36  ;;  %v3200_v30 = vld [vmem:[%s4131_s1 + $0x2e8] sm:$0xff]   ;;  %v3205_v35 = vld [vmem:[%s4131_s1 + $0x2b0] sm:$0xff]   ;;  %v3206_v36 = vld [vmem:[%s4131_s1 + $0x278] sm:$0xff]  }
  0x22   :  { %2851 = vmatprep.subr.bf16.mxu1 %v3142_v38  ;;  %v3201_v31 = vld [vmem:[%s4131_s1 + $0x2a8] sm:$0xff]   ;;  %v3208_v38 = vld [vmem:[%s4131_s1 + $0x2f8] sm:$0xff]  }
  0x23   :  { %1946 = vmatmul.mubr.bf16.vlgmr.msra.gmra.mrb[0].mxu0 %v3134_v32  ;;  %v3202_v32 = vld [vmem:[%s4131_s1 + $0x270] sm:$0xff]  }
  0x24   :  { %1987 = vmatmul.mubr.bf16.vlgmr.msra.gmra.mrb[0].mxu1 %v3137_v34  ;;  %2830 = vmatpush3.bf16.msra.mxu0 %v3141_v37  ;;  %v3204_v34 = vld [vmem:[%s4131_s1 + $0x2f0] sm:$0xff]   ;;  %v3207_v37 = vld [vmem:[%s4131_s1 + $0x238] sm:$0xff]  }
  0x25   :  { %2852 = vmatpush3.bf16.msra.mxu1 %v3143_v39  ;;  %2831 = vmatprep.subr.bf16.mxu0 %v3144_v40  ;;  %v3209_v39 = vld [vmem:[%s4132_s0 + $0x20] ss:$108 sps:$4 sm:$0xff]   ;;  %v3211_v40 = vld [vmem:[%s4132_s0 + $0x24] ss:$108 sps:$4 sm:$0xff]  }
  0x26   :  { %2853 = vmatprep.subr.bf16.mxu1 %v3146_v42  ;;  %2027 = vmatprep.mubr.bf16.mxu0 %v3173_v4  ;;  %v3213_v42 = vld [vmem:[%s4131_s1 + $0x340] sm:$0xff]   ;;  %v3240_v4 = vld [vmem:[%s4131_s1 + $0x370] sm:$0xff]  }
  0x27   :  { %2068 = vmatprep.mubr.bf16.mxu1 %v3178_v8  ;;  %v3244_v8 = vld [vmem:[%s4131_s1 + $0x378] sm:$0xff]  }
  0x28   :  { %2832 = vmatpush3.bf16.msra.mxu0 %v3145_v41  ;;  %v3212_v41 = vld [vmem:[%s4131_s1 + $0x2b8] sm:$0xff]  }
  0x29   :  { %2854 = vmatpush3.bf16.msra.mxu1 %v3147_v43  ;;  %2833 = vmatprep.subr.bf16.mxu0 %v3148_v44  ;;  %v3214_v43 = vld [vmem:[%s4132_s0 + $0x28] ss:$108 sps:$4 sm:$0xff]   ;;  %v3216_v44 = vld [vmem:[%s4132_s0 + $0x2c] ss:$108 sps:$4 sm:$0xff]  }
  0x2a   :  { %2855 = vmatprep.subr.bf16.mxu1 %v3150_v46  ;;  %v3218_v46 = vld [vmem:[%s4131_s1 + $0x3c0] sm:$0xff]  }
  0x2c   :  { %2834 = vmatpush3.bf16.msra.mxu0 %v3149_v45  ;;  %v3217_v45 = vld [vmem:[%s4131_s1 + $0x300] sm:$0xff]  }
  0x2d   :  { %2856 = vmatpush3.bf16.msra.mxu1 %v3151_v47  ;;  %2835 = vmatprep.subr.bf16.mxu0 %v3152_v48  ;;  %v3219_v47 = vld [vmem:[%s4131_s1 + $0x380] sm:$0xff]   ;;  %v3220_v48 = vld [vmem:[%s4131_s1 + $0x348] sm:$0xff]  }
  0x2e   :  { %2857 = vmatprep.subr.bf16.mxu1 %v3154_v50  ;;  %v3222_v50 = vld [vmem:[%s4131_s1 + $0x3c8] sm:$0xff]  }
  0x30   :  { %2836 = vmatpush3.bf16.msra.mxu0 %v3153_v49  ;;  %v3221_v49 = vld [vmem:[%s4131_s1 + $0x308] sm:$0xff]  }
  0x31   :  { %2858 = vmatpush3.bf16.msra.mxu1 %v3155_v51  ;;  %2837 = vmatprep.subr.bf16.mxu0 %v3156_v52  ;;  %v3223_v51 = vld [vmem:[%s4131_s1 + $0x388] sm:$0xff]   ;;  %v3224_v52 = vld [vmem:[%s4131_s1 + $0x350] sm:$0xff]  }
  0x32   :  { %2859 = vmatprep.subr.bf16.mxu1 %v3158_v54  ;;  %v3226_v54 = vld [vmem:[%s4131_s1 + $0x3d0] sm:$0xff]  }
  0x34   :  { %2838 = vmatpush3.bf16.msra.mxu0 %v3157_v53  ;;  %v3225_v53 = vld [vmem:[%s4131_s1 + $0x310] sm:$0xff]  }
  0x35   :  { %2860 = vmatpush3.bf16.msra.mxu1 %v3159_v55  ;;  %2839 = vmatprep.subr.bf16.mxu0 %v3160_v56  ;;  %v3227_v55 = vld [vmem:[%s4131_s1 + $0x390] sm:$0xff]   ;;  %v3228_v56 = vld [vmem:[%s4131_s1 + $0x358] sm:$0xff]  }
  0x36   :  { %2861 = vmatprep.subr.bf16.mxu1 %v3162_v58  ;;  %v3230_v58 = vld [vmem:[%s4131_s1 + $0x3d8] sm:$0xff]  }
  0x38   :  { %2840 = vmatpush3.bf16.msra.mxu0 %v3161_v57  ;;  %v3229_v57 = vld [vmem:[%s4131_s1 + $0x318] sm:$0xff]  }
  0x39   :  { %2862 = vmatpush3.bf16.msra.mxu1 %v3163_v59  ;;  %2841 = vmatprep.subr.bf16.mxu0 %v3164_v60  ;;  %v3231_v59 = vld [vmem:[%s4131_s1 + $0x398] sm:$0xff]   ;;  %v3232_v60 = vld [vmem:[%s4131_s1 + $0x360] sm:$0xff]  }
  0x3a   :  { %2863 = vmatprep.subr.bf16.mxu1 %v3166_v62  ;;  %v3234_v62 = vld [vmem:[%s4131_s1 + $0x3e0] sm:$0xff]  }
  0x3c   :  { %2842 = vmatpush3.bf16.msra.mxu0 %v3165_v61  ;;  %v3233_v61 = vld [vmem:[%s4131_s1 + $0x320] sm:$0xff]  }
  0x3d   :  { %2864 = vmatpush3.bf16.msra.mxu1 %v3167_v63  ;;  %2843 = vmatprep.subr.bf16.mxu0 %v3168_v0  ;;  %v3235_v63 = vld [vmem:[%s4131_s1 + $0x3a0] sm:$0xff]   ;;  %v3236_v0 = vld [vmem:[%s4131_s1 + $0x368] sm:$0xff]  }
  0x3e   :  { %2865 = vmatprep.subr.bf16.mxu1 %v3170_v2  ;;  %v3238_v2 = vld [vmem:[%s4131_s1 + $0x3e8] sm:$0xff]  }
  0x40   :  { %2844 = vmatpush3.bf16.msra.mxu0 %v3169_v1  ;;  %v3237_v1 = vld [vmem:[%s4131_s1 + $0x328] sm:$0xff]  }
  0x41   :  { %2866 = vmatpush3.bf16.msra.mxu1 %v3174_v5  ;;  %2873 = vmatprep.subr.bf16.mxu0 %v3175_v6  ;;  %v3241_v5 = vld [vmem:[%s4131_s1 + $0x330] sm:$0xff]  }
  0x42   :  { %2895 = vmatprep.subr.bf16.mxu1 %v3180_v10  ;;  %v3242_v6 = vld [vmem:[%s4131_s1 + $0x3f0] sm:$0xff]   ;;  %v3246_v10 = vld [vmem:[%s4131_s1 + $0x3f8] sm:$0xff]  }
  0x43   :  { %2028 = vmatmul.mubr.bf16.vlgmr.msra.gmra.mrb[4].mxu0 %v3171_v3  ;;  %v3239_v3 = vld [vmem:[%s4131_s1 + $0x3a8] sm:$0xff]  }
  0x44   :  { %2874 = vmatpush3.bf16.msra.mxu0 %v3179_v9  ;;  %2069 = vmatmul.mubr.bf16.vlgmr.msra.gmra.mrb[4].mxu1 %v3176_v7  ;;  %v3243_v7 = vld [vmem:[%s4131_s1 + $0x3b0] sm:$0xff]   ;;  %v3245_v9 = vld [vmem:[%s4131_s1 + $0x338] sm:$0xff]  }
  0x45   :  { %2896 = vmatpush3.bf16.msra.mxu1 %v3181_v11  ;;  %2875 = vmatprep.subr.bf16.mxu0 %v3182_v12  ;;  %v3247_v11 = vld [vmem:[%s4132_s0 + $0x30] ss:$108 sps:$4 sm:$0xff]   ;;  %v3249_v12 = vld [vmem:[%s4132_s0 + $0x34] ss:$108 sps:$4 sm:$0xff]  }
  0x46   :  { %2897 = vmatprep.subr.bf16.mxu1 %v3184_v14  ;;  %2109 = vmatprep.mubr.bf16.mxu0 %v3211_v40  ;;  %v3251_v14 = vld [vmem:[%s4131_s1 + $0x440] sm:$0xff]   ;;  %v3278_v40 = vld [vmem:[%s4131_s1 + $0x470] sm:$0xff]  }
  0x47   :  { %2150 = vmatprep.mubr.bf16.mxu1 %v3216_v44  ;;  %v3282_v44 = vld [vmem:[%s4131_s1 + $0x478] sm:$0xff]  }
  0x48   :  { %2876 = vmatpush3.bf16.msra.mxu0 %v3183_v13  ;;  %v3250_v13 = vld [vmem:[%s4131_s1 + $0x3b8] sm:$0xff]  }
  0x49   :  { %2898 = vmatpush3.bf16.msra.mxu1 %v3185_v15  ;;  %2877 = vmatprep.subr.bf16.mxu0 %v3186_v16  ;;  %v3252_v15 = vld [vmem:[%s4132_s0 + $0x38] ss:$108 sps:$4 sm:$0xff]   ;;  %v3254_v16 = vld [vmem:[%s4132_s0 + $0x3c] ss:$108 sps:$4 sm:$0xff]  }
  0x4a   :  { %2899 = vmatprep.subr.bf16.mxu1 %v3188_v18  ;;  %v3256_v18 = vld [vmem:[%s4131_s1 + $0x4c0] sm:$0xff]  }
  0x4c   :  { %2878 = vmatpush3.bf16.msra.mxu0 %v3187_v17  ;;  %v3255_v17 = vld [vmem:[%s4131_s1 + $0x400] sm:$0xff]  }
  0x4d   :  { %2900 = vmatpush3.bf16.msra.mxu1 %v3189_v19  ;;  %2879 = vmatprep.subr.bf16.mxu0 %v3190_v20  ;;  %v3257_v19 = vld [vmem:[%s4131_s1 + $0x480] sm:$0xff]   ;;  %v3258_v20 = vld [vmem:[%s4131_s1 + $0x448] sm:$0xff]  }
  0x4e   :  { %2901 = vmatprep.subr.bf16.mxu1 %v3192_v22  ;;  %v3260_v22 = vld [vmem:[%s4131_s1 + $0x4c8] sm:$0xff]  }
  0x50   :  { %2880 = vmatpush3.bf16.msra.mxu0 %v3191_v21  ;;  %v3259_v21 = vld [vmem:[%s4131_s1 + $0x408] sm:$0xff]  }
  0x51   :  { %2902 = vmatpush3.bf16.msra.mxu1 %v3193_v23  ;;  %2881 = vmatprep.subr.bf16.mxu0 %v3194_v24  ;;  %v3261_v23 = vld [vmem:[%s4131_s1 + $0x488] sm:$0xff]   ;;  %v3262_v24 = vld [vmem:[%s4131_s1 + $0x450] sm:$0xff]  }
  0x52   :  { %2903 = vmatprep.subr.bf16.mxu1 %v3196_v26  ;;  %v3264_v26 = vld [vmem:[%s4131_s1 + $0x4d0] sm:$0xff]  }
  0x54   :  { %2882 = vmatpush3.bf16.msra.mxu0 %v3195_v25  ;;  %v3263_v25 = vld [vmem:[%s4131_s1 + $0x410] sm:$0xff]  }
  0x55   :  { %2904 = vmatpush3.bf16.msra.mxu1 %v3197_v27  ;;  %2883 = vmatprep.subr.bf16.mxu0 %v3198_v28  ;;  %v3265_v27 = vld [vmem:[%s4131_s1 + $0x490] sm:$0xff]   ;;  %v3266_v28 = vld [vmem:[%s4131_s1 + $0x458] sm:$0xff]  }
  0x56   :  { %2905 = vmatprep.subr.bf16.mxu1 %v3200_v30  ;;  %v3268_v30 = vld [vmem:[%s4131_s1 + $0x4d8] sm:$0xff]  }
  0x58   :  { %2884 = vmatpush3.bf16.msra.mxu0 %v3199_v29  ;;  %v3267_v29 = vld [vmem:[%s4131_s1 + $0x418] sm:$0xff]  }
  0x59   :  { %2906 = vmatpush3.bf16.msra.mxu1 %v3201_v31  ;;  %2885 = vmatprep.subr.bf16.mxu0 %v3202_v32  ;;  %v3269_v31 = vld [vmem:[%s4131_s1 + $0x498] sm:$0xff]   ;;  %v3270_v32 = vld [vmem:[%s4131_s1 + $0x460] sm:$0xff]  }
  0x5a   :  { %2907 = vmatprep.subr.bf16.mxu1 %v3204_v34  ;;  %v3272_v34 = vld [vmem:[%s4131_s1 + $0x4e0] sm:$0xff]  }
  0x5c   :  { %2886 = vmatpush3.bf16.msra.mxu0 %v3203_v33  ;;  %v3271_v33 = vld [vmem:[%s4131_s1 + $0x420] sm:$0xff]  }
  0x5d   :  { %2908 = vmatpush3.bf16.msra.mxu1 %v3205_v35  ;;  %2887 = vmatprep.subr.bf16.mxu0 %v3206_v36  ;;  %v3273_v35 = vld [vmem:[%s4131_s1 + $0x4a0] sm:$0xff]   ;;  %v3274_v36 = vld [vmem:[%s4131_s1 + $0x468] sm:$0xff]  }
  0x5e   :  { %2909 = vmatprep.subr.bf16.mxu1 %v3208_v38  ;;  %v3276_v38 = vld [vmem:[%s4131_s1 + $0x4e8] sm:$0xff]  }
  0x60   :  { %2888 = vmatpush3.bf16.msra.mxu0 %v3207_v37  ;;  %v3275_v37 = vld [vmem:[%s4131_s1 + $0x428] sm:$0xff]  }
  0x61   :  { %2910 = vmatpush3.bf16.msra.mxu1 %v3212_v41  ;;  %2917 = vmatprep.subr.bf16.mxu0 %v3213_v42  ;;  %v3279_v41 = vld [vmem:[%s4131_s1 + $0x430] sm:$0xff]  }
  0x62   :  { %2939 = vmatprep.subr.bf16.mxu1 %v3218_v46  ;;  %v3280_v42 = vld [vmem:[%s4131_s1 + $0x4f0] sm:$0xff]   ;;  %v3284_v46 = vld [vmem:[%s4131_s1 + $0x4f8] sm:$0xff]  }
  0x63   :  { %2110 = vmatmul.mubr.bf16.vlgmr.msra.gmra.mrb[8].mxu0 %v3209_v39  ;;  %v3277_v39 = vld [vmem:[%s4131_s1 + $0x4a8] sm:$0xff]  }
  0x64   :  { %2918 = vmatpush3.bf16.msra.mxu0 %v3217_v45  ;;  %2151 = vmatmul.mubr.bf16.vlgmr.msra.gmra.mrb[8].mxu1 %v3214_v43  ;;  %v3281_v43 = vld [vmem:[%s4131_s1 + $0x4b0] sm:$0xff]   ;;  %v3283_v45 = vld [vmem:[%s4131_s1 + $0x438] sm:$0xff]  }
  0x65   :  { %2940 = vmatpush3.bf16.msra.mxu1 %v3219_v47  ;;  %2919 = vmatprep.subr.bf16.mxu0 %v3220_v48  ;;  %v3285_v47 = vld [vmem:[%s4132_s0 + $0x40] ss:$108 sps:$4 sm:$0xff]   ;;  %v3287_v48 = vld [vmem:[%s4132_s0 + $0x44] ss:$108 sps:$4 sm:$0xff]  }
  0x66   :  { %2941 = vmatprep.subr.bf16.mxu1 %v3222_v50  ;;  %2191 = vmatprep.mubr.bf16.mxu0 %v3249_v12  ;;  %v3289_v50 = vld [vmem:[%s4131_s1 + $0x540] sm:$0xff]   ;;  %v3316_v12 = vld [vmem:[%s4131_s1 + $0x570] sm:$0xff]  }
  0x67   :  { %2232 = vmatprep.mubr.bf16.mxu1 %v3254_v16  ;;  %v3320_v16 = vld [vmem:[%s4131_s1 + $0x578] sm:$0xff]  }
  0x68   :  { %2920 = vmatpush3.bf16.msra.mxu0 %v3221_v49  ;;  %v3288_v49 = vld [vmem:[%s4131_s1 + $0x4b8] sm:$0xff]  }
  0x69   :  { %2942 = vmatpush3.bf16.msra.mxu1 %v3223_v51  ;;  %2921 = vmatprep.subr.bf16.mxu0 %v3224_v52  ;;  %v3290_v51 = vld [vmem:[%s4132_s0 + $0x48] ss:$108 sps:$4 sm:$0xff]   ;;  %v3292_v52 = vld [vmem:[%s4132_s0 + $0x4c] ss:$108 sps:$4 sm:$0xff]  }
  0x6a   :  { %2943 = vmatprep.subr.bf16.mxu1 %v3226_v54  ;;  %v3294_v54 = vld [vmem:[%s4131_s1 + $0x5c0] sm:$0xff]  }
  0x6c   :  { %2922 = vmatpush3.bf16.msra.mxu0 %v3225_v53  ;;  %v3293_v53 = vld [vmem:[%s4131_s1 + $0x500] sm:$0xff]  }
  0x6d   :  { %2944 = vmatpush3.bf16.msra.mxu1 %v3227_v55  ;;  %2923 = vmatprep.subr.bf16.mxu0 %v3228_v56  ;;  %v3295_v55 = vld [vmem:[%s4131_s1 + $0x580] sm:$0xff]   ;;  %v3296_v56 = vld [vmem:[%s4131_s1 + $0x548] sm:$0xff]  }
  0x6e   :  { %2945 = vmatprep.subr.bf16.mxu1 %v3230_v58  ;;  %v3298_v58 = vld [vmem:[%s4131_s1 + $0x5c8] sm:$0xff]  }
  0x70   :  { %2924 = vmatpush3.bf16.msra.mxu0 %v3229_v57  ;;  %v3297_v57 = vld [vmem:[%s4131_s1 + $0x508] sm:$0xff]  }
  0x71   :  { %2946 = vmatpush3.bf16.msra.mxu1 %v3231_v59  ;;  %2925 = vmatprep.subr.bf16.mxu0 %v3232_v60  ;;  %v3299_v59 = vld [vmem:[%s4131_s1 + $0x588] sm:$0xff]   ;;  %v3300_v60 = vld [vmem:[%s4131_s1 + $0x550] sm:$0xff]  }
  0x72   :  { %2947 = vmatprep.subr.bf16.mxu1 %v3234_v62  ;;  %v3302_v62 = vld [vmem:[%s4131_s1 + $0x5d0] sm:$0xff]  }
  0x74   :  { %2926 = vmatpush3.bf16.msra.mxu0 %v3233_v61  ;;  %v3301_v61 = vld [vmem:[%s4131_s1 + $0x510] sm:$0xff]  }
  0x75   :  { %2948 = vmatpush3.bf16.msra.mxu1 %v3235_v63  ;;  %2927 = vmatprep.subr.bf16.mxu0 %v3236_v0  ;;  %v3303_v63 = vld [vmem:[%s4131_s1 + $0x590] sm:$0xff]   ;;  %v3304_v0 = vld [vmem:[%s4131_s1 + $0x558] sm:$0xff]  }
  0x76   :  { %2949 = vmatprep.subr.bf16.mxu1 %v3238_v2  ;;  %v3306_v2 = vld [vmem:[%s4131_s1 + $0x5d8] sm:$0xff]  }
  0x78   :  { %2928 = vmatpush3.bf16.msra.mxu0 %v3237_v1  ;;  %v3305_v1 = vld [vmem:[%s4131_s1 + $0x518] sm:$0xff]  }
  0x79   :  { %2950 = vmatpush3.bf16.msra.mxu1 %v3239_v3  ;;  %2929 = vmatprep.subr.bf16.mxu0 %v3240_v4  ;;  %v3307_v3 = vld [vmem:[%s4131_s1 + $0x598] sm:$0xff]   ;;  %v3308_v4 = vld [vmem:[%s4131_s1 + $0x560] sm:$0xff]  }
  0x7a   :  { %2951 = vmatprep.subr.bf16.mxu1 %v3242_v6  ;;  %v3310_v6 = vld [vmem:[%s4131_s1 + $0x5e0] sm:$0xff]  }
  0x7c   :  { %2930 = vmatpush3.bf16.msra.mxu0 %v3241_v5  ;;  %v3309_v5 = vld [vmem:[%s4131_s1 + $0x520] sm:$0xff]  }
  0x7d   :  { %2952 = vmatpush3.bf16.msra.mxu1 %v3243_v7  ;;  %2931 = vmatprep.subr.bf16.mxu0 %v3244_v8  ;;  %v3311_v7 = vld [vmem:[%s4131_s1 + $0x5a0] sm:$0xff]   ;;  %v3312_v8 = vld [vmem:[%s4131_s1 + $0x568] sm:$0xff]  }
  0x7e   :  { %2953 = vmatprep.subr.bf16.mxu1 %v3246_v10  ;;  %v3314_v10 = vld [vmem:[%s4131_s1 + $0x5e8] sm:$0xff]  }
  0x80   :  { %2932 = vmatpush3.bf16.msra.mxu0 %v3245_v9  ;;  %v3313_v9 = vld [vmem:[%s4131_s1 + $0x528] sm:$0xff]  }
  0x81   :  { %2954 = vmatpush3.bf16.msra.mxu1 %v3250_v13  ;;  %2961 = vmatprep.subr.bf16.mxu0 %v3251_v14  ;;  %v3317_v13 = vld [vmem:[%s4131_s1 + $0x530] sm:$0xff]  }
  0x82   :  { %2983 = vmatprep.subr.bf16.mxu1 %v3256_v18  ;;  %v3318_v14 = vld [vmem:[%s4131_s1 + $0x5f0] sm:$0xff]   ;;  %v3322_v18 = vld [vmem:[%s4131_s1 + $0x5f8] sm:$0xff]  }
  0x83   :  { %2192 = vmatmul.mubr.bf16.vlgmr.msra.gmra.mrb[12].mxu0 %v3247_v11  ;;  %v3315_v11 = vld [vmem:[%s4131_s1 + $0x5a8] sm:$0xff]  }
  0x84   :  { %2962 = vmatpush3.bf16.msra.mxu0 %v3255_v17  ;;  %2233 = vmatmul.mubr.bf16.vlgmr.msra.gmra.mrb[12].mxu1 %v3252_v15  ;;  %v3319_v15 = vld [vmem:[%s4131_s1 + $0x5b0] sm:$0xff]   ;;  %v3321_v17 = vld [vmem:[%s4131_s1 + $0x538] sm:$0xff]  }
  0x85   :  { %2984 = vmatpush3.bf16.msra.mxu1 %v3257_v19  ;;  %2963 = vmatprep.subr.bf16.mxu0 %v3258_v20  ;;  %v3323_v19 = vld [vmem:[%s4132_s0 + $0x50] ss:$108 sps:$4 sm:$0xff]   ;;  %v3325_v20 = vld [vmem:[%s4132_s0 + $0x54] ss:$108 sps:$4 sm:$0xff]  }
  0x86   :  { %2985 = vmatprep.subr.bf16.mxu1 %v3260_v22  ;;  %2273 = vmatprep.mubr.bf16.mxu0 %v3287_v48  ;;  %v3327_v22 = vld [vmem:[%s4131_s1 + $0x640] sm:$0xff]   ;;  %v3352_v48 = vld [vmem:[%s4131_s1 + $0x638] sm:$0xff]  }
  0x87   :  { %2314 = vmatprep.mubr.bf16.mxu1 %v3292_v52 }
  0x88   :  { %2964 = vmatpush3.bf16.msra.mxu0 %v3259_v21  ;;  %v3326_v21 = vld [vmem:[%s4131_s1 + $0x5b8] sm:$0xff]  }
  0x89   :  { %2986 = vmatpush3.bf16.msra.mxu1 %v3261_v23  ;;  %2965 = vmatprep.subr.bf16.mxu0 %v3262_v24  ;;  %v3328_v23 = vld [vmem:[%s4132_s0 + $0x58] ss:$108 sps:$4 sm:$0xff]   ;;  %v3330_v24 = vld [vmem:[%s4132_s0 + $0x5c] ss:$108 sps:$4 sm:$0xff]  }
  0x8a   :  { %2987 = vmatprep.subr.bf16.mxu1 %v3264_v26  ;;  %v3358_v26 = vmov 0.0  }
  0x8c   :  { %2966 = vmatpush3.bf16.msra.mxu0 %v3263_v25  ;;  %v3331_v25 = vld [vmem:[%s4131_s1 + $0x600] sm:$0xff]  }
  0x8d   :  { %2988 = vmatpush3.bf16.msra.mxu1 %v3265_v27  ;;  %2967 = vmatprep.subr.bf16.mxu0 %v3266_v28  ;;  %v3332_v27 = vld [vmem:[%s4131_s1 + $0x680] sm:$0xff]   ;;  %v3333_v28 = vld [vmem:[%s4131_s1 + $0x648] sm:$0xff]  }
  0x8e   :  { %2989 = vmatprep.subr.bf16.mxu1 %v3268_v30  ;;  %v3335_v30 = vld [vmem:[%s4131_s1 + $0x688] sm:$0xff]  }
  0x90   :  { %2968 = vmatpush3.bf16.msra.mxu0 %v3267_v29  ;;  %v3334_v29 = vld [vmem:[%s4131_s1 + $0x608] sm:$0xff]  }
  0x91   :  { %2990 = vmatpush3.bf16.msra.mxu1 %v3269_v31  ;;  %2969 = vmatprep.subr.bf16.mxu0 %v3270_v32  ;;  %v3336_v31 = vld [vmem:[%s4131_s1 + $0x650] sm:$0xff]  }
  0x92   :  { %2991 = vmatprep.subr.bf16.mxu1 %v3272_v34  ;;  %v3337_v32 = vld [vmem:[%s4131_s1 + $0x610] sm:$0xff]   ;;  %v3339_v34 = vld [vmem:[%s4131_s1 + $0x658] sm:$0xff]  }
  0x94   :  { %2970 = vmatpush3.bf16.msra.mxu0 %v3271_v33  ;;  %v3338_v33 = vld [vmem:[%s4131_s1 + $0x690] sm:$0xff]  }
  0x95   :  { %2992 = vmatpush3.bf16.msra.mxu1 %v3273_v35  ;;  %2971 = vmatprep.subr.bf16.mxu0 %v3274_v36  ;;  %v3340_v35 = vld [vmem:[%s4131_s1 + $0x618] sm:$0xff]  }
  0x96   :  { %2993 = vmatprep.subr.bf16.mxu1 %v3276_v38  ;;  %v3341_v36 = vld [vmem:[%s4131_s1 + $0x698] sm:$0xff]   ;;  %v3343_v38 = vld [vmem:[%s4131_s1 + $0x620] sm:$0xff]  }
  0x98   :  { %2972 = vmatpush3.bf16.msra.mxu0 %v3275_v37  ;;  %v3342_v37 = vld [vmem:[%s4131_s1 + $0x660] sm:$0xff]  }
  0x99   :  { %2994 = vmatpush3.bf16.msra.mxu1 %v3277_v39  ;;  %2973 = vmatprep.subr.bf16.mxu0 %v3278_v40  ;;  %v3344_v39 = vld [vmem:[%s4131_s1 + $0x6a0] sm:$0xff]   ;;  %v3345_v40 = vld [vmem:[%s4131_s1 + $0x668] sm:$0xff]  }
  0x9a   :  { %2995 = vmatprep.subr.bf16.mxu1 %v3280_v42  ;;  %v3347_v42 = vld [vmem:[%s4131_s1 + $0x6a8] sm:$0xff]  }
  0x9c   :  { %2974 = vmatpush3.bf16.msra.mxu0 %v3279_v41  ;;  %v3346_v41 = vld [vmem:[%s4131_s1 + $0x628] sm:$0xff]  }
  0x9d   :  { %2996 = vmatpush3.bf16.msra.mxu1 %v3281_v43  ;;  %2975 = vmatprep.subr.bf16.mxu0 %v3282_v44  ;;  %v3348_v43 = vld [vmem:[%s4131_s1 + $0x670] sm:$0xff]  }
  0x9e   :  { %2997 = vmatprep.subr.bf16.mxu1 %v3284_v46  ;;  %v3349_v44 = vld [vmem:[%s4131_s1 + $0x630] sm:$0xff]   ;;  %v3351_v46 = vld [vmem:[%s4131_s1 + $0x678] sm:$0xff]  }
  0xa0   :  { %2976 = vmatpush3.bf16.msra.mxu0 %v3283_v45  ;;  %v3350_v45 = vld [vmem:[%s4131_s1 + $0x6b0] sm:$0xff]  }
  0xa1   :  { %2998 = vmatpush3.bf16.msra.mxu1 %v3288_v49  ;;  %3005 = vmatprep.subr.bf16.mxu0 %v3289_v50  ;;  %v3356_v49 = vld [vmem:[%s4131_s1 + $0x6b8] sm:$0xff]   ;;  %v3353_v50 = vld [vmem:[%s4132_s0 + $0x60] ss:$108 sps:$4 sm:$0xff]  }
  0xa2   :  { %3027 = vmatprep.subr.bf16.mxu1 %v3294_v54 }
  0xa3   :  { %2274 = vmatmul.mubr.bf16.vlgmr.msra.gmra.mrb[16].mxu0 %v3285_v47  ;;  %v3355_v47 = vld [vmem:[%s4132_s0 + $0x64] ss:$108 sps:$4 sm:$0xff]  }
  0xa4   :  { %3006 = vmatpush3.bf16.msra.mxu0 %v3293_v53  ;;  %2315 = vmatmul.mubr.bf16.vlgmr.msra.gmra.mrb[16].mxu1 %v3290_v51  ;;  %v3357_v51 = vld [vmem:[%s4132_s0 + $0x68] ss:$108 sps:$4 sm:$0xff]  }
  0xa5   :  { %3028 = vmatpush3.bf16.msra.mxu1 %v3295_v55  ;;  %3007 = vmatprep.subr.bf16.mxu0 %v3296_v56 }
  0xa6   :  { %3029 = vmatprep.subr.bf16.mxu1 %v3298_v58  ;;  %2355 = vmatprep.mubr.bf16.mxu0 %v3325_v20 }
  0xa7   :  { %2396 = vmatprep.mubr.bf16.mxu1 %v3330_v24 }
  0xa8   :  { %3008 = vmatpush3.bf16.msra.mxu0 %v3297_v57 }
  0xa9   :  { %3030 = vmatpush3.bf16.msra.mxu1 %v3299_v59  ;;  %3009 = vmatprep.subr.bf16.mxu0 %v3300_v60 }
  0xaa   :  { %3031 = vmatprep.subr.bf16.mxu1 %v3302_v62 }
  0xac   :  { %3010 = vmatpush3.bf16.msra.mxu0 %v3301_v61 }
  0xad   :  { %3032 = vmatpush3.bf16.msra.mxu1 %v3303_v63  ;;  %3011 = vmatprep.subr.bf16.mxu0 %v3304_v0 }
  0xae   :  { %3033 = vmatprep.subr.bf16.mxu1 %v3306_v2 }
  0xb0   :  { %3012 = vmatpush3.bf16.msra.mxu0 %v3305_v1 }
  0xb1   :  { %3034 = vmatpush3.bf16.msra.mxu1 %v3307_v3  ;;  %3013 = vmatprep.subr.bf16.mxu0 %v3308_v4 }
  0xb2   :  { %3035 = vmatprep.subr.bf16.mxu1 %v3310_v6 }
  0xb4   :  { %3014 = vmatpush3.bf16.msra.mxu0 %v3309_v5 }
  0xb5   :  { %3036 = vmatpush3.bf16.msra.mxu1 %v3311_v7  ;;  %3015 = vmatprep.subr.bf16.mxu0 %v3312_v8 }
  0xb6   :  { %3037 = vmatprep.subr.bf16.mxu1 %v3314_v10 }
  0xb8   :  { %3016 = vmatpush3.bf16.msra.mxu0 %v3313_v9 }
  0xb9   :  { %3038 = vmatpush3.bf16.msra.mxu1 %v3315_v11  ;;  %3017 = vmatprep.subr.bf16.mxu0 %v3316_v12 }
  0xba   :  { %3039 = vmatprep.subr.bf16.mxu1 %v3318_v14 }
  0xbc   :  { %3018 = vmatpush3.bf16.msra.mxu0 %v3317_v13 }
  0xbd   :  { %3040 = vmatpush3.bf16.msra.mxu1 %v3319_v15  ;;  %3019 = vmatprep.subr.bf16.mxu0 %v3320_v16 }
  0xbe   :  { %3041 = vmatprep.subr.bf16.mxu1 %v3322_v18 }
  0xc0   :  { %3020 = vmatpush3.bf16.msra.mxu0 %v3321_v17 }
  0xc1   :  { %3042 = vmatpush3.bf16.msra.mxu1 %v3326_v21  ;;  %3049 = vmatprep.subr.bf16.mxu0 %v3327_v22 }
  0xc2   :  { %3080 = vmatprep.subr.bf16.mxu1 %v3358_v26 }
  0xc3   :  { %2356 = vmatmul.mubr.bf16.vlgmr.msra.gmra.mrb[20].mxu0 %v3323_v19 }
  0xc4   :  { %3050 = vmatpush3.bf16.msra.mxu0 %v3331_v25  ;;  %2397 = vmatmul.mubr.bf16.vlgmr.msra.gmra.mrb[20].mxu1 %v3328_v23 }
  0xc5   :  { %3081 = vmatpush3.bf16.msra.mxu1 %v3332_v27  ;;  %3096 = vmatprep.mubr.msk.bf16.mxu1 %vm3359_vm0, %v3358_v26 }
  0xc6   :  { %3051 = vmatprep.subr.bf16.mxu0 %v3333_v28  ;;  %3082 = vmatprep.subr.bf16.mxu1 %v3358_v26 }
  0xc7   :  { %2437 = vmatprep.mubr.bf16.mxu0 %v3355_v47 }
  0xc8   :  { %3052 = vmatpush3.bf16.msra.mxu0 %v3334_v29 }
  0xc9   :  { %3083 = vmatpush3.bf16.msra.mxu1 %v3335_v30  ;;  %3053 = vmatprep.subr.bf16.mxu0 %v3336_v31 }
  0xca   :  { %3084 = vmatprep.subr.bf16.mxu1 %v3358_v26 }
  0xcc   :  { %3054 = vmatpush3.bf16.msra.mxu0 %v3337_v32 }
  0xcd   :  { %3085 = vmatpush3.bf16.msra.mxu1 %v3338_v33  ;;  %3055 = vmatprep.subr.bf16.mxu0 %v3339_v34 }
  0xce   :  { %3086 = vmatprep.subr.bf16.mxu1 %v3358_v26 }
  0xd0   :  { %3056 = vmatpush3.bf16.msra.mxu0 %v3340_v35 }
  0xd1   :  { %3087 = vmatpush3.bf16.msra.mxu1 %v3341_v36  ;;  %3057 = vmatprep.subr.bf16.mxu0 %v3342_v37 }
  0xd2   :  { %3088 = vmatprep.subr.bf16.mxu1 %v3358_v26 }
  0xd4   :  { %3058 = vmatpush3.bf16.msra.mxu0 %v3343_v38 }
  0xd5   :  { %3089 = vmatpush3.bf16.msra.mxu1 %v3344_v39  ;;  %3059 = vmatprep.subr.bf16.mxu0 %v3345_v40 }
  0xd6   :  { %3090 = vmatprep.subr.bf16.mxu1 %v3358_v26 }
  0xd8   :  { %3060 = vmatpush3.bf16.msra.mxu0 %v3346_v41 }
  0xd9   :  { %3091 = vmatpush3.bf16.msra.mxu1 %v3347_v42  ;;  %3061 = vmatprep.subr.bf16.mxu0 %v3348_v43 }
  0xda   :  { %3092 = vmatprep.subr.bf16.mxu1 %v3358_v26 }
  0xdc   :  { %3062 = vmatpush3.bf16.msra.mxu0 %v3349_v44 }
  0xdd   :  { %3093 = vmatpush3.bf16.msra.mxu1 %v3350_v45  ;;  %3063 = vmatprep.subr.bf16.mxu0 %v3351_v46 }
  0xde   :  { %3094 = vmatprep.subr.bf16.mxu1 %v3358_v26 }
  0xe0   :  { %3064 = vmatpush3.bf16.msra.mxu0 %v3352_v48 }
  0xe1   :  { %3095 = vmatpush3.bf16.msra.mxu1 %v3356_v49 }
  0xe3   :  { %2438 = vmatmul.mubr.bf16.vlgmr.msra.gmra.mrb[24].mxu0 %v3353_v50 }
  0xe4   :  { %3097 = vmatmul.mubr.bf16.vlgmr.msra.gmra.mrb[24].mxu1 %v3357_v51 }
  0xf6   :  { %v2801_v52 = vpop.f32.mrb[0].mxu0 }
  0xf7   :  { %v2823_v53 = vpop.f32.mrb[0].mxu1  ;;  %v2802_v54 = vpop.f32.mrb[1].mxu0 }
  0xf8   :  { %v2803_v55 = vadd.f32 %v2802_v54, %v2801_v52  ;;  %v2824_v56 = vpop.f32.mrb[1].mxu1  ;;  %v2804_v57 = vpop.f32.mrb[2].mxu0 }
  0xf9   :  { %v2825_v58 = vadd.f32 %v2824_v56, %v2823_v53  ;;  %v2826_v59 = vpop.f32.mrb[2].mxu1  ;;  %v2805_v60 = vpop.f32.mrb[3].mxu0 }
  0xfa   :  { %v2806_v61 = vadd.f32 %v2805_v60, %v2804_v57  ;;  %v2827_v62 = vpop.f32.mrb[3].mxu1 }
  0xfb   :  { %v1989_v63 = vadd.f32 %v2825_v58, %v2803_v55  ;;  %v2828_v0 = vadd.f32 %v2827_v62, %v2826_v59 }
  0xfd   :  { %v1992_v1 = vadd.f32 %v2828_v0, %v2806_v61 }
 0x116   :  { %v2845_v2 = vpop.f32.mrb[4].mxu0 }
 0x117   :  { %v2846_v3 = vpop.f32.mrb[5].mxu0  ;;  %v2867_v8 = vpop.f32.mrb[4].mxu1 }
 0x118   :  { %v2847_v4 = vadd.f32 %v2846_v3, %v2845_v2  ;;  %v2848_v5 = vpop.f32.mrb[6].mxu0  ;;  %v2868_v10 = vpop.f32.mrb[5].mxu1 }
 0x119   :  { %v2849_v6 = vpop.f32.mrb[7].mxu0  ;;  %v2869_v12 = vadd.f32 %v2868_v10, %v2867_v8  ;;  %v2870_v13 = vpop.f32.mrb[6].mxu1 }
 0x11a   :  { %v2030_v7 = vadd.f32 %v2847_v4, %v1989_v63  ;;  %v2850_v9 = vadd.f32 %v2849_v6, %v2848_v5  ;;  %v2871_v14 = vpop.f32.mrb[7].mxu1 }
 0x11b   :  { %v2872_v16 = vadd.f32 %v2871_v14, %v2870_v13 }
 0x11c   :  { %v2033_v11 = vadd.f32 %v2850_v9, %v1992_v1  ;;  %v2071_v15 = vadd.f32 %v2869_v12, %v2030_v7 }
 0x11e   :  { %v2074_v17 = vadd.f32 %v2872_v16, %v2033_v11 }
 0x136   :  { %v2889_v18 = vpop.f32.mrb[8].mxu0 }
 0x137   :  { %v2890_v19 = vpop.f32.mrb[9].mxu0  ;;  %v2911_v22 = vpop.f32.mrb[8].mxu1 }
 0x138   :  { %v2891_v20 = vadd.f32 %v2890_v19, %v2889_v18  ;;  %v2892_v21 = vpop.f32.mrb[10].mxu0  ;;  %v2912_v26 = vpop.f32.mrb[9].mxu1 }
 0x139   :  { %v2893_v23 = vpop.f32.mrb[11].mxu0  ;;  %v2913_v27 = vadd.f32 %v2912_v26, %v2911_v22  ;;  %v2914_v28 = vpop.f32.mrb[10].mxu1 }
 0x13a   :  { %v2112_v24 = vadd.f32 %v2891_v20, %v2071_v15  ;;  %v2894_v25 = vadd.f32 %v2893_v23, %v2892_v21  ;;  %v2915_v30 = vpop.f32.mrb[11].mxu1 }
 0x13b   :  { %v2916_v32 = vadd.f32 %v2915_v30, %v2914_v28  ;;  %v2777_v30 = vld [vmem:[%s4134_s4] sm:$0xff]  }
 0x13c   :  { %v2115_v29 = vadd.f32 %v2894_v25, %v2074_v17  ;;  %v2153_v31 = vadd.f32 %v2913_v27, %v2112_v24 }
 0x13e   :  { %v2156_v33 = vadd.f32 %v2916_v32, %v2115_v29  ;;  %v2770_v29 = vld [vmem:[%s4133_s2] ss:$0 sm:$0xff] }
 0x156   :  { %v2933_v34 = vpop.f32.mrb[12].mxu0 }
 0x157   :  { %v2934_v35 = vpop.f32.mrb[13].mxu0  ;;  %v2955_v38 = vpop.f32.mrb[12].mxu1 }
 0x158   :  { %v2935_v36 = vadd.f32 %v2934_v35, %v2933_v34  ;;  %v2936_v37 = vpop.f32.mrb[14].mxu0  ;;  %v2956_v42 = vpop.f32.mrb[13].mxu1  ;;  %v2778_v35 = vunpack.c.l.bf16 %v2777_v30 }
 0x159   :  { %v2937_v39 = vpop.f32.mrb[15].mxu0  ;;  %v2957_v43 = vadd.f32 %v2956_v42, %v2955_v38  ;;  %v2958_v44 = vpop.f32.mrb[14].mxu1 }
 0x15a   :  { %v2194_v40 = vadd.f32 %v2935_v36, %v2153_v31  ;;  %v2938_v41 = vadd.f32 %v2937_v39, %v2936_v37  ;;  %v2959_v46 = vpop.f32.mrb[15].mxu1  ;;  %v2779_v39 = vunpack.c.h.bf16 %v2777_v30 }
 0x15b   :  { %v2960_v48 = vadd.f32 %v2959_v46, %v2958_v44 }
 0x15c   :  { %v2197_v45 = vadd.f32 %v2938_v41, %v2156_v33  ;;  %v2235_v47 = vadd.f32 %v2957_v43, %v2194_v40  ;;  %v2771_v33 = vld [vmem:[%s4135_s3] ss:$0 sm:$0xff] }
 0x15e   :  { %v2238_v49 = vadd.f32 %v2960_v48, %v2197_v45 }
 0x176   :  { %v2977_v50 = vpop.f32.mrb[16].mxu0 }
 0x177   :  { %v2978_v51 = vpop.f32.mrb[17].mxu0  ;;  %v2999_v56 = vpop.f32.mrb[16].mxu1 }
 0x178   :  { %v2979_v52 = vadd.f32 %v2978_v51, %v2977_v50  ;;  %v2980_v53 = vpop.f32.mrb[18].mxu0  ;;  %v3000_v58 = vpop.f32.mrb[17].mxu1 }
 0x179   :  { %v2981_v54 = vpop.f32.mrb[19].mxu0  ;;  %v3001_v60 = vadd.f32 %v3000_v58, %v2999_v56  ;;  %v3002_v61 = vpop.f32.mrb[18].mxu1 }
 0x17a   :  { %v2276_v55 = vadd.f32 %v2979_v52, %v2235_v47  ;;  %v2982_v57 = vadd.f32 %v2981_v54, %v2980_v53  ;;  %v3003_v62 = vpop.f32.mrb[19].mxu1 }
 0x17b   :  { %v3004_v0 = vadd.f32 %v3003_v62, %v3002_v61 }
 0x17c   :  { %v2279_v59 = vadd.f32 %v2982_v57, %v2238_v49  ;;  %v2317_v63 = vadd.f32 %v3001_v60, %v2276_v55 }
 0x17e   :  { %v2320_v1 = vadd.f32 %v3004_v0, %v2279_v59 }
 0x196   :  { %v3021_v2 = vpop.f32.mrb[20].mxu0 }
 0x197   :  { %v3022_v3 = vpop.f32.mrb[21].mxu0  ;;  %v3043_v6 = vpop.f32.mrb[20].mxu1 }
 0x198   :  { %v3023_v4 = vadd.f32 %v3022_v3, %v3021_v2  ;;  %v3024_v5 = vpop.f32.mrb[22].mxu0  ;;  %v3044_v10 = vpop.f32.mrb[21].mxu1 }
 0x199   :  { %v3025_v7 = vpop.f32.mrb[23].mxu0  ;;  %v3045_v11 = vadd.f32 %v3044_v10, %v3043_v6  ;;  %v3046_v12 = vpop.f32.mrb[22].mxu1 }
 0x19a   :  { %v2358_v8 = vadd.f32 %v3023_v4, %v2317_v63  ;;  %v3026_v9 = vadd.f32 %v3025_v7, %v3024_v5  ;;  %v3047_v14 = vpop.f32.mrb[23].mxu1 }
 0x19b   :  { %v3048_v16 = vadd.f32 %v3047_v14, %v3046_v12 }
 0x19c   :  { %v2361_v13 = vadd.f32 %v3026_v9, %v2320_v1  ;;  %v2399_v15 = vadd.f32 %v3045_v11, %v2358_v8 }
 0x19e   :  { %v2402_v17 = vadd.f32 %v3048_v16, %v2361_v13 }
 0x1b6   :  { %v3065_v18 = vpop.f32.mrb[24].mxu0 }
 0x1b7   :  { %v3066_v19 = vpop.f32.mrb[25].mxu0  ;;  %v2480_v20 = vpop.f32.mrb[24].mxu1 }
 0x1b8   :  { %v3067_v21 = vadd.f32 %v3066_v19, %v3065_v18  ;;  %v3068_v22 = vpop.f32.mrb[26].mxu0  ;;  %v3098_v23 = vpop.f32.mrb[25].mxu1 }
 0x1b9   :  { %v3069_v24 = vpop.f32.mrb[27].mxu0  ;;  %v2483_v25 = vpop.f32.mrb[26].mxu1 }
 0x1ba   :  { %v2440_v26 = vadd.f32 %v3067_v21, %v2399_v15  ;;  %v3070_v27 = vadd.f32 %v3069_v24, %v3068_v22  ;;  %v3099_v28 = vpop.f32.mrb[27].mxu1 }
 0x1bc   :  { %v2481_v31 = vadd.f32 %v2480_v20, %v2440_v26  ;;  %v2443_v32 = vadd.f32 %v3070_v27, %v2402_v17 }
 0x1be   :  { %v2494_v34 = vmul.f32 %v2770_v29, %v2481_v31  ;;  %v2484_v36 = vadd.f32 %v2483_v25, %v2443_v32 }
 0x1c0   :  { %v2503_v37 = vadd.f32 %v2771_v33, %v2494_v34  ;;  %v2495_v38 = vmul.f32 %v2770_v29, %v2484_v36 }
 0x1c2   :  { %v2509_v40 = vadd.f32 %v2778_v35, %v2503_v37  ;;  %v2504_v41 = vadd.f32 %v2771_v33, %v2495_v38 }
 0x1c4   :  { %v2510_v42 = vadd.f32 %v2779_v39, %v2504_v41  ;;  %v2511_v43 = vmax.f32 %v2509_v40, 0.0 }
 0x1c6   :  { %v2512_v44 = vmax.f32 %v2510_v42, 0.0 }
 0x1c8   :  { %v2783_v45 = vpack.c.bf16 %v2512_v44, %v2511_v43 }
 0x1ca   :  { %2784 = vst [vmem:[%s4136_s5] sm:$0xff] %v2783_v45  }

// kernel: rasternet_forward.17
= control target key start
LH: loop header
LB: loop body
LE: loop exit
PB: predicated region body
PF: predicated region fallthrough
CT: control target
= control target key end

     0   :  { %v1973_v1 = vmov 0   ;;  %v179_v8 = vlaneseq  ;;  %v1974_v9 = vmov 1966171168   ;;  %s2639_s2 = inlined_call_operand.vmem [shape: bf16[1024,256], index: 2, kind: input, shape index: {}]   ;;  %s2640_s0 = inlined_call_operand.vmem [shape: bf16[2,1024], index: 0, kind: input, shape index: {}]   ;;  %s2641_s8 = inlined_call_operand.vmem [shape: bf16[128,256], index: 8, kind: input, shape index: {}]   ;;  %s2642_s1 = inlined_call_operand.vmem [shape: bf16[2,128], index: 1, kind: input, shape index: {}]   ;;  %s2643_s5 = inlined_call_operand.vmem [shape: bf16[256,256], index: 5, kind: input, shape index: {}]   ;;  %s2644_s3 = inlined_call_operand.vmem [shape: f32[1,256], index: 3, kind: input, shape index: {}]   ;;  %s2645_s4 = inlined_call_operand.vmem [shape: f32[1,256], index: 4, kind: input, shape index: {}]   ;;  %s2646_s9 = inlined_call_operand.vmem [shape: f32[1,256], index: 9, kind: input, shape index: {}]   ;;  %s2647_s6 = inlined_call_operand.vmem [shape: f32[1,256], index: 6, kind: input, shape index: {}]   ;;  %s2648_s10 = inlined_call_operand.vmem [shape: f32[1,256], index: 10, kind: input, shape index: {}]   ;;  %s2649_s7 = inlined_call_operand.vmem [shape: f32[1,256], index: 7, kind: input, shape index: {}]   ;;  %s2650_s11 = inlined_call_operand.vmem [shape: bf16[2,256], index: 11, kind: output, shape index: {}]  }
   0x1   :  { %v1708_v0 = vld [vmem:[%s2639_s2 + $0x104] ss:$8 sps:$4 sm:$0xff]   ;;  %168 = vmatprep.mubr.bf16.mxu0 %v1973_v1  ;;  %v1710_v2 = vld [vmem:[%s2639_s2 + $0x100] ss:$8 sps:$4 sm:$0xff]   ;;  %v1711_v3 = vld [vmem:[%s2639_s2 + $0x114] ss:$8 sps:$4 sm:$0xff]   ;;  %v337_v10 = vunpack.c.l.s4 %v1974_v9 }
   0x2   :  { %1073 = vmatprep.subr.bf16.mxu1 %v1708_v0  ;;  %v1713_v4 = vld [vmem:[%s2639_s2 + $0x110] ss:$8 sps:$4 sm:$0xff]   ;;  %v1714_v5 = vld [vmem:[%s2639_s2 + $0x124] ss:$8 sps:$4 sm:$0xff]   ;;  %v1716_v6 = vld [vmem:[%s2639_s2 + $0x120] ss:$8 sps:$4 sm:$0xff]  }
   0x3   :  { %1074 = vmatpush1.bf16.msra.mxu1 %v1710_v2  ;;  %v1717_v7 = vld [vmem:[%s2639_s2 + $0x134] ss:$8 sps:$4 sm:$0xff]   ;;  %v1719_v11 = vld [vmem:[%s2639_s2 + $0x130] ss:$8 sps:$4 sm:$0xff]   ;;  %v1720_v12 = vld [vmem:[%s2639_s2 + $0x144] ss:$8 sps:$4 sm:$0xff]   ;;  %v338_v14 = vunpack.c.0.s8 %v337_v10 }
   0x4   :  { %1075 = vmatprep.subr.bf16.mxu1 %v1711_v3  ;;  %v2062_v13 = vshrl.u32 %v179_v8, 7  ;;  %v1722_v15 = vld [vmem:[%s2639_s2 + $0x140] ss:$8 sps:$4 sm:$0xff]   ;;  %v1723_v16 = vld [vmem:[%s2639_s2 + $0x154] ss:$8 sps:$4 sm:$0xff]  }
   0x5   :  { %v1725_v18 = vld [vmem:[%s2639_s2 + $0x150] ss:$8 sps:$4 sm:$0xff]   ;;  %v1726_v19 = vld [vmem:[%s2639_s2 + $0x164] ss:$8 sps:$4 sm:$0xff]   ;;  %v1728_v22 = vld [vmem:[%s2639_s2 + $0x160] ss:$8 sps:$4 sm:$0xff]  }
   0x6   :  { %v2071_v17 = vsub.s32 %v338_v14, %v2062_v13  ;;  %v2082_v20 = vld [vmem:[%s2640_s0] sm:$0xff]  ;;  %v1729_v23 = vld [vmem:[%s2639_s2 + $0x174] ss:$8 sps:$4 sm:$0xff]   ;;  %v1731_v26 = vld [vmem:[%s2639_s2 + $0x170] ss:$8 sps:$4 sm:$0xff]  }
   0x7   :  { %1076 = vmatpush1.bf16.msra.mxu1 %v1713_v4  ;;  %v1732_v27 = vld [vmem:[%s2639_s2 + $0x184] ss:$8 sps:$4 sm:$0xff]   ;;  %v1734_v29 = vld [vmem:[%s2639_s2 + $0x180] ss:$8 sps:$4 sm:$0xff]   ;;  %v1735_v30 = vld [vmem:[%s2639_s2 + $0x194] ss:$8 sps:$4 sm:$0xff]   ;;  %v335_v53 = vcombine.high %v2082_v20, %v2082_v20 }
   0x8   :  { %1077 = vmatprep.subr.bf16.mxu1 %v1714_v5  ;;  %v2086_v21 = vrot.slane %v2082_v20, %v2071_v17  ;;  %v1781_v31 = vld [vmem:[%s2641_s8 + $0x4] ss:$8 sps:$4 sm:$0xff]   ;;  %v1783_v32 = vld [vmem:[%s2641_s8] ss:$8 sps:$4 sm:$0xff]   ;;  %v1737_v33 = vld [vmem:[%s2639_s2 + $0x190] ss:$8 sps:$4 sm:$0xff]  }
   0x9   :  { %v1738_v34 = vld [vmem:[%s2639_s2 + $0x1a4] ss:$8 sps:$4 sm:$0xff]   ;;  %136 = vmatprep.subr.bf16.mxu0 %v1781_v31  ;;  %v1787_v35 = vld [vmem:[%s2641_s8 + $0x14] ss:$8 sps:$4 sm:$0xff]   ;;  %v1789_v36 = vld [vmem:[%s2641_s8 + $0x10] ss:$8 sps:$4 sm:$0xff]   ;;  %v2197_v59 = vrot.slane %v335_v53, %v2071_v17 }
   0xa   :  { %v350_v24 = vcombine.high %v2086_v21, %v2086_v21  ;;  %137 = vmatpush1.bf16.msra.mxu0 %v1783_v32  ;;  %v1740_v37 = vld [vmem:[%s2639_s2 + $0x1a0] ss:$8 sps:$4 sm:$0xff]   ;;  %v1793_v38 = vld [vmem:[%s2641_s8 + $0x24] ss:$8 sps:$4 sm:$0xff]   ;;  %v1741_v39 = vld [vmem:[%s2639_s2 + $0x1b4] ss:$8 sps:$4 sm:$0xff]   ;;  %v2201_v60 = vrot.slane %v2086_v21, %v2071_v17 }
   0xb   :  { %1078 = vmatpush1.bf16.msra.mxu1 %v1716_v6  ;;  %138 = vmatprep.subr.bf16.mxu0 %v1787_v35  ;;  %v1795_v40 = vld [vmem:[%s2641_s8 + $0x20] ss:$8 sps:$4 sm:$0xff]   ;;  %v1799_v41 = vld [vmem:[%s2641_s8 + $0x34] ss:$8 sps:$4 sm:$0xff]   ;;  %v1743_v42 = vld [vmem:[%s2639_s2 + $0x1b0] ss:$8 sps:$4 sm:$0xff]   ;;  %v351_v1 = vcombine.high %v2197_v59, %v2197_v59 }
   0xc   :  { %1079 = vmatprep.subr.bf16.mxu1 %v1717_v7  ;;  %v2097_v25 = vrot.slane %v350_v24, %v2071_v17  ;;  %v1744_v43 = vld [vmem:[%s2639_s2 + $0x1c4] ss:$8 sps:$4 sm:$0xff]   ;;  %v1801_v44 = vld [vmem:[%s2641_s8 + $0x30] ss:$8 sps:$4 sm:$0xff]   ;;  %v1746_v46 = vld [vmem:[%s2639_s2 + $0x1c0] ss:$8 sps:$4 sm:$0xff]   ;;  %v380_v3 = vcombine.high %v2201_v60, %v2201_v60 }
   0xd   :  { %v1805_v45 = vld [vmem:[%s2641_s8 + $0x44] ss:$8 sps:$4 sm:$0xff]   ;;  %v1747_v47 = vld [vmem:[%s2639_s2 + $0x1d4] ss:$8 sps:$4 sm:$0xff]   ;;  %v1807_v48 = vld [vmem:[%s2641_s8 + $0x40] ss:$8 sps:$4 sm:$0xff]   ;;  %v2232_v7 = vrot.slane %v351_v1, %v2071_v17 }
   0xe   :  { %v382_v28 = vcombine.high %v2097_v25, %v2097_v25  ;;  %139 = vmatpush1.bf16.msra.mxu0 %v1789_v36  ;;  %v1811_v49 = vld [vmem:[%s2641_s8 + $0x54] ss:$8 sps:$4 sm:$0xff]   ;;  %v1749_v50 = vld [vmem:[%s2639_s2 + $0x1d0] ss:$8 sps:$4 sm:$0xff]   ;;  %v1750_v51 = vld [vmem:[%s2639_s2 + $0x1e4] ss:$8 sps:$4 sm:$0xff]  }
   0xf   :  { %1080 = vmatpush1.bf16.msra.mxu1 %v1719_v11  ;;  %140 = vmatprep.subr.bf16.mxu0 %v1793_v38  ;;  %v1813_v52 = vld [vmem:[%s2641_s8 + $0x50] ss:$8 sps:$4 sm:$0xff]   ;;  %v1817_v54 = vld [vmem:[%s2641_s8 + $0x64] ss:$8 sps:$4 sm:$0xff]   ;;  %v1752_v55 = vld [vmem:[%s2639_s2 + $0x1e0] ss:$8 sps:$4 sm:$0xff]  }
  0x10   :  { %1081 = vmatprep.subr.bf16.mxu1 %v1720_v12  ;;  %1105 = vmatprep.mubr.bf16.mxu1 %v382_v28  ;;  %v1753_v56 = vld [vmem:[%s2639_s2 + $0x1f4] ss:$8 sps:$4 sm:$0xff]   ;;  %v1819_v57 = vld [vmem:[%s2641_s8 + $0x60] ss:$8 sps:$4 sm:$0xff]   ;;  %v1755_v61 = vld [vmem:[%s2639_s2 + $0x1f0] ss:$8 sps:$4 sm:$0xff]  }
  0x11   :  { %v1823_v58 = vld [vmem:[%s2641_s8 + $0x74] ss:$8 sps:$4 sm:$0xff]   ;;  %v1759_v62 = vld [vmem:[%s2639_s2 + $0x204] ss:$8 sps:$4 sm:$0xff]   ;;  %v1825_v63 = vld [vmem:[%s2641_s8 + $0x70] ss:$8 sps:$4 sm:$0xff]  }
  0x12   :  { %141 = vmatpush1.bf16.msra.mxu0 %v1795_v40  ;;  %v1831_v0 = vld [vmem:[%s2639_s2 + $0x4] ss:$8 sps:$4 sm:$0xff]   ;;  %v1757_v2 = vld [vmem:[%s2639_s2 + $0x200] ss:$8 sps:$4 sm:$0xff]   ;;  %v1762_v4 = vld [vmem:[%s2639_s2 + $0x214] ss:$8 sps:$4 sm:$0xff]  }
  0x13   :  { %1082 = vmatpush1.bf16.msra.mxu1 %v1722_v15  ;;  %142 = vmatprep.subr.bf16.mxu0 %v1799_v41  ;;  %v1829_v5 = vld [vmem:[%s2639_s2] ss:$8 sps:$4 sm:$0xff]   ;;  %v1837_v8 = vld [vmem:[%s2639_s2 + $0x14] ss:$8 sps:$4 sm:$0xff]   ;;  %v1760_v9 = vld [vmem:[%s2639_s2 + $0x210] ss:$8 sps:$4 sm:$0xff]  }
  0x14   :  { %1083 = vmatprep.subr.bf16.mxu1 %v1723_v16  ;;  %v39_v6 = vld [vmem:[%s2642_s1] sm:$0x1]  ;;  %v1765_v10 = vld [vmem:[%s2639_s2 + $0x224] ss:$8 sps:$4 sm:$0xff]   ;;  %v1835_v11 = vld [vmem:[%s2639_s2 + $0x10] ss:$8 sps:$4 sm:$0xff]  }
  0x15   :  { %v1843_v12 = vld [vmem:[%s2639_s2 + $0x24] ss:$8 sps:$4 sm:$0xff]   ;;  %v1763_v14 = vld [vmem:[%s2639_s2 + $0x220] ss:$8 sps:$4 sm:$0xff]   ;;  %v1768_v15 = vld [vmem:[%s2639_s2 + $0x234] ss:$8 sps:$4 sm:$0xff]  }
  0x16   :  { %143 = vmatpush1.bf16.msra.mxu0 %v1801_v44  ;;  %v1841_v16 = vld [vmem:[%s2639_s2 + $0x20] ss:$8 sps:$4 sm:$0xff]   ;;  %v1771_v20 = vld [vmem:[%s2639_s2 + $0x244] ss:$8 sps:$4 sm:$0xff]   ;;  %v1847_v21 = vld [vmem:[%s2639_s2 + $0x30] ss:$8 sps:$4 sm:$0xff]  }
  0x17   :  { %1084 = vmatpush1.bf16.msra.mxu1 %v1725_v18  ;;  %144 = vmatprep.subr.bf16.mxu0 %v1805_v45  ;;  %v1849_v18 = vld [vmem:[%s2639_s2 + $0x34] ss:$8 sps:$4 sm:$0xff]   ;;  %v1777_v28 = vld [vmem:[%s2639_s2 + $0x264] ss:$8 sps:$4 sm:$0xff]   ;;  %v1775_v31 = vld [vmem:[%s2639_s2 + $0x260] ss:$8 sps:$4 sm:$0xff]  }
  0x18   :  { %1085 = vmatprep.subr.bf16.mxu1 %v1726_v19  ;;  %v1766_v19 = vld [vmem:[%s2639_s2 + $0x230] ss:$8 sps:$4 sm:$0xff]   ;;  %v1774_v24 = vld [vmem:[%s2639_s2 + $0x254] ss:$8 sps:$4 sm:$0xff]   ;;  %v1786_v36 = vld [vmem:[%s2639_s2 + $0x284] ss:$8 sps:$4 sm:$0xff]  }
  0x19   :  { %v1780_v32 = vld [vmem:[%s2639_s2 + $0x274] ss:$8 sps:$4 sm:$0xff]   ;;  %v1778_v35 = vld [vmem:[%s2639_s2 + $0x270] ss:$8 sps:$4 sm:$0xff]   ;;  %v1879_v38 = vld [vmem:[%s2639_s2 + $0x84] ss:$8 sps:$4 sm:$0xff]  }
  0x1a   :  { %145 = vmatpush1.bf16.msra.mxu0 %v1807_v48  ;;  %v1792_v40 = vld [vmem:[%s2639_s2 + $0x294] ss:$8 sps:$4 sm:$0xff]   ;;  %v1877_v41 = vld [vmem:[%s2639_s2 + $0x80] ss:$8 sps:$4 sm:$0xff]   ;;  %v1798_v44 = vld [vmem:[%s2639_s2 + $0x2a4] ss:$8 sps:$4 sm:$0xff]  }
  0x1b   :  { %1086 = vmatpush1.bf16.msra.mxu1 %v1728_v22  ;;  %146 = vmatprep.subr.bf16.mxu0 %v1811_v49  ;;  %v1855_v22 = vld [vmem:[%s2639_s2 + $0x44] ss:$8 sps:$4 sm:$0xff]   ;;  %v1883_v45 = vld [vmem:[%s2639_s2 + $0x90] ss:$8 sps:$4 sm:$0xff]   ;;  %v1804_v48 = vld [vmem:[%s2639_s2 + $0x2b4] ss:$8 sps:$4 sm:$0xff]  }
  0x1c   :  { %1087 = vmatprep.subr.bf16.mxu1 %v1729_v23  ;;  %v1769_v23 = vld [vmem:[%s2639_s2 + $0x240] ss:$8 sps:$4 sm:$0xff]   ;;  %v1895_v53 = vld [vmem:[%s2639_s2 + $0xb0] ss:$8 sps:$4 sm:$0xff]  }
  0x1d   :  { %v1889_v49 = vld [vmem:[%s2639_s2 + $0xa0] ss:$8 sps:$4 sm:$0xff]  }
  0x1e   :  { %147 = vmatpush1.bf16.msra.mxu0 %v1813_v52  ;;  %v1810_v52 = vld [vmem:[%s2639_s2 + $0x2c4] ss:$8 sps:$4 sm:$0xff]   ;;  %v1820_v1 = vld [vmem:[%s2639_s2 + $0x2e0] ss:$8 sps:$4 sm:$0xff]  }
  0x1f   :  { %1088 = vmatpush1.bf16.msra.mxu1 %v1731_v26  ;;  %148 = vmatprep.subr.bf16.mxu0 %v1817_v54  ;;  %v1861_v26 = vld [vmem:[%s2639_s2 + $0x54] ss:$8 sps:$4 sm:$0xff]   ;;  %v1903_v54 = vld [vmem:[%s2639_s2 + $0xc4] ss:$8 sps:$4 sm:$0xff]  }
  0x20   :  { %1089 = vmatprep.subr.bf16.mxu1 %v1732_v27  ;;  %v1772_v27 = vld [vmem:[%s2639_s2 + $0x250] ss:$8 sps:$4 sm:$0xff]  }
  0x22   :  { %149 = vmatpush1.bf16.msra.mxu0 %v1819_v57  ;;  %v1901_v57 = vld [vmem:[%s2639_s2 + $0xc0] ss:$8 sps:$4 sm:$0xff]  }
  0x23   :  { %1090 = vmatpush1.bf16.msra.mxu1 %v1734_v29  ;;  %150 = vmatprep.subr.bf16.mxu0 %v1823_v58  ;;  %v1859_v29 = vld [vmem:[%s2639_s2 + $0x50] ss:$8 sps:$4 sm:$0xff]   ;;  %v1909_v58 = vld [vmem:[%s2639_s2 + $0xd4] ss:$8 sps:$4 sm:$0xff]  }
  0x24   :  { %1091 = vmatprep.subr.bf16.mxu1 %v1735_v30  ;;  %v1867_v30 = vld [vmem:[%s2639_s2 + $0x64] ss:$8 sps:$4 sm:$0xff]  }
  0x26   :  { %151 = vmatpush1.bf16.msra.mxu0 %v1825_v63  ;;  %v1907_v63 = vld [vmem:[%s2639_s2 + $0xd0] ss:$8 sps:$4 sm:$0xff]  }
  0x27   :  { %1092 = vmatpush1.bf16.msra.mxu1 %v1737_v33  ;;  %1032 = vmatprep.subr.bf16.mxu0 %v1831_v0  ;;  %v1865_v33 = vld [vmem:[%s2639_s2 + $0x60] ss:$8 sps:$4 sm:$0xff]   ;;  %v1915_v0 = vld [vmem:[%s2639_s2 + $0xe4] ss:$8 sps:$4 sm:$0xff]  }
  0x28   :  { %1093 = vmatprep.subr.bf16.mxu1 %v1738_v34  ;;  %v1873_v34 = vld [vmem:[%s2639_s2 + $0x74] ss:$8 sps:$4 sm:$0xff]  }
  0x29   :  { %169 = vmatmul.mubr.bf16.vlgmr.msra.gmra.mrb[0].mxu0 %v39_v6  ;;  %v1834_v6 = vld [vmem:[%s2639_s2 + $0x304] ss:$8 sps:$4 sm:$0xff]  }
  0x2a   :  { %1033 = vmatpush1.bf16.msra.mxu0 %v1829_v5  ;;  %1064 = vmatprep.mubr.bf16.mxu0 %v2097_v25  ;;  %v1853_v25 = vld [vmem:[%s2639_s2 + $0x40] ss:$8 sps:$4 sm:$0xff]   ;;  %v1826_v5 = vld [vmem:[%s2639_s2 + $0x2f0] ss:$8 sps:$4 sm:$0xff]  }
  0x2b   :  { %1094 = vmatpush1.bf16.msra.mxu1 %v1740_v37  ;;  %1034 = vmatprep.subr.bf16.mxu0 %v1837_v8  ;;  %v1871_v37 = vld [vmem:[%s2639_s2 + $0x70] ss:$8 sps:$4 sm:$0xff]  }
  0x2c   :  { %1095 = vmatprep.subr.bf16.mxu1 %v1741_v39  ;;  %v1784_v39 = vld [vmem:[%s2639_s2 + $0x280] ss:$8 sps:$4 sm:$0xff]   ;;  %v1919_v8 = vld [vmem:[%s2639_s2 + $0xf0] ss:$8 sps:$4 sm:$0xff]  }
  0x2e   :  { %1035 = vmatpush1.bf16.msra.mxu0 %v1835_v11  ;;  %v1840_v11 = vld [vmem:[%s2639_s2 + $0x314] ss:$8 sps:$4 sm:$0xff]  }
  0x2f   :  { %1096 = vmatpush1.bf16.msra.mxu1 %v1743_v42  ;;  %1036 = vmatprep.subr.bf16.mxu0 %v1843_v12  ;;  %v1885_v42 = vld [vmem:[%s2639_s2 + $0x94] ss:$8 sps:$4 sm:$0xff]   ;;  %v383_v12 = vcombine.high %v2232_v7, %v2232_v7 }
  0x30   :  { %1097 = vmatprep.subr.bf16.mxu1 %v1744_v43  ;;  %v1790_v43 = vld [vmem:[%s2639_s2 + $0x290] ss:$8 sps:$4 sm:$0xff]  }
  0x32   :  { %1037 = vmatpush1.bf16.msra.mxu0 %v1841_v16  ;;  %v1858_v16 = vld [vmem:[%s2639_s2 + $0x344] ss:$8 sps:$4 sm:$0xff]  }
  0x33   :  { %1098 = vmatpush1.bf16.msra.mxu1 %v1746_v46  ;;  %1038 = vmatprep.subr.bf16.mxu0 %v1849_v18  ;;  %v1891_v46 = vld [vmem:[%s2639_s2 + $0xa4] ss:$8 sps:$4 sm:$0xff]   ;;  %v1856_v18 = vld [vmem:[%s2639_s2 + $0x340] ss:$8 sps:$4 sm:$0xff]  }
  0x34   :  { %1099 = vmatprep.subr.bf16.mxu1 %v1747_v47  ;;  %v1796_v47 = vld [vmem:[%s2639_s2 + $0x2a0] ss:$8 sps:$4 sm:$0xff]  }
  0x36   :  { %1039 = vmatpush1.bf16.msra.mxu0 %v1847_v21  ;;  %v1870_v21 = vld [vmem:[%s2639_s2 + $0x364] ss:$8 sps:$4 sm:$0xff]  }
  0x37   :  { %1100 = vmatpush1.bf16.msra.mxu1 %v1749_v50  ;;  %1040 = vmatprep.subr.bf16.mxu0 %v1855_v22  ;;  %v1897_v50 = vld [vmem:[%s2639_s2 + $0xb4] ss:$8 sps:$4 sm:$0xff]   ;;  %v1868_v22 = vld [vmem:[%s2639_s2 + $0x360] ss:$8 sps:$4 sm:$0xff]  }
  0x38   :  { %1101 = vmatprep.subr.bf16.mxu1 %v1750_v51  ;;  %v1802_v51 = vld [vmem:[%s2639_s2 + $0x2b0] ss:$8 sps:$4 sm:$0xff]  }
  0x3a   :  { %1041 = vmatpush1.bf16.msra.mxu0 %v1853_v25  ;;  %v1882_v25 = vld [vmem:[%s2639_s2 + $0x384] ss:$8 sps:$4 sm:$0xff]  }
  0x3b   :  { %1102 = vmatpush1.bf16.msra.mxu1 %v1752_v55  ;;  %1042 = vmatprep.subr.bf16.mxu0 %v1861_v26  ;;  %v1808_v55 = vld [vmem:[%s2639_s2 + $0x2c0] ss:$8 sps:$4 sm:$0xff]  }
  0x3c   :  { %1103 = vmatprep.subr.bf16.mxu1 %v1753_v56  ;;  %v1816_v56 = vld [vmem:[%s2639_s2 + $0x2d4] ss:$8 sps:$4 sm:$0xff]   ;;  %v1925_v26 = vld [vmem:[%s2643_s5] ss:$8 sps:$4 sm:$0xff]  }
  0x3e   :  { %1043 = vmatpush1.bf16.msra.mxu0 %v1859_v29  ;;  %v1880_v29 = vld [vmem:[%s2639_s2 + $0x380] ss:$8 sps:$4 sm:$0xff]  }
  0x3f   :  { %1104 = vmatpush1.bf16.msra.mxu1 %v1755_v61  ;;  %1044 = vmatprep.subr.bf16.mxu0 %v1867_v30  ;;  %v1814_v61 = vld [vmem:[%s2639_s2 + $0x2d0] ss:$8 sps:$4 sm:$0xff]   ;;  %v1888_v30 = vld [vmem:[%s2639_s2 + $0x394] ss:$8 sps:$4 sm:$0xff]  }
  0x40   :  { %1114 = vmatprep.subr.bf16.mxu1 %v1759_v62  ;;  %v1822_v62 = vld [vmem:[%s2639_s2 + $0x2e4] ss:$8 sps:$4 sm:$0xff]  }
  0x42   :  { %1106 = vmatmul.mubr.bf16.vlgmr.msra.gmra.mrb[0].mxu1 %v380_v3  ;;  %1045 = vmatpush1.bf16.msra.mxu0 %v1865_v33  ;;  %v1913_v3 = vld [vmem:[%s2639_s2 + $0xe0] ss:$8 sps:$4 sm:$0xff]   ;;  %v1886_v33 = vld [vmem:[%s2639_s2 + $0x390] ss:$8 sps:$4 sm:$0xff]  }
  0x43   :  { %1115 = vmatpush1.bf16.msra.mxu1 %v1757_v2  ;;  %1146 = vmatprep.mubr.bf16.mxu1 %v2232_v7  ;;  %v1828_v2 = vld [vmem:[%s2639_s2 + $0x2f4] ss:$8 sps:$4 sm:$0xff]   ;;  %v1844_v7 = vld [vmem:[%s2639_s2 + $0x320] ss:$8 sps:$4 sm:$0xff]  }
  0x44   :  { %1116 = vmatprep.subr.bf16.mxu1 %v1762_v4  ;;  %1046 = vmatprep.subr.bf16.mxu0 %v1873_v34  ;;  %v1921_v4 = vld [vmem:[%s2639_s2 + $0xf4] ss:$8 sps:$4 sm:$0xff]   ;;  %v1894_v34 = vld [vmem:[%s2639_s2 + $0x3a4] ss:$8 sps:$4 sm:$0xff]  }
  0x46   :  { %1047 = vmatpush1.bf16.msra.mxu0 %v1871_v37  ;;  %v1892_v37 = vld [vmem:[%s2639_s2 + $0x3a0] ss:$8 sps:$4 sm:$0xff]  }
  0x47   :  { %1117 = vmatpush1.bf16.msra.mxu1 %v1760_v9  ;;  %1048 = vmatprep.subr.bf16.mxu0 %v1879_v38  ;;  %v2418_v9 = vrot.slane %v2197_v59, %v2071_v17  ;;  %v1838_v59 = vld [vmem:[%s2639_s2 + $0x310] ss:$8 sps:$4 sm:$0xff]   ;;  %v1900_v38 = vld [vmem:[%s2639_s2 + $0x3b4] ss:$8 sps:$4 sm:$0xff]  }
  0x48   :  { %1118 = vmatprep.subr.bf16.mxu1 %v1765_v10  ;;  %v1832_v10 = vld [vmem:[%s2639_s2 + $0x300] ss:$8 sps:$4 sm:$0xff]  }
  0x4a   :  { %1049 = vmatpush1.bf16.msra.mxu0 %v1877_v41  ;;  %v1898_v41 = vld [vmem:[%s2639_s2 + $0x3b0] ss:$8 sps:$4 sm:$0xff]  }
  0x4b   :  { %1119 = vmatpush1.bf16.msra.mxu1 %v1763_v14  ;;  %1050 = vmatprep.subr.bf16.mxu0 %v1885_v42  ;;  %v1846_v14 = vld [vmem:[%s2639_s2 + $0x324] ss:$8 sps:$4 sm:$0xff]  }
  0x4c   :  { %1120 = vmatprep.subr.bf16.mxu1 %v1768_v15  ;;  %v1852_v15 = vld [vmem:[%s2639_s2 + $0x334] ss:$8 sps:$4 sm:$0xff]   ;;  %v1906_v42 = vld [vmem:[%s2639_s2 + $0x3c4] ss:$8 sps:$4 sm:$0xff]  }
  0x4e   :  { %1051 = vmatpush1.bf16.msra.mxu0 %v1883_v45  ;;  %v1904_v45 = vld [vmem:[%s2639_s2 + $0x3c0] ss:$8 sps:$4 sm:$0xff]  }
  0x4f   :  { %1121 = vmatpush1.bf16.msra.mxu1 %v1766_v19  ;;  %1052 = vmatprep.subr.bf16.mxu0 %v1891_v46  ;;  %v1864_v19 = vld [vmem:[%s2639_s2 + $0x354] ss:$8 sps:$4 sm:$0xff]   ;;  %v1940_v46 = vld [vmem:[%s2643_s5 + $0x50] ss:$8 sps:$4 sm:$0xff]  }
  0x50   :  { %1122 = vmatprep.subr.bf16.mxu1 %v1771_v20  ;;  %v1862_v20 = vld [vmem:[%s2639_s2 + $0x350] ss:$8 sps:$4 sm:$0xff]  }
  0x52   :  { %1053 = vmatpush1.bf16.msra.mxu0 %v1889_v49  ;;  %v1910_v49 = vld [vmem:[%s2639_s2 + $0x3d0] ss:$8 sps:$4 sm:$0xff]  }
  0x53   :  { %1123 = vmatpush1.bf16.msra.mxu1 %v1769_v23  ;;  %1054 = vmatprep.subr.bf16.mxu0 %v1897_v50  ;;  %v1876_v23 = vld [vmem:[%s2639_s2 + $0x374] ss:$8 sps:$4 sm:$0xff]   ;;  %v1943_v50 = vld [vmem:[%s2643_s5 + $0x60] ss:$8 sps:$4 sm:$0xff]  }
  0x54   :  { %1124 = vmatprep.subr.bf16.mxu1 %v1774_v24  ;;  %v1874_v24 = vld [vmem:[%s2639_s2 + $0x370] ss:$8 sps:$4 sm:$0xff]  }
  0x56   :  { %1055 = vmatpush1.bf16.msra.mxu0 %v1895_v53  ;;  %v1916_v53 = vld [vmem:[%s2639_s2 + $0x3e0] ss:$8 sps:$4 sm:$0xff]  }
  0x57   :  { %1125 = vmatpush1.bf16.msra.mxu1 %v1772_v27  ;;  %1056 = vmatprep.subr.bf16.mxu0 %v1903_v54  ;;  %v1927_v27 = vld [vmem:[%s2643_s5 + $0x4] ss:$8 sps:$4 sm:$0xff]   ;;  %v1946_v54 = vld [vmem:[%s2643_s5 + $0x70] ss:$8 sps:$4 sm:$0xff]  }
  0x58   :  { %1126 = vmatprep.subr.bf16.mxu1 %v1777_v28  ;;  %v1930_v28 = vld [vmem:[%s2643_s5 + $0x14] ss:$8 sps:$4 sm:$0xff]  }
  0x5a   :  { %1057 = vmatpush1.bf16.msra.mxu0 %v1901_v57  ;;  %v1922_v57 = vld [vmem:[%s2639_s2 + $0x3f0] ss:$8 sps:$4 sm:$0xff]  }
  0x5b   :  { %1127 = vmatpush1.bf16.msra.mxu1 %v1775_v31  ;;  %1058 = vmatprep.subr.bf16.mxu0 %v1909_v58  ;;  %v1928_v31 = vld [vmem:[%s2643_s5 + $0x10] ss:$8 sps:$4 sm:$0xff]   ;;  %v1949_v58 = vld [vmem:[%s2643_s5 + $0x80] ss:$8 sps:$4 sm:$0xff]  }
  0x5c   :  { %1128 = vmatprep.subr.bf16.mxu1 %v1780_v32  ;;  %v1933_v32 = vld [vmem:[%s2643_s5 + $0x24] ss:$8 sps:$4 sm:$0xff]  }
  0x5e   :  { %1059 = vmatpush1.bf16.msra.mxu0 %v1907_v63  ;;  %v1952_v63 = vld [vmem:[%s2643_s5 + $0x90] ss:$8 sps:$4 sm:$0xff]  }
  0x5f   :  { %1129 = vmatpush1.bf16.msra.mxu1 %v1778_v35  ;;  %1060 = vmatprep.subr.bf16.mxu0 %v1915_v0  ;;  %v1931_v35 = vld [vmem:[%s2643_s5 + $0x20] ss:$8 sps:$4 sm:$0xff]   ;;  %v1957_v0 = vld [vmem:[%s2643_s5 + $0xa4] ss:$8 sps:$4 sm:$0xff]  }
  0x60   :  { %1130 = vmatprep.subr.bf16.mxu1 %v1786_v36  ;;  %v1936_v36 = vld [vmem:[%s2643_s5 + $0x34] ss:$8 sps:$4 sm:$0xff]  }
  0x62   :  { %1061 = vmatpush1.bf16.msra.mxu0 %v1913_v3  ;;  %v1958_v3 = vld [vmem:[%s2643_s5 + $0xb0] ss:$8 sps:$4 sm:$0xff]  }
  0x63   :  { %1131 = vmatpush1.bf16.msra.mxu1 %v1784_v39  ;;  %1062 = vmatprep.subr.bf16.mxu0 %v1921_v4  ;;  %v1934_v39 = vld [vmem:[%s2643_s5 + $0x30] ss:$8 sps:$4 sm:$0xff]   ;;  %v1961_v4 = vld [vmem:[%s2643_s5 + $0xc0] ss:$8 sps:$4 sm:$0xff]  }
  0x64   :  { %1132 = vmatprep.subr.bf16.mxu1 %v1792_v40  ;;  %v1939_v40 = vld [vmem:[%s2643_s5 + $0x44] ss:$8 sps:$4 sm:$0xff]  }
  0x66   :  { %1063 = vmatpush1.bf16.msra.mxu0 %v1919_v8  ;;  %v1964_v8 = vld [vmem:[%s2643_s5 + $0xd0] ss:$8 sps:$4 sm:$0xff]  }
  0x67   :  { %1133 = vmatpush1.bf16.msra.mxu1 %v1790_v43  ;;  %1420 = vmatprep.subr.bf16.mxu0 %v1927_v27  ;;  %v1937_v43 = vld [vmem:[%s2643_s5 + $0x40] ss:$8 sps:$4 sm:$0xff]  }
  0x68   :  { %1134 = vmatprep.subr.bf16.mxu1 %v1798_v44  ;;  %v1942_v44 = vld [vmem:[%s2643_s5 + $0x54] ss:$8 sps:$4 sm:$0xff]  }
  0x69   :  { %1065 = vmatmul.mubr.bf16.vlgmr.msra.gmra.mrb[4].mxu0 %v2201_v60  ;;  %v1850_v60 = vld [vmem:[%s2639_s2 + $0x330] ss:$8 sps:$4 sm:$0xff]  }
  0x6a   :  { %1421 = vmatpush1.bf16.msra.mxu0 %v1925_v26 }
  0x6b   :  { %1135 = vmatpush1.bf16.msra.mxu1 %v1796_v47  ;;  %1422 = vmatprep.subr.bf16.mxu0 %v1930_v28  ;;  %v1912_v47 = vld [vmem:[%s2639_s2 + $0x3d4] ss:$8 sps:$4 sm:$0xff]  }
  0x6c   :  { %1136 = vmatprep.subr.bf16.mxu1 %v1804_v48  ;;  %v1945_v48 = vld [vmem:[%s2643_s5 + $0x64] ss:$8 sps:$4 sm:$0xff]  }
  0x6e   :  { %1423 = vmatpush1.bf16.msra.mxu0 %v1928_v31 }
  0x6f   :  { %1137 = vmatpush1.bf16.msra.mxu1 %v1802_v51  ;;  %1424 = vmatprep.subr.bf16.mxu0 %v1933_v32  ;;  %v1918_v51 = vld [vmem:[%s2639_s2 + $0x3e4] ss:$8 sps:$4 sm:$0xff]  }
  0x70   :  { %1138 = vmatprep.subr.bf16.mxu1 %v1810_v52  ;;  %v1948_v52 = vld [vmem:[%s2643_s5 + $0x74] ss:$8 sps:$4 sm:$0xff]  }
  0x72   :  { %1425 = vmatpush1.bf16.msra.mxu0 %v1931_v35 }
  0x73   :  { %1139 = vmatpush1.bf16.msra.mxu1 %v1808_v55  ;;  %1426 = vmatprep.subr.bf16.mxu0 %v1936_v36  ;;  %v1924_v55 = vld [vmem:[%s2639_s2 + $0x3f4] ss:$8 sps:$4 sm:$0xff]  }
  0x74   :  { %1140 = vmatprep.subr.bf16.mxu1 %v1816_v56  ;;  %v1951_v56 = vld [vmem:[%s2643_s5 + $0x84] ss:$8 sps:$4 sm:$0xff]  }
  0x76   :  { %1427 = vmatpush1.bf16.msra.mxu0 %v1934_v39 }
  0x77   :  { %1141 = vmatpush1.bf16.msra.mxu1 %v1814_v61  ;;  %1428 = vmatprep.subr.bf16.mxu0 %v1939_v40  ;;  %v1954_v61 = vld [vmem:[%s2643_s5 + $0x94] ss:$8 sps:$4 sm:$0xff]  }
  0x78   :  { %1142 = vmatprep.subr.bf16.mxu1 %v1822_v62  ;;  %v381_v62 = vcombine.high %v2418_v9, %v2418_v9 }
  0x7a   :  { %1429 = vmatpush1.bf16.msra.mxu0 %v1937_v43 }
  0x7b   :  { %1143 = vmatpush1.bf16.msra.mxu1 %v1820_v1  ;;  %1430 = vmatprep.subr.bf16.mxu0 %v1942_v44  ;;  %v1955_v1 = vld [vmem:[%s2643_s5 + $0xa0] ss:$8 sps:$4 sm:$0xff]  }
  0x7c   :  { %1144 = vmatprep.subr.bf16.mxu1 %v1828_v2  ;;  %v1960_v2 = vld [vmem:[%s2643_s5 + $0xb4] ss:$8 sps:$4 sm:$0xff]   ;;  %v191_v44 = vld [vmem:[%s2648_s10] sm:$0x3] }
  0x7e   :  { %1431 = vmatpush1.bf16.msra.mxu0 %v1940_v46  ;;  %v1475_v46 = vld [vmem:[%s2649_s7] sm:$0x3] }
  0x7f   :  { %1145 = vmatpush1.bf16.msra.mxu1 %v1826_v5  ;;  %1432 = vmatprep.subr.bf16.mxu0 %v1945_v48  ;;  %v1963_v5 = vld [vmem:[%s2643_s5 + $0xc4] ss:$8 sps:$4 sm:$0xff]  }
  0x80   :  { %1155 = vmatprep.subr.bf16.mxu1 %v1834_v6  ;;  %v1966_v6 = vld [vmem:[%s2643_s5 + $0xd4] ss:$8 sps:$4 sm:$0xff]  }
  0x82   :  { %1147 = vmatmul.mubr.bf16.vlgmr.msra.gmra.mrb[0].mxu1 %v2418_v9  ;;  %1433 = vmatpush1.bf16.msra.mxu0 %v1943_v50 }
  0x83   :  { %1156 = vmatpush1.bf16.msra.mxu1 %v1832_v10  ;;  %1187 = vmatprep.mubr.bf16.mxu1 %v383_v12  ;;  %v1969_v12 = vld [vmem:[%s2643_s5 + $0xe4] ss:$8 sps:$4 sm:$0xff]  }
  0x84   :  { %1157 = vmatprep.subr.bf16.mxu1 %v1840_v11  ;;  %1434 = vmatprep.subr.bf16.mxu0 %v1948_v52 }
  0x86   :  { %1435 = vmatpush1.bf16.msra.mxu0 %v1946_v54 }
  0x87   :  { %1158 = vmatpush1.bf16.msra.mxu1 %v1838_v59  ;;  %1436 = vmatprep.subr.bf16.mxu0 %v1951_v56 }
  0x88   :  { %1159 = vmatprep.subr.bf16.mxu1 %v1846_v14  ;;  %v1967_v14 = vld [vmem:[%s2643_s5 + $0xe0] ss:$8 sps:$4 sm:$0xff]  }
  0x8a   :  { %1437 = vmatpush1.bf16.msra.mxu0 %v1949_v58 }
  0x8b   :  { %1160 = vmatpush1.bf16.msra.mxu1 %v1844_v7  ;;  %1438 = vmatprep.subr.bf16.mxu0 %v1954_v61  ;;  %v1972_v7 = vld [vmem:[%s2643_s5 + $0xf4] ss:$8 sps:$4 sm:$0xff]  }
  0x8c   :  { %1161 = vmatprep.subr.bf16.mxu1 %v1852_v15  ;;  %v1970_v15 = vld [vmem:[%s2643_s5 + $0xf0] ss:$8 sps:$4 sm:$0xff]  }
  0x8e   :  { %1439 = vmatpush1.bf16.msra.mxu0 %v1952_v63 }
  0x8f   :  { %1162 = vmatpush1.bf16.msra.mxu1 %v1850_v60  ;;  %1440 = vmatprep.subr.bf16.mxu0 %v1957_v0 }
  0x90   :  { %1163 = vmatprep.subr.bf16.mxu1 %v1858_v16 }
  0x92   :  { %1441 = vmatpush1.bf16.msra.mxu0 %v1955_v1 }
  0x93   :  { %1164 = vmatpush1.bf16.msra.mxu1 %v1856_v18  ;;  %1442 = vmatprep.subr.bf16.mxu0 %v1960_v2 }
  0x94   :  { %1165 = vmatprep.subr.bf16.mxu1 %v1864_v19 }
  0x96   :  { %1443 = vmatpush1.bf16.msra.mxu0 %v1958_v3 }
  0x97   :  { %1166 = vmatpush1.bf16.msra.mxu1 %v1862_v20  ;;  %1444 = vmatprep.subr.bf16.mxu0 %v1963_v5  ;;  %v1196_v20 = vld [vmem:[%s2644_s3] sm:$0x3] }
  0x98   :  { %1167 = vmatprep.subr.bf16.mxu1 %v1870_v21  ;;  %v181_v21 = vsub.s32 0, %v2062_v13 }
  0x9a   :  { %1445 = vmatpush1.bf16.msra.mxu0 %v1961_v4  ;;  %v196_v50 = vrot.slane %v191_v44, %v181_v21 }
  0x9b   :  { %1168 = vmatpush1.bf16.msra.mxu1 %v1868_v22  ;;  %1446 = vmatprep.subr.bf16.mxu0 %v1966_v6  ;;  %v185_v22 = vsub.s32 1, %v2062_v13 }
  0x9c   :  { %1169 = vmatprep.subr.bf16.mxu1 %v1876_v23  ;;  %v1210_v23 = vld [vmem:[%s2645_s4] sm:$0x3] }
  0x9d   :  { %v1205_v26 = vrot.slane %v1196_v20, %v185_v22  ;;  %v1215_v28 = vrot.slane %v1210_v23, %v181_v21  ;;  %v1219_v31 = vrot.slane %v1210_v23, %v185_v22 }
  0x9e   :  { %1447 = vmatpush1.bf16.msra.mxu0 %v1964_v8 }
  0x9f   :  { %1170 = vmatpush1.bf16.msra.mxu1 %v1874_v24  ;;  %1448 = vmatprep.subr.bf16.mxu0 %v1969_v12  ;;  %v1201_v24 = vrot.slane %v1196_v20, %v181_v21 }
  0xa0   :  { %1171 = vmatprep.subr.bf16.mxu1 %v1882_v25 }
  0xa2   :  { %1449 = vmatpush1.bf16.msra.mxu0 %v1967_v14 }
  0xa3   :  { %1172 = vmatpush1.bf16.msra.mxu1 %v1880_v29  ;;  %1450 = vmatprep.subr.bf16.mxu0 %v1972_v7 }
  0xa4   :  { %1173 = vmatprep.subr.bf16.mxu1 %v1888_v30 }
  0xa6   :  { %1451 = vmatpush1.bf16.msra.mxu0 %v1970_v15 }
  0xa7   :  { %1174 = vmatpush1.bf16.msra.mxu1 %v1886_v33 }
  0xa8   :  { %1175 = vmatprep.subr.bf16.mxu1 %v1894_v34 }
  0xab   :  { %1176 = vmatpush1.bf16.msra.mxu1 %v1892_v37 }
  0xac   :  { %1177 = vmatprep.subr.bf16.mxu1 %v1900_v38 }
  0xaf   :  { %1178 = vmatpush1.bf16.msra.mxu1 %v1898_v41  ;;  %v177_v41 = vld [vmem:[%s2646_s9] sm:$0x3] }
  0xb0   :  { %1179 = vmatprep.subr.bf16.mxu1 %v1906_v42  ;;  %v1461_v42 = vld [vmem:[%s2647_s6] sm:$0x3]  ;;  %v182_v43 = vrot.slane %v177_v41, %v181_v21 }
  0xb1   :  { %v1470_v48 = vrot.slane %v1461_v42, %v185_v22 }
  0xb3   :  { %1180 = vmatpush1.bf16.msra.mxu1 %v1904_v45  ;;  %v186_v45 = vrot.slane %v177_v41, %v185_v22 }
  0xb4   :  { %1181 = vmatprep.subr.bf16.mxu1 %v1912_v47  ;;  %v1466_v47 = vrot.slane %v1461_v42, %v181_v21 }
  0xb7   :  { %1182 = vmatpush1.bf16.msra.mxu1 %v1910_v49 }
  0xb8   :  { %1183 = vmatprep.subr.bf16.mxu1 %v1918_v51  ;;  %v1480_v51 = vrot.slane %v1475_v46, %v181_v21 }
  0xbb   :  { %1184 = vmatpush1.bf16.msra.mxu1 %v1916_v53  ;;  %v200_v53 = vrot.slane %v191_v44, %v185_v22 }
  0xbc   :  { %1185 = vmatprep.subr.bf16.mxu1 %v1924_v55  ;;  %v1484_v55 = vrot.slane %v1475_v46, %v185_v22 }
  0xbf   :  { %1186 = vmatpush1.bf16.msra.mxu1 %v1922_v57 }
  0xc2   :  { %1188 = vmatmul.mubr.bf16.vlgmr.msra.gmra.mrb[0].mxu1 %v381_v62 }
  0xfc   :  { %v170_v9 = vpop.f32.mrb[0].mxu0 }
  0xfd   :  { %v172_v10 = vpop.f32.mrb[1].mxu0  ;;  %v189_v49 = vmul.f32 %v182_v43, %v170_v9 }
  0xfe   :  { %v174_v11 = vpop.f32.mrb[2].mxu0  ;;  %v190_v52 = vmul.f32 %v186_v45, %v172_v10 }
  0xff   :  { %v175_v59 = vpop.f32.mrb[3].mxu0  ;;  %v203_v62 = vadd.f32 %v196_v50, %v189_v49 }
 0x100   :  { %v204_v1 = vadd.f32 %v200_v53, %v190_v52 }
 0x13c   :  { %v1066_v60 = vpop.f32.mrb[4].mxu0 }
 0x13d   :  { %v1068_v16 = vpop.f32.mrb[5].mxu0 }
 0x13e   :  { %v1070_v18 = vpop.f32.mrb[6].mxu0 }
 0x13f   :  { %v1071_v19 = vpop.f32.mrb[7].mxu0 }
 0x195   :  { %v1189_v25 = vpop.f32.mrb[0].mxu1 }
 0x196   :  { %v1696_v27 = vadd.f32 %v1189_v25, %v1066_v60  ;;  %v1191_v29 = vpop.f32.mrb[1].mxu1 }
 0x197   :  { %v1697_v30 = vadd.f32 %v1191_v29, %v1068_v16  ;;  %v1193_v32 = vpop.f32.mrb[2].mxu1 }
 0x198   :  { %v1208_v33 = vmul.f32 %v1696_v27, %v1201_v24  ;;  %v1194_v34 = vpop.f32.mrb[3].mxu1 }
 0x199   :  { %v1209_v35 = vmul.f32 %v1697_v30, %v1205_v26 }
 0x19a   :  { %v1222_v36 = vadd.f32 %v1215_v28, %v1208_v33 }
 0x19b   :  { %v1223_v37 = vadd.f32 %v1219_v31, %v1209_v35 }
 0x19c   :  { %v1224_v38 = vmax.f32 %v1222_v36, 0.0 }
 0x19d   :  { %v1225_v13 = vmax.f32 %v1223_v37, 0.0 }
 0x19e   :  { %v1226_v40 = vpack.c.bf16 %v1224_v38, %v1224_v38 }
 0x19f   :  { %v1227_v39 = vpack.c.bf16 %v1225_v13, %v1225_v13 }
 0x1a1   :  { %1452 = vmatprep.mubr.bf16.mxu0 %v1227_v39 }
 0x1a2   :  { %1453 = vmatmul.mubr.bf16.vlgmr.msra.gmra.mrb[8].mxu0 %v1226_v40 }
 0x275   :  { %v1454_v54 = vpop.f32.mrb[8].mxu0 }
 0x276   :  { %v1473_v56 = vmul.f32 %v1466_v47, %v1454_v54  ;;  %v1456_v57 = vpop.f32.mrb[9].mxu0 }
 0x277   :  { %v1474_v58 = vmul.f32 %v1470_v48, %v1456_v57  ;;  %v1458_v61 = vpop.f32.mrb[10].mxu0 }
 0x278   :  { %v1487_v63 = vadd.f32 %v1480_v51, %v1473_v56  ;;  %v1459_v0 = vpop.f32.mrb[11].mxu0 }
 0x279   :  { %v1488_v2 = vadd.f32 %v1484_v55, %v1474_v58 }
 0x27a   :  { %v1489_v3 = vadd.f32 %v1487_v63, %v203_v62 }
 0x27b   :  { %v1490_v4 = vadd.f32 %v1488_v2, %v204_v1 }
 0x27c   :  { %v1491_v5 = vmax.f32 %v1489_v3, 0.0 }
 0x27d   :  { %v1492_v6 = vmax.f32 %v1490_v4, 0.0 }
 0x27f   :  { %v1694_v8 = vpack.c.bf16 %v1492_v6, %v1491_v5 }
 0x281   :  { %v1504_v9 = vrot.slane %v1694_v8, %v2071_v17 }
 0x283   :  { %1695 = vst.sshfl [vmem:[%s2650_s11] sm:$0x5 pattern:$0x73625140] %v1504_v9 }

// kernel: rasternet_forward.18
= control target key start
LH: loop header
LB: loop body
LE: loop exit
PB: predicated region body
PF: predicated region fallthrough
CT: control target
= control target key end

     0   :  { %v2818_v9 = vmov 1966171168   ;;  %v115_v11 = vlaneseq  ;;  %s3758_s8 = inlined_call_operand.vmem [shape: bf16[256,512], index: 8, kind: input, shape index: {}]   ;;  %s3759_s1 = inlined_call_operand.vmem [shape: bf16[2,256], index: 1, kind: input, shape index: {}, may-alias: {0,1}]   ;;  %s3760_s2 = inlined_call_operand.vmem [shape: bf16[256,512], index: 2, kind: input, shape index: {}]   ;;  %s3761_s0 = inlined_call_operand.vmem [shape: bf16[2,256], index: 0, kind: input, shape index: {}, may-alias: {0,1}]   ;;  %s3762_s5 = inlined_call_operand.vmem [shape: bf16[512,512], index: 5, kind: input, shape index: {}]   ;;  %s3763_s3 = inlined_call_operand.vmem [shape: f32[1,512], index: 3, kind: input, shape index: {}]   ;;  %s3764_s4 = inlined_call_operand.vmem [shape: f32[1,512], index: 4, kind: input, shape index: {}]   ;;  %s3765_s9 = inlined_call_operand.vmem [shape: f32[1,512], index: 9, kind: input, shape index: {}]   ;;  %s3766_s10 = inlined_call_operand.vmem [shape: f32[1,512], index: 10, kind: input, shape index: {}]   ;;  %s3767_s6 = inlined_call_operand.vmem [shape: f32[1,512], index: 6, kind: input, shape index: {}]   ;;  %s3768_s7 = inlined_call_operand.vmem [shape: f32[1,512], index: 7, kind: input, shape index: {}]   ;;  %s3769_s11 = inlined_call_operand.vmem [shape: bf16[2,512], index: 11, kind: output, shape index: {}]  }
   0x1   :  { %v2434_v0 = vld [vmem:[%s3758_s8 + $0x4] ss:$16 sps:$4 sm:$0xff]   ;;  %v2436_v1 = vld [vmem:[%s3758_s8] ss:$16 sps:$4 sm:$0xff]   ;;  %v113_v10 = vunpack.c.l.s4 %v2818_v9  ;;  %v2481_v18 = vld [vmem:[%s3758_s8 + $0xc] ss:$16 sps:$4 sm:$0xff]  }
   0x2   :  { %448 = vmatprep.subr.bf16.mxu0 %v2434_v0  ;;  %v2437_v2 = vld [vmem:[%s3758_s8 + $0x24] ss:$16 sps:$4 sm:$0xff]   ;;  %v2439_v3 = vld [vmem:[%s3758_s8 + $0x20] ss:$16 sps:$4 sm:$0xff]   ;;  %v2912_v15 = vshrl.u32 %v115_v11, 7  ;;  %489 = vmatprep.subr.bf16.mxu1 %v2481_v18 }
   0x3   :  { %449 = vmatpush1.bf16.msra.mxu0 %v2436_v1  ;;  %v2440_v4 = vld [vmem:[%s3758_s8 + $0x44] ss:$16 sps:$4 sm:$0xff]   ;;  %v2442_v5 = vld [vmem:[%s3758_s8 + $0x40] ss:$16 sps:$4 sm:$0xff]   ;;  %v114_v14 = vunpack.c.0.s8 %v113_v10  ;;  %v2484_v20 = vld [vmem:[%s3758_s8 + $0x8] ss:$16 sps:$4 sm:$0xff]  }
   0x4   :  { %450 = vmatprep.subr.bf16.mxu0 %v2437_v2  ;;  %v2443_v6 = vld [vmem:[%s3758_s8 + $0x64] ss:$16 sps:$4 sm:$0xff]   ;;  %v2445_v7 = vld [vmem:[%s3758_s8 + $0x60] ss:$16 sps:$4 sm:$0xff]   ;;  %490 = vmatpush1.bf16.msra.mxu1 %v2484_v20  ;;  %v2485_v25 = vld [vmem:[%s3758_s8 + $0x2c] ss:$16 sps:$4 sm:$0xff]  }
   0x5   :  { %v2446_v8 = vld [vmem:[%s3758_s8 + $0x84] ss:$16 sps:$4 sm:$0xff]   ;;  %v2448_v12 = vld [vmem:[%s3758_s8 + $0x80] ss:$16 sps:$4 sm:$0xff]   ;;  %v2930_v21 = vsub.s32 %v114_v14, %v2912_v15  ;;  %v2490_v26 = vld [vmem:[%s3758_s8 + $0x28] ss:$16 sps:$4 sm:$0xff]   ;;  %491 = vmatprep.subr.bf16.mxu1 %v2485_v25 }
   0x6   :  { %v2449_v13 = vld [vmem:[%s3758_s8 + $0xa4] ss:$16 sps:$4 sm:$0xff]   ;;  %v2451_v16 = vld [vmem:[%s3758_s8 + $0xa0] ss:$16 sps:$4 sm:$0xff]   ;;  %v2491_v28 = vld [vmem:[%s3758_s8 + $0x4c] ss:$16 sps:$4 sm:$0xff]  }
   0x7   :  { %451 = vmatpush1.bf16.msra.mxu0 %v2439_v3  ;;  %v2452_v17 = vld [vmem:[%s3758_s8 + $0xc4] ss:$16 sps:$4 sm:$0xff]   ;;  %v2454_v19 = vld [vmem:[%s3758_s8 + $0xc0] ss:$16 sps:$4 sm:$0xff]   ;;  %v2496_v31 = vld [vmem:[%s3758_s8 + $0x48] ss:$16 sps:$4 sm:$0xff]  }
   0x8   :  { %452 = vmatprep.subr.bf16.mxu0 %v2440_v4  ;;  %v2935_v22 = vld.sshfl [vmem:[%s3759_s1] sm:$0x11 pattern:$0x75316420]  ;;  %v2455_v23 = vld [vmem:[%s3758_s8 + $0xe4] ss:$16 sps:$4 sm:$0xff]   ;;  %492 = vmatpush1.bf16.msra.mxu1 %v2490_v26 }
   0x9   :  { %v111_v24 = vcombine.high %v2935_v22, %v2935_v22  ;;  %v2457_v29 = vld [vmem:[%s3758_s8 + $0xe0] ss:$16 sps:$4 sm:$0xff]   ;;  %v2458_v30 = vld [vmem:[%s3758_s8 + $0x104] ss:$16 sps:$4 sm:$0xff]   ;;  %493 = vmatprep.subr.bf16.mxu1 %v2491_v28  ;;  %v2497_v32 = vld [vmem:[%s3758_s8 + $0x6c] ss:$16 sps:$4 sm:$0xff]   ;;  %v118_v0 = vrot.slane %v2935_v22, %v2930_v21 }
   0xa   :  { %v2460_v33 = vld [vmem:[%s3758_s8 + $0x100] ss:$16 sps:$4 sm:$0xff]   ;;  %v2461_v34 = vld [vmem:[%s3758_s8 + $0x124] ss:$16 sps:$4 sm:$0xff]   ;;  %v2502_v35 = vld [vmem:[%s3758_s8 + $0x68] ss:$16 sps:$4 sm:$0xff]  }
   0xb   :  { %453 = vmatpush1.bf16.msra.mxu0 %v2442_v5  ;;  %v125_v27 = vrot.slane %v111_v24, %v2930_v21  ;;  %v2503_v36 = vld [vmem:[%s3758_s8 + $0x8c] ss:$16 sps:$4 sm:$0xff]   ;;  %v2463_v37 = vld [vmem:[%s3758_s8 + $0x120] ss:$16 sps:$4 sm:$0xff]   ;;  %v2464_v38 = vld [vmem:[%s3758_s8 + $0x144] ss:$16 sps:$4 sm:$0xff]  }
   0xc   :  { %454 = vmatprep.subr.bf16.mxu0 %v2443_v6  ;;  %494 = vmatpush1.bf16.msra.mxu1 %v2496_v31  ;;  %v2508_v39 = vld [vmem:[%s3758_s8 + $0x88] ss:$16 sps:$4 sm:$0xff]   ;;  %v2509_v40 = vld [vmem:[%s3758_s8 + $0xac] ss:$16 sps:$4 sm:$0xff]   ;;  %v2466_v41 = vld [vmem:[%s3758_s8 + $0x140] ss:$16 sps:$4 sm:$0xff]  }
   0xd   :  { %480 = vmatprep.mubr.bf16.mxu0 %v125_v27  ;;  %521 = vmatprep.mubr.bf16.mxu1 %v125_v27  ;;  %v2467_v42 = vld [vmem:[%s3758_s8 + $0x164] ss:$16 sps:$4 sm:$0xff]   ;;  %v2514_v43 = vld [vmem:[%s3758_s8 + $0xa8] ss:$16 sps:$4 sm:$0xff]   ;;  %v2515_v44 = vld [vmem:[%s3758_s8 + $0xcc] ss:$16 sps:$4 sm:$0xff]  }
   0xe   :  { %495 = vmatprep.subr.bf16.mxu1 %v2497_v32  ;;  %v2469_v45 = vld [vmem:[%s3758_s8 + $0x160] ss:$16 sps:$4 sm:$0xff]   ;;  %v2470_v46 = vld [vmem:[%s3758_s8 + $0x184] ss:$16 sps:$4 sm:$0xff]   ;;  %v2520_v47 = vld [vmem:[%s3758_s8 + $0xc8] ss:$16 sps:$4 sm:$0xff]  }
   0xf   :  { %455 = vmatpush1.bf16.msra.mxu0 %v2445_v7  ;;  %v2521_v48 = vld [vmem:[%s3758_s8 + $0xec] ss:$16 sps:$4 sm:$0xff]   ;;  %v2472_v49 = vld [vmem:[%s3758_s8 + $0x180] ss:$16 sps:$4 sm:$0xff]   ;;  %v2473_v50 = vld [vmem:[%s3758_s8 + $0x1a4] ss:$16 sps:$4 sm:$0xff]  }
  0x10   :  { %456 = vmatprep.subr.bf16.mxu0 %v2446_v8  ;;  %496 = vmatpush1.bf16.msra.mxu1 %v2502_v35  ;;  %v2526_v51 = vld [vmem:[%s3758_s8 + $0xe8] ss:$16 sps:$4 sm:$0xff]   ;;  %v2527_v52 = vld [vmem:[%s3758_s8 + $0x10c] ss:$16 sps:$4 sm:$0xff]   ;;  %v2475_v53 = vld [vmem:[%s3758_s8 + $0x1a0] ss:$16 sps:$4 sm:$0xff]  }
  0x11   :  { %497 = vmatprep.subr.bf16.mxu1 %v2503_v36  ;;  %v2476_v54 = vld [vmem:[%s3758_s8 + $0x1c4] ss:$16 sps:$4 sm:$0xff]   ;;  %v2532_v55 = vld [vmem:[%s3758_s8 + $0x108] ss:$16 sps:$4 sm:$0xff]   ;;  %v2533_v56 = vld [vmem:[%s3758_s8 + $0x12c] ss:$16 sps:$4 sm:$0xff]  }
  0x12   :  { %v2478_v57 = vld [vmem:[%s3758_s8 + $0x1c0] ss:$16 sps:$4 sm:$0xff]   ;;  %v2479_v58 = vld [vmem:[%s3758_s8 + $0x1e4] ss:$16 sps:$4 sm:$0xff]   ;;  %v2538_v59 = vld [vmem:[%s3758_s8 + $0x128] ss:$16 sps:$4 sm:$0xff]  }
  0x13   :  { %457 = vmatpush1.bf16.msra.mxu0 %v2448_v12  ;;  %v2539_v60 = vld [vmem:[%s3758_s8 + $0x14c] ss:$16 sps:$4 sm:$0xff]   ;;  %v2483_v61 = vld [vmem:[%s3758_s8 + $0x1e0] ss:$16 sps:$4 sm:$0xff]   ;;  %v2489_v62 = vld [vmem:[%s3760_s2 + $0x4] ss:$16 sps:$4 sm:$0xff]  }
  0x14   :  { %458 = vmatprep.subr.bf16.mxu0 %v2449_v13  ;;  %498 = vmatpush1.bf16.msra.mxu1 %v2508_v39  ;;  %v2544_v63 = vld [vmem:[%s3758_s8 + $0x148] ss:$16 sps:$4 sm:$0xff]   ;;  %v2545_v1 = vld [vmem:[%s3758_s8 + $0x16c] ss:$16 sps:$4 sm:$0xff]   ;;  %v2487_v2 = vld [vmem:[%s3760_s2] ss:$16 sps:$4 sm:$0xff]  }
  0x15   :  { %499 = vmatprep.subr.bf16.mxu1 %v2509_v40  ;;  %v2495_v3 = vld [vmem:[%s3760_s2 + $0x24] ss:$16 sps:$4 sm:$0xff]   ;;  %v2550_v4 = vld [vmem:[%s3758_s8 + $0x168] ss:$16 sps:$4 sm:$0xff]   ;;  %v2551_v5 = vld [vmem:[%s3758_s8 + $0x18c] ss:$16 sps:$4 sm:$0xff]  }
  0x16   :  { %v3077_v6 = vld.sshfl [vmem:[%s3761_s0] sm:$0x11 pattern:$0x75316420]  ;;  %v2501_v9 = vld [vmem:[%s3760_s2 + $0x44] ss:$16 sps:$4 sm:$0xff]  }
  0x17   :  { %459 = vmatpush1.bf16.msra.mxu0 %v2451_v16  ;;  %v2493_v7 = vld [vmem:[%s3760_s2 + $0x20] ss:$16 sps:$4 sm:$0xff]   ;;  %v655_v8 = vcombine.high %v3077_v6, %v3077_v6  ;;  %v2556_v10 = vld [vmem:[%s3758_s8 + $0x188] ss:$16 sps:$4 sm:$0xff]   ;;  %v2557_v12 = vld [vmem:[%s3758_s8 + $0x1ac] ss:$16 sps:$4 sm:$0xff]  }
  0x18   :  { %460 = vmatprep.subr.bf16.mxu0 %v2452_v17  ;;  %500 = vmatpush1.bf16.msra.mxu1 %v2514_v43  ;;  %v2499_v13 = vld [vmem:[%s3760_s2 + $0x40] ss:$16 sps:$4 sm:$0xff]   ;;  %v2507_v14 = vld [vmem:[%s3760_s2 + $0x64] ss:$16 sps:$4 sm:$0xff]   ;;  %v2562_v16 = vld [vmem:[%s3758_s8 + $0x1a8] ss:$16 sps:$4 sm:$0xff]  }
  0x19   :  { %501 = vmatprep.subr.bf16.mxu1 %v2515_v44  ;;  %v669_v11 = vrot.slane %v655_v8, %v2930_v21  ;;  %v2563_v17 = vld [vmem:[%s3758_s8 + $0x1cc] ss:$16 sps:$4 sm:$0xff]   ;;  %v2505_v18 = vld [vmem:[%s3760_s2 + $0x60] ss:$16 sps:$4 sm:$0xff]   ;;  %v2568_v20 = vld [vmem:[%s3758_s8 + $0x1c8] ss:$16 sps:$4 sm:$0xff]  }
  0x1a   :  { %v2569_v22 = vld [vmem:[%s3758_s8 + $0x1ec] ss:$16 sps:$4 sm:$0xff]   ;;  %v2519_v24 = vld [vmem:[%s3760_s2 + $0xa4] ss:$16 sps:$4 sm:$0xff]   ;;  %v2574_v25 = vld [vmem:[%s3758_s8 + $0x1e8] ss:$16 sps:$4 sm:$0xff]  }
  0x1b   :  { %461 = vmatpush1.bf16.msra.mxu0 %v2454_v19  ;;  %v2513_v19 = vld [vmem:[%s3760_s2 + $0x84] ss:$16 sps:$4 sm:$0xff]   ;;  %v2580_v26 = vld [vmem:[%s3760_s2 + $0xc] ss:$16 sps:$4 sm:$0xff]   ;;  %v2517_v27 = vld [vmem:[%s3760_s2 + $0xa0] ss:$16 sps:$4 sm:$0xff]  }
  0x1c   :  { %462 = vmatprep.subr.bf16.mxu0 %v2455_v23  ;;  %502 = vmatpush1.bf16.msra.mxu1 %v2520_v47  ;;  %v2511_v23 = vld [vmem:[%s3760_s2 + $0x80] ss:$16 sps:$4 sm:$0xff]   ;;  %v2525_v28 = vld [vmem:[%s3760_s2 + $0xc4] ss:$16 sps:$4 sm:$0xff]   ;;  %v2611_v8 = vld [vmem:[%s3760_s2 + $0x168] ss:$16 sps:$4 sm:$0xff]  }
  0x1d   :  { %503 = vmatprep.subr.bf16.mxu1 %v2521_v48  ;;  %v2523_v31 = vld [vmem:[%s3760_s2 + $0xc0] ss:$16 sps:$4 sm:$0xff]   ;;  %v2531_v32 = vld [vmem:[%s3760_s2 + $0xe4] ss:$16 sps:$4 sm:$0xff]  }
  0x1e   :  { %v2529_v35 = vld [vmem:[%s3760_s2 + $0xe0] ss:$16 sps:$4 sm:$0xff]   ;;  %v2537_v36 = vld [vmem:[%s3760_s2 + $0x104] ss:$16 sps:$4 sm:$0xff]  }
  0x1f   :  { %463 = vmatpush1.bf16.msra.mxu0 %v2457_v29  ;;  %v2578_v29 = vld [vmem:[%s3760_s2 + $0x8] ss:$16 sps:$4 sm:$0xff]   ;;  %v2535_v39 = vld [vmem:[%s3760_s2 + $0x100] ss:$16 sps:$4 sm:$0xff]   ;;  %v2543_v40 = vld [vmem:[%s3760_s2 + $0x124] ss:$16 sps:$4 sm:$0xff]  }
  0x20   :  { %464 = vmatprep.subr.bf16.mxu0 %v2458_v30  ;;  %504 = vmatpush1.bf16.msra.mxu1 %v2526_v51  ;;  %v2583_v30 = vld [vmem:[%s3760_s2 + $0x2c] ss:$16 sps:$4 sm:$0xff]   ;;  %v2541_v43 = vld [vmem:[%s3760_s2 + $0x120] ss:$16 sps:$4 sm:$0xff]   ;;  %v2549_v44 = vld [vmem:[%s3760_s2 + $0x144] ss:$16 sps:$4 sm:$0xff]  }
  0x21   :  { %505 = vmatprep.subr.bf16.mxu1 %v2527_v52  ;;  %v2547_v47 = vld [vmem:[%s3760_s2 + $0x140] ss:$16 sps:$4 sm:$0xff]   ;;  %v2555_v48 = vld [vmem:[%s3760_s2 + $0x164] ss:$16 sps:$4 sm:$0xff]  }
  0x22   :  { %v2553_v51 = vld [vmem:[%s3760_s2 + $0x160] ss:$16 sps:$4 sm:$0xff]   ;;  %v2561_v52 = vld [vmem:[%s3760_s2 + $0x184] ss:$16 sps:$4 sm:$0xff]  }
  0x23   :  { %465 = vmatpush1.bf16.msra.mxu0 %v2460_v33  ;;  %v2581_v33 = vld [vmem:[%s3760_s2 + $0x28] ss:$16 sps:$4 sm:$0xff]  }
  0x24   :  { %466 = vmatprep.subr.bf16.mxu0 %v2461_v34  ;;  %506 = vmatpush1.bf16.msra.mxu1 %v2532_v55  ;;  %v2586_v34 = vld [vmem:[%s3760_s2 + $0x4c] ss:$16 sps:$4 sm:$0xff]   ;;  %v2559_v55 = vld [vmem:[%s3760_s2 + $0x180] ss:$16 sps:$4 sm:$0xff]  }
  0x25   :  { %507 = vmatprep.subr.bf16.mxu1 %v2533_v56  ;;  %v2567_v56 = vld [vmem:[%s3760_s2 + $0x1a4] ss:$16 sps:$4 sm:$0xff]  }
  0x27   :  { %467 = vmatpush1.bf16.msra.mxu0 %v2463_v37  ;;  %v2584_v37 = vld [vmem:[%s3760_s2 + $0x48] ss:$16 sps:$4 sm:$0xff]  }
  0x28   :  { %468 = vmatprep.subr.bf16.mxu0 %v2464_v38  ;;  %508 = vmatpush1.bf16.msra.mxu1 %v2538_v59  ;;  %v2589_v38 = vld [vmem:[%s3760_s2 + $0x6c] ss:$16 sps:$4 sm:$0xff]   ;;  %v2565_v59 = vld [vmem:[%s3760_s2 + $0x1a0] ss:$16 sps:$4 sm:$0xff]  }
  0x29   :  { %509 = vmatprep.subr.bf16.mxu1 %v2539_v60  ;;  %v2573_v60 = vld [vmem:[%s3760_s2 + $0x1c4] ss:$16 sps:$4 sm:$0xff]  }
  0x2b   :  { %469 = vmatpush1.bf16.msra.mxu0 %v2466_v41  ;;  %v2587_v41 = vld [vmem:[%s3760_s2 + $0x68] ss:$16 sps:$4 sm:$0xff]  }
  0x2c   :  { %470 = vmatprep.subr.bf16.mxu0 %v2467_v42  ;;  %510 = vmatpush1.bf16.msra.mxu1 %v2544_v63  ;;  %v2592_v42 = vld [vmem:[%s3760_s2 + $0x8c] ss:$16 sps:$4 sm:$0xff]   ;;  %v2571_v63 = vld [vmem:[%s3760_s2 + $0x1c0] ss:$16 sps:$4 sm:$0xff]  }
  0x2d   :  { %511 = vmatprep.subr.bf16.mxu1 %v2545_v1  ;;  %v2605_v1 = vld [vmem:[%s3760_s2 + $0x128] ss:$16 sps:$4 sm:$0xff]  }
  0x2f   :  { %471 = vmatpush1.bf16.msra.mxu0 %v2469_v45  ;;  %v2590_v45 = vld [vmem:[%s3760_s2 + $0x88] ss:$16 sps:$4 sm:$0xff]  }
  0x30   :  { %472 = vmatprep.subr.bf16.mxu0 %v2470_v46  ;;  %512 = vmatpush1.bf16.msra.mxu1 %v2550_v4  ;;  %v2595_v46 = vld [vmem:[%s3760_s2 + $0xac] ss:$16 sps:$4 sm:$0xff]   ;;  %v2608_v4 = vld [vmem:[%s3760_s2 + $0x148] ss:$16 sps:$4 sm:$0xff]  }
  0x31   :  { %513 = vmatprep.subr.bf16.mxu1 %v2551_v5  ;;  %v662_v5 = vrot.slane %v3077_v6, %v2930_v21  ;;  %v2614_v6 = vld [vmem:[%s3760_s2 + $0x188] ss:$16 sps:$4 sm:$0xff]  }
  0x33   :  { %473 = vmatpush1.bf16.msra.mxu0 %v2472_v49  ;;  %v2593_v49 = vld [vmem:[%s3760_s2 + $0xa8] ss:$16 sps:$4 sm:$0xff]  }
  0x34   :  { %474 = vmatprep.subr.bf16.mxu0 %v2473_v50  ;;  %514 = vmatpush1.bf16.msra.mxu1 %v2556_v10  ;;  %v2598_v50 = vld [vmem:[%s3760_s2 + $0xcc] ss:$16 sps:$4 sm:$0xff]  }
  0x35   :  { %515 = vmatprep.subr.bf16.mxu1 %v2557_v12  ;;  %v2619_v10 = vld [vmem:[%s3760_s2 + $0x1ac] ss:$16 sps:$4 sm:$0xff]  }
  0x36   :  { %v2622_v12 = vld [vmem:[%s3760_s2 + $0x1cc] ss:$16 sps:$4 sm:$0xff]  }
  0x37   :  { %475 = vmatpush1.bf16.msra.mxu0 %v2475_v53  ;;  %v2596_v53 = vld [vmem:[%s3760_s2 + $0xc8] ss:$16 sps:$4 sm:$0xff]  }
  0x38   :  { %476 = vmatprep.subr.bf16.mxu0 %v2476_v54  ;;  %516 = vmatpush1.bf16.msra.mxu1 %v2562_v16  ;;  %v2601_v54 = vld [vmem:[%s3760_s2 + $0xec] ss:$16 sps:$4 sm:$0xff]   ;;  %v2623_v16 = vld [vmem:[%s3760_s2 + $0x1e8] ss:$16 sps:$4 sm:$0xff]  }
  0x39   :  { %517 = vmatprep.subr.bf16.mxu1 %v2563_v17  ;;  %v2626_v17 = vld [vmem:[%s3762_s5] ss:$16 sps:$4 sm:$0xff]  }
  0x3b   :  { %477 = vmatpush1.bf16.msra.mxu0 %v2478_v57  ;;  %v2599_v57 = vld [vmem:[%s3760_s2 + $0xe8] ss:$16 sps:$4 sm:$0xff]  }
  0x3c   :  { %478 = vmatprep.subr.bf16.mxu0 %v2479_v58  ;;  %518 = vmatpush1.bf16.msra.mxu1 %v2568_v20  ;;  %v2604_v58 = vld [vmem:[%s3760_s2 + $0x10c] ss:$16 sps:$4 sm:$0xff]  }
  0x3d   :  { %519 = vmatprep.subr.bf16.mxu1 %v2569_v22  ;;  %v2631_v20 = vld [vmem:[%s3762_s5 + $0xc] ss:$16 sps:$4 sm:$0xff]   ;;  %v2632_v22 = vld [vmem:[%s3762_s5 + $0x20] ss:$16 sps:$4 sm:$0xff]  }
  0x3f   :  { %479 = vmatpush1.bf16.msra.mxu0 %v2483_v61  ;;  %v2602_v61 = vld [vmem:[%s3760_s2 + $0x108] ss:$16 sps:$4 sm:$0xff]  }
  0x40   :  { %992 = vmatprep.subr.bf16.mxu0 %v2489_v62  ;;  %520 = vmatpush1.bf16.msra.mxu1 %v2574_v25  ;;  %v2607_v62 = vld [vmem:[%s3760_s2 + $0x12c] ss:$16 sps:$4 sm:$0xff]  }
  0x41   :  { %1033 = vmatprep.subr.bf16.mxu1 %v2580_v26  ;;  %v2637_v25 = vld [vmem:[%s3762_s5 + $0x2c] ss:$16 sps:$4 sm:$0xff]   ;;  %v2640_v26 = vld [vmem:[%s3762_s5 + $0x44] ss:$16 sps:$4 sm:$0xff]  }
  0x42   :  { %481 = vmatmul.mubr.bf16.vlgmr.msra.gmra.mrb[0].mxu0 %v118_v0 }
  0x43   :  { %993 = vmatpush1.bf16.msra.mxu0 %v2487_v2  ;;  %1024 = vmatprep.mubr.bf16.mxu0 %v669_v11  ;;  %v2610_v2 = vld [vmem:[%s3760_s2 + $0x14c] ss:$16 sps:$4 sm:$0xff]  }
  0x44   :  { %994 = vmatprep.subr.bf16.mxu0 %v2495_v3  ;;  %522 = vmatmul.mubr.bf16.vlgmr.msra.gmra.mrb[0].mxu1 %v118_v0  ;;  %v2577_v0 = vld [vmem:[%s3760_s2 + $0x1e4] ss:$16 sps:$4 sm:$0xff]   ;;  %v2575_v3 = vld [vmem:[%s3760_s2 + $0x1e0] ss:$16 sps:$4 sm:$0xff]  }
  0x45   :  { %1034 = vmatpush1.bf16.msra.mxu1 %v2578_v29  ;;  %1065 = vmatprep.mubr.bf16.mxu1 %v669_v11  ;;  %v2617_v11 = vld [vmem:[%s3760_s2 + $0x1a8] ss:$16 sps:$4 sm:$0xff]  }
  0x46   :  { %1035 = vmatprep.subr.bf16.mxu1 %v2583_v30  ;;  %v2641_v29 = vld [vmem:[%s3762_s5 + $0x48] ss:$16 sps:$4 sm:$0xff]   ;;  %v2646_v30 = vld [vmem:[%s3762_s5 + $0x64] ss:$16 sps:$4 sm:$0xff]  }
  0x47   :  { %995 = vmatpush1.bf16.msra.mxu0 %v2493_v7  ;;  %v2613_v7 = vld [vmem:[%s3760_s2 + $0x16c] ss:$16 sps:$4 sm:$0xff]  }
  0x48   :  { %996 = vmatprep.subr.bf16.mxu0 %v2501_v9  ;;  %v2616_v9 = vld [vmem:[%s3760_s2 + $0x18c] ss:$16 sps:$4 sm:$0xff]  }
  0x49   :  { %1036 = vmatpush1.bf16.msra.mxu1 %v2581_v33  ;;  %v2647_v33 = vld [vmem:[%s3762_s5 + $0x68] ss:$16 sps:$4 sm:$0xff]  }
  0x4a   :  { %1037 = vmatprep.subr.bf16.mxu1 %v2586_v34  ;;  %v2652_v34 = vld [vmem:[%s3762_s5 + $0x84] ss:$16 sps:$4 sm:$0xff]  }
  0x4b   :  { %997 = vmatpush1.bf16.msra.mxu0 %v2499_v13  ;;  %v2620_v13 = vld [vmem:[%s3760_s2 + $0x1c8] ss:$16 sps:$4 sm:$0xff]  }
  0x4c   :  { %998 = vmatprep.subr.bf16.mxu0 %v2507_v14  ;;  %v2625_v14 = vld [vmem:[%s3760_s2 + $0x1ec] ss:$16 sps:$4 sm:$0xff]  }
  0x4d   :  { %1038 = vmatpush1.bf16.msra.mxu1 %v2584_v37  ;;  %v2653_v37 = vld [vmem:[%s3762_s5 + $0x88] ss:$16 sps:$4 sm:$0xff]  }
  0x4e   :  { %1039 = vmatprep.subr.bf16.mxu1 %v2589_v38  ;;  %v2658_v38 = vld [vmem:[%s3762_s5 + $0xa4] ss:$16 sps:$4 sm:$0xff]  }
  0x4f   :  { %999 = vmatpush1.bf16.msra.mxu0 %v2505_v18  ;;  %v2628_v18 = vld [vmem:[%s3762_s5 + $0x4] ss:$16 sps:$4 sm:$0xff]  }
  0x50   :  { %1000 = vmatprep.subr.bf16.mxu0 %v2513_v19  ;;  %v2629_v19 = vld [vmem:[%s3762_s5 + $0x8] ss:$16 sps:$4 sm:$0xff]  }
  0x51   :  { %1040 = vmatpush1.bf16.msra.mxu1 %v2587_v41  ;;  %v2659_v41 = vld [vmem:[%s3762_s5 + $0xa8] ss:$16 sps:$4 sm:$0xff]  }
  0x52   :  { %1041 = vmatprep.subr.bf16.mxu1 %v2592_v42  ;;  %v2664_v42 = vld [vmem:[%s3762_s5 + $0xc4] ss:$16 sps:$4 sm:$0xff]  }
  0x53   :  { %1001 = vmatpush1.bf16.msra.mxu0 %v2511_v23  ;;  %v2634_v23 = vld [vmem:[%s3762_s5 + $0x24] ss:$16 sps:$4 sm:$0xff]  }
  0x54   :  { %1002 = vmatprep.subr.bf16.mxu0 %v2519_v24  ;;  %v2635_v24 = vld [vmem:[%s3762_s5 + $0x28] ss:$16 sps:$4 sm:$0xff]  }
  0x55   :  { %1042 = vmatpush1.bf16.msra.mxu1 %v2590_v45  ;;  %v2665_v45 = vld [vmem:[%s3762_s5 + $0xc8] ss:$16 sps:$4 sm:$0xff]  }
  0x56   :  { %1043 = vmatprep.subr.bf16.mxu1 %v2595_v46  ;;  %v2670_v46 = vld [vmem:[%s3762_s5 + $0xe4] ss:$16 sps:$4 sm:$0xff]  }
  0x57   :  { %1003 = vmatpush1.bf16.msra.mxu0 %v2517_v27  ;;  %v2638_v27 = vld [vmem:[%s3762_s5 + $0x40] ss:$16 sps:$4 sm:$0xff]  }
  0x58   :  { %1004 = vmatprep.subr.bf16.mxu0 %v2525_v28  ;;  %v2643_v28 = vld [vmem:[%s3762_s5 + $0x4c] ss:$16 sps:$4 sm:$0xff]  }
  0x59   :  { %1044 = vmatpush1.bf16.msra.mxu1 %v2593_v49  ;;  %v2671_v49 = vld [vmem:[%s3762_s5 + $0xe8] ss:$16 sps:$4 sm:$0xff]  }
  0x5a   :  { %1045 = vmatprep.subr.bf16.mxu1 %v2598_v50  ;;  %v2676_v50 = vld [vmem:[%s3762_s5 + $0x104] ss:$16 sps:$4 sm:$0xff]  }
  0x5b   :  { %1005 = vmatpush1.bf16.msra.mxu0 %v2523_v31  ;;  %v2649_v31 = vld [vmem:[%s3762_s5 + $0x6c] ss:$16 sps:$4 sm:$0xff]  }
  0x5c   :  { %1006 = vmatprep.subr.bf16.mxu0 %v2531_v32  ;;  %v2644_v32 = vld [vmem:[%s3762_s5 + $0x60] ss:$16 sps:$4 sm:$0xff]  }
  0x5d   :  { %1046 = vmatpush1.bf16.msra.mxu1 %v2596_v53  ;;  %v2677_v53 = vld [vmem:[%s3762_s5 + $0x108] ss:$16 sps:$4 sm:$0xff]  }
  0x5e   :  { %1047 = vmatprep.subr.bf16.mxu1 %v2601_v54  ;;  %v2682_v54 = vld [vmem:[%s3762_s5 + $0x124] ss:$16 sps:$4 sm:$0xff]  }
  0x5f   :  { %1007 = vmatpush1.bf16.msra.mxu0 %v2529_v35  ;;  %v2655_v35 = vld [vmem:[%s3762_s5 + $0x8c] ss:$16 sps:$4 sm:$0xff]  }
  0x60   :  { %1008 = vmatprep.subr.bf16.mxu0 %v2537_v36  ;;  %v2650_v36 = vld [vmem:[%s3762_s5 + $0x80] ss:$16 sps:$4 sm:$0xff]  }
  0x61   :  { %1048 = vmatpush1.bf16.msra.mxu1 %v2599_v57  ;;  %v2683_v57 = vld [vmem:[%s3762_s5 + $0x128] ss:$16 sps:$4 sm:$0xff]  }
  0x62   :  { %1049 = vmatprep.subr.bf16.mxu1 %v2604_v58  ;;  %v2688_v58 = vld [vmem:[%s3762_s5 + $0x144] ss:$16 sps:$4 sm:$0xff]  }
  0x63   :  { %1009 = vmatpush1.bf16.msra.mxu0 %v2535_v39  ;;  %v2661_v39 = vld [vmem:[%s3762_s5 + $0xac] ss:$16 sps:$4 sm:$0xff]  }
  0x64   :  { %1010 = vmatprep.subr.bf16.mxu0 %v2543_v40  ;;  %v2656_v40 = vld [vmem:[%s3762_s5 + $0xa0] ss:$16 sps:$4 sm:$0xff]  }
  0x65   :  { %1050 = vmatpush1.bf16.msra.mxu1 %v2602_v61  ;;  %v2689_v61 = vld [vmem:[%s3762_s5 + $0x148] ss:$16 sps:$4 sm:$0xff]  }
  0x66   :  { %1051 = vmatprep.subr.bf16.mxu1 %v2607_v62  ;;  %v2694_v62 = vld [vmem:[%s3762_s5 + $0x164] ss:$16 sps:$4 sm:$0xff]  }
  0x67   :  { %1011 = vmatpush1.bf16.msra.mxu0 %v2541_v43  ;;  %v2667_v43 = vld [vmem:[%s3762_s5 + $0xcc] ss:$16 sps:$4 sm:$0xff]  }
  0x68   :  { %1012 = vmatprep.subr.bf16.mxu0 %v2549_v44  ;;  %v2662_v44 = vld [vmem:[%s3762_s5 + $0xc0] ss:$16 sps:$4 sm:$0xff]  }
  0x69   :  { %1052 = vmatpush1.bf16.msra.mxu1 %v2605_v1  ;;  %v2695_v1 = vld [vmem:[%s3762_s5 + $0x168] ss:$16 sps:$4 sm:$0xff]  }
  0x6a   :  { %1053 = vmatprep.subr.bf16.mxu1 %v2610_v2  ;;  %v2700_v2 = vld [vmem:[%s3762_s5 + $0x184] ss:$16 sps:$4 sm:$0xff]  }
  0x6b   :  { %1013 = vmatpush1.bf16.msra.mxu0 %v2547_v47  ;;  %v2673_v47 = vld [vmem:[%s3762_s5 + $0xec] ss:$16 sps:$4 sm:$0xff]  }
  0x6c   :  { %1014 = vmatprep.subr.bf16.mxu0 %v2555_v48  ;;  %v2668_v48 = vld [vmem:[%s3762_s5 + $0xe0] ss:$16 sps:$4 sm:$0xff]  }
  0x6d   :  { %1054 = vmatpush1.bf16.msra.mxu1 %v2608_v4  ;;  %v2698_v4 = vld [vmem:[%s3762_s5 + $0x180] ss:$16 sps:$4 sm:$0xff]  }
  0x6e   :  { %1055 = vmatprep.subr.bf16.mxu1 %v2613_v7  ;;  %v2706_v7 = vld [vmem:[%s3762_s5 + $0x1a4] ss:$16 sps:$4 sm:$0xff]  }
  0x6f   :  { %1015 = vmatpush1.bf16.msra.mxu0 %v2553_v51  ;;  %v2679_v51 = vld [vmem:[%s3762_s5 + $0x10c] ss:$16 sps:$4 sm:$0xff]  }
  0x70   :  { %1016 = vmatprep.subr.bf16.mxu0 %v2561_v52  ;;  %v2674_v52 = vld [vmem:[%s3762_s5 + $0x100] ss:$16 sps:$4 sm:$0xff]  }
  0x71   :  { %1056 = vmatpush1.bf16.msra.mxu1 %v2611_v8  ;;  %v2709_v8 = vld [vmem:[%s3762_s5 + $0x1ac] ss:$16 sps:$4 sm:$0xff]  }
  0x72   :  { %1057 = vmatprep.subr.bf16.mxu1 %v2616_v9  ;;  %v2704_v9 = vld [vmem:[%s3762_s5 + $0x1a0] ss:$16 sps:$4 sm:$0xff]  }
  0x73   :  { %1017 = vmatpush1.bf16.msra.mxu0 %v2559_v55  ;;  %v2685_v55 = vld [vmem:[%s3762_s5 + $0x12c] ss:$16 sps:$4 sm:$0xff]  }
  0x74   :  { %1018 = vmatprep.subr.bf16.mxu0 %v2567_v56  ;;  %v2680_v56 = vld [vmem:[%s3762_s5 + $0x120] ss:$16 sps:$4 sm:$0xff]  }
  0x75   :  { %1058 = vmatpush1.bf16.msra.mxu1 %v2614_v6  ;;  %v2707_v6 = vld [vmem:[%s3762_s5 + $0x1a8] ss:$16 sps:$4 sm:$0xff]  }
  0x76   :  { %1059 = vmatprep.subr.bf16.mxu1 %v2619_v10  ;;  %v2712_v10 = vld [vmem:[%s3762_s5 + $0x1c4] ss:$16 sps:$4 sm:$0xff]  }
  0x77   :  { %1019 = vmatpush1.bf16.msra.mxu0 %v2565_v59  ;;  %v2691_v59 = vld [vmem:[%s3762_s5 + $0x14c] ss:$16 sps:$4 sm:$0xff]  }
  0x78   :  { %1020 = vmatprep.subr.bf16.mxu0 %v2573_v60  ;;  %v2686_v60 = vld [vmem:[%s3762_s5 + $0x140] ss:$16 sps:$4 sm:$0xff]  }
  0x79   :  { %1060 = vmatpush1.bf16.msra.mxu1 %v2617_v11  ;;  %v2715_v11 = vld [vmem:[%s3762_s5 + $0x1cc] ss:$16 sps:$4 sm:$0xff]  }
  0x7a   :  { %1061 = vmatprep.subr.bf16.mxu1 %v2622_v12  ;;  %v2710_v12 = vld [vmem:[%s3762_s5 + $0x1c0] ss:$16 sps:$4 sm:$0xff]  }
  0x7b   :  { %1021 = vmatpush1.bf16.msra.mxu0 %v2571_v63  ;;  %v2697_v63 = vld [vmem:[%s3762_s5 + $0x16c] ss:$16 sps:$4 sm:$0xff]  }
  0x7c   :  { %1022 = vmatprep.subr.bf16.mxu0 %v2577_v0  ;;  %v2692_v0 = vld [vmem:[%s3762_s5 + $0x160] ss:$16 sps:$4 sm:$0xff]  }
  0x7d   :  { %1062 = vmatpush1.bf16.msra.mxu1 %v2620_v13  ;;  %v2713_v13 = vld [vmem:[%s3762_s5 + $0x1c8] ss:$16 sps:$4 sm:$0xff]  }
  0x7e   :  { %1063 = vmatprep.subr.bf16.mxu1 %v2625_v14  ;;  %v2718_v14 = vld [vmem:[%s3762_s5 + $0x1e4] ss:$16 sps:$4 sm:$0xff]  }
  0x7f   :  { %1023 = vmatpush1.bf16.msra.mxu0 %v2575_v3  ;;  %v2703_v3 = vld [vmem:[%s3762_s5 + $0x18c] ss:$16 sps:$4 sm:$0xff]  }
  0x80   :  { %1902 = vmatprep.subr.bf16.mxu0 %v2628_v18  ;;  %v2719_v18 = vld [vmem:[%s3762_s5 + $0x1e8] ss:$16 sps:$4 sm:$0xff]  }
  0x81   :  { %1064 = vmatpush1.bf16.msra.mxu1 %v2623_v16  ;;  %v2721_v16 = vld [vmem:[%s3762_s5 + $0x1ec] ss:$16 sps:$4 sm:$0xff]  }
  0x82   :  { %1025 = vmatmul.mubr.bf16.vlgmr.msra.gmra.mrb[4].mxu0 %v662_v5  ;;  %1984 = vmatprep.subr.bf16.mxu1 %v2631_v20  ;;  %v2727_v20 = vld [vmem:[%s3762_s5 + $0x20c] ss:$16 sps:$4 sm:$0xff]  }
  0x83   :  { %1903 = vmatpush1.bf16.msra.mxu0 %v2626_v17  ;;  %v2716_v17 = vld [vmem:[%s3762_s5 + $0x1e0] ss:$16 sps:$4 sm:$0xff]  }
  0x84   :  { %1066 = vmatmul.mubr.bf16.vlgmr.msra.gmra.mrb[4].mxu1 %v662_v5  ;;  %1904 = vmatprep.subr.bf16.mxu0 %v2634_v23  ;;  %v2701_v5 = vld [vmem:[%s3762_s5 + $0x188] ss:$16 sps:$4 sm:$0xff]  }
  0x85   :  { %1985 = vmatpush1.bf16.msra.mxu1 %v2629_v19  ;;  %v2724_v19 = vld [vmem:[%s3762_s5 + $0x204] ss:$16 sps:$4 sm:$0xff]  }
  0x86   :  { %1986 = vmatprep.subr.bf16.mxu1 %v2637_v25 }
  0x87   :  { %1905 = vmatpush1.bf16.msra.mxu0 %v2632_v22 }
  0x88   :  { %1906 = vmatprep.subr.bf16.mxu0 %v2640_v26 }
  0x89   :  { %1987 = vmatpush1.bf16.msra.mxu1 %v2635_v24 }
  0x8a   :  { %1988 = vmatprep.subr.bf16.mxu1 %v2643_v28 }
  0x8b   :  { %1907 = vmatpush1.bf16.msra.mxu0 %v2638_v27 }
  0x8c   :  { %1908 = vmatprep.subr.bf16.mxu0 %v2646_v30  ;;  %v3497_v30 = vld [vmem:[%s3763_s3] sm:$0xf] }
  0x8d   :  { %1989 = vmatpush1.bf16.msra.mxu1 %v2641_v29 }
  0x8e   :  { %1990 = vmatprep.subr.bf16.mxu1 %v2649_v31  ;;  %v3500_v31 = vsub.s32 0, %v2912_v15 }
  0x8f   :  { %1909 = vmatpush1.bf16.msra.mxu0 %v2644_v32  ;;  %v3503_v32 = vsub.s32 1, %v2912_v15 }
  0x90   :  { %1910 = vmatprep.subr.bf16.mxu0 %v2652_v34  ;;  %v1079_v34 = vrot.slane %v3497_v30, %v3500_v31 }
  0x91   :  { %1991 = vmatpush1.bf16.msra.mxu1 %v2647_v33  ;;  %v3508_v33 = vld [vmem:[%s3764_s4] sm:$0xf] }
  0x92   :  { %1992 = vmatprep.subr.bf16.mxu1 %v2655_v35  ;;  %v1083_v35 = vrot.slane %v3497_v30, %v3503_v32 }
  0x93   :  { %1911 = vmatpush1.bf16.msra.mxu0 %v2650_v36  ;;  %v1105_v36 = vrot.slane %v3508_v33, %v3500_v31 }
  0x94   :  { %1912 = vmatprep.subr.bf16.mxu0 %v2658_v38  ;;  %v1109_v38 = vrot.slane %v3508_v33, %v3503_v32 }
  0x95   :  { %1993 = vmatpush1.bf16.msra.mxu1 %v2653_v37 }
  0x96   :  { %1994 = vmatprep.subr.bf16.mxu1 %v2661_v39 }
  0x97   :  { %1913 = vmatpush1.bf16.msra.mxu0 %v2656_v40 }
  0x98   :  { %1914 = vmatprep.subr.bf16.mxu0 %v2664_v42 }
  0x99   :  { %1995 = vmatpush1.bf16.msra.mxu1 %v2659_v41 }
  0x9a   :  { %1996 = vmatprep.subr.bf16.mxu1 %v2667_v43 }
  0x9b   :  { %1915 = vmatpush1.bf16.msra.mxu0 %v2662_v44 }
  0x9c   :  { %1916 = vmatprep.subr.bf16.mxu0 %v2670_v46 }
  0x9d   :  { %1997 = vmatpush1.bf16.msra.mxu1 %v2665_v45 }
  0x9e   :  { %1998 = vmatprep.subr.bf16.mxu1 %v2673_v47 }
  0x9f   :  { %1917 = vmatpush1.bf16.msra.mxu0 %v2668_v48 }
  0xa0   :  { %1918 = vmatprep.subr.bf16.mxu0 %v2676_v50  ;;  %v2725_v50 = vld [vmem:[%s3762_s5 + $0x208] ss:$16 sps:$4 sm:$0xff]  }
  0xa1   :  { %1999 = vmatpush1.bf16.msra.mxu1 %v2671_v49  ;;  %v2722_v49 = vld [vmem:[%s3762_s5 + $0x200] ss:$16 sps:$4 sm:$0xff]  }
  0xa2   :  { %2000 = vmatprep.subr.bf16.mxu1 %v2679_v51 }
  0xa3   :  { %1919 = vmatpush1.bf16.msra.mxu0 %v2674_v52  ;;  %v2730_v52 = vld [vmem:[%s3762_s5 + $0x224] ss:$16 sps:$4 sm:$0xff]  }
  0xa4   :  { %1920 = vmatprep.subr.bf16.mxu0 %v2682_v54  ;;  %v2728_v54 = vld [vmem:[%s3762_s5 + $0x220] ss:$16 sps:$4 sm:$0xff]  }
  0xa5   :  { %2001 = vmatpush1.bf16.msra.mxu1 %v2677_v53  ;;  %v2733_v53 = vld [vmem:[%s3762_s5 + $0x22c] ss:$16 sps:$4 sm:$0xff]  }
  0xa6   :  { %2002 = vmatprep.subr.bf16.mxu1 %v2685_v55  ;;  %v2731_v55 = vld [vmem:[%s3762_s5 + $0x228] ss:$16 sps:$4 sm:$0xff]  }
  0xa7   :  { %1921 = vmatpush1.bf16.msra.mxu0 %v2680_v56  ;;  %v2736_v56 = vld [vmem:[%s3762_s5 + $0x244] ss:$16 sps:$4 sm:$0xff]  }
  0xa8   :  { %1922 = vmatprep.subr.bf16.mxu0 %v2688_v58  ;;  %v2734_v58 = vld [vmem:[%s3762_s5 + $0x240] ss:$16 sps:$4 sm:$0xff]  }
  0xa9   :  { %2003 = vmatpush1.bf16.msra.mxu1 %v2683_v57  ;;  %v2739_v57 = vld [vmem:[%s3762_s5 + $0x24c] ss:$16 sps:$4 sm:$0xff]  }
  0xaa   :  { %2004 = vmatprep.subr.bf16.mxu1 %v2691_v59  ;;  %v2737_v59 = vld [vmem:[%s3762_s5 + $0x248] ss:$16 sps:$4 sm:$0xff]  }
  0xab   :  { %1923 = vmatpush1.bf16.msra.mxu0 %v2686_v60  ;;  %v3549_v60 = vsub.s32 2, %v2912_v15 }
  0xac   :  { %1924 = vmatprep.subr.bf16.mxu0 %v2694_v62  ;;  %v2745_v62 = vld [vmem:[%s3762_s5 + $0x26c] ss:$16 sps:$4 sm:$0xff]  }
  0xad   :  { %2005 = vmatpush1.bf16.msra.mxu1 %v2689_v61  ;;  %v2742_v61 = vld [vmem:[%s3762_s5 + $0x264] ss:$16 sps:$4 sm:$0xff]  }
  0xae   :  { %2006 = vmatprep.subr.bf16.mxu1 %v2697_v63  ;;  %v3558_v63 = vsub.s32 3, %v2912_v15  ;;  %v2748_v15 = vld [vmem:[%s3762_s5 + $0x284] ss:$16 sps:$4 sm:$0xff]  }
  0xaf   :  { %1925 = vmatpush1.bf16.msra.mxu0 %v2692_v0  ;;  %v1087_v0 = vrot.slane %v3497_v30, %v3549_v60 }
  0xb0   :  { %1926 = vmatprep.subr.bf16.mxu0 %v2700_v2  ;;  %v2743_v2 = vld [vmem:[%s3762_s5 + $0x268] ss:$16 sps:$4 sm:$0xff]  }
  0xb1   :  { %2007 = vmatpush1.bf16.msra.mxu1 %v2695_v1  ;;  %v2740_v1 = vld [vmem:[%s3762_s5 + $0x260] ss:$16 sps:$4 sm:$0xff]  }
  0xb2   :  { %2008 = vmatprep.subr.bf16.mxu1 %v2703_v3  ;;  %v1091_v3 = vrot.slane %v3497_v30, %v3558_v63 }
  0xb3   :  { %1927 = vmatpush1.bf16.msra.mxu0 %v2698_v4  ;;  %v2751_v4 = vld [vmem:[%s3762_s5 + $0x28c] ss:$16 sps:$4 sm:$0xff]  }
  0xb4   :  { %1928 = vmatprep.subr.bf16.mxu0 %v2706_v7 }
  0xb5   :  { %2009 = vmatpush1.bf16.msra.mxu1 %v2701_v5  ;;  %v1113_v5 = vrot.slane %v3508_v33, %v3549_v60 }
  0xb6   :  { %2010 = vmatprep.subr.bf16.mxu1 %v2709_v8  ;;  %v1117_v8 = vrot.slane %v3508_v33, %v3558_v63  ;;  %v2758_v33 = vld [vmem:[%s3762_s5 + $0x2c0] ss:$16 sps:$4 sm:$0xff]  }
  0xb7   :  { %1929 = vmatpush1.bf16.msra.mxu0 %v2704_v9 }
  0xb8   :  { %1930 = vmatprep.subr.bf16.mxu0 %v2712_v10  ;;  %v2746_v10 = vld [vmem:[%s3762_s5 + $0x280] ss:$16 sps:$4 sm:$0xff]  }
  0xb9   :  { %2011 = vmatpush1.bf16.msra.mxu1 %v2707_v6 }
  0xba   :  { %2012 = vmatprep.subr.bf16.mxu1 %v2715_v11  ;;  %v2749_v11 = vld [vmem:[%s3762_s5 + $0x288] ss:$16 sps:$4 sm:$0xff]  }
  0xbb   :  { %1931 = vmatpush1.bf16.msra.mxu0 %v2710_v12 }
  0xbc   :  { %1932 = vmatprep.subr.bf16.mxu0 %v2718_v14  ;;  %v2754_v14 = vld [vmem:[%s3762_s5 + $0x2a4] ss:$16 sps:$4 sm:$0xff]  }
  0xbd   :  { %2013 = vmatpush1.bf16.msra.mxu1 %v2713_v13 }
  0xbe   :  { %2014 = vmatprep.subr.bf16.mxu1 %v2721_v16  ;;  %v2757_v16 = vld [vmem:[%s3762_s5 + $0x2ac] ss:$16 sps:$4 sm:$0xff]  }
  0xbf   :  { %1933 = vmatpush1.bf16.msra.mxu0 %v2716_v17 }
  0xc0   :  { %1943 = vmatprep.subr.bf16.mxu0 %v2724_v19 }
  0xc1   :  { %2015 = vmatpush1.bf16.msra.mxu1 %v2719_v18 }
  0xc2   :  { %2025 = vmatprep.subr.bf16.mxu1 %v2727_v20  ;;  %v2752_v20 = vld [vmem:[%s3762_s5 + $0x2a0] ss:$16 sps:$4 sm:$0xff]  }
 0x115   :  { %v3486_v22 = vpop.f32.mrb[0].mxu0 }
 0x116   :  { %v3488_v23 = vpop.f32.mrb[1].mxu0 }
 0x117   :  { %v486_v24 = vpop.f32.mrb[2].mxu0  ;;  %v3490_v26 = vpop.f32.mrb[0].mxu1 }
 0x118   :  { %v487_v25 = vpop.f32.mrb[3].mxu0  ;;  %v3492_v27 = vpop.f32.mrb[1].mxu1  ;;  %v2755_v24 = vld [vmem:[%s3762_s5 + $0x2a8] ss:$16 sps:$4 sm:$0xff]  }
 0x119   :  { %v527_v28 = vpop.f32.mrb[2].mxu1 }
 0x11a   :  { %v528_v29 = vpop.f32.mrb[3].mxu1  ;;  %v2760_v28 = vld [vmem:[%s3762_s5 + $0x2c4] ss:$16 sps:$4 sm:$0xff]  }
 0x11b   :  { %v2763_v29 = vld [vmem:[%s3762_s5 + $0x2cc] ss:$16 sps:$4 sm:$0xff]  }
 0x155   :  { %v1026_v37 = vpop.f32.mrb[4].mxu0 }
 0x156   :  { %v1096_v39 = vmul.f32 %v1079_v34, %v1026_v37  ;;  %v1028_v40 = vpop.f32.mrb[5].mxu0  ;;  %v2761_v34 = vld [vmem:[%s3762_s5 + $0x2c8] ss:$16 sps:$4 sm:$0xff]   ;;  %v2764_v37 = vld [vmem:[%s3762_s5 + $0x2e0] ss:$16 sps:$4 sm:$0xff]  }
 0x157   :  { %v1097_v41 = vmul.f32 %v1083_v35, %v1028_v40  ;;  %v1030_v42 = vpop.f32.mrb[6].mxu0  ;;  %v1067_v7 = vpop.f32.mrb[4].mxu1  ;;  %v2766_v35 = vld [vmem:[%s3762_s5 + $0x2e4] ss:$16 sps:$4 sm:$0xff]   ;;  %v2775_v40 = vld [vmem:[%s3762_s5 + $0x30c] ss:$16 sps:$4 sm:$0xff]  }
 0x158   :  { %v1122_v43 = vadd.f32 %v1105_v36, %v1096_v39  ;;  %v1031_v44 = vpop.f32.mrb[7].mxu0  ;;  %v1098_v9 = vmul.f32 %v1087_v0, %v1067_v7  ;;  %v1069_v6 = vpop.f32.mrb[5].mxu1  ;;  %v2769_v36 = vld [vmem:[%s3762_s5 + $0x2ec] ss:$16 sps:$4 sm:$0xff]   ;;  %v2772_v39 = vld [vmem:[%s3762_s5 + $0x304] ss:$16 sps:$4 sm:$0xff]  }
 0x159   :  { %v1123_v45 = vadd.f32 %v1109_v38, %v1097_v41  ;;  %v1099_v12 = vmul.f32 %v1091_v3, %v1069_v6  ;;  %v1071_v13 = vpop.f32.mrb[6].mxu1  ;;  %v2767_v38 = vld [vmem:[%s3762_s5 + $0x2e8] ss:$16 sps:$4 sm:$0xff]   ;;  %v2770_v41 = vld [vmem:[%s3762_s5 + $0x300] ss:$16 sps:$4 sm:$0xff]  }
 0x15a   :  { %v1126_v46 = vmax.f32 %v1122_v43, 0.0  ;;  %v3592_v17 = vadd.f32 %v1113_v5, %v1098_v9  ;;  %v1072_v18 = vpop.f32.mrb[7].mxu1  ;;  %v2773_v42 = vld [vmem:[%s3762_s5 + $0x308] ss:$16 sps:$4 sm:$0xff]   ;;  %v2778_v43 = vld [vmem:[%s3762_s5 + $0x324] ss:$16 sps:$4 sm:$0xff]  }
 0x15b   :  { %v1127_v47 = vmax.f32 %v1123_v45, 0.0  ;;  %v1125_v19 = vadd.f32 %v1117_v8, %v1099_v12  ;;  %v2781_v44 = vld [vmem:[%s3762_s5 + $0x32c] ss:$16 sps:$4 sm:$0xff]   ;;  %v2776_v45 = vld [vmem:[%s3762_s5 + $0x320] ss:$16 sps:$4 sm:$0xff]  }
 0x15c   :  { %v1130_v51 = vpack.c.bf16 %v1126_v46, %v1126_v46  ;;  %v2779_v46 = vld [vmem:[%s3762_s5 + $0x328] ss:$16 sps:$4 sm:$0xff]   ;;  %v2806_v3 = vld [vmem:[%s3762_s5 + $0x3c0] ss:$16 sps:$4 sm:$0xff]   ;;  %v2817_v5 = vld [vmem:[%s3762_s5 + $0x3ec] ss:$16 sps:$4 sm:$0xff]  }
 0x15d   :  { %v1131_v48 = vpack.c.bf16 %v1127_v47, %v1127_v47  ;;  %v1129_v25 = vmax.f32 %v1125_v19, 0.0  ;;  %v2784_v47 = vld [vmem:[%s3762_s5 + $0x344] ss:$16 sps:$4 sm:$0xff]   ;;  %v2803_v0 = vld [vmem:[%s3762_s5 + $0x3a8] ss:$16 sps:$4 sm:$0xff]   ;;  %v1128_v9 = vmax.f32 %v3592_v17, 0.0 }
 0x15e   :  { %v2812_v7 = vld [vmem:[%s3762_s5 + $0x3e0] ss:$16 sps:$4 sm:$0xff]   ;;  %v2815_v8 = vld [vmem:[%s3762_s5 + $0x3e8] ss:$16 sps:$4 sm:$0xff]  }
 0x15f   :  { %1934 = vmatprep.mubr.bf16.mxu0 %v1131_v48  ;;  %2016 = vmatprep.mubr.bf16.mxu1 %v1131_v48  ;;  %v1133_v30 = vpack.c.bf16 %v1129_v25, %v1129_v25  ;;  %v2787_v48 = vld [vmem:[%s3762_s5 + $0x34c] ss:$16 sps:$4 sm:$0xff]   ;;  %v1132_v6 = vpack.c.bf16 %v1128_v9, %v1128_v9  ;;  %v2066_v12 = vld [vmem:[%s3767_s6] sm:$0xf] }
 0x160   :  { %1935 = vmatmul.mubr.bf16.vlgmr.msra.gmra.mrb[8].mxu0 %v1130_v51  ;;  %2017 = vmatmul.mubr.bf16.vlgmr.msra.gmra.mrb[8].mxu1 %v1130_v51  ;;  %v2790_v51 = vld [vmem:[%s3762_s5 + $0x364] ss:$16 sps:$4 sm:$0xff]   ;;  %v2092_v18 = vld [vmem:[%s3768_s7] sm:$0xf]  ;;  %v2079_v25 = vrot.slane %v2066_v12, %v3549_v60 }
 0x161   :  { %1944 = vmatpush1.bf16.msra.mxu0 %v2722_v49  ;;  %2026 = vmatpush1.bf16.msra.mxu1 %v2725_v50  ;;  %v2782_v49 = vld [vmem:[%s3762_s5 + $0x340] ss:$16 sps:$4 sm:$0xff]   ;;  %v2785_v50 = vld [vmem:[%s3762_s5 + $0x348] ss:$16 sps:$4 sm:$0xff]  }
 0x162   :  { %1945 = vmatprep.subr.bf16.mxu0 %v2730_v52  ;;  %2027 = vmatprep.subr.bf16.mxu1 %v2733_v53  ;;  %v2793_v52 = vld [vmem:[%s3762_s5 + $0x36c] ss:$16 sps:$4 sm:$0xff]   ;;  %v2788_v53 = vld [vmem:[%s3762_s5 + $0x360] ss:$16 sps:$4 sm:$0xff]  }
 0x163   :  { %1975 = vmatprep.mubr.bf16.mxu0 %v1133_v30  ;;  %2057 = vmatprep.mubr.bf16.mxu1 %v1133_v30  ;;  %v2075_v30 = vrot.slane %v2066_v12, %v3503_v32 }
 0x165   :  { %1946 = vmatpush1.bf16.msra.mxu0 %v2728_v54  ;;  %2028 = vmatpush1.bf16.msra.mxu1 %v2731_v55  ;;  %v2791_v54 = vld [vmem:[%s3762_s5 + $0x368] ss:$16 sps:$4 sm:$0xff]   ;;  %v2796_v55 = vld [vmem:[%s3762_s5 + $0x384] ss:$16 sps:$4 sm:$0xff]  }
 0x166   :  { %1947 = vmatprep.subr.bf16.mxu0 %v2736_v56  ;;  %2029 = vmatprep.subr.bf16.mxu1 %v2739_v57  ;;  %v2799_v56 = vld [vmem:[%s3762_s5 + $0x38c] ss:$16 sps:$4 sm:$0xff]   ;;  %v2794_v57 = vld [vmem:[%s3762_s5 + $0x380] ss:$16 sps:$4 sm:$0xff]  }
 0x169   :  { %1948 = vmatpush1.bf16.msra.mxu0 %v2734_v58  ;;  %2030 = vmatpush1.bf16.msra.mxu1 %v2737_v59  ;;  %v2797_v58 = vld [vmem:[%s3762_s5 + $0x388] ss:$16 sps:$4 sm:$0xff]   ;;  %v2802_v59 = vld [vmem:[%s3762_s5 + $0x3a4] ss:$16 sps:$4 sm:$0xff]  }
 0x16a   :  { %1949 = vmatprep.subr.bf16.mxu0 %v2742_v61  ;;  %2031 = vmatprep.subr.bf16.mxu1 %v2745_v62  ;;  %v2805_v61 = vld [vmem:[%s3762_s5 + $0x3ac] ss:$16 sps:$4 sm:$0xff]   ;;  %v2800_v62 = vld [vmem:[%s3762_s5 + $0x3a0] ss:$16 sps:$4 sm:$0xff]  }
 0x16d   :  { %1950 = vmatpush1.bf16.msra.mxu0 %v2740_v1  ;;  %2032 = vmatpush1.bf16.msra.mxu1 %v2743_v2  ;;  %v2808_v1 = vld [vmem:[%s3762_s5 + $0x3c4] ss:$16 sps:$4 sm:$0xff]   ;;  %v2811_v2 = vld [vmem:[%s3762_s5 + $0x3cc] ss:$16 sps:$4 sm:$0xff]  }
 0x16e   :  { %1951 = vmatprep.subr.bf16.mxu0 %v2748_v15  ;;  %2033 = vmatprep.subr.bf16.mxu1 %v2751_v4  ;;  %v2809_v15 = vld [vmem:[%s3762_s5 + $0x3c8] ss:$16 sps:$4 sm:$0xff]   ;;  %v2814_v4 = vld [vmem:[%s3762_s5 + $0x3e4] ss:$16 sps:$4 sm:$0xff]  }
 0x171   :  { %1952 = vmatpush1.bf16.msra.mxu0 %v2746_v10  ;;  %2034 = vmatpush1.bf16.msra.mxu1 %v2749_v11  ;;  %v530_v10 = vld [vmem:[%s3765_s9] sm:$0xf] }
 0x172   :  { %1953 = vmatprep.subr.bf16.mxu0 %v2754_v14  ;;  %2035 = vmatprep.subr.bf16.mxu1 %v2757_v16  ;;  %v556_v11 = vld [vmem:[%s3766_s10] sm:$0xf]  ;;  %v535_v13 = vrot.slane %v530_v10, %v3500_v31  ;;  %v543_v14 = vrot.slane %v530_v10, %v3549_v60  ;;  %v539_v16 = vrot.slane %v530_v10, %v3503_v32 }
 0x173   :  { %v547_v17 = vrot.slane %v530_v10, %v3558_v63  ;;  %v561_v19 = vrot.slane %v556_v11, %v3500_v31 }
 0x175   :  { %1954 = vmatpush1.bf16.msra.mxu0 %v2752_v20  ;;  %2036 = vmatpush1.bf16.msra.mxu1 %v2755_v24  ;;  %v565_v20 = vrot.slane %v556_v11, %v3503_v32  ;;  %v2071_v24 = vrot.slane %v2066_v12, %v3500_v31 }
 0x176   :  { %1955 = vmatprep.subr.bf16.mxu0 %v2760_v28  ;;  %2037 = vmatprep.subr.bf16.mxu1 %v2763_v29  ;;  %v569_v28 = vrot.slane %v556_v11, %v3549_v60  ;;  %v573_v29 = vrot.slane %v556_v11, %v3558_v63 }
 0x179   :  { %1956 = vmatpush1.bf16.msra.mxu0 %v2758_v33  ;;  %2038 = vmatpush1.bf16.msra.mxu1 %v2761_v34  ;;  %v2083_v33 = vrot.slane %v2066_v12, %v3558_v63  ;;  %v552_v34 = vmul.f32 %v535_v13, %v3486_v22 }
 0x17a   :  { %1957 = vmatprep.subr.bf16.mxu0 %v2766_v35  ;;  %2039 = vmatprep.subr.bf16.mxu1 %v2769_v36  ;;  %v554_v35 = vmul.f32 %v543_v14, %v3490_v26  ;;  %v2097_v36 = vrot.slane %v2092_v18, %v3500_v31 }
 0x17d   :  { %1958 = vmatpush1.bf16.msra.mxu0 %v2764_v37  ;;  %2040 = vmatpush1.bf16.msra.mxu1 %v2767_v38  ;;  %v2105_v37 = vrot.slane %v2092_v18, %v3549_v60  ;;  %v553_v38 = vmul.f32 %v539_v16, %v3488_v23  ;;  %v580_v60 = vadd.f32 %v569_v28, %v554_v35 }
 0x17e   :  { %1959 = vmatprep.subr.bf16.mxu0 %v2772_v39  ;;  %2041 = vmatprep.subr.bf16.mxu1 %v2775_v40  ;;  %v555_v39 = vmul.f32 %v547_v17, %v3492_v27 }
 0x181   :  { %1960 = vmatpush1.bf16.msra.mxu0 %v2770_v41  ;;  %2042 = vmatpush1.bf16.msra.mxu1 %v2773_v42  ;;  %v2101_v42 = vrot.slane %v2092_v18, %v3503_v32 }
 0x182   :  { %1961 = vmatprep.subr.bf16.mxu0 %v2778_v43  ;;  %2043 = vmatprep.subr.bf16.mxu1 %v2781_v44  ;;  %v2109_v43 = vrot.slane %v2092_v18, %v3558_v63 }
 0x185   :  { %1962 = vmatpush1.bf16.msra.mxu0 %v2776_v45  ;;  %2044 = vmatpush1.bf16.msra.mxu1 %v2779_v46 }
 0x186   :  { %1963 = vmatprep.subr.bf16.mxu0 %v2784_v47  ;;  %2045 = vmatprep.subr.bf16.mxu1 %v2787_v48 }
 0x189   :  { %1964 = vmatpush1.bf16.msra.mxu0 %v2782_v49  ;;  %2046 = vmatpush1.bf16.msra.mxu1 %v2785_v50  ;;  %v578_v49 = vadd.f32 %v561_v19, %v552_v34 }
 0x18a   :  { %1965 = vmatprep.subr.bf16.mxu0 %v2790_v51  ;;  %2047 = vmatprep.subr.bf16.mxu1 %v2793_v52  ;;  %v579_v52 = vadd.f32 %v565_v20, %v553_v38 }
 0x18d   :  { %1966 = vmatpush1.bf16.msra.mxu0 %v2788_v53  ;;  %2048 = vmatpush1.bf16.msra.mxu1 %v2791_v54  ;;  %v581_v53 = vadd.f32 %v573_v29, %v555_v39 }
 0x18e   :  { %1967 = vmatprep.subr.bf16.mxu0 %v2796_v55  ;;  %2049 = vmatprep.subr.bf16.mxu1 %v2799_v56 }
 0x191   :  { %1968 = vmatpush1.bf16.msra.mxu0 %v2794_v57  ;;  %2050 = vmatpush1.bf16.msra.mxu1 %v2797_v58 }
 0x192   :  { %1969 = vmatprep.subr.bf16.mxu0 %v2802_v59  ;;  %2051 = vmatprep.subr.bf16.mxu1 %v2805_v61 }
 0x195   :  { %1970 = vmatpush1.bf16.msra.mxu0 %v2800_v62  ;;  %2052 = vmatpush1.bf16.msra.mxu1 %v2803_v0 }
 0x196   :  { %1971 = vmatprep.subr.bf16.mxu0 %v2808_v1  ;;  %2053 = vmatprep.subr.bf16.mxu1 %v2811_v2 }
 0x199   :  { %1972 = vmatpush1.bf16.msra.mxu0 %v2806_v3  ;;  %2054 = vmatpush1.bf16.msra.mxu1 %v2809_v15 }
 0x19a   :  { %1973 = vmatprep.subr.bf16.mxu0 %v2814_v4  ;;  %2055 = vmatprep.subr.bf16.mxu1 %v2817_v5 }
 0x19d   :  { %1974 = vmatpush1.bf16.msra.mxu0 %v2812_v7  ;;  %2056 = vmatpush1.bf16.msra.mxu1 %v2815_v8 }
 0x1a0   :  { %1976 = vmatmul.mubr.bf16.vlgmr.msra.gmra.mrb[8].mxu0 %v1132_v6  ;;  %2058 = vmatmul.mubr.bf16.vlgmr.msra.gmra.mrb[8].mxu1 %v1132_v6 }
 0x273   :  { %v1977_v40 = vpop.f32.mrb[8].mxu0  ;;  %v2059_v41 = vpop.f32.mrb[8].mxu1 }
 0x274   :  { %v2088_v44 = vmul.f32 %v2071_v24, %v1977_v40  ;;  %v2090_v45 = vmul.f32 %v2079_v25, %v2059_v41  ;;  %v1979_v46 = vpop.f32.mrb[9].mxu0  ;;  %v2061_v22 = vpop.f32.mrb[9].mxu1 }
 0x275   :  { %v2089_v47 = vmul.f32 %v2075_v30, %v1979_v46  ;;  %v2091_v26 = vmul.f32 %v2083_v33, %v2061_v22  ;;  %v1981_v48 = vpop.f32.mrb[10].mxu0  ;;  %v2063_v31 = vpop.f32.mrb[10].mxu1 }
 0x276   :  { %v2114_v50 = vadd.f32 %v2097_v36, %v2088_v44  ;;  %v2116_v23 = vadd.f32 %v2105_v37, %v2090_v45  ;;  %v1982_v51 = vpop.f32.mrb[11].mxu0  ;;  %v2064_v27 = vpop.f32.mrb[11].mxu1 }
 0x277   :  { %v2115_v54 = vadd.f32 %v2101_v42, %v2089_v47  ;;  %v2117_v32 = vadd.f32 %v2109_v43, %v2091_v26 }
 0x278   :  { %v2118_v55 = vadd.f32 %v2114_v50, %v578_v49  ;;  %v2120_v63 = vadd.f32 %v2116_v23, %v580_v60 }
 0x279   :  { %v2119_v56 = vadd.f32 %v2115_v54, %v579_v52  ;;  %v2121_v57 = vadd.f32 %v2117_v32, %v581_v53 }
 0x27a   :  { %v2122_v58 = vmax.f32 %v2118_v55, 0.0  ;;  %v2124_v59 = vmax.f32 %v2120_v63, 0.0 }
 0x27b   :  { %v2123_v61 = vmax.f32 %v2119_v56, 0.0  ;;  %v2125_v62 = vmax.f32 %v2121_v57, 0.0 }
 0x27d   :  { %v2422_v0 = vpack.c.bf16 %v2123_v61, %v2122_v58  ;;  %v2423_v1 = vpack.c.bf16 %v2125_v62, %v2124_v59 }
 0x27f   :  { %v2142_v2 = vrot.slane %v2422_v0, %v2930_v21  ;;  %v2149_v3 = vrot.slane %v2423_v1, %v2930_v21 }
 0x281   :  { %v2150_v15 = vcombine.low %v2142_v2, %v2149_v3 }
 0x283   :  { %2424 = vst.sshfl [vmem:[%s3769_s11] sm:$0x55 pattern:$0x73625140] %v2150_v15 }

// kernel: rasternet_forward.19
= control target key start
LH: loop header
LB: loop body
LE: loop exit
PB: predicated region body
PF: predicated region fallthrough
CT: control target
= control target key end

     0   :  { %vm619_vm0 = vcmask 1040384   ;;  %vm616_vm1 = vcmask 7168   ;;  %vm1554_vm2 = vcmask 1041408   ;;  %vm1580_vm3 = vcmask 1024   ;;  %s3825_s1 = inlined_call_operand.vmem [shape: f32[513,1024], index: 1, kind: input, shape index: {}]   ;;  %s3826_s0 = inlined_call_operand.vmem [shape: f32[2,513], index: 0, kind: input, shape index: {}]   ;;  %s3827_s2 = inlined_call_operand.vmem [shape: f32[1,1024], index: 2, kind: input, shape index: {}]   ;;  %s3828_s3 = inlined_call_operand.vmem [shape: f32[1,1024], index: 3, kind: input, shape index: {}]   ;;  %s3829_s4 = inlined_call_operand.<no memory space> [shape: f32[1,1], index: 4, kind: input, shape index: {}]   ;;  %s3830_s5 = inlined_call_operand.vmem [shape: f32[2,1], index: 5, kind: output, shape index: {}]  }
   0x1   :  { %v25_v0 = vld [vmem:[%s3825_s1 + $0x8] sm:$0xff]  ;;  %v27_v2 = vld [vmem:[%s3825_s1 + $0x18] sm:$0xff]  ;;  %v24_v5 = vld [vmem:[%s3825_s1] sm:$0xff] }
   0x2   :  { %v33_v1 = vld [vmem:[%s3825_s1 + $0x48] sm:$0xff]  ;;  %v35_v4 = vld [vmem:[%s3825_s1 + $0x58] sm:$0xff]  ;;  %v32_v6 = vld [vmem:[%s3825_s1 + $0x40] sm:$0xff] }
   0x3   :  { %v1600_v3 = vpack.c.bf16 %v33_v1, %v25_v0  ;;  %v1728_v7 = vpack.c.bf16 %v35_v4, %v27_v2  ;;  %v1602_v8 = vpack.c.bf16 %v32_v6, %v24_v5  ;;  %v26_v9 = vld [vmem:[%s3825_s1 + $0x10] sm:$0xff]  ;;  %v41_v11 = vld [vmem:[%s3825_s1 + $0x88] sm:$0xff]  ;;  %v43_v14 = vld [vmem:[%s3825_s1 + $0x98] sm:$0xff] }
   0x4   :  { %v34_v10 = vld [vmem:[%s3825_s1 + $0x50] sm:$0xff]  ;;  %v49_v13 = vld [vmem:[%s3825_s1 + $0xc8] sm:$0xff]  ;;  %v51_v15 = vld [vmem:[%s3825_s1 + $0xd8] sm:$0xff] }
   0x5   :  { %1601 = vmatprep.subr.bf16.mxu0 %v1600_v3  ;;  %v1730_v12 = vpack.c.bf16 %v34_v10, %v26_v9  ;;  %1729 = vmatprep.subr.bf16.mxu1 %v1728_v7  ;;  %v1604_v16 = vpack.c.bf16 %v49_v13, %v41_v11  ;;  %v1732_v17 = vpack.c.bf16 %v51_v15, %v43_v14  ;;  %v40_v18 = vld [vmem:[%s3825_s1 + $0x80] sm:$0xff]  ;;  %v42_v20 = vld [vmem:[%s3825_s1 + $0x90] sm:$0xff]  ;;  %v57_v23 = vld [vmem:[%s3825_s1 + $0x108] sm:$0xff] }
   0x6   :  { %1603 = vmatpush1.bf16.msra.mxu0 %v1602_v8  ;;  %v48_v19 = vld [vmem:[%s3825_s1 + $0xc0] sm:$0xff]  ;;  %v50_v22 = vld [vmem:[%s3825_s1 + $0xd0] sm:$0xff]  ;;  %v65_v24 = vld [vmem:[%s3825_s1 + $0x148] sm:$0xff] }
   0x7   :  { %1731 = vmatpush1.bf16.msra.mxu1 %v1730_v12  ;;  %v1606_v21 = vpack.c.bf16 %v48_v19, %v40_v18  ;;  %1605 = vmatprep.subr.bf16.mxu0 %v1604_v16  ;;  %v1734_v25 = vpack.c.bf16 %v50_v22, %v42_v20  ;;  %v1608_v26 = vpack.c.bf16 %v65_v24, %v57_v23  ;;  %v59_v27 = vld [vmem:[%s3825_s1 + $0x118] sm:$0xff]  ;;  %v56_v29 = vld [vmem:[%s3825_s1 + $0x100] sm:$0xff]  ;;  %v58_v32 = vld [vmem:[%s3825_s1 + $0x110] sm:$0xff] }
   0x8   :  { %1733 = vmatprep.subr.bf16.mxu1 %v1732_v17  ;;  %v67_v28 = vld [vmem:[%s3825_s1 + $0x158] sm:$0xff]  ;;  %v64_v31 = vld [vmem:[%s3825_s1 + $0x140] sm:$0xff]  ;;  %v66_v33 = vld [vmem:[%s3825_s1 + $0x150] sm:$0xff] }
   0x9   :  { %v1736_v30 = vpack.c.bf16 %v67_v28, %v59_v27  ;;  %v1610_v34 = vpack.c.bf16 %v64_v31, %v56_v29  ;;  %v73_v35 = vld [vmem:[%s3825_s1 + $0x188] sm:$0xff]  ;;  %v75_v37 = vld [vmem:[%s3825_s1 + $0x198] sm:$0xff]  ;;  %v1738_v38 = vpack.c.bf16 %v66_v33, %v58_v32  ;;  %v72_v41 = vld [vmem:[%s3825_s1 + $0x180] sm:$0xff] }
   0xa   :  { %1607 = vmatpush1.bf16.msra.mxu0 %v1606_v21  ;;  %v81_v36 = vld [vmem:[%s3825_s1 + $0x1c8] sm:$0xff]  ;;  %v83_v40 = vld [vmem:[%s3825_s1 + $0x1d8] sm:$0xff]  ;;  %v80_v42 = vld [vmem:[%s3825_s1 + $0x1c0] sm:$0xff] }
   0xb   :  { %1735 = vmatpush1.bf16.msra.mxu1 %v1734_v25  ;;  %1609 = vmatprep.subr.bf16.mxu0 %v1608_v26  ;;  %v1612_v39 = vpack.c.bf16 %v81_v36, %v73_v35  ;;  %v1740_v43 = vpack.c.bf16 %v83_v40, %v75_v37  ;;  %v74_v44 = vld [vmem:[%s3825_s1 + $0x190] sm:$0xff]  ;;  %v89_v46 = vld [vmem:[%s3825_s1 + $0x208] sm:$0xff]  ;;  %v91_v48 = vld [vmem:[%s3825_s1 + $0x218] sm:$0xff]  ;;  %v1614_v50 = vpack.c.bf16 %v80_v42, %v72_v41 }
   0xc   :  { %1737 = vmatprep.subr.bf16.mxu1 %v1736_v30  ;;  %v82_v45 = vld [vmem:[%s3825_s1 + $0x1d0] sm:$0xff]  ;;  %v97_v47 = vld [vmem:[%s3825_s1 + $0x248] sm:$0xff]  ;;  %v99_v49 = vld [vmem:[%s3825_s1 + $0x258] sm:$0xff] }
   0xd   :  { %v1742_v51 = vpack.c.bf16 %v82_v45, %v74_v44  ;;  %v1616_v52 = vpack.c.bf16 %v97_v47, %v89_v46  ;;  %v88_v53 = vld [vmem:[%s3825_s1 + $0x200] sm:$0xff]  ;;  %v90_v55 = vld [vmem:[%s3825_s1 + $0x210] sm:$0xff]  ;;  %v1744_v56 = vpack.c.bf16 %v99_v49, %v91_v48  ;;  %v105_v58 = vld [vmem:[%s3825_s1 + $0x288] sm:$0xff]  ;;  %v546_v46 = vlaneseq }
   0xe   :  { %1611 = vmatpush1.bf16.msra.mxu0 %v1610_v34  ;;  %v96_v54 = vld [vmem:[%s3825_s1 + $0x240] sm:$0xff]  ;;  %v98_v57 = vld [vmem:[%s3825_s1 + $0x250] sm:$0xff]  ;;  %v113_v59 = vld [vmem:[%s3825_s1 + $0x2c8] sm:$0xff]  ;;  %v2140_v47 = vmov 1983009808  }
   0xf   :  { %1739 = vmatpush1.bf16.msra.mxu1 %v1738_v38  ;;  %1613 = vmatprep.subr.bf16.mxu0 %v1612_v39  ;;  %v107_v60 = vld [vmem:[%s3825_s1 + $0x298] sm:$0xff]  ;;  %v1618_v62 = vpack.c.bf16 %v96_v54, %v88_v53  ;;  %v1746_v63 = vpack.c.bf16 %v98_v57, %v90_v55  ;;  %v1620_v0 = vpack.c.bf16 %v113_v59, %v105_v58  ;;  %v104_v1 = vld [vmem:[%s3825_s1 + $0x280] sm:$0xff]  ;;  %v106_v3 = vld [vmem:[%s3825_s1 + $0x290] sm:$0xff]  ;;  %v590_v48 = vunpack.c.l.s4 %v2140_v47 }
  0x10   :  { %1741 = vmatprep.subr.bf16.mxu1 %v1740_v43  ;;  %v115_v61 = vld [vmem:[%s3825_s1 + $0x2d8] sm:$0xff]  ;;  %v112_v2 = vld [vmem:[%s3825_s1 + $0x2c0] sm:$0xff]  ;;  %v114_v5 = vld [vmem:[%s3825_s1 + $0x2d0] sm:$0xff] }
  0x11   :  { %v1748_v4 = vpack.c.bf16 %v115_v61, %v107_v60  ;;  %v121_v6 = vld [vmem:[%s3825_s1 + $0x308] sm:$0xff]  ;;  %v123_v8 = vld [vmem:[%s3825_s1 + $0x318] sm:$0xff]  ;;  %v1622_v10 = vpack.c.bf16 %v112_v2, %v104_v1  ;;  %v1750_v11 = vpack.c.bf16 %v114_v5, %v106_v3  ;;  %v120_v13 = vld [vmem:[%s3825_s1 + $0x300] sm:$0xff]  ;;  %v2424_v61 = vshrl.u32 %v546_v46, 7 }
  0x12   :  { %1615 = vmatpush1.bf16.msra.mxu0 %v1614_v50  ;;  %v129_v7 = vld [vmem:[%s3825_s1 + $0x348] sm:$0xff]  ;;  %v131_v9 = vld [vmem:[%s3825_s1 + $0x358] sm:$0xff]  ;;  %v128_v14 = vld [vmem:[%s3825_s1 + $0x340] sm:$0xff] }
  0x13   :  { %1743 = vmatpush1.bf16.msra.mxu1 %v1742_v51  ;;  %1617 = vmatprep.subr.bf16.mxu0 %v1616_v52  ;;  %v1624_v12 = vpack.c.bf16 %v129_v7, %v121_v6  ;;  %v122_v15 = vld [vmem:[%s3825_s1 + $0x310] sm:$0xff]  ;;  %v1752_v16 = vpack.c.bf16 %v131_v9, %v123_v8  ;;  %v137_v18 = vld [vmem:[%s3825_s1 + $0x388] sm:$0xff]  ;;  %v139_v20 = vld [vmem:[%s3825_s1 + $0x398] sm:$0xff]  ;;  %v1626_v22 = vpack.c.bf16 %v128_v14, %v120_v13 }
  0x14   :  { %1745 = vmatprep.subr.bf16.mxu1 %v1744_v56  ;;  %v130_v17 = vld [vmem:[%s3825_s1 + $0x350] sm:$0xff]  ;;  %v145_v19 = vld [vmem:[%s3825_s1 + $0x3c8] sm:$0xff]  ;;  %v147_v21 = vld [vmem:[%s3825_s1 + $0x3d8] sm:$0xff] }
  0x15   :  { %v1754_v23 = vpack.c.bf16 %v130_v17, %v122_v15  ;;  %v1628_v24 = vpack.c.bf16 %v145_v19, %v137_v18  ;;  %v136_v25 = vld [vmem:[%s3825_s1 + $0x380] sm:$0xff]  ;;  %v138_v27 = vld [vmem:[%s3825_s1 + $0x390] sm:$0xff]  ;;  %v1756_v28 = vpack.c.bf16 %v147_v21, %v139_v20  ;;  %v153_v30 = vld [vmem:[%s3825_s1 + $0x408] sm:$0xff] }
  0x16   :  { %1619 = vmatpush1.bf16.msra.mxu0 %v1618_v62  ;;  %v144_v26 = vld [vmem:[%s3825_s1 + $0x3c0] sm:$0xff]  ;;  %v146_v29 = vld [vmem:[%s3825_s1 + $0x3d0] sm:$0xff]  ;;  %v161_v31 = vld [vmem:[%s3825_s1 + $0x448] sm:$0xff]  ;;  %v591_v62 = vunpack.c.0.s8 %v590_v48 }
  0x17   :  { %1747 = vmatpush1.bf16.msra.mxu1 %v1746_v63  ;;  %1621 = vmatprep.subr.bf16.mxu0 %v1620_v0  ;;  %v155_v32 = vld [vmem:[%s3825_s1 + $0x418] sm:$0xff]  ;;  %v1630_v34 = vpack.c.bf16 %v144_v26, %v136_v25  ;;  %v1758_v35 = vpack.c.bf16 %v146_v29, %v138_v27  ;;  %v1632_v36 = vpack.c.bf16 %v161_v31, %v153_v30  ;;  %v152_v37 = vld [vmem:[%s3825_s1 + $0x400] sm:$0xff]  ;;  %v154_v39 = vld [vmem:[%s3825_s1 + $0x410] sm:$0xff] }
  0x18   :  { %1749 = vmatprep.subr.bf16.mxu1 %v1748_v4  ;;  %v163_v33 = vld [vmem:[%s3825_s1 + $0x458] sm:$0xff]  ;;  %v160_v38 = vld [vmem:[%s3825_s1 + $0x440] sm:$0xff]  ;;  %v162_v41 = vld [vmem:[%s3825_s1 + $0x450] sm:$0xff] }
  0x19   :  { %v1760_v40 = vpack.c.bf16 %v163_v33, %v155_v32  ;;  %v169_v42 = vld [vmem:[%s3825_s1 + $0x488] sm:$0xff]  ;;  %v171_v44 = vld [vmem:[%s3825_s1 + $0x498] sm:$0xff]  ;;  %v1634_v49 = vpack.c.bf16 %v160_v38, %v152_v37  ;;  %v1762_v50 = vpack.c.bf16 %v162_v41, %v154_v39  ;;  %v168_v52 = vld [vmem:[%s3825_s1 + $0x480] sm:$0xff] }
  0x1a   :  { %1623 = vmatpush1.bf16.msra.mxu0 %v1622_v10  ;;  %v177_v43 = vld [vmem:[%s3825_s1 + $0x4c8] sm:$0xff]  ;;  %v179_v45 = vld [vmem:[%s3825_s1 + $0x4d8] sm:$0xff]  ;;  %v176_v53 = vld [vmem:[%s3825_s1 + $0x4c0] sm:$0xff] }
  0x1b   :  { %1751 = vmatpush1.bf16.msra.mxu1 %v1750_v11  ;;  %1625 = vmatprep.subr.bf16.mxu0 %v1624_v12  ;;  %v1636_v51 = vpack.c.bf16 %v177_v43, %v169_v42  ;;  %v170_v54 = vld [vmem:[%s3825_s1 + $0x490] sm:$0xff]  ;;  %v1764_v55 = vpack.c.bf16 %v179_v45, %v171_v44  ;;  %v185_v57 = vld [vmem:[%s3825_s1 + $0x508] sm:$0xff]  ;;  %v187_v59 = vld [vmem:[%s3825_s1 + $0x518] sm:$0xff]  ;;  %v1638_v63 = vpack.c.bf16 %v176_v53, %v168_v52 }
  0x1c   :  { %1753 = vmatprep.subr.bf16.mxu1 %v1752_v16  ;;  %v178_v56 = vld [vmem:[%s3825_s1 + $0x4d0] sm:$0xff]  ;;  %v193_v58 = vld [vmem:[%s3825_s1 + $0x548] sm:$0xff]  ;;  %v195_v60 = vld [vmem:[%s3825_s1 + $0x558] sm:$0xff]  ;;  %v2451_v11 = vsub.s32 %v591_v62, %v2424_v61 }
  0x1d   :  { %v1766_v0 = vpack.c.bf16 %v178_v56, %v170_v54  ;;  %v1640_v1 = vpack.c.bf16 %v193_v58, %v185_v57  ;;  %v184_v2 = vld [vmem:[%s3825_s1 + $0x500] sm:$0xff]  ;;  %v186_v4 = vld [vmem:[%s3825_s1 + $0x510] sm:$0xff]  ;;  %v1768_v5 = vpack.c.bf16 %v195_v60, %v187_v59  ;;  %v201_v7 = vld [vmem:[%s3825_s1 + $0x588] sm:$0xff] }
  0x1e   :  { %1627 = vmatpush1.bf16.msra.mxu0 %v1626_v22  ;;  %v192_v3 = vld [vmem:[%s3825_s1 + $0x540] sm:$0xff]  ;;  %v194_v6 = vld [vmem:[%s3825_s1 + $0x550] sm:$0xff]  ;;  %v209_v8 = vld [vmem:[%s3825_s1 + $0x5c8] sm:$0xff] }
  0x1f   :  { %1755 = vmatpush1.bf16.msra.mxu1 %v1754_v23  ;;  %1629 = vmatprep.subr.bf16.mxu0 %v1628_v24  ;;  %v203_v9 = vld [vmem:[%s3825_s1 + $0x598] sm:$0xff]  ;;  %v1642_v12 = vpack.c.bf16 %v192_v3, %v184_v2  ;;  %v200_v13 = vld [vmem:[%s3825_s1 + $0x580] sm:$0xff]  ;;  %v1770_v14 = vpack.c.bf16 %v194_v6, %v186_v4  ;;  %v1644_v15 = vpack.c.bf16 %v209_v8, %v201_v7  ;;  %v202_v17 = vld [vmem:[%s3825_s1 + $0x590] sm:$0xff] }
  0x20   :  { %1757 = vmatprep.subr.bf16.mxu1 %v1756_v28  ;;  %v211_v10 = vld [vmem:[%s3825_s1 + $0x5d8] sm:$0xff]  ;;  %v208_v16 = vld [vmem:[%s3825_s1 + $0x5c0] sm:$0xff]  ;;  %v210_v18 = vld [vmem:[%s3825_s1 + $0x5d0] sm:$0xff] }
  0x21   :  { %v1772_v19 = vpack.c.bf16 %v211_v10, %v203_v9  ;;  %v217_v20 = vld [vmem:[%s3825_s1 + $0x608] sm:$0xff]  ;;  %v2474_v22 = vld [vmem:[%s3826_s0] sm:$0xff]  ;;  %v219_v23 = vld [vmem:[%s3825_s1 + $0x618] sm:$0xff]  ;;  %v1646_v26 = vpack.c.bf16 %v208_v16, %v200_v13  ;;  %v1774_v27 = vpack.c.bf16 %v210_v18, %v202_v17 }
  0x22   :  { %1631 = vmatpush1.bf16.msra.mxu0 %v1630_v34  ;;  %v225_v21 = vld [vmem:[%s3825_s1 + $0x648] sm:$0xff]  ;;  %v227_v24 = vld [vmem:[%s3825_s1 + $0x658] sm:$0xff]  ;;  %v2484_v25 = vrot.slane %v2474_v22, %v2451_v11  ;;  %v216_v29 = vld [vmem:[%s3825_s1 + $0x600] sm:$0xff]  ;;  %v588_v10 = vcombine.high %v2474_v22, %v2474_v22 }
  0x23   :  { %1759 = vmatpush1.bf16.msra.mxu1 %v1758_v35  ;;  %1633 = vmatprep.subr.bf16.mxu0 %v1632_v36  ;;  %v1648_v28 = vpack.c.bf16 %v225_v21, %v217_v20  ;;  %v224_v30 = vld [vmem:[%s3825_s1 + $0x640] sm:$0xff]  ;;  %v218_v31 = vld [vmem:[%s3825_s1 + $0x610] sm:$0xff]  ;;  %v1776_v33 = vpack.c.bf16 %v227_v24, %v219_v23  ;;  %v233_v35 = vld [vmem:[%s3825_s1 + $0x688] sm:$0xff] }
  0x24   :  { %1761 = vmatprep.subr.bf16.mxu1 %v1760_v40  ;;  %v2497_v32 = vcombine.high %v2484_v25, %v2484_v25  ;;  %v226_v34 = vld [vmem:[%s3825_s1 + $0x650] sm:$0xff]  ;;  %v241_v36 = vld [vmem:[%s3825_s1 + $0x6c8] sm:$0xff]  ;;  %v235_v37 = vld [vmem:[%s3825_s1 + $0x698] sm:$0xff]  ;;  %v1650_v39 = vpack.c.bf16 %v224_v30, %v216_v29  ;;  %v2609_v24 = vrot.slane %v588_v10, %v2451_v11 }
  0x25   :  { %v243_v38 = vld [vmem:[%s3825_s1 + $0x6d8] sm:$0xff]  ;;  %v1778_v40 = vpack.c.bf16 %v226_v34, %v218_v31  ;;  %v1652_v41 = vpack.c.bf16 %v241_v36, %v233_v35  ;;  %v232_v42 = vld [vmem:[%s3825_s1 + $0x680] sm:$0xff]  ;;  %v234_v44 = vld [vmem:[%s3825_s1 + $0x690] sm:$0xff] }
  0x26   :  { %1635 = vmatpush1.bf16.msra.mxu0 %v1634_v49  ;;  %708 = vmatprep.mubr.f32.mxu0 %v2497_v32  ;;  %v240_v43 = vld [vmem:[%s3825_s1 + $0x6c0] sm:$0xff]  ;;  %v1780_v45 = vpack.c.bf16 %v243_v38, %v235_v37  ;;  %v242_v46 = vld [vmem:[%s3825_s1 + $0x6d0] sm:$0xff]  ;;  %v249_v47 = vld [vmem:[%s3825_s1 + $0x708] sm:$0xff]  ;;  %v2637_v38 = vcombine.high %v2609_v24, %v2609_v24 }
  0x27   :  { %1763 = vmatpush1.bf16.msra.mxu1 %v1762_v50  ;;  %1637 = vmatprep.subr.bf16.mxu0 %v1636_v51  ;;  %v257_v48 = vld [vmem:[%s3825_s1 + $0x748] sm:$0xff]  ;;  %v251_v49 = vld [vmem:[%s3825_s1 + $0x718] sm:$0xff]  ;;  %v1654_v51 = vpack.c.bf16 %v240_v43, %v232_v42  ;;  %v1782_v52 = vpack.c.bf16 %v242_v46, %v234_v44  ;;  %v248_v54 = vld [vmem:[%s3825_s1 + $0x700] sm:$0xff] }
  0x28   :  { %1765 = vmatprep.subr.bf16.mxu1 %v1764_v55  ;;  %921 = vmatprep.mubr.f32.mxu1 %v2497_v32  ;;  %v259_v50 = vld [vmem:[%s3825_s1 + $0x758] sm:$0xff]  ;;  %v1656_v53 = vpack.c.bf16 %v257_v48, %v249_v47  ;;  %v256_v55 = vld [vmem:[%s3825_s1 + $0x740] sm:$0xff]  ;;  %v250_v56 = vld [vmem:[%s3825_s1 + $0x710] sm:$0xff] }
  0x29   :  { %v1784_v57 = vpack.c.bf16 %v259_v50, %v251_v49  ;;  %v258_v58 = vld [vmem:[%s3825_s1 + $0x750] sm:$0xff]  ;;  %v265_v59 = vld [vmem:[%s3825_s1 + $0x788] sm:$0xff]  ;;  %v267_v62 = vld [vmem:[%s3825_s1 + $0x798] sm:$0xff] }
  0x2a   :  { %1639 = vmatpush1.bf16.msra.mxu0 %v1638_v63  ;;  %v273_v60 = vld [vmem:[%s3825_s1 + $0x7c8] sm:$0xff]  ;;  %v275_v63 = vld [vmem:[%s3825_s1 + $0x7d8] sm:$0xff]  ;;  %v264_v3 = vld [vmem:[%s3825_s1 + $0x780] sm:$0xff] }
  0x2b   :  { %1767 = vmatpush1.bf16.msra.mxu1 %v1766_v0  ;;  %1641 = vmatprep.subr.bf16.mxu0 %v1640_v1  ;;  %v1658_v0 = vpack.c.bf16 %v256_v55, %v248_v54  ;;  %v1786_v1 = vpack.c.bf16 %v258_v58, %v250_v56  ;;  %v1660_v2 = vpack.c.bf16 %v273_v60, %v265_v59  ;;  %v272_v4 = vld [vmem:[%s3825_s1 + $0x7c0] sm:$0xff]  ;;  %v274_v7 = vld [vmem:[%s3825_s1 + $0x7d0] sm:$0xff]  ;;  %v281_v8 = vld [vmem:[%s3825_s1 + $0x808] sm:$0xff] }
  0x2c   :  { %1769 = vmatprep.subr.bf16.mxu1 %v1768_v5  ;;  %v266_v5 = vld [vmem:[%s3825_s1 + $0x790] sm:$0xff]  ;;  %v1788_v6 = vpack.c.bf16 %v275_v63, %v267_v62  ;;  %v289_v9 = vld [vmem:[%s3825_s1 + $0x848] sm:$0xff]  ;;  %v291_v13 = vld [vmem:[%s3825_s1 + $0x858] sm:$0xff] }
  0x2d   :  { %v1664_v16 = vpack.c.bf16 %v289_v9, %v281_v8  ;;  %v280_v17 = vld [vmem:[%s3825_s1 + $0x800] sm:$0xff]  ;;  %v290_v21 = vld [vmem:[%s3825_s1 + $0x850] sm:$0xff]  ;;  %v297_v22 = vld [vmem:[%s3825_s1 + $0x888] sm:$0xff] }
  0x2e   :  { %1643 = vmatpush1.bf16.msra.mxu0 %v1642_v12  ;;  %v283_v12 = vld [vmem:[%s3825_s1 + $0x818] sm:$0xff]  ;;  %v288_v18 = vld [vmem:[%s3825_s1 + $0x840] sm:$0xff]  ;;  %v305_v23 = vld [vmem:[%s3825_s1 + $0x8c8] sm:$0xff] }
  0x2f   :  { %1771 = vmatpush1.bf16.msra.mxu1 %v1770_v14  ;;  %1645 = vmatprep.subr.bf16.mxu0 %v1644_v15  ;;  %v1662_v14 = vpack.c.bf16 %v272_v4, %v264_v3  ;;  %v1790_v15 = vpack.c.bf16 %v274_v7, %v266_v5  ;;  %v1792_v20 = vpack.c.bf16 %v291_v13, %v283_v12  ;;  %v296_v31 = vld [vmem:[%s3825_s1 + $0x880] sm:$0xff]  ;;  %v306_v35 = vld [vmem:[%s3825_s1 + $0x8d0] sm:$0xff]  ;;  %v313_v36 = vld [vmem:[%s3825_s1 + $0x908] sm:$0xff] }
  0x30   :  { %1773 = vmatprep.subr.bf16.mxu1 %v1772_v19  ;;  %v282_v19 = vld [vmem:[%s3825_s1 + $0x810] sm:$0xff]  ;;  %v1668_v30 = vpack.c.bf16 %v305_v23, %v297_v22  ;;  %v304_v11 = vld [vmem:[%s3825_s1 + $0x8c0] sm:$0xff]  ;;  %v321_v37 = vld [vmem:[%s3825_s1 + $0x948] sm:$0xff] }
  0x31   :  { %v1794_v29 = vpack.c.bf16 %v290_v21, %v282_v19  ;;  %v1672_v43 = vpack.c.bf16 %v321_v37, %v313_v36  ;;  %v312_v44 = vld [vmem:[%s3825_s1 + $0x900] sm:$0xff]  ;;  %v314_v46 = vld [vmem:[%s3825_s1 + $0x910] sm:$0xff]  ;;  %v329_v49 = vld [vmem:[%s3825_s1 + $0x988] sm:$0xff] }
  0x32   :  { %1647 = vmatpush1.bf16.msra.mxu0 %v1646_v26  ;;  %v299_v26 = vld [vmem:[%s3825_s1 + $0x898] sm:$0xff]  ;;  %v322_v48 = vld [vmem:[%s3825_s1 + $0x950] sm:$0xff]  ;;  %v337_v50 = vld [vmem:[%s3825_s1 + $0x9c8] sm:$0xff] }
  0x33   :  { %1775 = vmatpush1.bf16.msra.mxu1 %v1774_v27  ;;  %1649 = vmatprep.subr.bf16.mxu0 %v1648_v28  ;;  %v307_v27 = vld [vmem:[%s3825_s1 + $0x8d8] sm:$0xff]  ;;  %v1666_v28 = vpack.c.bf16 %v288_v18, %v280_v17  ;;  %v1802_v54 = vpack.c.bf16 %v322_v48, %v314_v46  ;;  %v1676_v55 = vpack.c.bf16 %v337_v50, %v329_v49  ;;  %v328_v56 = vld [vmem:[%s3825_s1 + $0x980] sm:$0xff]  ;;  %v330_v58 = vld [vmem:[%s3825_s1 + $0x990] sm:$0xff] }
  0x34   :  { %1777 = vmatprep.subr.bf16.mxu1 %v1776_v33  ;;  %v298_v33 = vld [vmem:[%s3825_s1 + $0x890] sm:$0xff]  ;;  %v1796_v34 = vpack.c.bf16 %v307_v27, %v299_v26  ;;  %v345_v62 = vld [vmem:[%s3825_s1 + $0xa08] sm:$0xff]  ;;  %v344_v5 = vld [vmem:[%s3825_s1 + $0xa00] sm:$0xff] }
  0x35   :  { %v1798_v42 = vpack.c.bf16 %v306_v35, %v298_v33  ;;  %v338_v60 = vld [vmem:[%s3825_s1 + $0x9d0] sm:$0xff]  ;;  %v353_v63 = vld [vmem:[%s3825_s1 + $0xa48] sm:$0xff]  ;;  %v363_v13 = vld [vmem:[%s3825_s1 + $0xa98] sm:$0xff] }
  0x36   :  { %1651 = vmatpush1.bf16.msra.mxu0 %v1650_v39  ;;  %v315_v39 = vld [vmem:[%s3825_s1 + $0x918] sm:$0xff]  ;;  %v1806_v3 = vpack.c.bf16 %v338_v60, %v330_v58  ;;  %v1680_v4 = vpack.c.bf16 %v353_v63, %v345_v62  ;;  %v346_v7 = vld [vmem:[%s3825_s1 + $0xa10] sm:$0xff]  ;;  %v361_v10 = vld [vmem:[%s3825_s1 + $0xa88] sm:$0xff] }
  0x37   :  { %1779 = vmatpush1.bf16.msra.mxu1 %v1778_v40  ;;  %1653 = vmatprep.subr.bf16.mxu0 %v1652_v41  ;;  %v323_v40 = vld [vmem:[%s3825_s1 + $0x958] sm:$0xff]  ;;  %v1670_v41 = vpack.c.bf16 %v304_v11, %v296_v31  ;;  %v354_v9 = vld [vmem:[%s3825_s1 + $0xa50] sm:$0xff]  ;;  %v369_v12 = vld [vmem:[%s3825_s1 + $0xac8] sm:$0xff] }
  0x38   :  { %1781 = vmatprep.subr.bf16.mxu1 %v1780_v45  ;;  %v320_v45 = vld [vmem:[%s3825_s1 + $0x940] sm:$0xff]  ;;  %v1800_v47 = vpack.c.bf16 %v323_v40, %v315_v39  ;;  %v1684_v17 = vpack.c.bf16 %v369_v12, %v361_v10  ;;  %v370_v22 = vld [vmem:[%s3825_s1 + $0xad0] sm:$0xff]  ;;  %v377_v23 = vld [vmem:[%s3825_s1 + $0xb08] sm:$0xff] }
  0x39   :  { %v360_v18 = vld [vmem:[%s3825_s1 + $0xa80] sm:$0xff]  ;;  %v385_v26 = vld [vmem:[%s3825_s1 + $0xb48] sm:$0xff]  ;;  %v379_v27 = vld [vmem:[%s3825_s1 + $0xb18] sm:$0xff] }
  0x3a   :  { %1655 = vmatpush1.bf16.msra.mxu0 %v1654_v51  ;;  %v331_v51 = vld [vmem:[%s3825_s1 + $0x998] sm:$0xff]  ;;  %v368_v19 = vld [vmem:[%s3825_s1 + $0xac0] sm:$0xff]  ;;  %v1688_v31 = vpack.c.bf16 %v385_v26, %v377_v23  ;;  %v386_v36 = vld [vmem:[%s3825_s1 + $0xb50] sm:$0xff] }
  0x3b   :  { %1783 = vmatpush1.bf16.msra.mxu1 %v1782_v52  ;;  %1657 = vmatprep.subr.bf16.mxu0 %v1656_v53  ;;  %v339_v52 = vld [vmem:[%s3825_s1 + $0x9d8] sm:$0xff]  ;;  %v1674_v53 = vpack.c.bf16 %v320_v45, %v312_v44  ;;  %v376_v11 = vld [vmem:[%s3825_s1 + $0xb00] sm:$0xff]  ;;  %v393_v37 = vld [vmem:[%s3825_s1 + $0xb88] sm:$0xff] }
  0x3c   :  { %1785 = vmatprep.subr.bf16.mxu1 %v1784_v57  ;;  %v336_v57 = vld [vmem:[%s3825_s1 + $0x9c0] sm:$0xff]  ;;  %v1804_v59 = vpack.c.bf16 %v339_v52, %v331_v51  ;;  %v401_v39 = vld [vmem:[%s3825_s1 + $0xbc8] sm:$0xff]  ;;  %v395_v40 = vld [vmem:[%s3825_s1 + $0xb98] sm:$0xff] }
  0x3d   :  { %v384_v33 = vld [vmem:[%s3825_s1 + $0xb40] sm:$0xff]  ;;  %v1692_v44 = vpack.c.bf16 %v401_v39, %v393_v37  ;;  %v402_v49 = vld [vmem:[%s3825_s1 + $0xbd0] sm:$0xff]  ;;  %v409_v50 = vld [vmem:[%s3825_s1 + $0xc08] sm:$0xff] }
  0x3e   :  { %1659 = vmatpush1.bf16.msra.mxu0 %v1658_v0  ;;  %v347_v0 = vld [vmem:[%s3825_s1 + $0xa18] sm:$0xff]  ;;  %v392_v45 = vld [vmem:[%s3825_s1 + $0xb80] sm:$0xff]  ;;  %v417_v51 = vld [vmem:[%s3825_s1 + $0xc48] sm:$0xff] }
  0x3f   :  { %1787 = vmatpush1.bf16.msra.mxu1 %v1786_v1  ;;  %1661 = vmatprep.subr.bf16.mxu0 %v1660_v2  ;;  %v355_v1 = vld [vmem:[%s3825_s1 + $0xa58] sm:$0xff]  ;;  %v1678_v2 = vpack.c.bf16 %v336_v57, %v328_v56  ;;  %v400_v46 = vld [vmem:[%s3825_s1 + $0xbc0] sm:$0xff]  ;;  %v1696_v56 = vpack.c.bf16 %v417_v51, %v409_v50  ;;  %v418_v62 = vld [vmem:[%s3825_s1 + $0xc50] sm:$0xff] }
  0x40   :  { %1789 = vmatprep.subr.bf16.mxu1 %v1788_v6  ;;  %v352_v6 = vld [vmem:[%s3825_s1 + $0xa40] sm:$0xff]  ;;  %v1808_v8 = vpack.c.bf16 %v355_v1, %v347_v0  ;;  %v411_v52 = vld [vmem:[%s3825_s1 + $0xc18] sm:$0xff]  ;;  %v425_v63 = vld [vmem:[%s3825_s1 + $0xc88] sm:$0xff] }
  0x41   :  { %v408_v57 = vld [vmem:[%s3825_s1 + $0xc00] sm:$0xff]  ;;  %v433_v0 = vld [vmem:[%s3825_s1 + $0xcc8] sm:$0xff]  ;;  %v427_v1 = vld [vmem:[%s3825_s1 + $0xc98] sm:$0xff] }
  0x42   :  { %1663 = vmatpush1.bf16.msra.mxu0 %v1662_v14  ;;  %v371_v14 = vld [vmem:[%s3825_s1 + $0xad8] sm:$0xff]  ;;  %v416_v58 = vld [vmem:[%s3825_s1 + $0xc40] sm:$0xff]  ;;  %v434_v10 = vld [vmem:[%s3825_s1 + $0xcd0] sm:$0xff] }
  0x43   :  { %1791 = vmatpush1.bf16.msra.mxu1 %v1790_v15  ;;  %1665 = vmatprep.subr.bf16.mxu0 %v1664_v16  ;;  %v1682_v15 = vpack.c.bf16 %v352_v6, %v344_v5  ;;  %v1810_v16 = vpack.c.bf16 %v354_v9, %v346_v7  ;;  %v1812_v21 = vpack.c.bf16 %v371_v14, %v363_v13  ;;  %v424_v6 = vld [vmem:[%s3825_s1 + $0xc80] sm:$0xff]  ;;  %v441_v12 = vld [vmem:[%s3825_s1 + $0xd08] sm:$0xff]  ;;  %v443_v14 = vld [vmem:[%s3825_s1 + $0xd18] sm:$0xff] }
  0x44   :  { %1793 = vmatprep.subr.bf16.mxu1 %v1792_v20  ;;  %v362_v20 = vld [vmem:[%s3825_s1 + $0xa90] sm:$0xff]  ;;  %v1700_v5 = vpack.c.bf16 %v433_v0, %v425_v63  ;;  %v432_v7 = vld [vmem:[%s3825_s1 + $0xcc0] sm:$0xff]  ;;  %v449_v13 = vld [vmem:[%s3825_s1 + $0xd48] sm:$0xff] }
  0x45   :  { %709 = vmatmul.mubr.f32.vlgmr.msra.gmra.mrb[0].mxu0 %v2484_v25  ;;  %v450_v23 = vld [vmem:[%s3825_s1 + $0xd50] sm:$0xff]  ;;  %v457_v26 = vld [vmem:[%s3825_s1 + $0xd88] sm:$0xff] }
  0x46   :  { %1667 = vmatpush1.bf16.msra.mxu0 %v1666_v28  ;;  %922 = vmatmul.mubr.f32.vlgmr.msra.gmra.mrb[0].mxu1 %v2484_v25  ;;  %v387_v28 = vld [vmem:[%s3825_s1 + $0xb58] sm:$0xff]  ;;  %v466_v37 = vld [vmem:[%s3825_s1 + $0xdd0] sm:$0xff]  ;;  %v473_v39 = vld [vmem:[%s3825_s1 + $0xe08] sm:$0xff] }
  0x47   :  { %1795 = vmatpush1.bf16.msra.mxu1 %v1794_v29  ;;  %1669 = vmatprep.subr.bf16.mxu0 %v1668_v30  ;;  %v1686_v29 = vpack.c.bf16 %v368_v19, %v360_v18  ;;  %v1814_v30 = vpack.c.bf16 %v370_v22, %v362_v20  ;;  %v1816_v35 = vpack.c.bf16 %v387_v28, %v379_v27  ;;  %v440_v19 = vld [vmem:[%s3825_s1 + $0xd00] sm:$0xff]  ;;  %v465_v27 = vld [vmem:[%s3825_s1 + $0xdc8] sm:$0xff]  ;;  %v459_v28 = vld [vmem:[%s3825_s1 + $0xd98] sm:$0xff] }
  0x48   :  { %1797 = vmatprep.subr.bf16.mxu1 %v1796_v34  ;;  %779 = vmatprep.mubr.f32.mxu0 %v2637_v38  ;;  %v378_v34 = vld [vmem:[%s3825_s1 + $0xb10] sm:$0xff]  ;;  %v1704_v18 = vpack.c.bf16 %v449_v13, %v441_v12  ;;  %v448_v20 = vld [vmem:[%s3825_s1 + $0xd40] sm:$0xff]  ;;  %v489_v51 = vld [vmem:[%s3825_s1 + $0xe88] sm:$0xff] }
  0x49   :  { %992 = vmatprep.mubr.f32.mxu1 %v2637_v38  ;;  %v482_v50 = vld [vmem:[%s3825_s1 + $0xe50] sm:$0xff]  ;;  %v505_v0 = vld [vmem:[%s3825_s1 + $0xf08] sm:$0xff] }
  0x4a   :  { %1671 = vmatpush1.bf16.msra.mxu0 %v1670_v41  ;;  %v403_v41 = vld [vmem:[%s3825_s1 + $0xbd8] sm:$0xff]  ;;  %v498_v63 = vld [vmem:[%s3825_s1 + $0xed0] sm:$0xff]  ;;  %v521_v13 = vld [vmem:[%s3825_s1 + $0xf88] sm:$0xff] }
  0x4b   :  { %1799 = vmatpush1.bf16.msra.mxu1 %v1798_v42  ;;  %1673 = vmatprep.subr.bf16.mxu0 %v1672_v43  ;;  %v1690_v42 = vpack.c.bf16 %v384_v33, %v376_v11  ;;  %v1818_v43 = vpack.c.bf16 %v386_v36, %v378_v34  ;;  %v1820_v48 = vpack.c.bf16 %v403_v41, %v395_v40  ;;  %v456_v33 = vld [vmem:[%s3825_s1 + $0xd80] sm:$0xff]  ;;  %v481_v40 = vld [vmem:[%s3825_s1 + $0xe48] sm:$0xff]  ;;  %v475_v41 = vld [vmem:[%s3825_s1 + $0xe18] sm:$0xff] }
  0x4c   :  { %1801 = vmatprep.subr.bf16.mxu1 %v1800_v47  ;;  %v394_v47 = vld [vmem:[%s3825_s1 + $0xb90] sm:$0xff]  ;;  %v1708_v11 = vpack.c.bf16 %v465_v27, %v457_v26  ;;  %v464_v34 = vld [vmem:[%s3825_s1 + $0xdc0] sm:$0xff] }
  0x4d   :  { %v514_v12 = vld [vmem:[%s3825_s1 + $0xf50] sm:$0xff] }
  0x4e   :  { %1675 = vmatpush1.bf16.msra.mxu0 %v1674_v53  ;;  %v419_v53 = vld [vmem:[%s3825_s1 + $0xc58] sm:$0xff]  ;;  %v530_v26 = vld [vmem:[%s3825_s1 + $0xfd0] sm:$0xff] }
  0x4f   :  { %1803 = vmatpush1.bf16.msra.mxu1 %v1802_v54  ;;  %1677 = vmatprep.subr.bf16.mxu0 %v1676_v55  ;;  %v1694_v54 = vpack.c.bf16 %v400_v46, %v392_v45  ;;  %v1822_v55 = vpack.c.bf16 %v402_v49, %v394_v47  ;;  %v1824_v60 = vpack.c.bf16 %v419_v53, %v411_v52  ;;  %v472_v46 = vld [vmem:[%s3825_s1 + $0xe00] sm:$0xff]  ;;  %v497_v52 = vld [vmem:[%s3825_s1 + $0xec8] sm:$0xff]  ;;  %v491_v53 = vld [vmem:[%s3825_s1 + $0xe98] sm:$0xff] }
  0x50   :  { %1805 = vmatprep.subr.bf16.mxu1 %v1804_v59  ;;  %v410_v59 = vld [vmem:[%s3825_s1 + $0xc10] sm:$0xff]  ;;  %v1712_v45 = vpack.c.bf16 %v481_v40, %v473_v39  ;;  %v480_v47 = vld [vmem:[%s3825_s1 + $0xe40] sm:$0xff]  ;;  %v2141_v40 = vmov 0.0  }
  0x52   :  { %1679 = vmatpush1.bf16.msra.mxu0 %v1678_v2  ;;  %v435_v2 = vld [vmem:[%s3825_s1 + $0xcd8] sm:$0xff] }
  0x53   :  { %1807 = vmatpush1.bf16.msra.mxu1 %v1806_v3  ;;  %1681 = vmatprep.subr.bf16.mxu0 %v1680_v4  ;;  %v1698_v3 = vpack.c.bf16 %v416_v58, %v408_v57  ;;  %v1826_v4 = vpack.c.bf16 %v418_v62, %v410_v59  ;;  %v1828_v9 = vpack.c.bf16 %v435_v2, %v427_v1  ;;  %v488_v58 = vld [vmem:[%s3825_s1 + $0xe80] sm:$0xff]  ;;  %v513_v1 = vld [vmem:[%s3825_s1 + $0xf48] sm:$0xff]  ;;  %v507_v2 = vld [vmem:[%s3825_s1 + $0xf18] sm:$0xff] }
  0x54   :  { %1809 = vmatprep.subr.bf16.mxu1 %v1808_v8  ;;  %v426_v8 = vld [vmem:[%s3825_s1 + $0xc90] sm:$0xff]  ;;  %v1716_v57 = vpack.c.bf16 %v497_v52, %v489_v51  ;;  %v496_v59 = vld [vmem:[%s3825_s1 + $0xec0] sm:$0xff] }
  0x56   :  { %1683 = vmatpush1.bf16.msra.mxu0 %v1682_v15  ;;  %v451_v15 = vld [vmem:[%s3825_s1 + $0xd58] sm:$0xff] }
  0x57   :  { %1811 = vmatpush1.bf16.msra.mxu1 %v1810_v16  ;;  %1685 = vmatprep.subr.bf16.mxu0 %v1684_v17  ;;  %v1702_v16 = vpack.c.bf16 %v432_v7, %v424_v6  ;;  %v1830_v17 = vpack.c.bf16 %v434_v10, %v426_v8  ;;  %v1832_v22 = vpack.c.bf16 %v451_v15, %v443_v14  ;;  %v504_v7 = vld [vmem:[%s3825_s1 + $0xf00] sm:$0xff]  ;;  %v529_v14 = vld [vmem:[%s3825_s1 + $0xfc8] sm:$0xff]  ;;  %v523_v15 = vld [vmem:[%s3825_s1 + $0xf98] sm:$0xff] }
  0x58   :  { %1813 = vmatprep.subr.bf16.mxu1 %v1812_v21  ;;  %v442_v21 = vld [vmem:[%s3825_s1 + $0xd10] sm:$0xff]  ;;  %v1720_v6 = vpack.c.bf16 %v513_v1, %v505_v0  ;;  %v512_v8 = vld [vmem:[%s3825_s1 + $0xf40] sm:$0xff] }
  0x5a   :  { %1687 = vmatpush1.bf16.msra.mxu0 %v1686_v29  ;;  %v467_v29 = vld [vmem:[%s3825_s1 + $0xdd8] sm:$0xff] }
  0x5b   :  { %1815 = vmatpush1.bf16.msra.mxu1 %v1814_v30  ;;  %1689 = vmatprep.subr.bf16.mxu0 %v1688_v31  ;;  %v1706_v30 = vpack.c.bf16 %v448_v20, %v440_v19  ;;  %v1834_v31 = vpack.c.bf16 %v450_v23, %v442_v21  ;;  %v1836_v36 = vpack.c.bf16 %v467_v29, %v459_v28  ;;  %v520_v20 = vld [vmem:[%s3825_s1 + $0xf80] sm:$0xff]  ;;  %v522_v23 = vld [vmem:[%s3825_s1 + $0xf90] sm:$0xff]  ;;  %v537_v29 = vld [vmem:[%s3825_s1 + $0x1008] sm:$0x1] }
  0x5c   :  { %1817 = vmatprep.subr.bf16.mxu1 %v1816_v35  ;;  %v458_v35 = vld [vmem:[%s3825_s1 + $0xd90] sm:$0xff]  ;;  %v1724_v19 = vpack.c.bf16 %v529_v14, %v521_v13  ;;  %v528_v21 = vld [vmem:[%s3825_s1 + $0xfc0] sm:$0xff]  ;;  %v1854_v28 = vpack.c.bf16 %v530_v26, %v522_v23 }
  0x5d   :  { %v1726_v27 = vpack.c.bf16 %v528_v21, %v520_v20  ;;  %v101_v20 = vld [vmem:[%s3825_s1 + $0x268] sm:$0xff]  ;;  %v95_v21 = vld [vmem:[%s3825_s1 + $0x238] sm:$0xff] }
  0x5e   :  { %1691 = vmatpush1.bf16.msra.mxu0 %v1690_v42  ;;  %v483_v42 = vld [vmem:[%s3825_s1 + $0xe58] sm:$0xff] }
  0x5f   :  { %1819 = vmatpush1.bf16.msra.mxu1 %v1818_v43  ;;  %1693 = vmatprep.subr.bf16.mxu0 %v1692_v44  ;;  %v1710_v43 = vpack.c.bf16 %v464_v34, %v456_v33  ;;  %v1838_v44 = vpack.c.bf16 %v466_v37, %v458_v35  ;;  %v1840_v49 = vpack.c.bf16 %v483_v42, %v475_v41  ;;  %v31_v33 = vld [vmem:[%s3825_s1 + $0x38] sm:$0xff]  ;;  %v536_v35 = vld [vmem:[%s3825_s1 + $0x1000] sm:$0x1] }
  0x60   :  { %1821 = vmatprep.subr.bf16.mxu1 %v1820_v48  ;;  %v474_v48 = vld [vmem:[%s3825_s1 + $0xe10] sm:$0xff]  ;;  %v39_v34 = vld [vmem:[%s3825_s1 + $0x78] sm:$0xff]  ;;  %v28_v41 = vld [vmem:[%s3825_s1 + $0x20] sm:$0xff] }
  0x61   :  { %v1984_v39 = vpack.c.bf16 %v39_v34, %v31_v33  ;;  %v36_v42 = vld [vmem:[%s3825_s1 + $0x60] sm:$0xff]  ;;  %v109_v33 = vld [vmem:[%s3825_s1 + $0x2a8] sm:$0xff] }
  0x62   :  { %1695 = vmatpush1.bf16.msra.mxu0 %v1694_v54  ;;  %v499_v54 = vld [vmem:[%s3825_s1 + $0xed8] sm:$0xff]  ;;  %v117_v34 = vld [vmem:[%s3825_s1 + $0x2e8] sm:$0xff] }
  0x63   :  { %1823 = vmatpush1.bf16.msra.mxu1 %v1822_v55  ;;  %1697 = vmatprep.subr.bf16.mxu0 %v1696_v56  ;;  %v1714_v55 = vpack.c.bf16 %v480_v47, %v472_v46  ;;  %v1842_v56 = vpack.c.bf16 %v482_v50, %v474_v48  ;;  %v1844_v62 = vpack.c.bf16 %v499_v54, %v491_v53  ;;  %v53_v46 = vld [vmem:[%s3825_s1 + $0xe8] sm:$0xff]  ;;  %v47_v47 = vld [vmem:[%s3825_s1 + $0xb8] sm:$0xff]  ;;  %v44_v53 = vld [vmem:[%s3825_s1 + $0xa0] sm:$0xff] }
  0x64   :  { %1825 = vmatprep.subr.bf16.mxu1 %v1824_v60  ;;  %v490_v60 = vld [vmem:[%s3825_s1 + $0xe90] sm:$0xff]  ;;  %v55_v48 = vld [vmem:[%s3825_s1 + $0xf8] sm:$0xff]  ;;  %v1858_v50 = vpack.c.bf16 %v36_v42, %v28_v41  ;;  %v52_v54 = vld [vmem:[%s3825_s1 + $0xe0] sm:$0xff]  ;;  %v1876_v41 = vpack.c.bf16 %v117_v34, %v109_v33 }
  0x65   :  { %v108_v42 = vld [vmem:[%s3825_s1 + $0x2a0] sm:$0xff]  ;;  %v182_v33 = vld [vmem:[%s3825_s1 + $0x4f0] sm:$0xff]  ;;  %v189_v34 = vld [vmem:[%s3825_s1 + $0x528] sm:$0xff] }
  0x66   :  { %1699 = vmatpush1.bf16.msra.mxu0 %v1698_v3  ;;  %v515_v3 = vld [vmem:[%s3825_s1 + $0xf58] sm:$0xff] }
  0x67   :  { %1827 = vmatpush1.bf16.msra.mxu1 %v1826_v4  ;;  %1701 = vmatprep.subr.bf16.mxu0 %v1700_v5  ;;  %v1718_v4 = vpack.c.bf16 %v496_v59, %v488_v58  ;;  %v1846_v5 = vpack.c.bf16 %v498_v63, %v490_v60  ;;  %v1848_v10 = vpack.c.bf16 %v515_v3, %v507_v2  ;;  %v61_v58 = vld [vmem:[%s3825_s1 + $0x128] sm:$0xff]  ;;  %v63_v60 = vld [vmem:[%s3825_s1 + $0x138] sm:$0xff]  ;;  %v60_v2 = vld [vmem:[%s3825_s1 + $0x120] sm:$0xff] }
  0x68   :  { %1829 = vmatprep.subr.bf16.mxu1 %v1828_v9  ;;  %v506_v9 = vld [vmem:[%s3825_s1 + $0xf10] sm:$0xff]  ;;  %v69_v59 = vld [vmem:[%s3825_s1 + $0x168] sm:$0xff]  ;;  %v1862_v63 = vpack.c.bf16 %v52_v54, %v44_v53  ;;  %v68_v3 = vld [vmem:[%s3825_s1 + $0x160] sm:$0xff] }
  0x69   :  { %v1864_v1 = vpack.c.bf16 %v69_v59, %v61_v58  ;;  %v124_v54 = vld [vmem:[%s3825_s1 + $0x320] sm:$0xff]  ;;  %v134_v58 = vld [vmem:[%s3825_s1 + $0x370] sm:$0xff]  ;;  %v141_v59 = vld [vmem:[%s3825_s1 + $0x3a8] sm:$0xff] }
  0x6a   :  { %1703 = vmatpush1.bf16.msra.mxu0 %v1702_v16  ;;  %v531_v16 = vld [vmem:[%s3825_s1 + $0xfd8] sm:$0xff] }
  0x6b   :  { %1831 = vmatpush1.bf16.msra.mxu1 %v1830_v17  ;;  %1705 = vmatprep.subr.bf16.mxu0 %v1704_v18  ;;  %v1722_v17 = vpack.c.bf16 %v512_v8, %v504_v7  ;;  %v1850_v18 = vpack.c.bf16 %v514_v12, %v506_v9  ;;  %v77_v7 = vld [vmem:[%s3825_s1 + $0x1a8] sm:$0xff]  ;;  %v79_v9 = vld [vmem:[%s3825_s1 + $0x1b8] sm:$0xff]  ;;  %v1866_v12 = vpack.c.bf16 %v68_v3, %v60_v2  ;;  %v140_v3 = vld [vmem:[%s3825_s1 + $0x3a0] sm:$0xff] }
  0x6c   :  { %1833 = vmatprep.subr.bf16.mxu1 %v1832_v22  ;;  %v1852_v22 = vpack.c.bf16 %v531_v16, %v523_v15  ;;  %v85_v8 = vld [vmem:[%s3825_s1 + $0x1e8] sm:$0xff]  ;;  %v76_v15 = vld [vmem:[%s3825_s1 + $0x1a0] sm:$0xff] }
  0x6d   :  { %v1868_v14 = vpack.c.bf16 %v85_v8, %v77_v7  ;;  %v84_v16 = vld [vmem:[%s3825_s1 + $0x1e0] sm:$0xff]  ;;  %v150_v7 = vld [vmem:[%s3825_s1 + $0x3f0] sm:$0xff]  ;;  %v157_v8 = vld [vmem:[%s3825_s1 + $0x428] sm:$0xff] }
  0x6e   :  { %1707 = vmatpush1.bf16.msra.mxu0 %v1706_v30  ;;  %v539_v30 = vld [vmem:[%s3825_s1 + $0x1018] sm:$0x1]  ;;  %v1870_v23 = vpack.c.bf16 %v84_v16, %v76_v15  ;;  %v156_v16 = vld [vmem:[%s3825_s1 + $0x420] sm:$0xff] }
  0x6f   :  { %1835 = vmatpush1.bf16.msra.mxu1 %v1834_v31  ;;  %1709 = vmatprep.subr.bf16.mxu0 %v1708_v11  ;;  %v29_v31 = vld [vmem:[%s3825_s1 + $0x28] sm:$0xff] }
  0x70   :  { %1837 = vmatprep.subr.bf16.mxu1 %v1836_v36  ;;  %v37_v11 = vld [vmem:[%s3825_s1 + $0x68] sm:$0xff]  ;;  %v538_v36 = vld [vmem:[%s3825_s1 + $0x1010] sm:$0x1] }
  0x71   :  { %v1856_v37 = vpack.c.bf16 %v37_v11, %v29_v31  ;;  %v102_v11 = vld [vmem:[%s3825_s1 + $0x270] sm:$0xff] }
  0x72   :  { %1711 = vmatpush1.bf16.msra.mxu0 %v1710_v43  ;;  %v30_v43 = vld [vmem:[%s3825_s1 + $0x30] sm:$0xff] }
  0x73   :  { %1839 = vmatpush1.bf16.msra.mxu1 %v1838_v44  ;;  %1713 = vmatprep.subr.bf16.mxu0 %v1712_v45  ;;  %v38_v44 = vld [vmem:[%s3825_s1 + $0x70] sm:$0xff]  ;;  %v45_v45 = vld [vmem:[%s3825_s1 + $0xa8] sm:$0xff] }
  0x74   :  { %1841 = vmatprep.subr.bf16.mxu1 %v1840_v49  ;;  %v1586_v49 = vld.sshfl [vmem:[%s3826_s0 + $0x8] sm:$0x3 pattern:$0x76325410]  ;;  %v1986_v51 = vpack.c.bf16 %v38_v44, %v30_v43  ;;  %v1860_v52 = vpack.c.bf16 %v53_v46, %v45_v45  ;;  %v116_v43 = vld [vmem:[%s3825_s1 + $0x2e0] sm:$0xff]  ;;  %v110_v44 = vld [vmem:[%s3825_s1 + $0x2b0] sm:$0xff] }
  0x75   :  { %v118_v46 = vld [vmem:[%s3825_s1 + $0x2f0] sm:$0xff] }
  0x76   :  { %1715 = vmatpush1.bf16.msra.mxu0 %v1714_v55  ;;  %v46_v55 = vld [vmem:[%s3825_s1 + $0xb0] sm:$0xff] }
  0x77   :  { %1843 = vmatpush1.bf16.msra.mxu1 %v1842_v56  ;;  %1717 = vmatprep.subr.bf16.mxu0 %v1716_v57  ;;  %v1988_v56 = vpack.c.bf16 %v55_v48, %v47_v47  ;;  %v54_v57 = vld [vmem:[%s3825_s1 + $0xf0] sm:$0xff]  ;;  %v125_v47 = vld [vmem:[%s3825_s1 + $0x328] sm:$0xff] }
  0x78   :  { %1845 = vmatprep.subr.bf16.mxu1 %v1844_v62  ;;  %v71_v62 = vld [vmem:[%s3825_s1 + $0x178] sm:$0xff]  ;;  %v1990_v0 = vpack.c.bf16 %v54_v57, %v46_v55  ;;  %v133_v48 = vld [vmem:[%s3825_s1 + $0x368] sm:$0xff]  ;;  %v132_v55 = vld [vmem:[%s3825_s1 + $0x360] sm:$0xff] }
  0x79   :  { %v1880_v53 = vpack.c.bf16 %v133_v48, %v125_v47  ;;  %v198_v47 = vld [vmem:[%s3825_s1 + $0x570] sm:$0xff]  ;;  %v205_v48 = vld [vmem:[%s3825_s1 + $0x5a8] sm:$0xff] }
  0x7a   :  { %1719 = vmatpush1.bf16.msra.mxu0 %v1718_v4  ;;  %v62_v4 = vld [vmem:[%s3825_s1 + $0x130] sm:$0xff] }
  0x7b   :  { %1847 = vmatpush1.bf16.msra.mxu1 %v1846_v5  ;;  %1721 = vmatprep.subr.bf16.mxu0 %v1720_v6  ;;  %v1992_v5 = vpack.c.bf16 %v71_v62, %v63_v60  ;;  %v70_v6 = vld [vmem:[%s3825_s1 + $0x170] sm:$0xff]  ;;  %v149_v60 = vld [vmem:[%s3825_s1 + $0x3e8] sm:$0xff]  ;;  %v143_v62 = vld [vmem:[%s3825_s1 + $0x3b8] sm:$0xff] }
  0x7c   :  { %1849 = vmatprep.subr.bf16.mxu1 %v1848_v10  ;;  %v87_v10 = vld [vmem:[%s3825_s1 + $0x1f8] sm:$0xff]  ;;  %v1994_v13 = vpack.c.bf16 %v70_v6, %v62_v4  ;;  %v1884_v2 = vpack.c.bf16 %v149_v60, %v141_v59  ;;  %v148_v4 = vld [vmem:[%s3825_s1 + $0x3e0] sm:$0xff]  ;;  %v214_v59 = vld [vmem:[%s3825_s1 + $0x5f0] sm:$0xff] }
  0x7d   :  { %v221_v60 = vld [vmem:[%s3825_s1 + $0x628] sm:$0xff] }
  0x7e   :  { %1723 = vmatpush1.bf16.msra.mxu0 %v1722_v17  ;;  %v78_v17 = vld [vmem:[%s3825_s1 + $0x1b0] sm:$0xff] }
  0x7f   :  { %1851 = vmatpush1.bf16.msra.mxu1 %v1850_v18  ;;  %1725 = vmatprep.subr.bf16.mxu0 %v1724_v19  ;;  %v86_v18 = vld [vmem:[%s3825_s1 + $0x1f0] sm:$0xff]  ;;  %v93_v19 = vld [vmem:[%s3825_s1 + $0x228] sm:$0xff] }
  0x80   :  { %1853 = vmatprep.subr.bf16.mxu1 %v1852_v22  ;;  %v103_v22 = vld [vmem:[%s3825_s1 + $0x278] sm:$0xff]  ;;  %v1998_v26 = vpack.c.bf16 %v86_v18, %v78_v17  ;;  %v164_v17 = vld [vmem:[%s3825_s1 + $0x460] sm:$0xff] }
  0x81   :  { %v2000_v31 = vpack.c.bf16 %v103_v22, %v95_v21  ;;  %v181_v21 = vld [vmem:[%s3825_s1 + $0x4e8] sm:$0xff]  ;;  %v175_v22 = vld [vmem:[%s3825_s1 + $0x4b8] sm:$0xff] }
  0x82   :  { %1727 = vmatpush1.bf16.msra.mxu0 %v1726_v27  ;;  %v1872_v27 = vpack.c.bf16 %v101_v20, %v93_v19  ;;  %v166_v19 = vld [vmem:[%s3825_s1 + $0x470] sm:$0xff]  ;;  %v173_v20 = vld [vmem:[%s3825_s1 + $0x4a8] sm:$0xff] }
  0x83   :  { %1855 = vmatpush1.bf16.msra.mxu1 %v1854_v28  ;;  %1587 = vmatprep.subr.msk.mxu0 %vm619_vm0, %v537_v29  ;;  %v92_v28 = vld [vmem:[%s3825_s1 + $0x220] sm:$0xff] }
  0x84   :  { %1590 = vmatprep.subr.msk.mxu1 %vm619_vm0, %v539_v30  ;;  %v100_v29 = vld [vmem:[%s3825_s1 + $0x260] sm:$0xff]  ;;  %v94_v30 = vld [vmem:[%s3825_s1 + $0x230] sm:$0xff] }
  0x85   :  { %780 = vmatmul.mubr.f32.vlgmr.msra.gmra.mrb[0].mxu0 %v2609_v24 }
  0x86   :  { %993 = vmatmul.mubr.f32.vlgmr.msra.gmra.mrb[0].mxu1 %v2609_v24  ;;  %1588 = vmatpush1.msk.msra.mxu0 %vm619_vm0, %v536_v35  ;;  %v111_v35 = vld [vmem:[%s3825_s1 + $0x2b8] sm:$0xff] }
  0x87   :  { %1591 = vmatpush1.msk.msra.mxu1 %vm619_vm0, %v538_v36  ;;  %850 = vmatprep.mubr.f32.mxu0 %v2141_v40  ;;  %v119_v36 = vld [vmem:[%s3825_s1 + $0x2f8] sm:$0xff] }
  0x88   :  { %1063 = vmatprep.mubr.f32.mxu1 %v2141_v40  ;;  %1857 = vmatprep.subr.bf16.mxu0 %v1856_v37  ;;  %v1874_v37 = vpack.c.bf16 %v100_v29, %v92_v28  ;;  %v2004_v45 = vpack.c.bf16 %v119_v36, %v111_v35  ;;  %v1892_v28 = vpack.c.bf16 %v181_v21, %v173_v20  ;;  %v172_v29 = vld [vmem:[%s3825_s1 + $0x4a0] sm:$0xff]  ;;  %v197_v35 = vld [vmem:[%s3825_s1 + $0x568] sm:$0xff]  ;;  %v191_v36 = vld [vmem:[%s3825_s1 + $0x538] sm:$0xff] }
  0x89   :  { %1985 = vmatprep.subr.bf16.mxu1 %v1984_v39  ;;  %v2002_v39 = vpack.c.bf16 %v102_v11, %v94_v30  ;;  %v180_v30 = vld [vmem:[%s3825_s1 + $0x4e0] sm:$0xff]  ;;  %v246_v20 = vld [vmem:[%s3825_s1 + $0x6f0] sm:$0xff]  ;;  %v253_v21 = vld [vmem:[%s3825_s1 + $0x728] sm:$0xff] }
  0x8d   :  { %1589 = vmatmul.mubr.msk.f32.vlgmr.msra.gmra.mrb[0].mxu0 %vm616_vm1, %v1586_v49 }
  0x8e   :  { %1592 = vmatmul.mubr.msk.f32.vlgmr.msra.gmra.mrb[0].mxu1 %vm616_vm1, %v1586_v49  ;;  %1859 = vmatpush1.bf16.msra.mxu0 %v1858_v50  ;;  %v127_v49 = vld [vmem:[%s3825_s1 + $0x338] sm:$0xff] }
  0x8f   :  { %1987 = vmatpush1.bf16.msra.mxu1 %v1986_v51  ;;  %1861 = vmatprep.subr.bf16.mxu0 %v1860_v52  ;;  %v135_v50 = vld [vmem:[%s3825_s1 + $0x378] sm:$0xff]  ;;  %v1878_v51 = vpack.c.bf16 %v116_v43, %v108_v42  ;;  %v2006_v52 = vpack.c.bf16 %v118_v46, %v110_v44  ;;  %v1896_v42 = vpack.c.bf16 %v197_v35, %v189_v34  ;;  %v188_v43 = vld [vmem:[%s3825_s1 + $0x520] sm:$0xff]  ;;  %v262_v34 = vld [vmem:[%s3825_s1 + $0x770] sm:$0xff] }
  0x90   :  { %1989 = vmatprep.subr.bf16.mxu1 %v1988_v56  ;;  %1134 = vmatprep.mubr.f32.mxu0 %v2497_v32  ;;  %v126_v56 = vld [vmem:[%s3825_s1 + $0x330] sm:$0xff]  ;;  %v2008_v57 = vpack.c.bf16 %v135_v50, %v127_v49  ;;  %v196_v44 = vld [vmem:[%s3825_s1 + $0x560] sm:$0xff]  ;;  %v213_v49 = vld [vmem:[%s3825_s1 + $0x5e8] sm:$0xff] }
  0x91   :  { %1347 = vmatprep.mubr.f32.mxu1 %v2497_v32  ;;  %v1996_v32 = vpack.c.bf16 %v87_v10, %v79_v9  ;;  %v165_v9 = vld [vmem:[%s3825_s1 + $0x468] sm:$0xff]  ;;  %v159_v10 = vld [vmem:[%s3825_s1 + $0x438] sm:$0xff] }
  0x92   :  { %1863 = vmatpush1.bf16.msra.mxu0 %v1862_v63  ;;  %v151_v63 = vld [vmem:[%s3825_s1 + $0x3f8] sm:$0xff]  ;;  %v1888_v15 = vpack.c.bf16 %v165_v9, %v157_v8  ;;  %v230_v8 = vld [vmem:[%s3825_s1 + $0x670] sm:$0xff]  ;;  %v237_v9 = vld [vmem:[%s3825_s1 + $0x6a8] sm:$0xff] }
  0x93   :  { %1991 = vmatpush1.bf16.msra.mxu1 %v1990_v0  ;;  %1865 = vmatprep.subr.bf16.mxu0 %v1864_v1  ;;  %v1882_v0 = vpack.c.bf16 %v132_v55, %v124_v54  ;;  %v2010_v1 = vpack.c.bf16 %v134_v58, %v126_v56  ;;  %v2012_v6 = vpack.c.bf16 %v151_v63, %v143_v62  ;;  %v207_v50 = vld [vmem:[%s3825_s1 + $0x5b8] sm:$0xff]  ;;  %v204_v55 = vld [vmem:[%s3825_s1 + $0x5a0] sm:$0xff]  ;;  %v229_v62 = vld [vmem:[%s3825_s1 + $0x668] sm:$0xff] }
  0x94   :  { %1993 = vmatprep.subr.bf16.mxu1 %v1992_v5  ;;  %v142_v5 = vld [vmem:[%s3825_s1 + $0x3b0] sm:$0xff]  ;;  %v1900_v54 = vpack.c.bf16 %v213_v49, %v205_v48  ;;  %v212_v56 = vld [vmem:[%s3825_s1 + $0x5e0] sm:$0xff]  ;;  %v223_v63 = vld [vmem:[%s3825_s1 + $0x638] sm:$0xff] }
  0x95   :  { %v269_v35 = vld [vmem:[%s3825_s1 + $0x7a8] sm:$0xff]  ;;  %v278_v48 = vld [vmem:[%s3825_s1 + $0x7f0] sm:$0xff] }
  0x96   :  { %1867 = vmatpush1.bf16.msra.mxu0 %v1866_v12  ;;  %v167_v12 = vld [vmem:[%s3825_s1 + $0x478] sm:$0xff]  ;;  %v285_v49 = vld [vmem:[%s3825_s1 + $0x828] sm:$0xff] }
  0x97   :  { %1995 = vmatpush1.bf16.msra.mxu1 %v1994_v13  ;;  %1869 = vmatprep.subr.bf16.mxu0 %v1868_v14  ;;  %v1886_v13 = vpack.c.bf16 %v148_v4, %v140_v3  ;;  %v2014_v14 = vpack.c.bf16 %v150_v7, %v142_v5  ;;  %v2016_v18 = vpack.c.bf16 %v167_v12, %v159_v10  ;;  %v220_v4 = vld [vmem:[%s3825_s1 + $0x620] sm:$0xff]  ;;  %v245_v10 = vld [vmem:[%s3825_s1 + $0x6e8] sm:$0xff]  ;;  %v239_v12 = vld [vmem:[%s3825_s1 + $0x6b8] sm:$0xff] }
  0x98   :  { %1997 = vmatprep.subr.bf16.mxu1 %v1996_v32  ;;  %v158_v32 = vld [vmem:[%s3825_s1 + $0x430] sm:$0xff]  ;;  %v1904_v3 = vpack.c.bf16 %v229_v62, %v221_v60  ;;  %v228_v5 = vld [vmem:[%s3825_s1 + $0x660] sm:$0xff]  ;;  %v301_v62 = vld [vmem:[%s3825_s1 + $0x8a8] sm:$0xff] }
  0x99   :  { %v294_v60 = vld [vmem:[%s3825_s1 + $0x870] sm:$0xff] }
  0x9a   :  { %1871 = vmatpush1.bf16.msra.mxu0 %v1870_v23  ;;  %v183_v23 = vld [vmem:[%s3825_s1 + $0x4f8] sm:$0xff] }
  0x9b   :  { %1999 = vmatpush1.bf16.msra.mxu1 %v1998_v26  ;;  %1873 = vmatprep.subr.bf16.mxu0 %v1872_v27  ;;  %v1890_v26 = vpack.c.bf16 %v164_v17, %v156_v16  ;;  %v2018_v27 = vpack.c.bf16 %v166_v19, %v158_v32  ;;  %v2020_v11 = vpack.c.bf16 %v183_v23, %v175_v22  ;;  %v236_v17 = vld [vmem:[%s3825_s1 + $0x6a0] sm:$0xff]  ;;  %v261_v22 = vld [vmem:[%s3825_s1 + $0x768] sm:$0xff]  ;;  %v255_v23 = vld [vmem:[%s3825_s1 + $0x738] sm:$0xff] }
  0x9c   :  { %2001 = vmatprep.subr.bf16.mxu1 %v2000_v31  ;;  %v174_v31 = vld [vmem:[%s3825_s1 + $0x4b0] sm:$0xff]  ;;  %v1908_v16 = vpack.c.bf16 %v245_v10, %v237_v9  ;;  %v244_v32 = vld [vmem:[%s3825_s1 + $0x6e0] sm:$0xff]  ;;  %v317_v10 = vld [vmem:[%s3825_s1 + $0x928] sm:$0xff] }
  0x9d   :  { %v310_v9 = vld [vmem:[%s3825_s1 + $0x8f0] sm:$0xff] }
  0x9e   :  { %1875 = vmatpush1.bf16.msra.mxu0 %v1874_v37  ;;  %v199_v37 = vld [vmem:[%s3825_s1 + $0x578] sm:$0xff] }
  0x9f   :  { %2003 = vmatpush1.bf16.msra.mxu1 %v2002_v39  ;;  %1877 = vmatprep.subr.bf16.mxu0 %v1876_v41  ;;  %v1894_v39 = vpack.c.bf16 %v180_v30, %v172_v29  ;;  %v2022_v41 = vpack.c.bf16 %v182_v33, %v174_v31  ;;  %v2024_v46 = vpack.c.bf16 %v199_v37, %v191_v36  ;;  %v252_v30 = vld [vmem:[%s3825_s1 + $0x720] sm:$0xff]  ;;  %v277_v36 = vld [vmem:[%s3825_s1 + $0x7e8] sm:$0xff]  ;;  %v271_v37 = vld [vmem:[%s3825_s1 + $0x7b8] sm:$0xff] }
  0xa0   :  { %2005 = vmatprep.subr.bf16.mxu1 %v2004_v45  ;;  %v190_v45 = vld [vmem:[%s3825_s1 + $0x530] sm:$0xff]  ;;  %v1912_v29 = vpack.c.bf16 %v261_v22, %v253_v21  ;;  %v260_v31 = vld [vmem:[%s3825_s1 + $0x760] sm:$0xff]  ;;  %v333_v21 = vld [vmem:[%s3825_s1 + $0x9a8] sm:$0xff] }
  0xa1   :  { %v341_v22 = vld [vmem:[%s3825_s1 + $0x9e8] sm:$0xff] }
  0xa2   :  { %1879 = vmatpush1.bf16.msra.mxu0 %v1878_v51  ;;  %v215_v51 = vld [vmem:[%s3825_s1 + $0x5f8] sm:$0xff] }
  0xa3   :  { %2007 = vmatpush1.bf16.msra.mxu1 %v2006_v52  ;;  %1881 = vmatprep.subr.bf16.mxu0 %v1880_v53  ;;  %v1898_v52 = vpack.c.bf16 %v196_v44, %v188_v43  ;;  %v2026_v53 = vpack.c.bf16 %v198_v47, %v190_v45  ;;  %v2028_v58 = vpack.c.bf16 %v215_v51, %v207_v50  ;;  %v268_v44 = vld [vmem:[%s3825_s1 + $0x7a0] sm:$0xff]  ;;  %v293_v50 = vld [vmem:[%s3825_s1 + $0x868] sm:$0xff]  ;;  %v287_v51 = vld [vmem:[%s3825_s1 + $0x838] sm:$0xff] }
  0xa4   :  { %2009 = vmatprep.subr.bf16.mxu1 %v2008_v57  ;;  %v206_v57 = vld [vmem:[%s3825_s1 + $0x5b0] sm:$0xff]  ;;  %v1916_v43 = vpack.c.bf16 %v277_v36, %v269_v35  ;;  %v276_v45 = vld [vmem:[%s3825_s1 + $0x7e0] sm:$0xff]  ;;  %v357_v35 = vld [vmem:[%s3825_s1 + $0xa68] sm:$0xff] }
  0xa5   :  { %v351_v36 = vld [vmem:[%s3825_s1 + $0xa38] sm:$0xff] }
  0xa6   :  { %1883 = vmatpush1.bf16.msra.mxu0 %v1882_v0  ;;  %v231_v0 = vld [vmem:[%s3825_s1 + $0x678] sm:$0xff] }
  0xa7   :  { %2011 = vmatpush1.bf16.msra.mxu1 %v2010_v1  ;;  %1885 = vmatprep.subr.bf16.mxu0 %v1884_v2  ;;  %v1902_v1 = vpack.c.bf16 %v212_v56, %v204_v55  ;;  %v2030_v2 = vpack.c.bf16 %v214_v59, %v206_v57  ;;  %v2032_v7 = vpack.c.bf16 %v231_v0, %v223_v63  ;;  %v284_v56 = vld [vmem:[%s3825_s1 + $0x820] sm:$0xff]  ;;  %v309_v63 = vld [vmem:[%s3825_s1 + $0x8e8] sm:$0xff]  ;;  %v303_v0 = vld [vmem:[%s3825_s1 + $0x8b8] sm:$0xff] }
  0xa8   :  { %2013 = vmatprep.subr.bf16.mxu1 %v2012_v6  ;;  %v222_v6 = vld [vmem:[%s3825_s1 + $0x630] sm:$0xff]  ;;  %v1920_v55 = vpack.c.bf16 %v293_v50, %v285_v49  ;;  %v292_v57 = vld [vmem:[%s3825_s1 + $0x860] sm:$0xff]  ;;  %v373_v49 = vld [vmem:[%s3825_s1 + $0xae8] sm:$0xff] }
  0xa9   :  { %v367_v50 = vld [vmem:[%s3825_s1 + $0xab8] sm:$0xff] }
  0xaa   :  { %1887 = vmatpush1.bf16.msra.mxu0 %v1886_v13  ;;  %v247_v13 = vld [vmem:[%s3825_s1 + $0x6f8] sm:$0xff] }
  0xab   :  { %2015 = vmatpush1.bf16.msra.mxu1 %v2014_v14  ;;  %1889 = vmatprep.subr.bf16.mxu0 %v1888_v15  ;;  %v1906_v14 = vpack.c.bf16 %v228_v5, %v220_v4  ;;  %v2034_v15 = vpack.c.bf16 %v230_v8, %v222_v6  ;;  %v2036_v19 = vpack.c.bf16 %v247_v13, %v239_v12  ;;  %v300_v5 = vld [vmem:[%s3825_s1 + $0x8a0] sm:$0xff]  ;;  %v325_v12 = vld [vmem:[%s3825_s1 + $0x968] sm:$0xff]  ;;  %v319_v13 = vld [vmem:[%s3825_s1 + $0x938] sm:$0xff] }
  0xac   :  { %2017 = vmatprep.subr.bf16.mxu1 %v2016_v18  ;;  %v238_v18 = vld [vmem:[%s3825_s1 + $0x6b0] sm:$0xff]  ;;  %v1924_v4 = vpack.c.bf16 %v309_v63, %v301_v62  ;;  %v308_v6 = vld [vmem:[%s3825_s1 + $0x8e0] sm:$0xff]  ;;  %v389_v62 = vld [vmem:[%s3825_s1 + $0xb68] sm:$0xff] }
  0xad   :  { %v383_v63 = vld [vmem:[%s3825_s1 + $0xb38] sm:$0xff] }
  0xae   :  { %1891 = vmatpush1.bf16.msra.mxu0 %v1890_v26  ;;  %v263_v26 = vld [vmem:[%s3825_s1 + $0x778] sm:$0xff] }
  0xaf   :  { %2019 = vmatpush1.bf16.msra.mxu1 %v2018_v27  ;;  %1893 = vmatprep.subr.bf16.mxu0 %v1892_v28  ;;  %v1910_v27 = vpack.c.bf16 %v244_v32, %v236_v17  ;;  %v2038_v28 = vpack.c.bf16 %v246_v20, %v238_v18  ;;  %v2040_v33 = vpack.c.bf16 %v263_v26, %v255_v23  ;;  %v316_v32 = vld [vmem:[%s3825_s1 + $0x920] sm:$0xff]  ;;  %v335_v23 = vld [vmem:[%s3825_s1 + $0x9b8] sm:$0xff] }
  0xb0   :  { %2021 = vmatprep.subr.bf16.mxu1 %v2020_v11  ;;  %v254_v11 = vld [vmem:[%s3825_s1 + $0x730] sm:$0xff]  ;;  %v1928_v17 = vpack.c.bf16 %v325_v12, %v317_v10  ;;  %v324_v18 = vld [vmem:[%s3825_s1 + $0x960] sm:$0xff]  ;;  %v343_v26 = vld [vmem:[%s3825_s1 + $0x9f8] sm:$0xff] }
  0xb1   :  { %v405_v10 = vld [vmem:[%s3825_s1 + $0xbe8] sm:$0xff]  ;;  %v399_v12 = vld [vmem:[%s3825_s1 + $0xbb8] sm:$0xff] }
  0xb2   :  { %1895 = vmatpush1.bf16.msra.mxu0 %v1894_v39  ;;  %v279_v39 = vld [vmem:[%s3825_s1 + $0x7f8] sm:$0xff] }
  0xb3   :  { %2023 = vmatpush1.bf16.msra.mxu1 %v2022_v41  ;;  %1897 = vmatprep.subr.bf16.mxu0 %v1896_v42  ;;  %v1914_v41 = vpack.c.bf16 %v260_v31, %v252_v30  ;;  %v2042_v42 = vpack.c.bf16 %v262_v34, %v254_v11  ;;  %v2044_v47 = vpack.c.bf16 %v279_v39, %v271_v37  ;;  %v332_v30 = vld [vmem:[%s3825_s1 + $0x9a0] sm:$0xff]  ;;  %v334_v11 = vld [vmem:[%s3825_s1 + $0x9b0] sm:$0xff]  ;;  %v349_v34 = vld [vmem:[%s3825_s1 + $0xa28] sm:$0xff] }
  0xb4   :  { %2025 = vmatprep.subr.bf16.mxu1 %v2024_v46  ;;  %v270_v46 = vld [vmem:[%s3825_s1 + $0x7b0] sm:$0xff]  ;;  %v340_v31 = vld [vmem:[%s3825_s1 + $0x9e0] sm:$0xff]  ;;  %v359_v37 = vld [vmem:[%s3825_s1 + $0xa78] sm:$0xff] }
  0xb5   :  { %v1934_v39 = vpack.c.bf16 %v340_v31, %v332_v30  ;;  %v420_v30 = vld [vmem:[%s3825_s1 + $0xc60] sm:$0xff]  ;;  %v414_v31 = vld [vmem:[%s3825_s1 + $0xc30] sm:$0xff] }
  0xb6   :  { %1899 = vmatpush1.bf16.msra.mxu0 %v1898_v52  ;;  %v295_v52 = vld [vmem:[%s3825_s1 + $0x878] sm:$0xff] }
  0xb7   :  { %2027 = vmatpush1.bf16.msra.mxu1 %v2026_v53  ;;  %1901 = vmatprep.subr.bf16.mxu0 %v1900_v54  ;;  %v1918_v53 = vpack.c.bf16 %v276_v45, %v268_v44  ;;  %v2046_v54 = vpack.c.bf16 %v278_v48, %v270_v46  ;;  %v2048_v59 = vpack.c.bf16 %v295_v52, %v287_v51  ;;  %v356_v44 = vld [vmem:[%s3825_s1 + $0xa60] sm:$0xff]  ;;  %v350_v45 = vld [vmem:[%s3825_s1 + $0xa30] sm:$0xff]  ;;  %v365_v48 = vld [vmem:[%s3825_s1 + $0xaa8] sm:$0xff] }
  0xb8   :  { %2029 = vmatprep.subr.bf16.mxu1 %v2028_v58  ;;  %v286_v58 = vld [vmem:[%s3825_s1 + $0x830] sm:$0xff]  ;;  %v2064_v46 = vpack.c.bf16 %v359_v37, %v351_v36  ;;  %v375_v51 = vld [vmem:[%s3825_s1 + $0xaf8] sm:$0xff] }
  0xb9   :  { %v439_v36 = vld [vmem:[%s3825_s1 + $0xcf8] sm:$0xff] }
  0xba   :  { %1903 = vmatpush1.bf16.msra.mxu0 %v1902_v1  ;;  %v311_v1 = vld [vmem:[%s3825_s1 + $0x8f8] sm:$0xff] }
  0xbb   :  { %2031 = vmatpush1.bf16.msra.mxu1 %v2030_v2  ;;  %1905 = vmatprep.subr.bf16.mxu0 %v1904_v3  ;;  %v1922_v2 = vpack.c.bf16 %v292_v57, %v284_v56  ;;  %v2050_v3 = vpack.c.bf16 %v294_v60, %v286_v58  ;;  %v2052_v8 = vpack.c.bf16 %v311_v1, %v303_v0  ;;  %v372_v56 = vld [vmem:[%s3825_s1 + $0xae0] sm:$0xff]  ;;  %v366_v57 = vld [vmem:[%s3825_s1 + $0xab0] sm:$0xff]  ;;  %v381_v60 = vld [vmem:[%s3825_s1 + $0xb28] sm:$0xff] }
  0xbc   :  { %2033 = vmatprep.subr.bf16.mxu1 %v2032_v7  ;;  %v302_v7 = vld [vmem:[%s3825_s1 + $0x8b0] sm:$0xff]  ;;  %v2068_v58 = vpack.c.bf16 %v375_v51, %v367_v50  ;;  %v391_v0 = vld [vmem:[%s3825_s1 + $0xb78] sm:$0xff] }
  0xbd   :  { %v455_v50 = vld [vmem:[%s3825_s1 + $0xd78] sm:$0xff] }
  0xbe   :  { %1907 = vmatpush1.bf16.msra.mxu0 %v1906_v14  ;;  %v327_v14 = vld [vmem:[%s3825_s1 + $0x978] sm:$0xff] }
  0xbf   :  { %2035 = vmatpush1.bf16.msra.mxu1 %v2034_v15  ;;  %1909 = vmatprep.subr.bf16.mxu0 %v1908_v16  ;;  %v1926_v15 = vpack.c.bf16 %v308_v6, %v300_v5  ;;  %v2054_v16 = vpack.c.bf16 %v310_v9, %v302_v7  ;;  %v2056_v20 = vpack.c.bf16 %v327_v14, %v319_v13  ;;  %v388_v5 = vld [vmem:[%s3825_s1 + $0xb60] sm:$0xff]  ;;  %v382_v6 = vld [vmem:[%s3825_s1 + $0xb30] sm:$0xff]  ;;  %v397_v9 = vld [vmem:[%s3825_s1 + $0xba8] sm:$0xff] }
  0xc0   :  { %2037 = vmatprep.subr.bf16.mxu1 %v2036_v19  ;;  %v318_v19 = vld [vmem:[%s3825_s1 + $0x930] sm:$0xff]  ;;  %v2072_v7 = vpack.c.bf16 %v391_v0, %v383_v63  ;;  %v407_v13 = vld [vmem:[%s3825_s1 + $0xbf8] sm:$0xff] }
  0xc1   :  { %v471_v63 = vld [vmem:[%s3825_s1 + $0xdf8] sm:$0xff] }
  0xc2   :  { %1911 = vmatpush1.bf16.msra.mxu0 %v1910_v27  ;;  %v1930_v27 = vpack.c.bf16 %v324_v18, %v316_v32  ;;  %v404_v32 = vld [vmem:[%s3825_s1 + $0xbe0] sm:$0xff]  ;;  %v398_v18 = vld [vmem:[%s3825_s1 + $0xbb0] sm:$0xff] }
  0xc3   :  { %2039 = vmatpush1.bf16.msra.mxu1 %v2038_v28  ;;  %1913 = vmatprep.subr.bf16.mxu0 %v1912_v29  ;;  %v1932_v29 = vpack.c.bf16 %v341_v22, %v333_v21  ;;  %v421_v21 = vld [vmem:[%s3825_s1 + $0xc68] sm:$0xff]  ;;  %v415_v22 = vld [vmem:[%s3825_s1 + $0xc38] sm:$0xff] }
  0xc4   :  { %2041 = vmatprep.subr.bf16.mxu1 %v2040_v33  ;;  %v342_v33 = vld [vmem:[%s3825_s1 + $0x9f0] sm:$0xff] }
  0xc6   :  { %1915 = vmatpush1.bf16.msra.mxu0 %v1914_v41  ;;  %v2062_v41 = vpack.c.bf16 %v342_v33, %v334_v11  ;;  %v429_v33 = vld [vmem:[%s3825_s1 + $0xca8] sm:$0xff] }
  0xc7   :  { %2043 = vmatpush1.bf16.msra.mxu1 %v2042_v42  ;;  %1917 = vmatprep.subr.bf16.mxu0 %v1916_v43  ;;  %v1936_v42 = vpack.c.bf16 %v357_v35, %v349_v34  ;;  %v348_v43 = vld [vmem:[%s3825_s1 + $0xa20] sm:$0xff]  ;;  %v437_v34 = vld [vmem:[%s3825_s1 + $0xce8] sm:$0xff]  ;;  %v431_v35 = vld [vmem:[%s3825_s1 + $0xcb8] sm:$0xff] }
  0xc8   :  { %2045 = vmatprep.subr.bf16.mxu1 %v2044_v47  ;;  %v358_v47 = vld [vmem:[%s3825_s1 + $0xa70] sm:$0xff]  ;;  %v1938_v52 = vpack.c.bf16 %v356_v44, %v348_v43  ;;  %v436_v43 = vld [vmem:[%s3825_s1 + $0xce0] sm:$0xff] }
  0xc9   :  { %v430_v44 = vld [vmem:[%s3825_s1 + $0xcb0] sm:$0xff] }
  0xca   :  { %1919 = vmatpush1.bf16.msra.mxu0 %v1918_v53  ;;  %v2066_v53 = vpack.c.bf16 %v358_v47, %v350_v45  ;;  %v2084_v45 = vpack.c.bf16 %v439_v36, %v431_v35  ;;  %v445_v47 = vld [vmem:[%s3825_s1 + $0xd28] sm:$0xff]  ;;  %v519_v35 = vld [vmem:[%s3825_s1 + $0xf78] sm:$0xff] }
  0xcb   :  { %2047 = vmatpush1.bf16.msra.mxu1 %v2046_v54  ;;  %1921 = vmatprep.subr.bf16.mxu0 %v1920_v55  ;;  %v1940_v54 = vpack.c.bf16 %v373_v49, %v365_v48  ;;  %v364_v55 = vld [vmem:[%s3825_s1 + $0xaa0] sm:$0xff]  ;;  %v453_v48 = vld [vmem:[%s3825_s1 + $0xd68] sm:$0xff]  ;;  %v447_v49 = vld [vmem:[%s3825_s1 + $0xd38] sm:$0xff] }
  0xcc   :  { %2049 = vmatprep.subr.bf16.mxu1 %v2048_v59  ;;  %v374_v59 = vld [vmem:[%s3825_s1 + $0xaf0] sm:$0xff]  ;;  %v1942_v1 = vpack.c.bf16 %v372_v56, %v364_v55  ;;  %v452_v55 = vld [vmem:[%s3825_s1 + $0xd60] sm:$0xff] }
  0xcd   :  { %1135 = vmatmul.mubr.f32.vlgmr.msra.gmra.mrb[2].mxu0 %v2484_v25  ;;  %v446_v56 = vld [vmem:[%s3825_s1 + $0xd30] sm:$0xff] }
  0xce   :  { %1923 = vmatpush1.bf16.msra.mxu0 %v1922_v2  ;;  %1348 = vmatmul.mubr.f32.vlgmr.msra.gmra.mrb[2].mxu1 %v2484_v25  ;;  %v326_v25 = vld [vmem:[%s3825_s1 + $0x970] sm:$0xff]  ;;  %v2070_v2 = vpack.c.bf16 %v374_v59, %v366_v57  ;;  %v2088_v57 = vpack.c.bf16 %v455_v50, %v447_v49  ;;  %v461_v59 = vld [vmem:[%s3825_s1 + $0xda8] sm:$0xff]  ;;  %v535_v49 = vld [vmem:[%s3825_s1 + $0xff8] sm:$0xff] }
  0xcf   :  { %2051 = vmatpush1.bf16.msra.mxu1 %v2050_v3  ;;  %1925 = vmatprep.subr.bf16.mxu0 %v1924_v4  ;;  %v2058_v28 = vpack.c.bf16 %v326_v25, %v318_v19  ;;  %v1944_v3 = vpack.c.bf16 %v389_v62, %v381_v60  ;;  %v380_v4 = vld [vmem:[%s3825_s1 + $0xb20] sm:$0xff]  ;;  %v2076_v19 = vpack.c.bf16 %v407_v13, %v399_v12  ;;  %v413_v25 = vld [vmem:[%s3825_s1 + $0xc28] sm:$0xff]  ;;  %v463_v62 = vld [vmem:[%s3825_s1 + $0xdb8] sm:$0xff] }
  0xd0   :  { %2053 = vmatprep.subr.bf16.mxu1 %v2052_v8  ;;  %1205 = vmatprep.mubr.f32.mxu0 %v2637_v38  ;;  %v390_v8 = vld [vmem:[%s3825_s1 + $0xb70] sm:$0xff]  ;;  %v1946_v14 = vpack.c.bf16 %v388_v5, %v380_v4  ;;  %v469_v60 = vld [vmem:[%s3825_s1 + $0xde8] sm:$0xff]  ;;  %v468_v4 = vld [vmem:[%s3825_s1 + $0xde0] sm:$0xff] }
  0xd1   :  { %1418 = vmatprep.mubr.f32.mxu1 %v2637_v38  ;;  %v2060_v38 = vpack.c.bf16 %v343_v26, %v335_v23  ;;  %v423_v23 = vld [vmem:[%s3825_s1 + $0xc78] sm:$0xff]  ;;  %v462_v5 = vld [vmem:[%s3825_s1 + $0xdb0] sm:$0xff] }
  0xd2   :  { %1927 = vmatpush1.bf16.msra.mxu0 %v1926_v15  ;;  %v2074_v15 = vpack.c.bf16 %v390_v8, %v382_v6  ;;  %v2080_v11 = vpack.c.bf16 %v423_v23, %v415_v22  ;;  %v2092_v6 = vpack.c.bf16 %v471_v63, %v463_v62  ;;  %v477_v8 = vld [vmem:[%s3825_s1 + $0xe28] sm:$0xff]  ;;  %v487_v12 = vld [vmem:[%s3825_s1 + $0xe78] sm:$0xff]  ;;  %v540_v63 = vld [vmem:[%s3825_s1 + $0x1020] sm:$0x1] }
  0xd3   :  { %2055 = vmatpush1.bf16.msra.mxu1 %v2054_v16  ;;  %1929 = vmatprep.subr.bf16.mxu0 %v1928_v17  ;;  %v1948_v16 = vpack.c.bf16 %v405_v10, %v397_v9  ;;  %v396_v17 = vld [vmem:[%s3825_s1 + $0xba0] sm:$0xff]  ;;  %v485_v9 = vld [vmem:[%s3825_s1 + $0xe68] sm:$0xff]  ;;  %v479_v10 = vld [vmem:[%s3825_s1 + $0xe38] sm:$0xff] }
  0xd4   :  { %2057 = vmatprep.subr.bf16.mxu1 %v2056_v20  ;;  %v406_v20 = vld [vmem:[%s3825_s1 + $0xbf0] sm:$0xff]  ;;  %v1950_v26 = vpack.c.bf16 %v404_v32, %v396_v17  ;;  %v484_v17 = vld [vmem:[%s3825_s1 + $0xe60] sm:$0xff]  ;;  %v503_v22 = vld [vmem:[%s3825_s1 + $0xef8] sm:$0xff] }
  0xd5   :  { %v478_v32 = vld [vmem:[%s3825_s1 + $0xe30] sm:$0xff]  ;;  %v543_v62 = vld [vmem:[%s3825_s1 + $0x1038] sm:$0x1] }
  0xd6   :  { %1931 = vmatpush1.bf16.msra.mxu0 %v1930_v27  ;;  %v2078_v27 = vpack.c.bf16 %v406_v20, %v398_v18  ;;  %v2096_v18 = vpack.c.bf16 %v487_v12, %v479_v10  ;;  %v493_v20 = vld [vmem:[%s3825_s1 + $0xea8] sm:$0xff] }
  0xd7   :  { %2059 = vmatpush1.bf16.msra.mxu1 %v2058_v28  ;;  %1933 = vmatprep.subr.bf16.mxu0 %v1932_v29  ;;  %v1952_v28 = vpack.c.bf16 %v421_v21, %v413_v25  ;;  %v412_v29 = vld [vmem:[%s3825_s1 + $0xc20] sm:$0xff]  ;;  %v501_v25 = vld [vmem:[%s3825_s1 + $0xee8] sm:$0xff]  ;;  %v495_v21 = vld [vmem:[%s3825_s1 + $0xeb8] sm:$0xff] }
  0xd8   :  { %2061 = vmatprep.subr.bf16.mxu1 %v2060_v38  ;;  %v422_v38 = vld [vmem:[%s3825_s1 + $0xc70] sm:$0xff]  ;;  %v1954_v37 = vpack.c.bf16 %v420_v30, %v412_v29  ;;  %v500_v29 = vld [vmem:[%s3825_s1 + $0xee0] sm:$0xff] }
  0xd9   :  { %v494_v30 = vld [vmem:[%s3825_s1 + $0xeb0] sm:$0xff] }
  0xda   :  { %1935 = vmatpush1.bf16.msra.mxu0 %v1934_v39  ;;  %v2082_v39 = vpack.c.bf16 %v422_v38, %v414_v31  ;;  %v2100_v31 = vpack.c.bf16 %v503_v22, %v495_v21  ;;  %v509_v38 = vld [vmem:[%s3825_s1 + $0xf28] sm:$0xff] }
  0xdb   :  { %2063 = vmatpush1.bf16.msra.mxu1 %v2062_v41  ;;  %1937 = vmatprep.subr.bf16.mxu0 %v1936_v42  ;;  %v1956_v41 = vpack.c.bf16 %v437_v34, %v429_v33  ;;  %v428_v42 = vld [vmem:[%s3825_s1 + $0xca0] sm:$0xff]  ;;  %v517_v33 = vld [vmem:[%s3825_s1 + $0xf68] sm:$0xff]  ;;  %v511_v34 = vld [vmem:[%s3825_s1 + $0xf38] sm:$0xff] }
  0xdc   :  { %2065 = vmatprep.subr.bf16.mxu1 %v2064_v46  ;;  %v438_v46 = vld [vmem:[%s3825_s1 + $0xcf0] sm:$0xff]  ;;  %v1958_v51 = vpack.c.bf16 %v436_v43, %v428_v42  ;;  %v516_v42 = vld [vmem:[%s3825_s1 + $0xf60] sm:$0xff] }
  0xdd   :  { %v510_v43 = vld [vmem:[%s3825_s1 + $0xf30] sm:$0xff] }
  0xde   :  { %1939 = vmatpush1.bf16.msra.mxu0 %v1938_v52  ;;  %v2086_v52 = vpack.c.bf16 %v438_v46, %v430_v44  ;;  %v2104_v44 = vpack.c.bf16 %v519_v35, %v511_v34  ;;  %v525_v46 = vld [vmem:[%s3825_s1 + $0xfa8] sm:$0xff] }
  0xdf   :  { %2067 = vmatpush1.bf16.msra.mxu1 %v2066_v53  ;;  %1941 = vmatprep.subr.bf16.mxu0 %v1940_v54  ;;  %v1960_v53 = vpack.c.bf16 %v453_v48, %v445_v47  ;;  %v444_v54 = vld [vmem:[%s3825_s1 + $0xd20] sm:$0xff]  ;;  %v533_v47 = vld [vmem:[%s3825_s1 + $0xfe8] sm:$0xff]  ;;  %v527_v48 = vld [vmem:[%s3825_s1 + $0xfb8] sm:$0xff] }
  0xe0   :  { %2069 = vmatprep.subr.bf16.mxu1 %v2068_v58  ;;  %v454_v58 = vld [vmem:[%s3825_s1 + $0xd70] sm:$0xff]  ;;  %v1962_v0 = vpack.c.bf16 %v452_v55, %v444_v54  ;;  %v532_v54 = vld [vmem:[%s3825_s1 + $0xfe0] sm:$0xff]  ;;  %v2108_v55 = vpack.c.bf16 %v535_v49, %v527_v48 }
  0xe2   :  { %1943 = vmatpush1.bf16.msra.mxu0 %v1942_v1  ;;  %v2090_v1 = vpack.c.bf16 %v454_v58, %v446_v56  ;;  %v526_v56 = vld [vmem:[%s3825_s1 + $0xfb0] sm:$0xff] }
  0xe3   :  { %2071 = vmatpush1.bf16.msra.mxu1 %v2070_v2  ;;  %1945 = vmatprep.subr.bf16.mxu0 %v1944_v3  ;;  %v1964_v2 = vpack.c.bf16 %v469_v60, %v461_v59  ;;  %v460_v3 = vld [vmem:[%s3825_s1 + $0xda0] sm:$0xff]  ;;  %v541_v60 = vld [vmem:[%s3825_s1 + $0x1028] sm:$0x1] }
  0xe4   :  { %2073 = vmatprep.subr.bf16.mxu1 %v2072_v7  ;;  %v470_v7 = vld [vmem:[%s3825_s1 + $0xdf0] sm:$0xff]  ;;  %v1966_v13 = vpack.c.bf16 %v468_v4, %v460_v3  ;;  %v556_v3 = vsub.s32 2, %v2424_v61  ;;  %v552_v4 = vsub.s32 1, %v2424_v61 }
  0xe6   :  { %1947 = vmatpush1.bf16.msra.mxu0 %v1946_v14  ;;  %v2094_v14 = vpack.c.bf16 %v470_v7, %v462_v5 }
  0xe7   :  { %2075 = vmatpush1.bf16.msra.mxu1 %v2074_v15  ;;  %1949 = vmatprep.subr.bf16.mxu0 %v1948_v16  ;;  %v1968_v15 = vpack.c.bf16 %v485_v9, %v477_v8  ;;  %v476_v16 = vld [vmem:[%s3825_s1 + $0xe20] sm:$0xff] }
  0xe8   :  { %2077 = vmatprep.subr.bf16.mxu1 %v2076_v19  ;;  %v486_v19 = vld [vmem:[%s3825_s1 + $0xe70] sm:$0xff]  ;;  %v1970_v23 = vpack.c.bf16 %v484_v17, %v476_v16 }
  0xea   :  { %1951 = vmatpush1.bf16.msra.mxu0 %v1950_v26  ;;  %v2098_v26 = vpack.c.bf16 %v486_v19, %v478_v32 }
  0xeb   :  { %2079 = vmatpush1.bf16.msra.mxu1 %v2078_v27  ;;  %1953 = vmatprep.subr.bf16.mxu0 %v1952_v28  ;;  %v1972_v27 = vpack.c.bf16 %v501_v25, %v493_v20  ;;  %v492_v28 = vld [vmem:[%s3825_s1 + $0xea0] sm:$0xff] }
  0xec   :  { %2081 = vmatprep.subr.bf16.mxu1 %v2080_v11  ;;  %v502_v11 = vld [vmem:[%s3825_s1 + $0xef0] sm:$0xff]  ;;  %v1974_v36 = vpack.c.bf16 %v500_v29, %v492_v28 }
  0xee   :  { %1955 = vmatpush1.bf16.msra.mxu0 %v1954_v37  ;;  %v2102_v37 = vpack.c.bf16 %v502_v11, %v494_v30 }
  0xef   :  { %2083 = vmatpush1.bf16.msra.mxu1 %v2082_v39  ;;  %1957 = vmatprep.subr.bf16.mxu0 %v1956_v41  ;;  %v1976_v39 = vpack.c.bf16 %v517_v33, %v509_v38  ;;  %v508_v41 = vld [vmem:[%s3825_s1 + $0xf20] sm:$0xff] }
  0xf0   :  { %2085 = vmatprep.subr.bf16.mxu1 %v2084_v45  ;;  %v518_v45 = vld [vmem:[%s3825_s1 + $0xf70] sm:$0xff]  ;;  %v1978_v50 = vpack.c.bf16 %v516_v42, %v508_v41  ;;  %v572_v41 = vsub.s32 6, %v2424_v61  ;;  %v568_v42 = vsub.s32 5, %v2424_v61 }
  0xf2   :  { %1959 = vmatpush1.bf16.msra.mxu0 %v1958_v51  ;;  %v2106_v51 = vpack.c.bf16 %v518_v45, %v510_v43  ;;  %v576_v43 = vsub.s32 7, %v2424_v61 }
  0xf3   :  { %2087 = vmatpush1.bf16.msra.mxu1 %v2086_v52  ;;  %1961 = vmatprep.subr.bf16.mxu0 %v1960_v53  ;;  %v1980_v52 = vpack.c.bf16 %v533_v47, %v525_v46  ;;  %v524_v53 = vld [vmem:[%s3825_s1 + $0xfa0] sm:$0xff] }
  0xf4   :  { %2089 = vmatprep.subr.bf16.mxu1 %v2088_v57  ;;  %v534_v57 = vld [vmem:[%s3825_s1 + $0xff0] sm:$0xff]  ;;  %v1982_v58 = vpack.c.bf16 %v532_v54, %v524_v53 }
  0xf5   :  { %v2110_v59 = vpack.c.bf16 %v534_v57, %v526_v56 }
  0xf6   :  { %1963 = vmatpush1.bf16.msra.mxu0 %v1962_v0  ;;  %v542_v0 = vld [vmem:[%s3825_s1 + $0x1030] sm:$0x1] }
  0xf7   :  { %2091 = vmatpush1.bf16.msra.mxu1 %v2090_v1  ;;  %1965 = vmatprep.subr.bf16.mxu0 %v1964_v2  ;;  %v2139_v1 = vld.sshfl [vmem:[%s3826_s0 + $0x8] sm:$0x3 pattern:$0x76325410]  ;;  %v548_v2 = vsub.s32 0, %v2424_v61 }
  0xf8   :  { %2093 = vmatprep.subr.bf16.mxu1 %v2092_v6  ;;  %v1504_v6 = vld [vmem:[%s3828_s3] sm:$0xff] }
  0xf9   :  { %v1517_v17 = vrot.slane %v1504_v6, %v556_v3 }
  0xfa   :  { %1967 = vmatpush1.bf16.msra.mxu0 %v1966_v13  ;;  %v1509_v13 = vrot.slane %v1504_v6, %v548_v2 }
  0xfb   :  { %2095 = vmatpush1.bf16.msra.mxu1 %v2094_v14  ;;  %1969 = vmatprep.subr.bf16.mxu0 %v1968_v15 }
  0xfc   :  { %2097 = vmatprep.subr.bf16.mxu1 %v2096_v18  ;;  %v1513_v18 = vrot.slane %v1504_v6, %v552_v4 }
  0xfe   :  { %1971 = vmatpush1.bf16.msra.mxu0 %v1970_v23 }
  0xff   :  { %2099 = vmatpush1.bf16.msra.mxu1 %v2098_v26  ;;  %1973 = vmatprep.subr.bf16.mxu0 %v1972_v27 }
 0x100   :  { %2101 = vmatprep.subr.bf16.mxu1 %v2100_v31 }
 0x102   :  { %1975 = vmatpush1.bf16.msra.mxu0 %v1974_v36 }
 0x103   :  { %2103 = vmatpush1.bf16.msra.mxu1 %v2102_v37  ;;  %1977 = vmatprep.subr.bf16.mxu0 %v1976_v39  ;;  %v10_v37 = vstv %s3829_s4  ;;  %v564_v39 = vsub.s32 4, %v2424_v61 }
 0x104   :  { %2105 = vmatprep.subr.bf16.mxu1 %v2104_v44  ;;  %11 = vst [vmem:[#allocation2] sm:$0x1] %v10_v37 }
 0x106   :  { %1979 = vmatpush1.bf16.msra.mxu0 %v1978_v50  ;;  %v1525_v50 = vrot.slane %v1504_v6, %v564_v39 }
 0x107   :  { %2107 = vmatpush1.bf16.msra.mxu1 %v2106_v51  ;;  %1981 = vmatprep.subr.bf16.mxu0 %v1980_v52 }
 0x108   :  { %2109 = vmatprep.subr.bf16.mxu1 %v2108_v55  ;;  %v1529_v55 = vrot.slane %v1504_v6, %v568_v42 }
 0x10a   :  { %1983 = vmatpush1.bf16.msra.mxu0 %v1982_v58  ;;  %v1533_v58 = vrot.slane %v1504_v6, %v572_v41 }
 0x10b   :  { %2111 = vmatpush1.bf16.msra.mxu1 %v2110_v59  ;;  %1593 = vmatprep.subr.msk.mxu0 %vm619_vm0, %v541_v60 }
 0x10c   :  { %1596 = vmatprep.subr.msk.mxu1 %vm619_vm0, %v543_v62 }
 0x10d   :  { %1206 = vmatmul.mubr.f32.vlgmr.msra.gmra.mrb[2].mxu0 %v2609_v24 }
 0x10e   :  { %1419 = vmatmul.mubr.f32.vlgmr.msra.gmra.mrb[2].mxu1 %v2609_v24  ;;  %1594 = vmatpush1.msk.msra.mxu0 %vm619_vm0, %v540_v63  ;;  %v544_v24 = vld [vmem:[%s3827_s2] sm:$0xff] }
 0x10f   :  { %1597 = vmatpush1.msk.msra.mxu1 %vm619_vm0, %v542_v0  ;;  %1276 = vmatprep.mubr.f32.mxu0 %v2141_v40  ;;  %v549_v5 = vrot.slane %v544_v24, %v548_v2  ;;  %v557_v7 = vrot.slane %v544_v24, %v556_v3  ;;  %v553_v8 = vrot.slane %v544_v24, %v552_v4 }
 0x110   :  { %1489 = vmatprep.mubr.f32.mxu1 %v2141_v40  ;;  %v560_v40 = vsub.s32 3, %v2424_v61  ;;  %v565_v44 = vrot.slane %v544_v24, %v564_v39  ;;  %v573_v45 = vrot.slane %v544_v24, %v572_v41  ;;  %v569_v46 = vrot.slane %v544_v24, %v568_v42 }
 0x111   :  { %v577_v47 = vrot.slane %v544_v24, %v576_v43  ;;  %v1537_v0 = vrot.slane %v1504_v6, %v576_v43 }
 0x112   :  { %v561_v9 = vrot.slane %v544_v24, %v560_v40  ;;  %v1521_v23 = vrot.slane %v1504_v6, %v560_v40 }
 0x115   :  { %1595 = vmatmul.mubr.msk.f32.vlgmr.msra.gmra.mrb[2].mxu0 %vm616_vm1, %v2139_v1 }
 0x116   :  { %1598 = vmatmul.mubr.msk.f32.vlgmr.msra.gmra.mrb[2].mxu1 %vm616_vm1, %v2139_v1 }
 0x160   :  { %v852_v10 = vpop.f32.mrb[0].mxu0 }
 0x161   :  { %v2112_v12 = vadd.f32 %v852_v10, %v549_v5  ;;  %v1065_v14 = vpop.f32.mrb[0].mxu1  ;;  %v854_v15 = vpop.f32.mrb[1].mxu0 }
 0x162   :  { %v2114_v16 = vadd.f32 %v1065_v14, %v557_v7  ;;  %v2113_v32 = vadd.f32 %v854_v15, %v553_v8  ;;  %v1067_v19 = vpop.f32.mrb[1].mxu1 }
 0x163   :  { %v1496_v20 = vmax.f32 %v2112_v12, 0.0  ;;  %v2115_v25 = vadd.f32 %v1067_v19, %v561_v9  ;;  %v1599_v12 = vld [vmem:[#allocation2] ss:$0 sm:$0xff] }
 0x164   :  { %v1498_v21 = vmax.f32 %v2114_v16, 0.0  ;;  %v1497_v22 = vmax.f32 %v2113_v32, 0.0 }
 0x165   :  { %v1546_v26 = vmul.f32 %v1509_v13, %v1496_v20  ;;  %v1499_v27 = vmax.f32 %v2115_v25, 0.0 }
 0x166   :  { %v1548_v28 = vmul.f32 %v1517_v17, %v1498_v21  ;;  %v1547_v29 = vmul.f32 %v1513_v18, %v1497_v22 }
 0x167   :  { %v1555_v30 = vsel %vm1554_vm2, %v1546_v26, 0.0  ;;  %v1549_v11 = vmul.f32 %v1521_v23, %v1499_v27 }
 0x168   :  { %v1556_v31 = vsel %vm1554_vm2, %v1547_v29, 0.0  ;;  %v1558_v33 = vsel %vm1554_vm2, %v1548_v28, 0.0 }
 0x169   :  { %v1557_v38 = vadd.f32 %v1556_v31, %v1555_v30  ;;  %v1560_v35 = vsel %vm1554_vm2, %v1549_v11, 0.0 }
 0x16b   :  { %v1559_v34 = vadd.f32 %v1558_v33, %v1557_v38 }
 0x16d   :  { %v1561_v36 = vadd.f32 %v1560_v35, %v1559_v34 }
 0x1e8   :  { %v1278_v48 = vpop.f32.mrb[2].mxu0 }
 0x1e9   :  { %v2116_v49 = vadd.f32 %v1278_v48, %v565_v44  ;;  %v1491_v51 = vpop.f32.mrb[2].mxu1  ;;  %v1280_v52 = vpop.f32.mrb[3].mxu0 }
 0x1ea   :  { %v2118_v53 = vadd.f32 %v1491_v51, %v573_v45  ;;  %v2117_v54 = vadd.f32 %v1280_v52, %v569_v46  ;;  %v1493_v56 = vpop.f32.mrb[3].mxu1 }
 0x1eb   :  { %v1500_v57 = vmax.f32 %v2116_v49, 0.0  ;;  %v2119_v59 = vadd.f32 %v1493_v56, %v577_v47 }
 0x1ec   :  { %v1502_v60 = vmax.f32 %v2118_v53, 0.0  ;;  %v1501_v62 = vmax.f32 %v2117_v54, 0.0 }
 0x1ed   :  { %v1550_v63 = vmul.f32 %v1525_v50, %v1500_v57  ;;  %v1503_v61 = vmax.f32 %v2119_v59, 0.0 }
 0x1ee   :  { %v1551_v1 = vmul.f32 %v1529_v55, %v1501_v62  ;;  %v1552_v24 = vmul.f32 %v1533_v58, %v1502_v60 }
 0x1ef   :  { %v1562_v2 = vsel %vm1554_vm2, %v1550_v63, 0.0  ;;  %v1553_v40 = vmul.f32 %v1537_v0, %v1503_v61 }
 0x1f0   :  { %v1563_v3 = vadd.f32 %v1562_v2, %v1561_v36  ;;  %v1564_v4 = vsel %vm1554_vm2, %v1551_v1, 0.0  ;;  %v1566_v7 = vsel %vm1554_vm2, %v1552_v24, 0.0 }
 0x1f1   :  { %v1568_v9 = vsel %vm1554_vm2, %v1553_v40, 0.0 }
 0x1f2   :  { %v1565_v5 = vadd.f32 %v1564_v4, %v1563_v3 }
 0x1f4   :  { %v1567_v8 = vadd.f32 %v1566_v7, %v1565_v5 }
 0x1f6   :  { %v1569_v10 = vadd.f32 %v1568_v9, %v1567_v8 }
 0x1f8   :  { %1570 = vadd.xlane.f32.xlu0 %v1569_v10 }
 0x285   :  { %v1571_v13 = vpop.xlane.xlu0 %1570 }
 0x286   :  { %v1579_v6 = vadd.f32 %v1599_v12, %v1571_v13 }
 0x288   :  { %1581 = vst.msk [vmem:[%s3830_s5] sm:$0x3] %vm1580_vm3, %v1579_v6 }

</bundles_post_ra>
